<compile_context>
chip_gen: v7x
topology: tpu7x:2x2x1
jax: 0.10.0
libtpu: 0.0.40
codegen_flags: <defaults>
</compile_context>

<pallas_src>
import jax
import jax.numpy as jnp
from jax.experimental import pallas as pl
from jax.experimental.pallas import tpu as pltpu

_VMEM_LIMIT = 32 * 1024 * 1024  # explicit scoped-VMEM budget; safe on v5e/v6e/v7x


# -----------------------------------------------------------------------------
# Small constant matrices (built once per call in plain JAX; all tiny)
# -----------------------------------------------------------------------------
def _bilinear_matrix(size_in, size_out):
    """Interpolation matrix matching F.interpolate(mode='bilinear', align_corners=True)."""
    idx = jnp.arange(size_out)
    if size_in == 1 or size_out == 1:
        src = jnp.zeros((size_out,), jnp.float32)
    else:
        src = idx.astype(jnp.float32) * (size_in - 1) / (size_out - 1)
    i0 = jnp.clip(jnp.floor(src).astype(jnp.int32), 0, size_in - 1)
    i1 = jnp.clip(i0 + 1, 0, size_in - 1)
    w1 = src - i0.astype(jnp.float32)
    w0 = 1.0 - w1
    m = jnp.zeros((size_out, size_in), jnp.float32)
    m = m.at[idx, i0].add(w0)
    m = m.at[idx, i1].add(w1)
    return m


def _pick_row_tile(oh, ow):
    """Output rows per tile: prefer >=2 tiles per image (megacore / pipelining)
    while keeping the packed output block width (TH*OW) a multiple of 128 lanes
    so stores are unmasked.  Falls back to a single full-image tile."""
    for th in (64, 32, 16, 8):
        if th <= oh // 2 and oh % th == 0 and (th * ow) % 128 == 0:
            return th
    return oh


def _make_tile_matrices(h, w, oh, ow, th):
    """Matrices that fold the bilinear 2x upsample, the conv zero-padding and the
    per-tile row-halo selection into MXU matmuls inside the kernels."""
    n_tiles = oh // th
    p = th + 2

    # Bilinear interp with the conv's zero-pad rows/cols folded in: row 0 and
    # row OH+1 (col 0 / col OW+1) of the padded upsampled image are exactly zero.
    mh = _bilinear_matrix(h, oh)                                         # (OH, H)
    mh_pad = jnp.zeros((oh + 2, h), jnp.float32).at[1:oh + 1].set(mh)
    mh_tiles = jnp.stack([mh_pad[t * th: t * th + p] for t in range(n_tiles)])

    mw = _bilinear_matrix(w, ow)                                         # (OW, W)
    mwt_pad = jnp.zeros((w, ow + 2), jnp.float32).at[:, 1:ow + 1].set(mw.T)

    # Row-halo selector (with zero-pad rows) for the non-upsampled operands.
    eye_pad = jnp.zeros((oh + 2, oh), jnp.float32).at[1:oh + 1].set(
        jnp.eye(oh, dtype=jnp.float32))
    rsel_tiles = jnp.stack([eye_pad[t * th: t * th + p] for t in range(n_tiles)])

    # Column zero-pad selector, transposed: (OW, OW+2).
    cpad_t = jnp.zeros((ow, ow + 2), jnp.float32).at[:, 1:ow + 1].set(
        jnp.eye(ow, dtype=jnp.float32))
    return mh_tiles, mwt_pad, rsel_tiles, cpad_t


# -----------------------------------------------------------------------------
# In-kernel helper: 3x3 conv + folded BN + ReLU from a padded channel-major tile
# -----------------------------------------------------------------------------
def _conv3x3_bn_relu_from_padded(xp, wflat, scale, bias, th, ow):
    # xp    : (C, TH+2, OW+2) f32, spatially zero-padded, channel-major
    # wflat : (Co, 9*C) with K-order (kh, kw, c)  (== OIHW -> OHWI flatten)
    # scale, bias : (Co, 1)
    # returns (Co, TH*OW) f32 (lane-dense)
    c = xp.shape[0]
    # im2col into one (9C, TH*OW) operand + ONE MXU matmul (instead of 9 tiny ones).
    taps = [xp[:, kh:kh + th, kw:kw + ow] for kh in range(3) for kw in range(3)]
    col = jnp.concatenate(taps, axis=0).reshape(9 * c, th * ow)
    y = jnp.dot(wflat, col, preferred_element_type=jnp.float32)          # (Co, TH*OW)
    return jnp.maximum(y * scale + bias, 0.0)


# -----------------------------------------------------------------------------
# Kernel 1: fused bilinear-2x upsample + concat + conv3x3 + BN + ReLU
# -----------------------------------------------------------------------------
def _fused_up_cat_conv1_kernel(x_ref, oth_ref, mh_ref, mwt_ref, rsel_ref,
                               cpad_ref, w_ref, s_ref, b_ref, o_ref):
    # x_ref   : (1, Cin, H, W)      raw NCHW input (whole small image)
    # oth_ref : (1, Cout, OH, OW)   skip tensor, NCHW (whole image)
    # mh_ref  : (1, TH+2, H)        bilinear rows (+ zero-pad) for this row tile
    # mwt_ref : (W, OW+2)           bilinear cols (+ zero-pad), transposed
    # rsel_ref: (1, TH+2, OH)       row-halo selector (+ zero-pad) for this tile
    # cpad_ref: (OW, OW+2)          column zero-pad selector, transposed
    # w_ref   : (Co, 9*(Cin+Cout))  conv1 weights, K-order (kh, kw, c)
    # s_ref/b_ref : (Co, 1)         folded BN scale / (BN + conv bias) shift
    # o_ref   : (1, Co, TH*OW)      lane-dense channel-major output tile
    _, cin, h, w = x_ref.shape
    _, cout, oh, ow = oth_ref.shape
    p = mh_ref.shape[1]
    th = p - 2
    q = mwt_ref.shape[1]
    f32 = jnp.float32

    # -- branch 1: bilinear 2x upsample of x fused with the conv zero-pad -------
    s1 = jnp.dot(x_ref[0].reshape(cin * h, w), mwt_ref[...],
                 preferred_element_type=f32).reshape(cin, h, q)           # (Cin,H,Q)
    up_pad = jnp.einsum('cph,chq->cpq',
                        jnp.broadcast_to(mh_ref[0], (cin, p, h)), s1,
                        preferred_element_type=f32)                       # (Cin,P,Q)

    # -- branch 2: `other` row-halo select + zero-pad (branch-free matmuls) -----
    s2 = jnp.dot(oth_ref[0].reshape(cout * oh, ow), cpad_ref[...],
                 preferred_element_type=f32).reshape(cout, oh, q)         # (Cout,OH,Q)
    oth_pad = jnp.einsum('cpo,coq->cpq',
                         jnp.broadcast_to(rsel_ref[0], (cout, p, oh)), s2,
                         preferred_element_type=f32)                      # (Cout,P,Q)

    # Channel concat only ever exists in VMEM (never written to HBM).
    cat_pad = jnp.concatenate([up_pad, oth_pad], axis=0)                  # (Ctot,P,Q)

    y = _conv3x3_bn_relu_from_padded(cat_pad, w_ref[...], s_ref[...],
                                     b_ref[...], th, ow)
    o_ref[0] = y.astype(o_ref.dtype)


# -----------------------------------------------------------------------------
# Kernel 2: conv3x3 + BN + ReLU on an NCHW activation (used for conv2)
# -----------------------------------------------------------------------------
def _conv3x3_bn_relu_kernel(h_ref, rsel_ref, cpad_ref, w_ref, s_ref, b_ref, o_ref):
    _, c, oh, ow = h_ref.shape
    p = rsel_ref.shape[1]
    th = p - 2
    q = cpad_ref.shape[1]
    f32 = jnp.float32

    s = jnp.dot(h_ref[0].reshape(c * oh, ow), cpad_ref[...],
                preferred_element_type=f32).reshape(c, oh, q)             # (C,OH,Q)
    hpad = jnp.einsum('cpo,coq->cpq',
                      jnp.broadcast_to(rsel_ref[0], (c, p, oh)), s,
                      preferred_element_type=f32)                         # (C,P,Q)

    y = _conv3x3_bn_relu_from_padded(hpad, w_ref[...], s_ref[...], b_ref[...],
                                     th, ow)
    o_ref[0] = y.astype(o_ref.dtype)


# -----------------------------------------------------------------------------
# pallas_call wrappers
# -----------------------------------------------------------------------------
def _fused_upsample_cat_conv1(x, other, mh_tiles, mwt_pad, rsel_tiles, cpad_t,
                              wflat, scale, bias, th):
    n, cin, h, w = x.shape
    _, cout, oh, ow = other.shape
    co = wflat.shape[0]
    n_tiles = oh // th
    p = th + 2
    # TODO(synk): for very large OH*OW, `x`/`other` should be streamed with a
    # haloed manual DMA instead of a whole-image block per batch element.
    return pl.pallas_call(
        _fused_up_cat_conv1_kernel,
        out_shape=jax.ShapeDtypeStruct((n, co, oh * ow), x.dtype),
        grid=(n, n_tiles),
        in_specs=[
            pl.BlockSpec((1, cin, h, w), lambda i, t: (i, 0, 0, 0)),
            pl.BlockSpec((1, cout, oh, ow), lambda i, t: (i, 0, 0, 0)),
            pl.BlockSpec((1, p, h), lambda i, t: (t, 0, 0)),
            pl.BlockSpec((w, ow + 2), lambda i, t: (0, 0)),
            pl.BlockSpec((1, p, oh), lambda i, t: (t, 0, 0)),
            pl.BlockSpec((ow, ow + 2), lambda i, t: (0, 0)),
            pl.BlockSpec((co, wflat.shape[1]), lambda i, t: (0, 0)),
            pl.BlockSpec((co, 1), lambda i, t: (0, 0)),
            pl.BlockSpec((co, 1), lambda i, t: (0, 0)),
        ],
        out_specs=pl.BlockSpec((1, co, th * ow), lambda i, t: (i, 0, t)),
        compiler_params=pltpu.CompilerParams(
            dimension_semantics=("parallel", "parallel"),
            vmem_limit_bytes=_VMEM_LIMIT),
    )(x, other, mh_tiles, mwt_pad, rsel_tiles, cpad_t, wflat, scale, bias)


def _conv3x3_bn_relu_nchw(x, rsel_tiles, cpad_t, wflat, scale, bias, th):
    n, c, oh, ow = x.shape
    co = wflat.shape[0]
    n_tiles = oh // th
    p = th + 2
    return pl.pallas_call(
        _conv3x3_bn_relu_kernel,
        out_shape=jax.ShapeDtypeStruct((n, co, oh * ow), x.dtype),
        grid=(n, n_tiles),
        in_specs=[
            pl.BlockSpec((1, c, oh, ow), lambda i, t: (i, 0, 0, 0)),
            pl.BlockSpec((1, p, oh), lambda i, t: (t, 0, 0)),
            pl.BlockSpec((ow, ow + 2), lambda i, t: (0, 0)),
            pl.BlockSpec((co, wflat.shape[1]), lambda i, t: (0, 0)),
            pl.BlockSpec((co, 1), lambda i, t: (0, 0)),
            pl.BlockSpec((co, 1), lambda i, t: (0, 0)),
        ],
        out_specs=pl.BlockSpec((1, co, th * ow), lambda i, t: (i, 0, t)),
        compiler_params=pltpu.CompilerParams(
            dimension_semantics=("parallel", "parallel"),
            vmem_limit_bytes=_VMEM_LIMIT),
    )(x, rsel_tiles, cpad_t, wflat, scale, bias)


# -----------------------------------------------------------------------------
# Module wrapper (deterministic synthetic parameters, shapes per nn module init)
# -----------------------------------------------------------------------------
class UpSampleConvCatPallas:
    def __init__(self, in_channels, out_channels, key):
        self.in_channels = in_channels
        self.out_channels = out_channels
        eps = 1e-5
        k = jax.random.split(key, 8)
        c1_in = in_channels + out_channels

        # Synthetic parameters in PyTorch layouts (OIHW weights, per-channel vecs).
        w1 = 0.1 * jax.random.normal(k[0], (out_channels, c1_in, 3, 3), jnp.float32)
        cb1 = 0.1 * jax.random.normal(k[1], (out_channels,), jnp.float32)
        w2 = 0.1 * jax.random.normal(k[2], (out_channels, out_channels, 3, 3), jnp.float32)
        cb2 = 0.1 * jax.random.normal(k[3], (out_channels,), jnp.float32)
        g1 = 1.0 + 0.1 * jax.random.normal(k[4], (out_channels,), jnp.float32)
        be1 = 0.1 * jax.random.normal(k[5], (out_channels,), jnp.float32)
        g2 = 1.0 + 0.1 * jax.random.normal(k[6], (out_channels,), jnp.float32)
        be2 = 0.1 * jax.random.normal(k[7], (out_channels,), jnp.float32)
        rm = jnp.zeros((out_channels,), jnp.float32)   # running stats at init
        rv = jnp.ones((out_channels,), jnp.float32)

        # Fold conv bias + inference-mode BatchNorm into per-channel scale/shift.
        s1 = g1 / jnp.sqrt(rv + eps)
        s2 = g2 / jnp.sqrt(rv + eps)
        b1 = (cb1 - rm) * s1 + be1
        b2 = (cb2 - rm) * s2 + be2

        # Keep OIHW copies for the pure-JAX reference check.
        self.w1_oihw, self.w2_oihw = w1, w2

        # Kernel layouts: (Co, 9*Ci) weights with K-order (kh, kw, c); (Co, 1) affine.
        self.w1 = jnp.transpose(w1, (0, 2, 3, 1)).reshape(out_channels, 9 * c1_in)
        self.w2 = jnp.transpose(w2, (0, 2, 3, 1)).reshape(out_channels, 9 * out_channels)
        self.s1 = s1.reshape(out_channels, 1)
        self.b1 = b1.reshape(out_channels, 1)
        self.s2 = s2.reshape(out_channels, 1)
        self.b2 = b2.reshape(out_channels, 1)

    def __call__(self, x, other_tensor):
        # x: (N, Cin, H, W), other_tensor: (N, Cout, 2H, 2W)   [NCHW, like PyTorch]
        n, _, h, w = x.shape
        oh, ow = 2 * h, 2 * w
        assert other_tensor.shape[2] == oh and other_tensor.shape[3] == ow
        co = self.out_channels

        th = _pick_row_tile(oh, ow)
        mh_tiles, mwt_pad, rsel_tiles, cpad_t = _make_tile_matrices(h, w, oh, ow, th)

        y = _fused_upsample_cat_conv1(x, other_tensor, mh_tiles, mwt_pad,
                                      rsel_tiles, cpad_t, self.w1, self.s1,
                                      self.b1, th)                  # (N, Co, OH*OW)
        y = y.reshape(n, co, oh, ow)                                # free reshape
        y = _conv3x3_bn_relu_nchw(y, rsel_tiles, cpad_t, self.w2,
                                  self.s2, self.b2, th)             # (N, Co, OH*OW)
        return y.reshape(n, co, oh, ow)                             # NCHW output


# -----------------------------------------------------------------------------
# Pure-JAX reference (non-Pallas) used to validate the fused kernels
# -----------------------------------------------------------------------------
def _reference_forward(module, x, other):
    n, cin, h, w = x.shape
    oh, ow = 2 * h, 2 * w
    mh = _bilinear_matrix(h, oh)
    mw = _bilinear_matrix(w, ow)
    up = jnp.einsum('ph,nchw,qw->ncpq', mh, x, mw,
                    precision=jax.lax.Precision.HIGHEST)
    cat = jnp.concatenate([up, other], axis=1)

    def conv_bn_relu(inp, w_oihw, scale, bias):
        y = jax.lax.conv_general_dilated(
            inp, w_oihw, window_strides=(1, 1), padding=((1, 1), (1, 1)),
            dimension_numbers=('NCHW', 'OIHW', 'NCHW'),
            precision=jax.lax.Precision.HIGHEST)
        return jnp.maximum(y * scale.reshape(1, -1, 1, 1)
                           + bias.reshape(1, -1, 1, 1), 0.0)

    y = conv_bn_relu(cat, module.w1_oihw, module.s1, module.b1)
    return conv_bn_relu(y, module.w2_oihw, module.s2, module.b2)


if __name__ == "__main__":
    key = jax.random.PRNGKey(0)
    kx, ko, kp = jax.random.split(key, 3)

    in_channels, out_channels = 4, 8
    N, H, W = 2, 16, 16

    x = jax.random.normal(kx, (N, in_channels, H, W), jnp.float32)
    other = jax.random.normal(ko, (N, out_channels, 2 * H, 2 * W), jnp.float32)

    module = UpSampleConvCatPallas(in_channels, out_channels, kp)
    out = jax.jit(module.__call__)(x, other)
    out = jax.block_until_ready(out)

    assert out.shape == (N, out_channels, 2 * H, 2 * W), out.shape
    assert bool(jnp.all(jnp.isfinite(out)))
    assert bool(jnp.all(out >= 0.0))          # final ReLU

    # Cross-check the fused Pallas pipeline against a plain-JAX reference.
    ref = _reference_forward(module, x, other)
    err = float(jnp.max(jnp.abs(out - ref)))
    assert err < 2e-3, f"max abs error vs reference: {err}"

    print("KERNEL_OK")
</pallas_src>

<mosaic_0001>
module attributes {stable_mosaic.version = 11 : i64} {
  func.func private @main(%arg0: i32) attributes {dimension_semantics = [#tpu.dimension_semantics<core_parallel>], iteration_bounds = array<i64: 2>, tpu.core_type = #tpu.core_type<sc_scalar_subcore>, window_params = []} {
    return
  }
}

module attributes {stable_mosaic.version = 11 : i64} {
  func.func private @main(%arg0: i32) attributes {dimension_semantics = [#tpu.dimension_semantics<core_parallel>], iteration_bounds = array<i64: 2>, tpu.core_type = #tpu.core_type<sc_scalar_subcore>, window_params = []} {
    return
  }
}

module attributes {stable_mosaic.version = 11 : i64} {
  func.func @_fused_up_cat_conv1_kernel(%arg0: i32, %arg1: i32, %arg2: memref<1x4x16x16xf32, #tpu.memory_space<vmem>>, %arg3: memref<1x8x32x32xf32, #tpu.memory_space<vmem>>, %arg4: memref<1x18x16xf32, #tpu.memory_space<vmem>>, %arg5: memref<16x34xf32, #tpu.memory_space<vmem>>, %arg6: memref<1x18x32xf32, #tpu.memory_space<vmem>>, %arg7: memref<32x34xf32, #tpu.memory_space<vmem>>, %arg8: memref<8x108xf32, #tpu.memory_space<vmem>>, %arg9: memref<8x1xf32, #tpu.memory_space<vmem>>, %arg10: memref<8x1xf32, #tpu.memory_space<vmem>>, %arg11: memref<1x8x512xf32, #tpu.memory_space<vmem>>) attributes {dimension_semantics = [#tpu.dimension_semantics<parallel>, #tpu.dimension_semantics<parallel>], iteration_bounds = array<i64: 2, 2>, scalar_prefetch = 0 : i64, scratch_operands = 0 : i64, tpu.core_type = #tpu.core_type<tc>, window_params = [{transform_indices = @transform_0, window_bounds = array<i64: 1, 4, 16, 16>}, {transform_indices = @transform_1, window_bounds = array<i64: 1, 8, 32, 32>}, {transform_indices = @transform_2, window_bounds = array<i64: 1, 18, 16>}, {pipeline_mode = #tpu.pipeline_mode<synchronous>, transform_indices = @transform_3, window_bounds = array<i64: 16, 34>}, {transform_indices = @transform_4, window_bounds = array<i64: 1, 18, 32>}, {pipeline_mode = #tpu.pipeline_mode<synchronous>, transform_indices = @transform_5, window_bounds = array<i64: 32, 34>}, {pipeline_mode = #tpu.pipeline_mode<synchronous>, transform_indices = @transform_6, window_bounds = array<i64: 8, 108>}, {pipeline_mode = #tpu.pipeline_mode<synchronous>, transform_indices = @transform_7, window_bounds = array<i64: 8, 1>}, {pipeline_mode = #tpu.pipeline_mode<synchronous>, transform_indices = @transform_8, window_bounds = array<i64: 8, 1>}, {transform_indices = @transform_9, window_bounds = array<i64: 1, 8, 512>}]} {
    %c0 = arith.constant 0 : index
    %c0_0 = arith.constant 0 : index
    %c0_1 = arith.constant 0 : index
    %c0_2 = arith.constant 0 : index
    %0 = vector.load %arg2[%c0, %c0_0, %c0_1, %c0_2] : memref<1x4x16x16xf32, #tpu.memory_space<vmem>>, vector<1x4x16x16xf32>
    %1 = vector.shape_cast %0 : vector<1x4x16x16xf32> to vector<4x16x16xf32>
    %2 = vector.shape_cast %1 : vector<4x16x16xf32> to vector<64x16xf32>
    %c0_3 = arith.constant 0 : index
    %c0_4 = arith.constant 0 : index
    %3 = vector.load %arg5[%c0_3, %c0_4] : memref<16x34xf32, #tpu.memory_space<vmem>>, vector<16x34xf32>
    %cst = arith.constant dense<0.000000e+00> : vector<64x34xf32>
    %4 = tpu.matmul %2, %3, %cst {dimension_numbers = #tpu.dot_dimension_numbers<[1], [0], [0], [1], [0, 0, 1, 1], [], []>} : vector<64x16xf32>, vector<16x34xf32>, vector<64x34xf32> -> vector<64x34xf32>
    %5 = vector.shape_cast %4 : vector<64x34xf32> to vector<4x16x34xf32>
    %c0_5 = arith.constant 0 : index
    %c0_6 = arith.constant 0 : index
    %c0_7 = arith.constant 0 : index
    %6 = vector.load %arg4[%c0_5, %c0_6, %c0_7] : memref<1x18x16xf32, #tpu.memory_space<vmem>>, vector<1x18x16xf32>
    %7 = vector.shape_cast %6 : vector<1x18x16xf32> to vector<18x16xf32>
    %8 = vector.shape_cast %7 : vector<18x16xf32> to vector<1x18x16xf32>
    %9 = vector.broadcast %8 : vector<1x18x16xf32> to vector<4x18x16xf32>
    "tpu.trace_start"() <{level = 10 : i32, message = "cph,chq->cpq"}> : () -> ()
    %cst_8 = arith.constant dense<0.000000e+00> : vector<4x18x34xf32>
    %10 = tpu.matmul %9, %5, %cst_8 {dimension_numbers = #tpu.dot_dimension_numbers<[2], [1], [1], [2], [0, 0, 0, 1, 1, 2], [0], [0]>} : vector<4x18x16xf32>, vector<4x16x34xf32>, vector<4x18x34xf32> -> vector<4x18x34xf32>
    "tpu.trace_stop"() : () -> ()
    %c0_9 = arith.constant 0 : index
    %c0_10 = arith.constant 0 : index
    %c0_11 = arith.constant 0 : index
    %c0_12 = arith.constant 0 : index
    %11 = vector.load %arg3[%c0_9, %c0_10, %c0_11, %c0_12] : memref<1x8x32x32xf32, #tpu.memory_space<vmem>>, vector<1x8x32x32xf32>
    %12 = vector.shape_cast %11 : vector<1x8x32x32xf32> to vector<8x32x32xf32>
    %13 = vector.shape_cast %12 : vector<8x32x32xf32> to vector<256x32xf32>
    %c0_13 = arith.constant 0 : index
    %c0_14 = arith.constant 0 : index
    %14 = vector.load %arg7[%c0_13, %c0_14] : memref<32x34xf32, #tpu.memory_space<vmem>>, vector<32x34xf32>
    %cst_15 = arith.constant dense<0.000000e+00> : vector<256x34xf32>
    %15 = tpu.matmul %13, %14, %cst_15 {dimension_numbers = #tpu.dot_dimension_numbers<[1], [0], [0], [1], [0, 0, 1, 1], [], []>} : vector<256x32xf32>, vector<32x34xf32>, vector<256x34xf32> -> vector<256x34xf32>
    %16 = vector.shape_cast %15 : vector<256x34xf32> to vector<8x32x34xf32>
    %c0_16 = arith.constant 0 : index
    %c0_17 = arith.constant 0 : index
    %c0_18 = arith.constant 0 : index
    %17 = vector.load %arg6[%c0_16, %c0_17, %c0_18] : memref<1x18x32xf32, #tpu.memory_space<vmem>>, vector<1x18x32xf32>
    %18 = vector.shape_cast %17 : vector<1x18x32xf32> to vector<18x32xf32>
    %19 = vector.shape_cast %18 : vector<18x32xf32> to vector<1x18x32xf32>
    %20 = vector.broadcast %19 : vector<1x18x32xf32> to vector<8x18x32xf32>
    "tpu.trace_start"() <{level = 10 : i32, message = "cpo,coq->cpq"}> : () -> ()
    %cst_19 = arith.constant dense<0.000000e+00> : vector<8x18x34xf32>
    %21 = tpu.matmul %20, %16, %cst_19 {dimension_numbers = #tpu.dot_dimension_numbers<[2], [1], [1], [2], [0, 0, 0, 1, 1, 2], [0], [0]>} : vector<8x18x32xf32>, vector<8x32x34xf32>, vector<8x18x34xf32> -> vector<8x18x34xf32>
    "tpu.trace_stop"() : () -> ()
    %22 = tpu.concatenate %10, %21 in 0 : vector<4x18x34xf32>, vector<8x18x34xf32> -> vector<12x18x34xf32>
    %c0_20 = arith.constant 0 : index
    %c0_21 = arith.constant 0 : index
    %23 = vector.load %arg8[%c0_20, %c0_21] : memref<8x108xf32, #tpu.memory_space<vmem>>, vector<8x108xf32>
    %c0_22 = arith.constant 0 : index
    %c0_23 = arith.constant 0 : index
    %24 = vector.load %arg9[%c0_22, %c0_23] : memref<8x1xf32, #tpu.memory_space<vmem>>, vector<8x1xf32>
    %c0_24 = arith.constant 0 : index
    %c0_25 = arith.constant 0 : index
    %25 = vector.load %arg10[%c0_24, %c0_25] : memref<8x1xf32, #tpu.memory_space<vmem>>, vector<8x1xf32>
    %26 = vector.extract_strided_slice %22 {offsets = [0, 0, 0], sizes = [12, 16, 32], strides = [1, 1, 1]} : vector<12x18x34xf32> to vector<12x16x32xf32>
    %27 = vector.extract_strided_slice %22 {offsets = [0, 0, 1], sizes = [12, 16, 32], strides = [1, 1, 1]} : vector<12x18x34xf32> to vector<12x16x32xf32>
    %28 = vector.extract_strided_slice %22 {offsets = [0, 0, 2], sizes = [12, 16, 32], strides = [1, 1, 1]} : vector<12x18x34xf32> to vector<12x16x32xf32>
    %29 = vector.extract_strided_slice %22 {offsets = [0, 1, 0], sizes = [12, 16, 32], strides = [1, 1, 1]} : vector<12x18x34xf32> to vector<12x16x32xf32>
    %30 = vector.extract_strided_slice %22 {offsets = [0, 1, 1], sizes = [12, 16, 32], strides = [1, 1, 1]} : vector<12x18x34xf32> to vector<12x16x32xf32>
    %31 = vector.extract_strided_slice %22 {offsets = [0, 1, 2], sizes = [12, 16, 32], strides = [1, 1, 1]} : vector<12x18x34xf32> to vector<12x16x32xf32>
    %32 = vector.extract_strided_slice %22 {offsets = [0, 2, 0], sizes = [12, 16, 32], strides = [1, 1, 1]} : vector<12x18x34xf32> to vector<12x16x32xf32>
    %33 = vector.extract_strided_slice %22 {offsets = [0, 2, 1], sizes = [12, 16, 32], strides = [1, 1, 1]} : vector<12x18x34xf32> to vector<12x16x32xf32>
    %34 = vector.extract_strided_slice %22 {offsets = [0, 2, 2], sizes = [12, 16, 32], strides = [1, 1, 1]} : vector<12x18x34xf32> to vector<12x16x32xf32>
    %35 = tpu.concatenate %26, %27, %28, %29, %30, %31, %32, %33, %34 in 0 : vector<12x16x32xf32>, vector<12x16x32xf32>, vector<12x16x32xf32>, vector<12x16x32xf32>, vector<12x16x32xf32>, vector<12x16x32xf32>, vector<12x16x32xf32>, vector<12x16x32xf32>, vector<12x16x32xf32> -> vector<108x16x32xf32>
    %36 = vector.shape_cast %35 : vector<108x16x32xf32> to vector<108x512xf32>
    %cst_26 = arith.constant dense<0.000000e+00> : vector<8x512xf32>
    %37 = tpu.matmul %23, %36, %cst_26 {dimension_numbers = #tpu.dot_dimension_numbers<[1], [0], [0], [1], [0, 0, 1, 1], [], []>} : vector<8x108xf32>, vector<108x512xf32>, vector<8x512xf32> -> vector<8x512xf32>
    %38 = vector.broadcast %24 : vector<8x1xf32> to vector<8x512xf32>
    %39 = arith.mulf %37, %38 : vector<8x512xf32>
    %40 = vector.broadcast %25 : vector<8x1xf32> to vector<8x512xf32>
    %41 = arith.addf %39, %40 : vector<8x512xf32>
    %cst_27 = arith.constant 0.000000e+00 : f32
    %42 = vector.broadcast %cst_27 : f32 to vector<8x512xf32>
    %43 = arith.maximumf %41, %42 : vector<8x512xf32>
    %c0_28 = arith.constant 0 : index
    %c0_29 = arith.constant 0 : index
    %c0_30 = arith.constant 0 : index
    %44 = vector.load %arg11[%c0_28, %c0_29, %c0_30] : memref<1x8x512xf32, #tpu.memory_space<vmem>>, vector<1x8x512xf32>
    %45 = vector.shape_cast %44 : vector<1x8x512xf32> to vector<8x512xf32>
    %46 = vector.shape_cast %43 : vector<8x512xf32> to vector<1x8x512xf32>
    tpu.vector_store %arg11[%c0_28, %c0_29, %c0_30], %46 {strides = array<i32>} : memref<1x8x512xf32, #tpu.memory_space<vmem>>, vector<1x8x512xf32>,
    return
  }
  func.func @transform_0(%arg0: i32, %arg1: i32) -> (i32, i32, i32, i32) {
    %c0_i32 = arith.constant 0 : i32
    %c0_i32_0 = arith.constant 0 : i32
    %c0_i32_1 = arith.constant 0 : i32
    %c0_i32_2 = arith.constant 0 : i32
    return %arg0, %c0_i32, %c0_i32_0, %c0_i32_1 : i32, i32, i32, i32
  }
  func.func @transform_1(%arg0: i32, %arg1: i32) -> (i32, i32, i32, i32) {
    %c0_i32 = arith.constant 0 : i32
    %c0_i32_0 = arith.constant 0 : i32
    %c0_i32_1 = arith.constant 0 : i32
    %c0_i32_2 = arith.constant 0 : i32
    return %arg0, %c0_i32, %c0_i32_0, %c0_i32_1 : i32, i32, i32, i32
  }
  func.func @transform_2(%arg0: i32, %arg1: i32) -> (i32, i32, i32) {
    %c0_i32 = arith.constant 0 : i32
    %c0_i32_0 = arith.constant 0 : i32
    %c0_i32_1 = arith.constant 0 : i32
    return %arg1, %c0_i32, %c0_i32_0 : i32, i32, i32
  }
  func.func @transform_3(%arg0: i32, %arg1: i32) -> (i32, i32) {
    %c0_i32 = arith.constant 0 : i32
    %c0_i32_0 = arith.constant 0 : i32
    %c0_i32_1 = arith.constant 0 : i32
    return %c0_i32, %c0_i32_0 : i32, i32
  }
  func.func @transform_4(%arg0: i32, %arg1: i32) -> (i32, i32, i32) {
    %c0_i32 = arith.constant 0 : i32
    %c0_i32_0 = arith.constant 0 : i32
    %c0_i32_1 = arith.constant 0 : i32
    return %arg1, %c0_i32, %c0_i32_0 : i32, i32, i32
  }
  func.func @transform_5(%arg0: i32, %arg1: i32) -> (i32, i32) {
    %c0_i32 = arith.constant 0 : i32
    %c0_i32_0 = arith.constant 0 : i32
    %c0_i32_1 = arith.constant 0 : i32
    return %c0_i32, %c0_i32_0 : i32, i32
  }
  func.func @transform_6(%arg0: i32, %arg1: i32) -> (i32, i32) {
    %c0_i32 = arith.constant 0 : i32
    %c0_i32_0 = arith.constant 0 : i32
    %c0_i32_1 = arith.constant 0 : i32
    return %c0_i32, %c0_i32_0 : i32, i32
  }
  func.func @transform_7(%arg0: i32, %arg1: i32) -> (i32, i32) {
    %c0_i32 = arith.constant 0 : i32
    %c0_i32_0 = arith.constant 0 : i32
    %c0_i32_1 = arith.constant 0 : i32
    return %c0_i32, %c0_i32_0 : i32, i32
  }
  func.func @transform_8(%arg0: i32, %arg1: i32) -> (i32, i32) {
    %c0_i32 = arith.constant 0 : i32
    %c0_i32_0 = arith.constant 0 : i32
    %c0_i32_1 = arith.constant 0 : i32
    return %c0_i32, %c0_i32_0 : i32, i32
  }
  func.func @transform_9(%arg0: i32, %arg1: i32) -> (i32, i32, i32) {
    %c0_i32 = arith.constant 0 : i32
    %c0_i32_0 = arith.constant 0 : i32
    return %arg0, %c0_i32, %arg1 : i32, i32, i32
  }
}

module attributes {stable_mosaic.version = 11 : i64} {
  func.func @_conv3x3_bn_relu_kernel(%arg0: i32, %arg1: i32, %arg2: memref<1x8x32x32xf32, #tpu.memory_space<vmem>>, %arg3: memref<1x18x32xf32, #tpu.memory_space<vmem>>, %arg4: memref<32x34xf32, #tpu.memory_space<vmem>>, %arg5: memref<8x72xf32, #tpu.memory_space<vmem>>, %arg6: memref<8x1xf32, #tpu.memory_space<vmem>>, %arg7: memref<8x1xf32, #tpu.memory_space<vmem>>, %arg8: memref<1x8x512xf32, #tpu.memory_space<vmem>>) attributes {dimension_semantics = [#tpu.dimension_semantics<parallel>, #tpu.dimension_semantics<parallel>], iteration_bounds = array<i64: 2, 2>, scalar_prefetch = 0 : i64, scratch_operands = 0 : i64, tpu.core_type = #tpu.core_type<tc>, window_params = [{transform_indices = @transform_0, window_bounds = array<i64: 1, 8, 32, 32>}, {transform_indices = @transform_1, window_bounds = array<i64: 1, 18, 32>}, {pipeline_mode = #tpu.pipeline_mode<synchronous>, transform_indices = @transform_2, window_bounds = array<i64: 32, 34>}, {pipeline_mode = #tpu.pipeline_mode<synchronous>, transform_indices = @transform_3, window_bounds = array<i64: 8, 72>}, {pipeline_mode = #tpu.pipeline_mode<synchronous>, transform_indices = @transform_4, window_bounds = array<i64: 8, 1>}, {pipeline_mode = #tpu.pipeline_mode<synchronous>, transform_indices = @transform_5, window_bounds = array<i64: 8, 1>}, {transform_indices = @transform_6, window_bounds = array<i64: 1, 8, 512>}]} {
    %c0 = arith.constant 0 : index
    %c0_0 = arith.constant 0 : index
    %c0_1 = arith.constant 0 : index
    %c0_2 = arith.constant 0 : index
    %0 = vector.load %arg2[%c0, %c0_0, %c0_1, %c0_2] : memref<1x8x32x32xf32, #tpu.memory_space<vmem>>, vector<1x8x32x32xf32>
    %1 = vector.shape_cast %0 : vector<1x8x32x32xf32> to vector<8x32x32xf32>
    %2 = vector.shape_cast %1 : vector<8x32x32xf32> to vector<256x32xf32>
    %c0_3 = arith.constant 0 : index
    %c0_4 = arith.constant 0 : index
    %3 = vector.load %arg4[%c0_3, %c0_4] : memref<32x34xf32, #tpu.memory_space<vmem>>, vector<32x34xf32>
    %cst = arith.constant dense<0.000000e+00> : vector<256x34xf32>
    %4 = tpu.matmul %2, %3, %cst {dimension_numbers = #tpu.dot_dimension_numbers<[1], [0], [0], [1], [0, 0, 1, 1], [], []>} : vector<256x32xf32>, vector<32x34xf32>, vector<256x34xf32> -> vector<256x34xf32>
    %5 = vector.shape_cast %4 : vector<256x34xf32> to vector<8x32x34xf32>
    %c0_5 = arith.constant 0 : index
    %c0_6 = arith.constant 0 : index
    %c0_7 = arith.constant 0 : index
    %6 = vector.load %arg3[%c0_5, %c0_6, %c0_7] : memref<1x18x32xf32, #tpu.memory_space<vmem>>, vector<1x18x32xf32>
    %7 = vector.shape_cast %6 : vector<1x18x32xf32> to vector<18x32xf32>
    %8 = vector.shape_cast %7 : vector<18x32xf32> to vector<1x18x32xf32>
    %9 = vector.broadcast %8 : vector<1x18x32xf32> to vector<8x18x32xf32>
    "tpu.trace_start"() <{level = 10 : i32, message = "cpo,coq->cpq"}> : () -> ()
    %cst_8 = arith.constant dense<0.000000e+00> : vector<8x18x34xf32>
    %10 = tpu.matmul %9, %5, %cst_8 {dimension_numbers = #tpu.dot_dimension_numbers<[2], [1], [1], [2], [0, 0, 0, 1, 1, 2], [0], [0]>} : vector<8x18x32xf32>, vector<8x32x34xf32>, vector<8x18x34xf32> -> vector<8x18x34xf32>
    "tpu.trace_stop"() : () -> ()
    %c0_9 = arith.constant 0 : index
    %c0_10 = arith.constant 0 : index
    %11 = vector.load %arg5[%c0_9, %c0_10] : memref<8x72xf32, #tpu.memory_space<vmem>>, vector<8x72xf32>
    %c0_11 = arith.constant 0 : index
    %c0_12 = arith.constant 0 : index
    %12 = vector.load %arg6[%c0_11, %c0_12] : memref<8x1xf32, #tpu.memory_space<vmem>>, vector<8x1xf32>
    %c0_13 = arith.constant 0 : index
    %c0_14 = arith.constant 0 : index
    %13 = vector.load %arg7[%c0_13, %c0_14] : memref<8x1xf32, #tpu.memory_space<vmem>>, vector<8x1xf32>
    %14 = vector.extract_strided_slice %10 {offsets = [0, 0, 0], sizes = [8, 16, 32], strides = [1, 1, 1]} : vector<8x18x34xf32> to vector<8x16x32xf32>
    %15 = vector.extract_strided_slice %10 {offsets = [0, 0, 1], sizes = [8, 16, 32], strides = [1, 1, 1]} : vector<8x18x34xf32> to vector<8x16x32xf32>
    %16 = vector.extract_strided_slice %10 {offsets = [0, 0, 2], sizes = [8, 16, 32], strides = [1, 1, 1]} : vector<8x18x34xf32> to vector<8x16x32xf32>
    %17 = vector.extract_strided_slice %10 {offsets = [0, 1, 0], sizes = [8, 16, 32], strides = [1, 1, 1]} : vector<8x18x34xf32> to vector<8x16x32xf32>
    %18 = vector.extract_strided_slice %10 {offsets = [0, 1, 1], sizes = [8, 16, 32], strides = [1, 1, 1]} : vector<8x18x34xf32> to vector<8x16x32xf32>
    %19 = vector.extract_strided_slice %10 {offsets = [0, 1, 2], sizes = [8, 16, 32], strides = [1, 1, 1]} : vector<8x18x34xf32> to vector<8x16x32xf32>
    %20 = vector.extract_strided_slice %10 {offsets = [0, 2, 0], sizes = [8, 16, 32], strides = [1, 1, 1]} : vector<8x18x34xf32> to vector<8x16x32xf32>
    %21 = vector.extract_strided_slice %10 {offsets = [0, 2, 1], sizes = [8, 16, 32], strides = [1, 1, 1]} : vector<8x18x34xf32> to vector<8x16x32xf32>
    %22 = vector.extract_strided_slice %10 {offsets = [0, 2, 2], sizes = [8, 16, 32], strides = [1, 1, 1]} : vector<8x18x34xf32> to vector<8x16x32xf32>
    %23 = tpu.concatenate %14, %15, %16, %17, %18, %19, %20, %21, %22 in 0 : vector<8x16x32xf32>, vector<8x16x32xf32>, vector<8x16x32xf32>, vector<8x16x32xf32>, vector<8x16x32xf32>, vector<8x16x32xf32>, vector<8x16x32xf32>, vector<8x16x32xf32>, vector<8x16x32xf32> -> vector<72x16x32xf32>
    %24 = vector.shape_cast %23 : vector<72x16x32xf32> to vector<72x512xf32>
    %cst_15 = arith.constant dense<0.000000e+00> : vector<8x512xf32>
    %25 = tpu.matmul %11, %24, %cst_15 {dimension_numbers = #tpu.dot_dimension_numbers<[1], [0], [0], [1], [0, 0, 1, 1], [], []>} : vector<8x72xf32>, vector<72x512xf32>, vector<8x512xf32> -> vector<8x512xf32>
    %26 = vector.broadcast %12 : vector<8x1xf32> to vector<8x512xf32>
    %27 = arith.mulf %25, %26 : vector<8x512xf32>
    %28 = vector.broadcast %13 : vector<8x1xf32> to vector<8x512xf32>
    %29 = arith.addf %27, %28 : vector<8x512xf32>
    %cst_16 = arith.constant 0.000000e+00 : f32
    %30 = vector.broadcast %cst_16 : f32 to vector<8x512xf32>
    %31 = arith.maximumf %29, %30 : vector<8x512xf32>
    %c0_17 = arith.constant 0 : index
    %c0_18 = arith.constant 0 : index
    %c0_19 = arith.constant 0 : index
    %32 = vector.load %arg8[%c0_17, %c0_18, %c0_19] : memref<1x8x512xf32, #tpu.memory_space<vmem>>, vector<1x8x512xf32>
    %33 = vector.shape_cast %32 : vector<1x8x512xf32> to vector<8x512xf32>
    %34 = vector.shape_cast %31 : vector<8x512xf32> to vector<1x8x512xf32>
    tpu.vector_store %arg8[%c0_17, %c0_18, %c0_19], %34 {strides = array<i32>} : memref<1x8x512xf32, #tpu.memory_space<vmem>>, vector<1x8x512xf32>,
    return
  }
  func.func @transform_0(%arg0: i32, %arg1: i32) -> (i32, i32, i32, i32) {
    %c0_i32 = arith.constant 0 : i32
    %c0_i32_0 = arith.constant 0 : i32
    %c0_i32_1 = arith.constant 0 : i32
    %c0_i32_2 = arith.constant 0 : i32
    return %arg0, %c0_i32, %c0_i32_0, %c0_i32_1 : i32, i32, i32, i32
  }
  func.func @transform_1(%arg0: i32, %arg1: i32) -> (i32, i32, i32) {
    %c0_i32 = arith.constant 0 : i32
    %c0_i32_0 = arith.constant 0 : i32
    %c0_i32_1 = arith.constant 0 : i32
    return %arg1, %c0_i32, %c0_i32_0 : i32, i32, i32
  }
  func.func @transform_2(%arg0: i32, %arg1: i32) -> (i32, i32) {
    %c0_i32 = arith.constant 0 : i32
    %c0_i32_0 = arith.constant 0 : i32
    %c0_i32_1 = arith.constant 0 : i32
    return %c0_i32, %c0_i32_0 : i32, i32
  }
  func.func @transform_3(%arg0: i32, %arg1: i32) -> (i32, i32) {
    %c0_i32 = arith.constant 0 : i32
    %c0_i32_0 = arith.constant 0 : i32
    %c0_i32_1 = arith.constant 0 : i32
    return %c0_i32, %c0_i32_0 : i32, i32
  }
  func.func @transform_4(%arg0: i32, %arg1: i32) -> (i32, i32) {
    %c0_i32 = arith.constant 0 : i32
    %c0_i32_0 = arith.constant 0 : i32
    %c0_i32_1 = arith.constant 0 : i32
    return %c0_i32, %c0_i32_0 : i32, i32
  }
  func.func @transform_5(%arg0: i32, %arg1: i32) -> (i32, i32) {
    %c0_i32 = arith.constant 0 : i32
    %c0_i32_0 = arith.constant 0 : i32
    %c0_i32_1 = arith.constant 0 : i32
    return %c0_i32, %c0_i32_0 : i32, i32
  }
  func.func @transform_6(%arg0: i32, %arg1: i32) -> (i32, i32, i32) {
    %c0_i32 = arith.constant 0 : i32
    %c0_i32_0 = arith.constant 0 : i32
    return %arg0, %c0_i32, %arg1 : i32, i32, i32
  }
}

</mosaic_0001>

<bundles_post_ra>
// kernel: a_call__.3
= control target key start
LH: loop header
LB: loop body
LE: loop exit
PB: predicated region body
PF: predicated region fallthrough
CT: control target
= control target key end

     0   :  { %s5816_s21 = smov 0   ;;  %s5818_s22 = smov 0   ;;  %s8771_s0 = inlined_call_operand.vmem [shape: f32[2,8,32,32], index: 0, kind: input, shape index: {}]   ;;  %s8772_s1 = inlined_call_operand.vmem [shape: f32[2,18,32], index: 1, kind: input, shape index: {}]   ;;  %s8773_s2 = inlined_call_operand.vmem [shape: f32[32,34], index: 2, kind: input, shape index: {}]   ;;  %s8774_s3 = inlined_call_operand.vmem [shape: f32[8,72], index: 3, kind: input, shape index: {}]   ;;  %s8775_s4 = inlined_call_operand.vmem [shape: f32[8,1], index: 4, kind: input, shape index: {}]   ;;  %s8776_s5 = inlined_call_operand.vmem [shape: f32[8,1], index: 5, kind: input, shape index: {}]   ;;  %s8777_s6 = inlined_call_operand.vmem [shape: f32[2,8,1024], index: 6, kind: output, shape index: {}]  }
   0x1   :  { %s5820_s23 = smov 0   ;;  %s5822_s24 = smov 0  }
   0x2   :  { %s5824_s25 = smov 0  }
   0x3 LB: > { %s25_s26 = sadd.s32 1, %s5760_s23  ;;  %s28_s27 = sadd.s32 1, %s5764_s24  ;;  %s5768_s25 = sphi %s5824_s25, %s16_s25   ;;  %s5764_s24 = sphi %s5822_s24, %s9594_s24   ;;  %s5760_s23 = sphi %s5820_s23, %s9593_s23   ;;  %s5756_s22 = sphi %s5818_s22, %s9592_s22   ;;  %s5752_s21 = sphi %s5816_s21, %s9591_s21  }
   0x4   : > { %p26_p0 = scmp.ge.s32.totalorder %s25_s26, 2  ;;  %p4996_p1 = scmp.ge.s32.totalorder %s5768_s25, 1 }
   0x5   : > { %p236_p2 = scmp.lt.s32.totalorder %s5768_s25, 5 }
   0x6   : > { %s9596_s26 = smov (%p26_p0, %s25_s26), 0  ;;  %s9598_s27 = smov (!%p26_p0, %s28_s27), %s5764_s24 }
   0x7   : > { %p237_p3 = pnand %p4996_p1, %p236_p2  ;;  %p30_p4 = scmp.ge.s32.totalorder %s9598_s27, 2 }
   0x9   : > { %s9600_s27 = smov (%p30_p4, %s9598_s27), 0  ;;  %240 = sbr.rel (%p237_p3) target bundleno = 1238 (0x4d6), region = 44 }
  0x10   : > { %v327_v0 = vld [vmem:[%s8773_s2] sm:$0xff]  ;;  %v328_v1 = vld [vmem:[%s8773_s2 + $0x8] sm:$0xff]  ;;  %v329_v2 = vld [vmem:[%s8773_s2 + $0x10] sm:$0xff]  ;;  %p275_p5 = scmp.lt.s32.totalorder %s5756_s22, 1  ;;  %vm331_vm0 = vcmask 261120   ;;  %v5770_v38 = vmov 0.0|0.0  }
  0x11   : > { %v5348_v3 = vpack.c.bf16 %v328_v1, %v327_v0  ;;  %v330_v4 = vld [vmem:[%s8773_s2 + $0x18] sm:$0xff]  ;;  %5356 = vmatprep.subr.bf16.mxu1 %v5770_v38  ;;  %vm5771_vm1 = vmmov 0   ;;  %v5772_v39 = vmov 0.0   ;;  %p280_p6 = scmp.lt.s32.totalorder %s5752_s21, 1  ;;  %s5773_s28 = smov 127   ;;  %vm1428_vm2 = vcmask 1046528  }
  0x12   : > { %v5352_v5 = vpack.c.bf16 %v330_v4, %v329_v2  ;;  %s9602_s22 = smov (!%p275_p5, %s5756_s22), 1  ;;  %5220 = vmatprep.mubr.msk.f32.mxu1 %vm5771_vm1, %v5772_v39  ;;  %vm1581_vm3 = vcmask 1045504   ;;  %s5774_s29 = smov 126   ;;  %vm4623_vm4 = vcmask 523264   ;;  %vm4633_vm5 = vcmask 785408  }
  0x13   : > { %5349 = vmatprep.subr.bf16.mxu0 %v5348_v3  ;;  %s5063_s12 = sshll.u32 %s9602_s22, 8  ;;  %s5777_s30 = smov 32   ;;  %vm4724_vm6 = vcmask 588800  }
  0x14   : > { %5351 = vmatpush3.bf16.msra.mxu0 %v5348_v3  ;;  %s5866_s15 = scalar_lea.vmem %s8771_s0, %s5063_s12  ;;  %s5778_s7 = smov 64  }
  0x15   : > { %5353 = vmatprep.subr.bf16.mxu0 %v5352_v5  ;;  %v295_v6 = vld [vmem:[%s5866_s15] sm:$0xff]  ;;  %v296_v7 = vld [vmem:[%s5866_s15 + $0x8] sm:$0xff]  ;;  %v297_v8 = vld [vmem:[%s5866_s15 + $0x10] sm:$0xff]  ;;  %s281_s16 = scalar_select %p280_p6, %s5752_s21, 1 }
  0x16   : > { %5164 = vmatprep.mubr.msk.f32.mxu0 %vm331_vm0, %v295_v6  ;;  %v298_v9 = vld [vmem:[%s5866_s15 + $0x18] sm:$0xff]  ;;  %v299_v10 = vld [vmem:[%s5866_s15 + $0x20] sm:$0xff]  ;;  %v300_v11 = vld [vmem:[%s5866_s15 + $0x28] sm:$0xff]  ;;  %s5779_s8 = smov 96  }
  0x17   : > { %v301_v12 = vld [vmem:[%s5866_s15 + $0x30] sm:$0xff]  ;;  %v302_v13 = vld [vmem:[%s5866_s15 + $0x38] sm:$0xff]  ;;  %v303_v14 = vld [vmem:[%s5866_s15 + $0x40] sm:$0xff]  ;;  %s5436_s17 = smul.u32 24, %s281_s16  ;;  %s5001_s16 = sshll.u32 %s9602_s22, 3 }
  0x18   : > { %5355 = vmatpush3.bf16.msra.mxu0 %v5352_v5  ;;  %v304_v15 = vld [vmem:[%s5866_s15 + $0x48] sm:$0xff]  ;;  %v305_v16 = vld [vmem:[%s5866_s15 + $0x50] sm:$0xff]  ;;  %v306_v17 = vld [vmem:[%s5866_s15 + $0x58] sm:$0xff] }
  0x19   : > { %v307_v18 = vld [vmem:[%s5866_s15 + $0x60] sm:$0xff]  ;;  %v308_v19 = vld [vmem:[%s5866_s15 + $0x68] sm:$0xff]  ;;  %v309_v20 = vld [vmem:[%s5866_s15 + $0x70] sm:$0xff]  ;;  %5392 = vmatprep.subr.bf16.mxu0 %v5770_v38  ;;  %s284_s20 = scalar_lea.vmem %s8772_s1, %s5436_s17 }
  0x1a   : > { %v310_v21 = vld [vmem:[%s5866_s15 + $0x78] sm:$0xff]  ;;  %v311_v22 = vld [vmem:[%s5866_s15 + $0x80] sm:$0xff]  ;;  %v312_v23 = vld [vmem:[%s5866_s15 + $0x88] sm:$0xff] }
  0x1b   : > { %5165 = vmatmul.mubr.msk.f32.vlgmr.msra.gmra.mrb[0].mxu0 %vm331_vm0, %v296_v7  ;;  %v313_v24 = vld [vmem:[%s5866_s15 + $0x90] sm:$0xff]  ;;  %v314_v25 = vld [vmem:[%s5866_s15 + $0x98] sm:$0xff]  ;;  %v315_v26 = vld [vmem:[%s5866_s15 + $0xa0] sm:$0xff] }
  0x1c   : > { %5167 = vmatprep.mubr.msk.f32.mxu0 %vm331_vm0, %v297_v8  ;;  %v316_v27 = vld [vmem:[%s5866_s15 + $0xa8] sm:$0xff]  ;;  %v317_v28 = vld [vmem:[%s5866_s15 + $0xb0] sm:$0xff]  ;;  %v318_v29 = vld [vmem:[%s5866_s15 + $0xb8] sm:$0xff] }
  0x1d   : > { %v319_v30 = vld [vmem:[%s5866_s15 + $0xc0] sm:$0xff]  ;;  %v320_v31 = vld [vmem:[%s5866_s15 + $0xc8] sm:$0xff]  ;;  %v321_v32 = vld [vmem:[%s5866_s15 + $0xd0] sm:$0xff] }
  0x1e   : > { %v322_v33 = vld [vmem:[%s5866_s15 + $0xd8] sm:$0xff]  ;;  %v323_v34 = vld [vmem:[%s5866_s15 + $0xe0] sm:$0xff]  ;;  %v324_v35 = vld [vmem:[%s5866_s15 + $0xe8] sm:$0xff] }
  0x1f   : > { %5168 = vmatmul.mubr.msk.f32.gmra.mrb[2].mxu0 %vm331_vm0, %v298_v9  ;;  %v325_v36 = vld [vmem:[%s5866_s15 + $0xf0] sm:$0xff]  ;;  %v326_v37 = vld [vmem:[%s5866_s15 + $0xf8] sm:$0xff]  ;;  %v5944_v47 = vld [vmem:[%s284_s20] sm:$0xff]  ;;  %s5000_s15 = sshll.u32 %s5752_s21, 2 }
  0x20   : > { %5170 = vmatprep.mubr.msk.f32.mxu0 %vm331_vm0, %v299_v10  ;;  %v5951_v51 = vld [vmem:[%s284_s20 + $0x8] sm:$0xff]  ;;  %v5958_v55 = vld [vmem:[%s284_s20 + $0x10] sm:$0x3]  ;;  %p288_p7 = scmp.lt.s32.totalorder %s5000_s15, 7 }
  0x22   : > { %s9604_s15 = smov (!%p288_p7, %s5000_s15), 7 }
  0x23   : > { %5171 = vmatmul.mubr.msk.f32.gmra.mrb[4].mxu0 %vm331_vm0, %v300_v11  ;;  %s291_s17 = sadd.s32 %s5001_s16, %s9604_s15 }
  0x24   : > { %5173 = vmatprep.mubr.msk.f32.mxu0 %vm331_vm0, %v301_v12  ;;  %s5002_s18 = sshll.u32 %s291_s17, 3 }
  0x25   : > { %s293_s21 = scalar_lea.vmem %s8777_s6, %s5002_s18 }
  0x27   : > { %5174 = vmatmul.mubr.msk.f32.gmra.mrb[6].mxu0 %vm331_vm0, %v302_v13 }
  0x28   : > { %5176 = vmatprep.mubr.msk.f32.mxu0 %vm331_vm0, %v303_v14 }
  0x2b   : > { %5177 = vmatmul.mubr.msk.f32.gmra.mrb[8].mxu0 %vm331_vm0, %v304_v15 }
  0x2c   : > { %5179 = vmatprep.mubr.msk.f32.mxu0 %vm331_vm0, %v305_v16 }
  0x2f   : > { %5180 = vmatmul.mubr.msk.f32.gmra.mrb[10].mxu0 %vm331_vm0, %v306_v17 }
  0x30   : > { %5182 = vmatprep.mubr.msk.f32.mxu0 %vm331_vm0, %v307_v18 }
  0x33   : > { %5183 = vmatmul.mubr.msk.f32.gmra.mrb[12].mxu0 %vm331_vm0, %v308_v19 }
  0x34   : > { %5185 = vmatprep.mubr.msk.f32.mxu0 %vm331_vm0, %v309_v20 }
  0x37   : > { %5186 = vmatmul.mubr.msk.f32.gmra.mrb[14].mxu0 %vm331_vm0, %v310_v21 }
  0x38   : > { %5188 = vmatprep.mubr.msk.f32.mxu0 %vm331_vm0, %v311_v22 }
  0x3b   : > { %5189 = vmatmul.mubr.msk.f32.gmra.mrb[16].mxu0 %vm331_vm0, %v312_v23 }
  0x3c   : > { %5191 = vmatprep.mubr.msk.f32.mxu0 %vm331_vm0, %v313_v24 }
  0x3f   : > { %5192 = vmatmul.mubr.msk.f32.gmra.mrb[18].mxu0 %vm331_vm0, %v314_v25 }
  0x40   : > { %5194 = vmatprep.mubr.msk.f32.mxu0 %vm331_vm0, %v315_v26 }
  0x43   : > { %5195 = vmatmul.mubr.msk.f32.gmra.mrb[20].mxu0 %vm331_vm0, %v316_v27 }
  0x44   : > { %5197 = vmatprep.mubr.msk.f32.mxu0 %vm331_vm0, %v317_v28 }
  0x47   : > { %5198 = vmatmul.mubr.msk.f32.gmra.mrb[22].mxu0 %vm331_vm0, %v318_v29 }
  0x48   : > { %5200 = vmatprep.mubr.msk.f32.mxu0 %vm331_vm0, %v319_v30 }
  0x4b   : > { %5201 = vmatmul.mubr.msk.f32.gmra.mrb[24].mxu0 %vm331_vm0, %v320_v31 }
  0x4c   : > { %5203 = vmatprep.mubr.msk.f32.mxu0 %vm331_vm0, %v321_v32 }
  0x4f   : > { %5204 = vmatmul.mubr.msk.f32.gmra.mrb[26].mxu0 %vm331_vm0, %v322_v33 }
  0x50   : > { %5206 = vmatprep.mubr.msk.f32.mxu0 %vm331_vm0, %v323_v34 }
  0x53   : > { %5207 = vmatmul.mubr.msk.f32.gmra.mrb[28].mxu0 %vm331_vm0, %v324_v35 }
  0x54   : > { %5209 = vmatprep.mubr.msk.f32.mxu0 %vm331_vm0, %v325_v36 }
  0x57   : > { %5210 = vmatmul.mubr.msk.f32.gmra.mrb[30].mxu0 %vm331_vm0, %v326_v37 }
  0x58   : > { %5322 = vmatprep.mubr.msk.f32.mxu0 %vm5771_vm1, %v5772_v39 }
  0xee   : > { %v5166_v40 = vpop.f32.mrb[0].mxu0 }
  0xef   : > { %v494_v41 = vpop.f32.mrb[1].mxu0 }
  0xf0   : > { %v5357_v42 = vpack.c.bf16 %v5166_v40, %v494_v41 }
  0xf2   : > { %v5169_v43 = vpop.f32.mrb[2].mxu0  ;;  %5358 = vmatpush3.bf16.msra.mxu1 %v5357_v42 }
  0xf3   : > { %v504_v44 = vpop.f32.mrb[3].mxu0  ;;  %5359 = vmatprep.subr.bf16.mxu1 %v5770_v38 }
  0xf4   : > { %v5360_v45 = vpack.c.bf16 %v5169_v43, %v504_v44 }
  0xf6   : > { %v5172_v46 = vpop.f32.mrb[4].mxu0  ;;  %5361 = vmatpush3.bf16.msra.mxu1 %v5360_v45 }
  0xf7   : > { %v514_v48 = vpop.f32.mrb[5].mxu0  ;;  %5362 = vmatprep.subr.bf16.mxu1 %v5770_v38 }
  0xf8   : > { %v5363_v49 = vpack.c.bf16 %v5172_v46, %v514_v48 }
  0xf9   : > { %5221 = vmatmul.mubr.msk.f32.vlgmr.msra.gmra.mrb[0].mxu1 %vm331_vm0, %v5944_v47 }
  0xfa   : > { %v5175_v50 = vpop.f32.mrb[6].mxu0  ;;  %5364 = vmatpush3.bf16.msra.mxu1 %v5363_v49  ;;  %5223 = vmatprep.mubr.msk.f32.mxu1 %vm5771_vm1, %v5772_v39 }
  0xfb   : > { %v524_v52 = vpop.f32.mrb[7].mxu0  ;;  %5365 = vmatprep.subr.bf16.mxu1 %v5770_v38 }
  0xfc   : > { %v5366_v53 = vpack.c.bf16 %v5175_v50, %v524_v52 }
  0xfd   : > { %5224 = vmatmul.mubr.msk.f32.gmra.mrb[2].mxu1 %vm331_vm0, %v5951_v51 }
  0xfe   : > { %v5178_v54 = vpop.f32.mrb[8].mxu0  ;;  %5367 = vmatpush3.bf16.msra.mxu1 %v5366_v53  ;;  %5226 = vmatprep.mubr.msk.f32.mxu1 %vm5771_vm1, %v5772_v39 }
  0xff   : > { %v534_v56 = vpop.f32.mrb[9].mxu0  ;;  %5368 = vmatprep.subr.bf16.mxu1 %v5770_v38 }
 0x100   : > { %v5369_v57 = vpack.c.bf16 %v5178_v54, %v534_v56 }
 0x101   : > { %5227 = vmatmul.mubr.msk.f32.gmra.mrb[4].mxu1 %vm331_vm0, %v5958_v55 }
 0x102   : > { %v5181_v58 = vpop.f32.mrb[10].mxu0  ;;  %5237 = vmatprep.mubr.msk.f32.mxu1 %vm5771_vm1, %v5772_v39 }
 0x103   : > { %v544_v59 = vpop.f32.mrb[11].mxu0 }
 0x104   : > { %v5372_v60 = vpack.c.bf16 %v5181_v58, %v544_v59 }
 0x105   : > { %5238 = vmatmul.mubr.msk.f32.vlgmr.msra.gmra.mrb[6].mxu1 %vm331_vm0, %v5944_v47 }
 0x106   : > { %5370 = vmatpush3.bf16.msra.mxu1 %v5369_v57  ;;  %v5184_v61 = vpop.f32.mrb[12].mxu0  ;;  %5240 = vmatprep.mubr.msk.f32.mxu1 %vm5771_vm1, %v5772_v39 }
 0x107   : > { %v554_v62 = vpop.f32.mrb[13].mxu0  ;;  %5371 = vmatprep.subr.bf16.mxu1 %v5770_v38 }
 0x108   : > { %v5375_v63 = vpack.c.bf16 %v5184_v61, %v554_v62 }
 0x109   : > { %5241 = vmatmul.mubr.msk.f32.gmra.mrb[8].mxu1 %vm331_vm0, %v5951_v51 }
 0x10a   : > { %5373 = vmatpush3.bf16.msra.mxu1 %v5372_v60  ;;  %v5187_v0 = vpop.f32.mrb[14].mxu0  ;;  %5243 = vmatprep.mubr.msk.f32.mxu1 %vm5771_vm1, %v5772_v39 }
 0x10b   : > { %v564_v1 = vpop.f32.mrb[15].mxu0  ;;  %5374 = vmatprep.subr.bf16.mxu1 %v5770_v38 }
 0x10c   : > { %v5378_v2 = vpack.c.bf16 %v5187_v0, %v564_v1  ;;  %v1739_v1 = vlaneseq }
 0x10d   : > { %5244 = vmatmul.mubr.msk.f32.gmra.mrb[10].mxu1 %vm331_vm0, %v5958_v55 }
 0x10e   : > { %v5190_v3 = vpop.f32.mrb[16].mxu0  ;;  %5254 = vmatprep.mubr.msk.f32.mxu1 %vm5771_vm1, %v5772_v39 }
 0x10f   : > { %v574_v4 = vpop.f32.mrb[17].mxu0 }
 0x110   : > { %v5381_v5 = vpack.c.bf16 %v5190_v3, %v574_v4 }
 0x111   : > { %5255 = vmatmul.mubr.msk.f32.vlgmr.msra.gmra.mrb[12].mxu1 %vm331_vm0, %v5944_v47 }
 0x112   : > { %5376 = vmatpush3.bf16.msra.mxu1 %v5375_v63  ;;  %v5193_v6 = vpop.f32.mrb[18].mxu0  ;;  %5257 = vmatprep.mubr.msk.f32.mxu1 %vm5771_vm1, %v5772_v39  ;;  %v5775_v63 = vmov 1983009808  }
 0x113   : > { %v584_v7 = vpop.f32.mrb[19].mxu0  ;;  %5377 = vmatprep.subr.bf16.mxu1 %v5770_v38  ;;  %v1737_v0 = vunpack.c.l.s4 %v5775_v63 }
 0x114   : > { %v5384_v8 = vpack.c.bf16 %v5193_v6, %v584_v7 }
 0x115   : > { %5258 = vmatmul.mubr.msk.f32.gmra.mrb[14].mxu1 %vm331_vm0, %v5951_v51 }
 0x116   : > { %5379 = vmatpush3.bf16.msra.mxu1 %v5378_v2  ;;  %v5196_v9 = vpop.f32.mrb[20].mxu0  ;;  %5260 = vmatprep.mubr.msk.f32.mxu1 %vm5771_vm1, %v5772_v39 }
 0x117   : > { %v594_v10 = vpop.f32.mrb[21].mxu0  ;;  %5380 = vmatprep.subr.bf16.mxu1 %v5770_v38 }
 0x118   : > { %v5387_v11 = vpack.c.bf16 %v5196_v9, %v594_v10  ;;  %v1738_v10 = vunpack.c.0.s8 %v1737_v0 }
 0x119   : > { %5261 = vmatmul.mubr.msk.f32.gmra.mrb[16].mxu1 %vm331_vm0, %v5958_v55 }
 0x11a   : > { %v5199_v12 = vpop.f32.mrb[22].mxu0  ;;  %5271 = vmatprep.mubr.msk.f32.mxu1 %vm5771_vm1, %v5772_v39 }
 0x11b   : > { %v604_v13 = vpop.f32.mrb[23].mxu0 }
 0x11c   : > { %v5390_v14 = vpack.c.bf16 %v5199_v12, %v604_v13 }
 0x11d   : > { %5272 = vmatmul.mubr.msk.f32.vlgmr.msra.gmra.mrb[18].mxu1 %vm331_vm0, %v5944_v47 }
 0x11e   : > { %5382 = vmatpush3.bf16.msra.mxu1 %v5381_v5  ;;  %v5202_v15 = vpop.f32.mrb[24].mxu0  ;;  %5274 = vmatprep.mubr.msk.f32.mxu1 %vm5771_vm1, %v5772_v39 }
 0x11f   : > { %v614_v16 = vpop.f32.mrb[25].mxu0  ;;  %5383 = vmatprep.subr.bf16.mxu1 %v5770_v38 }
 0x120   : > { %v5393_v17 = vpack.c.bf16 %v5202_v15, %v614_v16 }
 0x121   : > { %5275 = vmatmul.mubr.msk.f32.gmra.mrb[20].mxu1 %vm331_vm0, %v5951_v51 }
 0x122   : > { %5385 = vmatpush3.bf16.msra.mxu1 %v5384_v8  ;;  %5394 = vmatpush3.bf16.msra.mxu0 %v5393_v17  ;;  %v5205_v18 = vpop.f32.mrb[26].mxu0 }
 0x123   : > { %5277 = vmatprep.mubr.msk.f32.mxu1 %vm5771_vm1, %v5772_v39  ;;  %5386 = vmatprep.subr.bf16.mxu1 %v5770_v38  ;;  %v624_v19 = vpop.f32.mrb[27].mxu0 }
 0x124   : > { %v5396_v20 = vpack.c.bf16 %v5205_v18, %v624_v19  ;;  %5395 = vmatprep.subr.bf16.mxu0 %v5770_v38 }
 0x125   : > { %5278 = vmatmul.mubr.msk.f32.gmra.mrb[22].mxu1 %vm331_vm0, %v5958_v55 }
 0x126   : > { %5288 = vmatprep.mubr.msk.f32.mxu1 %vm5771_vm1, %v5772_v39  ;;  %v5208_v21 = vpop.f32.mrb[28].mxu0  ;;  %5397 = vmatpush3.bf16.msra.mxu0 %v5396_v20 }
 0x127   : > { %v634_v22 = vpop.f32.mrb[29].mxu0 }
 0x128   : > { %v5399_v23 = vpack.c.bf16 %v5208_v21, %v634_v22 }
 0x129   : > { %5289 = vmatmul.mubr.msk.f32.vlgmr.msra.gmra.mrb[24].mxu1 %vm331_vm0, %v5944_v47  ;;  %5323 = vmatmul.mubr.msk.f32.vlgmr.msra.gmra.mrb[32].mxu0 %vm331_vm0, %v5944_v47 }
 0x12a   : > { %5388 = vmatpush3.bf16.msra.mxu1 %v5387_v11  ;;  %5291 = vmatprep.mubr.msk.f32.mxu1 %vm5771_vm1, %v5772_v39  ;;  %v5211_v24 = vpop.f32.mrb[30].mxu0  ;;  %v6141_v11 = vshrl.u32 %v1739_v1, 7 }
 0x12b   : > { %5389 = vmatprep.subr.bf16.mxu1 %v5770_v38  ;;  %v644_v25 = vpop.f32.mrb[31].mxu0  ;;  %5325 = vmatprep.mubr.msk.f32.mxu0 %vm5771_vm1, %v5772_v39 }
 0x12c   : > { %v5402_v26 = vpack.c.bf16 %v5211_v24, %v644_v25  ;;  %v6162_v22 = vsub.s32 %v1738_v10, %v6141_v11 }
 0x12d   : > { %5292 = vmatmul.mubr.msk.f32.gmra.mrb[26].mxu1 %vm331_vm0, %v5951_v51  ;;  %5326 = vmatmul.mubr.msk.f32.gmra.mrb[34].mxu0 %vm331_vm0, %v5951_v51 }
 0x12e   : > { %5391 = vmatpush3.bf16.msra.mxu1 %v5390_v14  ;;  %5294 = vmatprep.mubr.msk.f32.mxu1 %vm5771_vm1, %v5772_v39 }
 0x12f   : > { %5398 = vmatprep.subr.bf16.mxu1 %v5770_v38  ;;  %5328 = vmatprep.mubr.msk.f32.mxu0 %vm5771_vm1, %v5772_v39 }
 0x131   : > { %5295 = vmatmul.mubr.msk.f32.gmra.mrb[28].mxu1 %vm331_vm0, %v5958_v55  ;;  %5329 = vmatmul.mubr.msk.f32.gmra.mrb[36].mxu0 %vm331_vm0, %v5958_v55 }
 0x132   : > { %5305 = vmatprep.mubr.msk.f32.mxu1 %vm5771_vm1, %v5772_v39  ;;  %4792 = vmatprep.mubr.f32.mxu0 %v5772_v39 }
 0x135   : > { %5306 = vmatmul.mubr.msk.f32.vlgmr.msra.gmra.mrb[30].mxu1 %vm331_vm0, %v5944_v47 }
 0x136   : > { %5308 = vmatprep.mubr.msk.f32.mxu1 %vm5771_vm1, %v5772_v39  ;;  %5400 = vmatpush3.bf16.msra.mxu1 %v5399_v23 }
 0x137   : > { %5401 = vmatprep.subr.bf16.mxu1 %v5770_v38 }
 0x139   : > { %5309 = vmatmul.mubr.msk.f32.gmra.mrb[32].mxu1 %vm331_vm0, %v5951_v51 }
 0x13a   : > { %5311 = vmatprep.mubr.msk.f32.mxu1 %vm5771_vm1, %v5772_v39  ;;  %5403 = vmatpush3.bf16.msra.mxu1 %v5402_v26 }
 0x13d   : > { %5312 = vmatmul.mubr.msk.f32.gmra.mrb[34].mxu1 %vm331_vm0, %v5958_v55 }
 0x13e   : > { %5339 = vmatprep.mubr.msk.f32.mxu1 %vm5771_vm1, %v5772_v39 }
 0x141   : > { %5340 = vmatmul.mubr.msk.f32.vlgmr.msra.gmra.mrb[36].mxu1 %vm331_vm0, %v5944_v47 }
 0x142   : > { %5342 = vmatprep.mubr.msk.f32.mxu1 %vm5771_vm1, %v5772_v39 }
 0x145   : > { %5343 = vmatmul.mubr.msk.f32.gmra.mrb[38].mxu1 %vm331_vm0, %v5951_v51 }
 0x146   : > { %5345 = vmatprep.mubr.msk.f32.mxu1 %vm5771_vm1, %v5772_v39 }
 0x149   : > { %5346 = vmatmul.mubr.msk.f32.gmra.mrb[40].mxu1 %vm331_vm0, %v5958_v55 }
 0x14a   : > { %4863 = vmatprep.mubr.f32.mxu1 %v5772_v39 }
 0x1cc   : > { %v6057_v27 = vpop.f32.mrb[0].mxu1 }
 0x1cd   : > { %1324 = vrot.lane.b32.xlu0 %v6057_v27, %s5773_s28  ;;  %v5222_v28 = vpop.f32.mrb[1].mxu1  ;;  %v1429_v32 = vrot.slane %v6057_v27, 1  ;;  %v1582_v34 = vrot.slane %v6057_v27, 2 }
 0x1d0   : > { %v6061_v29 = vpop.f32.mrb[2].mxu1 }
 0x1d1   : > { %1372 = vrot.lane.b32.xlu0 %v6057_v27, %s5774_s29  ;;  %v5225_v30 = vpop.f32.mrb[3].mxu1  ;;  %1374 = vrot.lane.b32.xlu1 %v6061_v29, %s5774_s29  ;;  %v1430_v31 = vrot.slane %v6061_v29, 1  ;;  %v1583_v33 = vrot.slane %v6061_v29, 2 }
 0x1d3   : > { %v6072_v35 = vsel %vm1428_vm2, %v1429_v32, %v1430_v31  ;;  %v6075_v36 = vsel %vm1581_vm3, %v1582_v34, %v1583_v33 }
 0x1d4   : > { %v741_v37 = vpop.f32.mrb[4].mxu1 }
 0x1d5   : > { %v1432_v38 = vrot.slane %v741_v37, 1  ;;  %v1585_v39 = vrot.slane %v741_v37, 2  ;;  %1326 = vrot.lane.b32.xlu0 %v6061_v29, %s5773_s28  ;;  %v5228_v40 = vpop.f32.mrb[5].mxu1 }
 0x1d7   : > { %v6080_v41 = vsel %vm1428_vm2, %v1430_v31, %v1432_v38  ;;  %v6083_v42 = vsel %vm1581_vm3, %v1583_v33, %v1585_v39 }
 0x1d8   : > { %1487 = vrot.lane.b32.xlu1 %v6080_v41, %s5773_s28  ;;  %v6087_v43 = vpop.f32.mrb[6].mxu1 }
 0x1d9   : > { %1485 = vrot.lane.b32.xlu0 %v6072_v35, %s5773_s28  ;;  %v5239_v44 = vpop.f32.mrb[7].mxu1  ;;  %v1434_v45 = vrot.slane %v6087_v43, 1  ;;  %v1587_v46 = vrot.slane %v6087_v43, 2 }
 0x1dc   : > { %1535 = vrot.lane.b32.xlu1 %v6080_v41, %s5774_s29  ;;  %v6095_v47 = vpop.f32.mrb[8].mxu1 }
 0x1dd   : > { %1533 = vrot.lane.b32.xlu0 %v6072_v35, %s5774_s29  ;;  %v5242_v48 = vpop.f32.mrb[9].mxu1  ;;  %v1435_v49 = vrot.slane %v6095_v47, 1  ;;  %v1588_v50 = vrot.slane %v6095_v47, 2 }
 0x1df   : > { %v6102_v51 = vsel %vm1428_vm2, %v1434_v45, %v1435_v49  ;;  %v6105_v52 = vsel %vm1581_vm3, %v1587_v46, %v1588_v50 }
 0x1e0   : > { %1640 = vrot.lane.b32.xlu1 %v6083_v42, %s5773_s28  ;;  %v821_v53 = vpop.f32.mrb[10].mxu1 }
 0x1e1   : > { %1638 = vrot.lane.b32.xlu0 %v6075_v36, %s5773_s28  ;;  %v1437_v54 = vrot.slane %v821_v53, 1  ;;  %v1590_v55 = vrot.slane %v821_v53, 2  ;;  %v5245_v56 = vpop.f32.mrb[11].mxu1 }
 0x1e3   : > { %v6112_v57 = vsel %vm1428_vm2, %v1435_v49, %v1437_v54  ;;  %v6115_v58 = vsel %vm1581_vm3, %v1588_v50, %v1590_v55 }
 0x1e4   : > { %1688 = vrot.lane.b32.xlu1 %v6083_v42, %s5774_s29  ;;  %v6119_v59 = vpop.f32.mrb[12].mxu1 }
 0x1e5   : > { %v1734_v60 = vcombine.low %v6057_v27, %v6119_v59  ;;  %v1735_v61 = vcombine.high %v6057_v27, %v6119_v59  ;;  %1686 = vrot.lane.b32.xlu0 %v6075_v36, %s5774_s29  ;;  %v5256_v62 = vpop.f32.mrb[13].mxu1  ;;  %v1439_v2 = vrot.slane %v6119_v59, 1  ;;  %v1592_v3 = vrot.slane %v6119_v59, 2 }
 0x1e7   : > { %v6197_v38 = vrot.slane %v1734_v60, %v6162_v22  ;;  %v6204_v40 = vrot.slane %v1735_v61, %v6162_v22 }
 0x1e8   : > { %1328 = vrot.lane.b32.xlu1 %v6087_v43, %s5773_s28  ;;  %v6131_v4 = vpop.f32.mrb[14].mxu1 }
 0x1e9   : > { %v2958_v5 = vcombine.low %v6061_v29, %v6131_v4  ;;  %v2959_v6 = vcombine.high %v6061_v29, %v6131_v4  ;;  %1376 = vrot.lane.b32.xlu0 %v6087_v43, %s5774_s29  ;;  %v5259_v7 = vpop.f32.mrb[15].mxu1  ;;  %v1440_v8 = vrot.slane %v6131_v4, 1  ;;  %v1593_v9 = vrot.slane %v6131_v4, 2 }
 0x1eb   : > { %v6144_v12 = vsel %vm1428_vm2, %v1439_v2, %v1440_v8  ;;  %v6147_v13 = vsel %vm1581_vm3, %v1592_v3, %v1593_v9 }
 0x1ec   : > { %1330 = vrot.lane.b32.xlu1 %v6095_v47, %s5773_s28  ;;  %v901_v14 = vpop.f32.mrb[16].mxu1  ;;  %v2142_v15 = vcombine.low %v6072_v35, %v6144_v12  ;;  %v2143_v16 = vcombine.high %v6072_v35, %v6144_v12  ;;  %v2550_v17 = vcombine.low %v6075_v36, %v6147_v13  ;;  %v2551_v18 = vcombine.high %v6075_v36, %v6147_v13 }
 0x1ed   : > { %v1442_v19 = vrot.slane %v901_v14, 1  ;;  %v1595_v20 = vrot.slane %v901_v14, 2  ;;  %1489 = vrot.lane.b32.xlu0 %v6102_v51, %s5773_s28  ;;  %v5262_v21 = vpop.f32.mrb[17].mxu1 }
 0x1ee   : > { %v6223_v54 = vrot.slane %v2142_v15, %v6162_v22  ;;  %v6226_v55 = vrot.slane %v2143_v16, %v6162_v22 }
 0x1ef   : > { %v6165_v23 = vsel %vm1428_vm2, %v1440_v8, %v1442_v19  ;;  %v6168_v24 = vsel %vm1581_vm3, %v1593_v9, %v1595_v20  ;;  %v6247_v8 = vrot.slane %v2550_v17, %v6162_v22  ;;  %v6250_v9 = vrot.slane %v2551_v18, %v6162_v22 }
 0x1f0   : > { %1378 = vrot.lane.b32.xlu1 %v6095_v47, %s5774_s29  ;;  %v6172_v25 = vpop.f32.mrb[18].mxu1  ;;  %v3366_v26 = vcombine.low %v6080_v41, %v6165_v23  ;;  %v3367_v27 = vcombine.high %v6080_v41, %v6165_v23  ;;  %v3774_v28 = vcombine.low %v6083_v42, %v6168_v24  ;;  %v3775_v30 = vcombine.high %v6083_v42, %v6168_v24 }
 0x1f1   : > { %v1750_v31 = vcombine.low %v6087_v43, %v6172_v25  ;;  %v1751_v32 = vcombine.high %v6087_v43, %v6172_v25  ;;  %1537 = vrot.lane.b32.xlu0 %v6102_v51, %s5774_s29  ;;  %v5273_v33 = vpop.f32.mrb[19].mxu1  ;;  %v1444_v35 = vrot.slane %v6172_v25, 1  ;;  %v1597_v36 = vrot.slane %v6172_v25, 2 }
 0x1f2   : > { %v6268_v16 = vrot.slane %v3367_v27, %v6162_v22 }
 0x1f3   : > { %v6189_v34 = vrot.slane %v1750_v31, %v6162_v22  ;;  %v6194_v37 = vrot.slane %v1751_v32, %v6162_v22 }
 0x1f4   : > { %1491 = vrot.lane.b32.xlu1 %v6112_v57, %s5773_s28  ;;  %v6201_v39 = vpop.f32.mrb[20].mxu1 }
 0x1f5   : > { %v2974_v41 = vcombine.low %v6095_v47, %v6201_v39  ;;  %v2975_v43 = vcombine.high %v6095_v47, %v6201_v39  ;;  %1642 = vrot.lane.b32.xlu0 %v6105_v52, %s5773_s28  ;;  %v5276_v44 = vpop.f32.mrb[21].mxu1  ;;  %v1445_v45 = vrot.slane %v6201_v39, 1  ;;  %v1598_v46 = vrot.slane %v6201_v39, 2 }
 0x1f6   : > { %v1814_v48 = vcombine.low %v6204_v40, %v6194_v37  ;;  %v1815_v49 = vcombine.high %v6204_v40, %v6194_v37  ;;  %v6434_v47 = vrot.slane %v2958_v5, %v6162_v22  ;;  %v9078_v37 = vcombine.low %v6197_v38, %v6189_v34 }
 0x1f7   : > { %v6229_v56 = vsel %vm1428_vm2, %v1444_v35, %v1445_v45  ;;  %v6232_v60 = vsel %vm1581_vm3, %v1597_v36, %v1598_v46 }
 0x1f8   : > { %1539 = vrot.lane.b32.xlu1 %v6112_v57, %s5774_s29  ;;  %v981_v61 = vpop.f32.mrb[22].mxu1  ;;  %v2158_v62 = vcombine.low %v6102_v51, %v6229_v56  ;;  %v2159_v63 = vcombine.high %v6102_v51, %v6229_v56  ;;  %v2566_v0 = vcombine.low %v6105_v52, %v6232_v60  ;;  %v2567_v1 = vcombine.high %v6105_v52, %v6232_v60 }
 0x1f9   : > { %v1447_v2 = vrot.slane %v981_v61, 1  ;;  %v1600_v3 = vrot.slane %v981_v61, 2  ;;  %1690 = vrot.lane.b32.xlu0 %v6105_v52, %s5774_s29  ;;  %v5279_v7 = vpop.f32.mrb[23].mxu1  ;;  %v6265_v52 = vrot.slane %v3366_v26, %v6162_v22 }
 0x1fa   : > { %v6253_v51 = vrot.slane %v2158_v62, %v6162_v22  ;;  %v6256_v10 = vrot.slane %v2159_v63, %v6162_v22  ;;  %v6259_v14 = vrot.slane %v2566_v0, %v6162_v22  ;;  %v6262_v15 = vrot.slane %v2567_v1, %v6162_v22 }
 0x1fb   : > { %v6271_v17 = vsel %vm1428_vm2, %v1445_v45, %v1447_v2  ;;  %v6274_v18 = vsel %vm1581_vm3, %v1598_v46, %v1600_v3  ;;  %v6312_v0 = vrot.slane %v3774_v28, %v6162_v22  ;;  %v6330_v28 = vrot.slane %v3775_v30, %v6162_v22 }
 0x1fc   : > { %9056 = vst [vmem:[#allocation2_spill] sm:$0xff] %v6259_v14  ;;  %1644 = vrot.lane.b32.xlu1 %v6115_v58, %s5773_s28  ;;  %v6278_v19 = vpop.f32.mrb[24].mxu1  ;;  %v6280_v20 = vpop.f32.mrb[32].mxu0  ;;  %v3382_v44 = vcombine.low %v6112_v57, %v6271_v17  ;;  %v3383_v45 = vcombine.high %v6112_v57, %v6271_v17  ;;  %v3790_v2 = vcombine.low %v6115_v58, %v6274_v18 }
 0x1fd   : > { %1332 = vrot.lane.b32.xlu0 %v6119_v59, %s5773_s28  ;;  %v5290_v32 = vpop.f32.mrb[25].mxu1  ;;  %v5324_v36 = vpop.f32.mrb[33].mxu0  ;;  %9057 = vst [vmem:[#allocation3_spill] sm:$0xff] %v6312_v0  ;;  %9058 = vst [vmem:[#allocation4_spill] sm:$0xff] %v6330_v28  ;;  %v1602_v63 = vrot.slane %v6278_v19, 2  ;;  %v1612_v61 = vrot.slane %v6280_v20, 2 }
 0x1fe   : > { %v6315_v57 = vrot.slane %v3382_v44, %v6162_v22  ;;  %v6318_v1 = vrot.slane %v3383_v45, %v6162_v22  ;;  %v3791_v32 = vcombine.high %v6115_v58, %v6274_v18  ;;  %v1449_v36 = vrot.slane %v6278_v19, 1 }
 0x1ff   : > { %v1459_v44 = vrot.slane %v6280_v20, 1 }
 0x200   : > { %1692 = vrot.lane.b32.xlu1 %v6115_v58, %s5774_s29  ;;  %v6324_v3 = vpop.f32.mrb[26].mxu1  ;;  %v6332_v7 = vpop.f32.mrb[34].mxu0  ;;  %v6356_v62 = vrot.slane %v3791_v32, %v6162_v22 }
 0x201   : > { %9059 = vst [vmem:[#allocation5_spill] sm:$0xff] %v6332_v7  ;;  %1380 = vrot.lane.b32.xlu0 %v6119_v59, %s5774_s29  ;;  %v5293_v45 = vpop.f32.mrb[27].mxu1  ;;  %v5327_v30 = vpop.f32.mrb[35].mxu0  ;;  %v1460_v26 = vrot.slane %v6332_v7, 1  ;;  %v1603_v32 = vrot.slane %v6324_v3, 2 }
 0x202   : > { %v6353_v45 = vrot.slane %v3790_v2, %v6162_v22  ;;  %9061 = vst [vmem:[#allocation7_spill] sm:$0xff] %v6356_v62  ;;  %v1450_v30 = vrot.slane %v6324_v3, 1 }
 0x203   : > { %v6377_v2 = vsel %vm1428_vm2, %v1459_v44, %v1460_v26 }
 0x204   : > { %9060 = vst [vmem:[#allocation6_spill] sm:$0xff] %v6353_v45  ;;  %1334 = vrot.lane.b32.xlu1 %v6131_v4, %s5773_s28  ;;  %v1061_v58 = vpop.f32.mrb[28].mxu1  ;;  %v1221_v46 = vpop.f32.mrb[36].mxu0  ;;  %v6374_v59 = vsel %vm1428_vm2, %v1449_v36, %v1450_v30  ;;  %9063 = vst [vmem:[#allocation9_spill] sm:$0xff] %v6377_v2  ;;  %v1613_v36 = vrot.slane %v6332_v7, 2 }
 0x205   : > { %1493 = vrot.lane.b32.xlu0 %v6144_v12, %s5773_s28  ;;  %v1452_v27 = vrot.slane %v1061_v58, 1  ;;  %v1605_v31 = vrot.slane %v1061_v58, 2  ;;  %v5296_v35 = vpop.f32.mrb[29].mxu1  ;;  %v1462_v42 = vrot.slane %v1221_v46, 1  ;;  %v1615_v53 = vrot.slane %v1221_v46, 2  ;;  %v5330_v50 = vpop.f32.mrb[37].mxu0 }
 0x206   : > { %9062 = vst [vmem:[#allocation8_spill] sm:$0xff] %v6374_v59  ;;  %v5776_v35 = vmov 1934713408   ;;  %v6392_v46 = vsel %vm1581_vm3, %v1602_v63, %v1603_v32  ;;  %v2174_v29 = vcombine.low %v6374_v59, %v6377_v2 }
 0x207   : > { %v6382_v21 = vsel %vm1428_vm2, %v1450_v30, %v1452_v27  ;;  %v6385_v33 = vsel %vm1428_vm2, %v1460_v26, %v1462_v42  ;;  %v1801_v58 = vunpack.c.l.s4 %v5776_v35  ;;  %9067 = vst [vmem:[#allocation13_spill] sm:$0xff] %v6392_v46  ;;  %v6398_v44 = vsel %vm1581_vm3, %v1603_v32, %v1605_v31 }
 0x208   : > { %9064 = vst [vmem:[#allocation10_spill] sm:$0xff] %v6382_v21  ;;  %9065 = vst [vmem:[#allocation11_spill] sm:$0xff] %v6385_v33  ;;  %1382 = vrot.lane.b32.xlu1 %v6131_v4, %s5774_s29  ;;  %v6389_v50 = vpop.f32.mrb[30].mxu1  ;;  %v6404_v26 = vrot.slane %v2975_v43, %v6162_v22  ;;  %v6407_v42 = vsel %vm1581_vm3, %v1612_v61, %v1613_v36  ;;  %v6410_v63 = vsel %vm1581_vm3, %v1613_v36, %v1615_v53 }
 0x209   : > { %9066 = vst [vmem:[#allocation12_spill] sm:$0xff] %v6389_v50  ;;  %1541 = vrot.lane.b32.xlu0 %v6144_v12, %s5774_s29  ;;  %v5307_v27 = vpop.f32.mrb[31].mxu1  ;;  %9068 = vst [vmem:[#allocation14_spill] sm:$0xff] %v6398_v44  ;;  %v6416_v12 = vrot.slane %v2974_v41, %v6162_v22  ;;  %v1802_v31 = vunpack.c.0.s8 %v1801_v58  ;;  %v6422_v30 = vrot.slane %v2959_v6, %v6162_v22  ;;  %v1454_v53 = vrot.slane %v6389_v50, 1 }
 0x20a   : > { %9069 = vst [vmem:[#allocation15_spill] sm:$0xff] %v6407_v42  ;;  %9070 = vst [vmem:[#allocation16_spill] sm:$0xff] %v6410_v63  ;;  %v1607_v61 = vrot.slane %v6389_v50, 2  ;;  %v2175_v4 = vcombine.high %v6374_v59, %v6377_v2 }
 0x20b   : > { %v6443_v58 = vsub.s32 %v1802_v31, %v6141_v11 }
 0x20c   : > { %1495 = vrot.lane.b32.xlu1 %v6165_v23, %s5773_s28  ;;  %v6426_v43 = vpop.f32.mrb[32].mxu1 }
 0x20d   : > { %9071 = vst [vmem:[#allocation17_spill] sm:$0xff] %v6426_v43  ;;  %1646 = vrot.lane.b32.xlu0 %v6147_v13, %s5773_s28  ;;  %v5310_v6 = vpop.f32.mrb[33].mxu1  ;;  %v1455_v41 = vrot.slane %v6426_v43, 1  ;;  %v1608_v32 = vrot.slane %v6426_v43, 2  ;;  %v6505_v40 = vrot.slane %v9078_v37, %v6443_v58  ;;  %v9082_v37 = vcombine.high %v6324_v3, %v6332_v7 }
 0x20f   : > { %v6454_v27 = vsel %vm1428_vm2, %v1454_v53, %v1455_v41  ;;  %v6457_v6 = vsel %vm1581_vm3, %v1607_v61, %v1608_v32  ;;  %9079 = vst [vmem:[#allocation22_spill] sm:$0xff] %v6505_v40  ;;  %v6523_v2 = vrot.slane %v9082_v37, %v6162_v22 }
 0x210   : > { %1543 = vrot.lane.b32.xlu1 %v6165_v23, %s5774_s29  ;;  %v1141_v5 = vpop.f32.mrb[34].mxu1  ;;  %9072 = vst [vmem:[#allocation18_spill] sm:$0xff] %v6454_v27  ;;  %v3398_v23 = vcombine.low %v6382_v21, %v6385_v33  ;;  %v9154_v40 = vld [vmem:[#allocation12_spill] sm:$0xff] }
 0x211   : > { %1694 = vrot.lane.b32.xlu0 %v6147_v13, %s5774_s29  ;;  %v1457_v11 = vrot.slane %v1141_v5, 1  ;;  %v1610_v31 = vrot.slane %v1141_v5, 2  ;;  %v5313_v36 = vpop.f32.mrb[35].mxu1  ;;  %v6477_v13 = vrot.slane %v1814_v48, %v6443_v58  ;;  %v9077_v48 = vcombine.low %v6324_v3, %v6332_v7 }
 0x212   : > { %v6483_v36 = vrot.slane %v1815_v49, %v6443_v58  ;;  %v9080_v49 = vcombine.high %v6197_v38, %v6189_v34  ;;  %v3399_v34 = vcombine.high %v6382_v21, %v6385_v33  ;;  %v6528_v38 = vrot.slane %v2174_v29, %v6162_v22 }
 0x213   : > { %v6468_v53 = vsel %vm1428_vm2, %v1455_v41, %v1457_v11  ;;  %v6471_v61 = vsel %vm1581_vm3, %v1608_v32, %v1610_v31  ;;  %9073 = vst [vmem:[#allocation19_spill] sm:$0xff] %v6477_v13  ;;  %v9075_v41 = vcombine.low %v6278_v19, %v6280_v20  ;;  %v6499_v11 = vrot.slane %v9077_v48, %v6162_v22 }
 0x214   : > { %9074 = vst [vmem:[#allocation20_spill] sm:$0xff] %v6483_v36  ;;  %1648 = vrot.lane.b32.xlu1 %v6168_v24, %s5773_s28  ;;  %v6493_v5 = vpop.f32.mrb[36].mxu1  ;;  %v6511_v31 = vrot.slane %v9080_v49, %v6443_v58  ;;  %v6531_v49 = vrot.slane %v2175_v4, %v6162_v22  ;;  %v3807_v21 = vcombine.high %v6398_v44, %v6410_v63 }
 0x215   : > { %v6491_v32 = vrot.slane %v9075_v41, %v6162_v22  ;;  %9076 = vst [vmem:[#allocation21_spill] sm:$0xff] %v6493_v5  ;;  %v1782_v41 = vcombine.low %v6389_v50, %v6493_v5  ;;  %v1783_v35 = vcombine.high %v6389_v50, %v6493_v5  ;;  %1336 = vrot.lane.b32.xlu0 %v6172_v25, %s5773_s28  ;;  %v5341_v48 = vpop.f32.mrb[37].mxu1  ;;  %v1464_v7 = vrot.slane %v6493_v5, 1 }
 0x216   : > { %9081 = vst [vmem:[#allocation23_spill] sm:$0xff] %v6511_v31  ;;  %v6534_v50 = vrot.slane %v3398_v23, %v6162_v22  ;;  %v9083_v48 = vcombine.high %v6278_v19, %v6280_v20  ;;  %v1617_v33 = vrot.slane %v6493_v5, 2  ;;  %v2582_v23 = vcombine.low %v6392_v46, %v6407_v42 }
 0x217   : > { %v6541_v37 = vrot.slane %v1782_v41, %v6162_v22  ;;  %v1797_v29 = vrot.slane %v1783_v35, %v6162_v22  ;;  %v3806_v41 = vcombine.low %v6398_v44, %v6410_v63  ;;  %v6571_v44 = vrot.slane %v3399_v34, %v6162_v22 }
 0x218   : > { %v1781_v59 = vrot.slane %v9083_v48, %v6162_v22  ;;  %1696 = vrot.lane.b32.xlu1 %v6168_v24, %s5774_s29  ;;  %v6548_v4 = vpop.f32.mrb[38].mxu1  ;;  %v2583_v48 = vcombine.high %v6392_v46, %v6407_v42  ;;  %v9088_v34 = vcombine.low %v6226_v55, %v6256_v10 }
 0x219   : > { %9084 = vst [vmem:[#allocation24_spill] sm:$0xff] %v6548_v4  ;;  %v3006_v35 = vcombine.low %v6426_v43, %v6548_v4  ;;  %v3007_v24 = vcombine.high %v6426_v43, %v6548_v4  ;;  %1384 = vrot.lane.b32.xlu0 %v6172_v25, %s5774_s29  ;;  %v5344_v5 = vpop.f32.mrb[39].mxu1  ;;  %v1465_v45 = vrot.slane %v6548_v4, 1  ;;  %v1618_v42 = vrot.slane %v6548_v4, 2 }
 0x21a   : > { %v1846_v46 = vcombine.low %v1781_v59, %v1797_v29  ;;  %v1847_v0 = vcombine.high %v1781_v59, %v1797_v29  ;;  %v1830_v62 = vcombine.low %v6491_v32, %v6541_v37  ;;  %v1831_v63 = vcombine.high %v6491_v32, %v6541_v37 }
 0x21b   : > { %v6574_v43 = vsel %vm1428_vm2, %v1464_v7, %v1465_v45  ;;  %v6577_v25 = vsel %vm1581_vm3, %v1617_v33, %v1618_v42  ;;  %v9086_v5 = vcombine.high %v6226_v55, %v6256_v10  ;;  %v6588_v32 = vrot.slane %v2582_v23, %v6162_v22 }
 0x21c   : > { %9085 = vst [vmem:[#allocation25_spill] sm:$0xff] %v6574_v43  ;;  %1338 = vrot.lane.b32.xlu1 %v6201_v39, %s5773_s28  ;;  %v1301_v29 = vpop.f32.mrb[40].mxu1  ;;  %v2190_v7 = vcombine.low %v6454_v27, %v6574_v43  ;;  %v2191_v33 = vcombine.high %v6454_v27, %v6574_v43  ;;  %v6598_v37 = vrot.slane %v9088_v34, %v6443_v58 }
 0x21d   : > { %v6583_v59 = vrot.slane %v9086_v5, %v6443_v58  ;;  %v1467_v5 = vrot.slane %v1301_v29, 1  ;;  %v1620_v4 = vrot.slane %v1301_v29, 2  ;;  %1497 = vrot.lane.b32.xlu0 %v6229_v56, %s5773_s28  ;;  %v6603_v23 = vrot.slane %v2583_v48, %v6162_v22  ;;  %v5347_v28 = vpop.f32.mrb[41].mxu1 }
 0x21e   : > { %9089 = vst [vmem:[#allocation27_spill] sm:$0xff] %v6598_v37  ;;  %v6606_v14 = vrot.slane %v1846_v46, %v6443_v58  ;;  %v6609_v43 = vrot.slane %v3806_v41, %v6162_v22  ;;  %v6612_v27 = vrot.slane %v3807_v21, %v6162_v22  ;;  %v2205_v55 = vrot.slane %v2191_v33, %v6162_v22  ;;  %v9151_v37 = vld [vmem:[#allocation16_spill] sm:$0xff] }
 0x21f   : > { %9087 = vst [vmem:[#allocation26_spill] sm:$0xff] %v6583_v59  ;;  %v6616_v10 = vrot.slane %v1847_v0, %v6443_v58  ;;  %v6619_v29 = vsel %vm1428_vm2, %v1465_v45, %v1467_v5  ;;  %v6622_v48 = vsel %vm1581_vm3, %v1618_v42, %v1620_v4  ;;  %v2198_v21 = vrot.slane %v2190_v7, %v6162_v22  ;;  %v9141_v59 = vld [vmem:[#allocation10_spill] sm:$0xff] }
 0x220   : > { %9090 = vst [vmem:[#allocation28_spill] sm:$0xff] %v6606_v14  ;;  %9092 = vst [vmem:[#allocation30_spill] sm:$0xff] %v6622_v48  ;;  %1386 = vrot.lane.b32.xlu1 %v6201_v39, %s5774_s29  ;;  %v9093_v0 = vcombine.low %v6422_v30, %v6404_v26  ;;  %v9095_v42 = vcombine.low %v6223_v54, %v6253_v51  ;;  %v9097_v41 = vcombine.high %v6223_v54, %v6253_v51 }
 0x221   : > { %9091 = vst [vmem:[#allocation29_spill] sm:$0xff] %v6616_v10  ;;  %1545 = vrot.lane.b32.xlu0 %v6229_v56, %s5774_s29  ;;  %v2598_v39 = vcombine.low %v6457_v6, %v6577_v25  ;;  %v2599_v7 = vcombine.high %v6457_v6, %v6577_v25  ;;  %v9099_v34 = vcombine.high %v6422_v30, %v6404_v26 }
 0x222   : > { %v6635_v45 = vrot.slane %v9093_v0, %v6443_v58  ;;  %v6641_v4 = vrot.slane %v9095_v42, %v6443_v58  ;;  %v6647_v33 = vrot.slane %v9097_v41, %v6443_v58  ;;  %v9101_v54 = vcombine.high %v6434_v47, %v6416_v12 }
 0x223   : > { %v6659_v5 = vrot.slane %v9099_v34, %v6443_v58  ;;  %v3414_v56 = vcombine.low %v6468_v53, %v6619_v29  ;;  %v3415_v0 = vcombine.high %v6468_v53, %v6619_v29  ;;  %v3822_v42 = vcombine.low %v6471_v61, %v6622_v48 }
 0x224   : > { %9094 = vst [vmem:[#allocation31_spill] sm:$0xff] %v6635_v45  ;;  %9096 = vst [vmem:[#allocation32_spill] sm:$0xff] %v6641_v4  ;;  %v6665_v51 = vrot.slane %v9101_v54, %v6443_v58  ;;  %v3823_v26 = vcombine.high %v6471_v61, %v6622_v48  ;;  %v3021_v30 = vrot.slane %v3007_v24, %v6162_v22  ;;  %1499 = vrot.lane.b32.xlu1 %v6271_v17, %s5773_s28  ;;  %v9145_v4 = vld [vmem:[#allocation15_spill] sm:$0xff]  ;;  %v9148_v45 = vld [vmem:[#allocation14_spill] sm:$0xff] }
 0x225   : > { %9098 = vst [vmem:[#allocation33_spill] sm:$0xff] %v6647_v33  ;;  %9100 = vst [vmem:[#allocation34_spill] sm:$0xff] %v6659_v5  ;;  %v2255_v41 = vcombine.high %v6531_v49, %v2205_v55  ;;  %v6680_v54 = vrot.slane %v1830_v62, %v6443_v58  ;;  %v2238_v28 = vcombine.low %v6528_v38, %v2198_v21  ;;  %1650 = vrot.lane.b32.xlu0 %v6232_v60, %s5773_s28  ;;  %v9135_v5 = vld [vmem:[#allocation6_spill] sm:$0xff] }
 0x226   : > { %9102 = vst [vmem:[#allocation35_spill] sm:$0xff] %v6665_v51  ;;  %v2254_v46 = vcombine.low %v6531_v49, %v2205_v55  ;;  %v6689_v24 = vrot.slane %v1831_v63, %v6443_v58  ;;  %v3014_v13 = vrot.slane %v3006_v35, %v6162_v22  ;;  %v2239_v62 = vcombine.high %v6528_v38, %v2198_v21  ;;  %v9127_v38 = vld [vmem:[#allocation2_spill] sm:$0xff] }
 0x227   : > { %9103 = vst [vmem:[#allocation36_spill] sm:$0xff] %v6680_v54  ;;  %v6696_v34 = vrot.slane %v2598_v39, %v6162_v22  ;;  %v6699_v48 = vrot.slane %v2599_v7, %v6162_v22  ;;  %v6702_v49 = vrot.slane %v3414_v56, %v6162_v22  ;;  %v6705_v55 = vrot.slane %v3415_v0, %v6162_v22 }
 0x228   : > { %9104 = vst [vmem:[#allocation37_spill] sm:$0xff] %v6689_v24  ;;  %v6708_v63 = vrot.slane %v3822_v42, %v6162_v22  ;;  %v6711_v35 = vrot.slane %v3823_v26, %v6162_v22  ;;  %v6718_v39 = vrot.slane %v2255_v41, %v6443_v58  ;;  %1547 = vrot.lane.b32.xlu1 %v6271_v17, %s5774_s29  ;;  %v9138_v24 = vld [vmem:[#allocation5_spill] sm:$0xff] }
 0x229   : > { %v6725_v56 = vrot.slane %v2254_v46, %v6443_v58  ;;  %v3070_v0 = vcombine.low %v6523_v2, %v3021_v30  ;;  %v6729_v42 = vrot.slane %v2238_v28, %v6443_v58  ;;  %v3071_v26 = vcombine.high %v6523_v2, %v3021_v30  ;;  %1698 = vrot.lane.b32.xlu0 %v6232_v60, %s5774_s29 }
 0x22a   : > { %9105 = vst [vmem:[#allocation38_spill] sm:$0xff] %v6718_v39  ;;  %v6739_v17 = vrot.slane %v2239_v62, %v6443_v58  ;;  %v3055_v46 = vcombine.high %v6499_v11, %v3014_v13  ;;  %v3054_v28 = vcombine.low %v6499_v11, %v3014_v13  ;;  %v9112_v13 = vcombine.low %v6434_v47, %v6416_v12 }
 0x22b   : > { %9106 = vst [vmem:[#allocation39_spill] sm:$0xff] %v6725_v56  ;;  %9107 = vst [vmem:[#allocation40_spill] sm:$0xff] %v6729_v42  ;;  %v6745_v21 = vrot.slane %v3070_v0, %v6443_v58  ;;  %v6750_v2 = vrot.slane %v3071_v26, %v6443_v58  ;;  %v3462_v30 = vcombine.low %v6534_v50, %v6702_v49 }
 0x22c   : > { %9108 = vst [vmem:[#allocation41_spill] sm:$0xff] %v6739_v17  ;;  %v6757_v7 = vrot.slane %v3055_v46, %v6443_v58  ;;  %1652 = vrot.lane.b32.xlu1 %v6274_v18, %s5773_s28  ;;  %v6776_v11 = vrot.slane %v9112_v13, %v6443_v58  ;;  %v6779_v62 = vrot.slane %v3054_v28, %v6443_v58  ;;  %v9131_v17 = vld [vmem:[#allocation7_spill] sm:$0xff] }
 0x22d   : > { %9109 = vst [vmem:[#allocation42_spill] sm:$0xff] %v6745_v21  ;;  %9110 = vst [vmem:[#allocation43_spill] sm:$0xff] %v6750_v2  ;;  %1340 = vrot.lane.b32.xlu0 %v6278_v19, %s5773_s28  ;;  %v3478_v60 = vcombine.low %v6571_v44, %v6705_v55  ;;  %v2662_v46 = vcombine.low %v6603_v23, %v6699_v48  ;;  %v2646_v12 = vcombine.low %v6588_v32, %v6696_v34  ;;  %v9134_v2 = vld [vmem:[#allocation3_spill] sm:$0xff] }
 0x22e   : > { %9111 = vst [vmem:[#allocation44_spill] sm:$0xff] %v6757_v7  ;;  %9113 = vst [vmem:[#allocation45_spill] sm:$0xff] %v6776_v11  ;;  %v3870_v47 = vcombine.low %v6609_v43, %v6708_v63  ;;  %v3886_v28 = vcombine.low %v6612_v27, %v6711_v35  ;;  %v6805_v0 = vrot.slane %v3462_v30, %v6443_v58  ;;  %v9143_v11 = vld [vmem:[#allocation13_spill] sm:$0xff] }
 0x22f   : > { %9114 = vst [vmem:[#allocation46_spill] sm:$0xff] %v6779_v62  ;;  %v6802_v26 = vrot.slane %v3478_v60, %v6443_v58  ;;  %v6808_v41 = vrot.slane %v2662_v46, %v6443_v58  ;;  %v6811_v14 = vrot.slane %v2646_v12, %v6443_v58  ;;  %v9121_v60 = vcombine.low %v6268_v16, %v6318_v1 }
 0x230   : > { %1700 = vrot.lane.b32.xlu1 %v6274_v18, %s5774_s29  ;;  %9116 = vst [vmem:[#allocation48_spill] sm:$0xff] %v6805_v0  ;;  %v6814_v13 = vrot.slane %v3886_v28, %v6443_v58  ;;  %v6817_v18 = vrot.slane %v3870_v47, %v6443_v58  ;;  %v9123_v46 = vcombine.low %v6265_v52, %v6315_v57 }
 0x231   : > { %1348 = vrot.lane.b32.xlu0 %v6280_v20, %s5773_s28  ;;  %9115 = vst [vmem:[#allocation47_spill] sm:$0xff] %v6802_v26  ;;  %9117 = vst [vmem:[#allocation49_spill] sm:$0xff] %v6808_v41  ;;  %v6827_v30 = vrot.slane %v9121_v60, %v6443_v58  ;;  %v9125_v47 = vcombine.low %v6250_v9, %v6262_v15  ;;  %v9128_v7 = vcombine.low %v6247_v8, %v9127_v38  ;;  %v9130_v60 = vld [vmem:[#allocation4_spill] sm:$0xff] }
 0x232   : > { %9118 = vst [vmem:[#allocation50_spill] sm:$0xff] %v6811_v14  ;;  %9119 = vst [vmem:[#allocation51_spill] sm:$0xff] %v6814_v13  ;;  %v6833_v12 = vrot.slane %v9123_v46, %v6443_v58  ;;  %v9132_v46 = vcombine.low %v9130_v60, %v9131_v17 }
 0x233   : > { %9120 = vst [vmem:[#allocation52_spill] sm:$0xff] %v6817_v18  ;;  %9122 = vst [vmem:[#allocation53_spill] sm:$0xff] %v6827_v30  ;;  %v6839_v28 = vrot.slane %v9125_v47, %v6443_v58  ;;  %v6845_v51 = vrot.slane %v9128_v7, %v6443_v58  ;;  %v9136_v47 = vcombine.low %v9134_v2, %v9135_v5  ;;  %v9140_v7 = vld [vmem:[#allocation9_spill] sm:$0xff] }
 0x234   : > { %1342 = vrot.lane.b32.xlu1 %v6324_v3, %s5773_s28  ;;  %9124 = vst [vmem:[#allocation54_spill] sm:$0xff] %v6833_v12  ;;  %v6853_v33 = vrot.slane %v9132_v46, %v6443_v58  ;;  %v9142_v46 = vld [vmem:[#allocation11_spill] sm:$0xff] }
 0x235   : > { %9126 = vst [vmem:[#allocation55_spill] sm:$0xff] %v6839_v28  ;;  %9129 = vst [vmem:[#allocation2_spill] sm:$0xff] %v6845_v51  ;;  %1388 = vrot.lane.b32.xlu0 %v6278_v19, %s5774_s29  ;;  %v6859_v39 = vrot.slane %v9136_v47, %v6443_v58  ;;  %v9139_v47 = vld [vmem:[#allocation8_spill] sm:$0xff] }
 0x236   : > { %9133 = vst [vmem:[#allocation4_spill] sm:$0xff] %v6853_v33 }
 0x237   : > { %9137 = vst [vmem:[#allocation7_spill] sm:$0xff] %v6859_v39 }
 0x238   : > { %1350 = vrot.lane.b32.xlu1 %v9138_v24, %s5773_s28 }
 0x239   : > { %1396 = vrot.lane.b32.xlu0 %v6280_v20, %s5774_s29 }
 0x23c   : > { %1390 = vrot.lane.b32.xlu1 %v6324_v3, %s5774_s29 }
 0x23d   : > { %1501 = vrot.lane.b32.xlu0 %v9139_v47, %s5773_s28 }
 0x23f   : > { %v6889_v31 = vpop.permute.xlu0 %1324 }
 0x240   : > { %1398 = vrot.lane.b32.xlu1 %v9138_v24, %s5774_s29 }
 0x241   : > { %1509 = vrot.lane.b32.xlu0 %v9140_v7, %s5773_s28 }
 0x243   : > { %v6895_v19 = vpop.permute.xlu0 %1372  ;;  %v6899_v20 = vpop.permute.xlu1 %1374 }
 0x244   : > { %1503 = vrot.lane.b32.xlu1 %v9141_v59, %s5773_s28 }
 0x245   : > { %1549 = vrot.lane.b32.xlu0 %v9139_v47, %s5774_s29 }
 0x247   : > { %v6903_v3 = vpop.permute.xlu0 %1326 }
 0x248   : > { %1511 = vrot.lane.b32.xlu1 %v9142_v46, %s5773_s28 }
 0x249   : > { %1557 = vrot.lane.b32.xlu0 %v9140_v7, %s5774_s29 }
 0x24a   : > { %v6909_v24 = vpop.permute.xlu1 %1487 }
 0x24b   : > { %v6911_v62 = vpop.permute.xlu0 %1485 }
 0x24c   : > { %1551 = vrot.lane.b32.xlu1 %v9141_v59, %s5774_s29 }
 0x24d   : > { %1654 = vrot.lane.b32.xlu0 %v9143_v11, %s5773_s28 }
 0x24e   : > { %v6917_v42 = vpop.permute.xlu1 %1535 }
 0x24f   : > { %9144 = vst [vmem:[#allocation3_spill] sm:$0xff] %v6917_v42  ;;  %v6919_v47 = vpop.permute.xlu0 %1533 }
 0x250   : > { %1559 = vrot.lane.b32.xlu1 %v9142_v46, %s5774_s29 }
 0x251   : > { %1662 = vrot.lane.b32.xlu0 %v9145_v4, %s5773_s28 }
 0x252   : > { %v6925_v7 = vpop.permute.xlu1 %1640 }
 0x253   : > { %9146 = vst [vmem:[#allocation6_spill] sm:$0xff] %v6925_v7  ;;  %v6927_v21 = vpop.permute.xlu0 %1638 }
 0x254   : > { %9147 = vst [vmem:[#allocation5_spill] sm:$0xff] %v6927_v21  ;;  %1656 = vrot.lane.b32.xlu1 %v9148_v45, %s5773_s28 }
 0x255   : > { %1702 = vrot.lane.b32.xlu0 %v9143_v11, %s5774_s29 }
 0x256   : > { %v6933_v59 = vpop.permute.xlu1 %1688 }
 0x257   : > { %9149 = vst [vmem:[#allocation8_spill] sm:$0xff] %v6933_v59  ;;  %v6935_v56 = vpop.permute.xlu0 %1686  ;;  %v9159_v59 = vld [vmem:[#allocation17_spill] sm:$0xff] }
 0x258   : > { %9150 = vst [vmem:[#allocation9_spill] sm:$0xff] %v6935_v56  ;;  %1664 = vrot.lane.b32.xlu1 %v9151_v37, %s5773_s28 }
 0x259   : > { %1710 = vrot.lane.b32.xlu0 %v9145_v4, %s5774_s29 }
 0x25a   : > { %v6941_v46 = vpop.permute.xlu1 %1328 }
 0x25b   : > { %9152 = vst [vmem:[#allocation10_spill] sm:$0xff] %v6941_v46  ;;  %v6943_v54 = vpop.permute.xlu0 %1376 }
 0x25c   : > { %9153 = vst [vmem:[#allocation11_spill] sm:$0xff] %v6943_v54  ;;  %1704 = vrot.lane.b32.xlu1 %v9148_v45, %s5774_s29  ;;  %v9160_v45 = vld [vmem:[#allocation18_spill] sm:$0xff] }
 0x25d   : > { %1344 = vrot.lane.b32.xlu0 %v9154_v40, %s5773_s28 }
 0x25e   : > { %v6949_v11 = vpop.permute.xlu1 %1330 }
 0x25f   : > { %9155 = vst [vmem:[#allocation13_spill] sm:$0xff] %v6949_v11  ;;  %v6951_v10 = vpop.permute.xlu0 %1489  ;;  %v9212_v18 = vld [vmem:[#allocation9_spill] sm:$0xff] }
 0x260   : > { %9156 = vst [vmem:[#allocation15_spill] sm:$0xff] %v6951_v10  ;;  %1712 = vrot.lane.b32.xlu1 %v9151_v37, %s5774_s29 }
 0x261   : > { %1392 = vrot.lane.b32.xlu0 %v9154_v40, %s5774_s29 }
 0x262   : > { %v6957_v4 = vpop.permute.xlu1 %1378 }
 0x263   : > { %9157 = vst [vmem:[#allocation14_spill] sm:$0xff] %v6957_v4  ;;  %v6959_v36 = vpop.permute.xlu0 %1537  ;;  %v9215_v12 = vld [vmem:[#allocation11_spill] sm:$0xff] }
 0x264   : > { %9158 = vst [vmem:[#allocation16_spill] sm:$0xff] %v6959_v36  ;;  %1346 = vrot.lane.b32.xlu1 %v9159_v59, %s5773_s28 }
 0x265   : > { %1505 = vrot.lane.b32.xlu0 %v9160_v45, %s5773_s28 }
 0x266   : > { %v6965_v7 = vpop.permute.xlu1 %1491 }
 0x267   : > { %9161 = vst [vmem:[#allocation12_spill] sm:$0xff] %v6965_v7  ;;  %v6967_v11 = vpop.permute.xlu0 %1642  ;;  %v9224_v41 = vld [vmem:[#allocation15_spill] sm:$0xff] }
 0x268   : > { %9162 = vst [vmem:[#allocation17_spill] sm:$0xff] %v6967_v11  ;;  %1394 = vrot.lane.b32.xlu1 %v9159_v59, %s5774_s29  ;;  %v9169_v11 = vld [vmem:[#allocation25_spill] sm:$0xff] }
 0x269   : > { %1553 = vrot.lane.b32.xlu0 %v9160_v45, %s5774_s29 }
 0x26a   : > { %v6973_v40 = vpop.permute.xlu1 %1539 }
 0x26b   : > { %9163 = vst [vmem:[#allocation18_spill] sm:$0xff] %v6973_v40  ;;  %v6975_v37 = vpop.permute.xlu0 %1690 }
 0x26c   : > { %9164 = vst [vmem:[#allocation56_spill] sm:$0xff] %v6975_v37  ;;  %1507 = vrot.lane.b32.xlu1 %v6468_v53, %s5773_s28  ;;  %v9167_v37 = vld [vmem:[#allocation21_spill] sm:$0xff] }
 0x26d   : > { %1658 = vrot.lane.b32.xlu0 %v6457_v6, %s5773_s28 }
 0x26e   : > { %v6981_v36 = vpop.permute.xlu1 %1644 }
 0x26f   : > { %9165 = vst [vmem:[#allocation57_spill] sm:$0xff] %v6981_v36  ;;  %v6983_v7 = vpop.permute.xlu0 %1332 }
 0x270   : > { %1555 = vrot.lane.b32.xlu1 %v6468_v53, %s5774_s29 }
 0x271   : > { %1706 = vrot.lane.b32.xlu0 %v6457_v6, %s5774_s29 }
 0x272   : > { %v6989_v59 = vpop.permute.xlu1 %1692 }
 0x273   : > { %9166 = vst [vmem:[#allocation58_spill] sm:$0xff] %v6989_v59  ;;  %v6991_v45 = vpop.permute.xlu0 %1380  ;;  %v9168_v59 = vld [vmem:[#allocation24_spill] sm:$0xff] }
 0x274   : > { %1660 = vrot.lane.b32.xlu1 %v6471_v61, %s5773_s28 }
 0x275   : > { %1352 = vrot.lane.b32.xlu0 %v9167_v37, %s5773_s28 }
 0x276   : > { %v6997_v40 = vpop.permute.xlu1 %1334 }
 0x277   : > { %v6999_v36 = vpop.permute.xlu0 %1493 }
 0x278   : > { %1708 = vrot.lane.b32.xlu1 %v6471_v61, %s5774_s29 }
 0x279   : > { %1400 = vrot.lane.b32.xlu0 %v9167_v37, %s5774_s29 }
 0x27a   : > { %v7005_v6 = vpop.permute.xlu1 %1382 }
 0x27b   : > { %v7007_v53 = vpop.permute.xlu0 %1541 }
 0x27c   : > { %1354 = vrot.lane.b32.xlu1 %v9168_v59, %s5773_s28 }
 0x27d   : > { %1513 = vrot.lane.b32.xlu0 %v9169_v11, %s5773_s28 }
 0x27e   : > { %v7013_v4 = vpop.permute.xlu1 %1495 }
 0x27f   : > { %v7015_v10 = vpop.permute.xlu0 %1646 }
 0x280   : > { %9170 = vst [vmem:[#allocation21_spill] sm:$0xff] %v7015_v10  ;;  %1402 = vrot.lane.b32.xlu1 %v9168_v59, %s5774_s29 }
 0x281   : > { %1561 = vrot.lane.b32.xlu0 %v9169_v11, %s5774_s29 }
 0x282   : > { %v7021_v61 = vpop.permute.xlu1 %1543 }
 0x283   : > { %9171 = vst [vmem:[#allocation24_spill] sm:$0xff] %v7021_v61  ;;  %v7023_v37 = vpop.permute.xlu0 %1694 }
 0x284   : > { %9172 = vst [vmem:[#allocation25_spill] sm:$0xff] %v7023_v37  ;;  %1515 = vrot.lane.b32.xlu1 %v6619_v29, %s5773_s28  ;;  %v9176_v37 = vld [vmem:[#allocation30_spill] sm:$0xff] }
 0x285   : > { %1666 = vrot.lane.b32.xlu0 %v6577_v25, %s5773_s28 }
 0x286   : > { %v7029_v54 = vpop.permute.xlu1 %1648 }
 0x287   : > { %9173 = vst [vmem:[#allocation59_spill] sm:$0xff] %v7029_v54  ;;  %v7031_v56 = vpop.permute.xlu0 %1336 }
 0x288   : > { %1563 = vrot.lane.b32.xlu1 %v6619_v29, %s5774_s29 }
 0x289   : > { %1714 = vrot.lane.b32.xlu0 %v6577_v25, %s5774_s29 }
 0x28a   : > { %v7037_v11 = vpop.permute.xlu1 %1696 }
 0x28b   : > { %9174 = vst [vmem:[#allocation60_spill] sm:$0xff] %v7037_v11  ;;  %v7039_v59 = vpop.permute.xlu0 %1384 }
 0x28c   : > { %9175 = vst [vmem:[#allocation61_spill] sm:$0xff] %v7039_v59  ;;  %1668 = vrot.lane.b32.xlu1 %v9176_v37, %s5773_s28 }
 0x28e   : > { %v7043_v42 = vpop.permute.xlu1 %1338 }
 0x28f   : > { %9177 = vst [vmem:[#allocation30_spill] sm:$0xff] %v7043_v42  ;;  %v7045_v61 = vpop.permute.xlu0 %1497 }
 0x290   : > { %9178 = vst [vmem:[#allocation62_spill] sm:$0xff] %v7045_v61  ;;  %1716 = vrot.lane.b32.xlu1 %v9176_v37, %s5774_s29 }
 0x292   : > { %v7049_v54 = vpop.permute.xlu1 %1386 }
 0x293   : > { %9179 = vst [vmem:[#allocation63_spill] sm:$0xff] %v7049_v54  ;;  %v7051_v29 = vpop.permute.xlu0 %1545 }
 0x296   : > { %v7053_v21 = vpop.permute.xlu1 %1499 }
 0x297   : > { %9180 = vst [vmem:[#allocation64_spill] sm:$0xff] %v7053_v21  ;;  %v7055_v25 = vpop.permute.xlu0 %1650  ;;  %v3479_v21 = vcombine.high %v6571_v44, %v6705_v55  ;;  %v3871_v44 = vcombine.high %v6609_v43, %v6708_v63  ;;  %v9193_v43 = vcombine.high %v6265_v52, %v6315_v57  ;;  %v9199_v57 = vcombine.high %v9130_v60, %v9131_v17  ;;  %v9208_v60 = vld [vmem:[#allocation5_spill] sm:$0xff] }
 0x298   : > { %v3230_v52 = vcombine.low %v6899_v20, %v7005_v6 }
 0x29a   : > { %v7057_v11 = vpop.permute.xlu1 %1547 }
 0x29b   : > { %9181 = vst [vmem:[#allocation65_spill] sm:$0xff] %v7057_v11  ;;  %v7059_v59 = vpop.permute.xlu0 %1698  ;;  %v3463_v11 = vcombine.high %v6534_v50, %v6702_v49  ;;  %v3887_v50 = vcombine.high %v6612_v27, %v6711_v35  ;;  %v9195_v27 = vcombine.high %v6250_v9, %v6262_v15  ;;  %v9201_v9 = vcombine.high %v9134_v2, %v9135_v5  ;;  %v9207_v5 = vld [vmem:[#allocation21_spill] sm:$0xff]  ;;  %v9209_v35 = vld [vmem:[#allocation24_spill] sm:$0xff] }
 0x29c   : > { %9182 = vst [vmem:[#allocation66_spill] sm:$0xff] %v7059_v59  ;;  %v2663_v59 = vcombine.high %v6603_v23, %v6699_v48  ;;  %v9190_v48 = vcombine.high %v6268_v16, %v6318_v1  ;;  %v9197_v16 = vcombine.high %v6247_v8, %v9127_v38 }
 0x29d   : > { %v7118_v63 = vrot.slane %v9195_v27, %v6443_v58  ;;  %v7140_v15 = vrot.slane %v9201_v9, %v6443_v58  ;;  %v7158_v2 = vrot.slane %v3887_v50, %v6443_v58  ;;  %v2006_v27 = vcombine.low %v6895_v19, %v6991_v45 }
 0x29e   : > { %v7061_v10 = vpop.permute.xlu1 %1652  ;;  %v7101_v49 = vrot.slane %v9190_v48, %v6443_v58  ;;  %v7104_v55 = vrot.slane %v2663_v59, %v6443_v58  ;;  %v7124_v1 = vrot.slane %v9197_v16, %v6443_v58  ;;  %v7161_v48 = vrot.slane %v3871_v44, %v6443_v58 }
 0x29f   : > { %9183 = vst [vmem:[#allocation67_spill] sm:$0xff] %v7061_v10  ;;  %v7063_v42 = vpop.permute.xlu0 %1340  ;;  %9196 = vst [vmem:[#allocation77_spill] sm:$0xff] %v7118_v63  ;;  %v2007_v50 = vcombine.high %v6895_v19, %v6991_v45  ;;  %v3094_v44 = vcombine.low %v6903_v3, %v6997_v40  ;;  %v3095_v9 = vcombine.high %v6903_v3, %v6997_v40 }
 0x2a0   : > { %9184 = vst [vmem:[#allocation68_spill] sm:$0xff] %v7063_v42  ;;  %9191 = vst [vmem:[#allocation74_spill] sm:$0xff] %v7101_v49  ;;  %v7206_v19 = vrot.slane %v2006_v27, %v6162_v22  ;;  %v3231_v40 = vcombine.high %v6899_v20, %v7005_v6  ;;  %v2686_v20 = vcombine.low %v9208_v60, %v9207_v5  ;;  %v9221_v49 = vld [vmem:[#allocation13_spill] sm:$0xff] }
 0x2a1   : > { %9192 = vst [vmem:[#allocation75_spill] sm:$0xff] %v7104_v55  ;;  %9198 = vst [vmem:[#allocation78_spill] sm:$0xff] %v7124_v1  ;;  %v7213_v3 = vrot.slane %v2007_v50, %v6162_v22  ;;  %v7216_v38 = vrot.slane %v3094_v44, %v6162_v22  ;;  %v2414_v50 = vcombine.low %v6919_v47, %v7007_v53 }
 0x2a2   : > { %v7065_v61 = vpop.permute.xlu1 %1700  ;;  %9202 = vst [vmem:[#allocation80_spill] sm:$0xff] %v7140_v15  ;;  %9204 = vst [vmem:[#allocation82_spill] sm:$0xff] %v7158_v2  ;;  %v2415_v44 = vcombine.high %v6919_v47, %v7007_v53  ;;  %v2687_v6 = vcombine.high %v9208_v60, %v9207_v5  ;;  %v7264_v15 = vrot.slane %v3230_v52, %v6162_v22  ;;  %v9216_v2 = vld [vmem:[#allocation59_spill] sm:$0xff] }
 0x2a3   : > { %9185 = vst [vmem:[#allocation69_spill] sm:$0xff] %v7065_v61  ;;  %v7067_v46 = vpop.permute.xlu0 %1348  ;;  %v7084_v61 = vrot.slane %v3479_v21, %v6443_v58  ;;  %v7134_v21 = vrot.slane %v9199_v57, %v6443_v58  ;;  %9205 = vst [vmem:[#allocation83_spill] sm:$0xff] %v7161_v48  ;;  %v7285_v52 = vrot.slane %v2686_v20, %v6162_v22  ;;  %v9214_v20 = vld [vmem:[#allocation61_spill] sm:$0xff] }
 0x2a5   : > { %9188 = vst [vmem:[#allocation72_spill] sm:$0xff] %v7084_v61  ;;  %9200 = vst [vmem:[#allocation79_spill] sm:$0xff] %v7134_v21  ;;  %v9217_v21 = vld [vmem:[#allocation6_spill] sm:$0xff] }
 0x2a6   : > { %v7069_v37 = vpop.permute.xlu1 %1342  ;;  %v3910_v13 = vcombine.low %v9217_v21, %v9216_v2  ;;  %v9220_v61 = vld [vmem:[#allocation30_spill] sm:$0xff] }
 0x2a7   : > { %9186 = vst [vmem:[#allocation70_spill] sm:$0xff] %v7069_v37  ;;  %v7071_v54 = vpop.permute.xlu0 %1388  ;;  %v2647_v37 = vcombine.high %v6588_v32, %v6696_v34  ;;  %v7112_v34 = vrot.slane %v9193_v43, %v6443_v58  ;;  %v1870_v43 = vcombine.low %v6889_v31, %v6983_v7  ;;  %v3111_v1 = vcombine.high %v9221_v49, %v9220_v61 }
 0x2a8   : > { %9187 = vst [vmem:[#allocation71_spill] sm:$0xff] %v7071_v54  ;;  %v7089_v54 = vrot.slane %v3463_v11, %v6443_v58 }
 0x2a9   : > { %9194 = vst [vmem:[#allocation76_spill] sm:$0xff] %v7112_v34  ;;  %v7149_v59 = vrot.slane %v2647_v37, %v6443_v58  ;;  %v1871_v37 = vcombine.high %v6889_v31, %v6983_v7  ;;  %v2278_v7 = vcombine.low %v6911_v62, %v6999_v36  ;;  %v7200_v11 = vrot.slane %v1870_v43, %v6162_v22  ;;  %v9210_v34 = vld [vmem:[#allocation3_spill] sm:$0xff] }
 0x2aa   : > { %v7079_v10 = vpop.permute.xlu1 %1350  ;;  %9189 = vst [vmem:[#allocation73_spill] sm:$0xff] %v7089_v54  ;;  %v7219_v43 = vrot.slane %v3095_v9, %v6162_v22  ;;  %v3502_v9 = vcombine.low %v6909_v24, %v7013_v4  ;;  %v3638_v47 = vcombine.low %v9210_v34, %v9209_v35 }
 0x2ab   : > { %v7081_v42 = vpop.permute.xlu0 %1396  ;;  %9203 = vst [vmem:[#allocation81_spill] sm:$0xff] %v7149_v59  ;;  %v7203_v8 = vrot.slane %v1871_v37, %v6162_v22  ;;  %v2279_v37 = vcombine.high %v6911_v62, %v6999_v36  ;;  %v7224_v27 = vrot.slane %v2278_v7, %v6162_v22  ;;  %v3503_v36 = vcombine.high %v6909_v24, %v7013_v4  ;;  %v9206_v62 = vld [vmem:[#allocation10_spill] sm:$0xff]  ;;  %v9211_v4 = vld [vmem:[#allocation25_spill] sm:$0xff] }
 0x2ac   : > { %v1886_v7 = vcombine.low %v9206_v62, %v7031_v56  ;;  %v1887_v53 = vcombine.high %v9206_v62, %v7031_v56  ;;  %v3639_v24 = vcombine.high %v9210_v34, %v9209_v35  ;;  %v2822_v39 = vcombine.low %v9212_v18, %v9211_v4 }
 0x2ad   : > { %v7261_v5 = vrot.slane %v2279_v37, %v6162_v22  ;;  %v7267_v56 = vrot.slane %v3231_v40, %v6162_v22  ;;  %v7270_v34 = vrot.slane %v2414_v50, %v6162_v22  ;;  %v7273_v35 = vrot.slane %v2415_v44, %v6162_v22 }
 0x2ae   : > { %v7095_v23 = vpop.permute.xlu1 %1390  ;;  %v7276_v62 = vrot.slane %v3502_v9, %v6162_v22  ;;  %v7279_v60 = vrot.slane %v3503_v36, %v6162_v22  ;;  %v1894_v37 = vrot.slane %v1886_v7, %v6162_v22  ;;  %v7288_v40 = vrot.slane %v2687_v6, %v6162_v22 }
 0x2af   : > { %v7106_v32 = vpop.permute.xlu0 %1501  ;;  %v2823_v50 = vcombine.high %v9212_v18, %v9211_v4  ;;  %v1901_v44 = vrot.slane %v1887_v53, %v6162_v22  ;;  %v7296_v36 = vrot.slane %v3638_v47, %v6162_v22  ;;  %v7299_v7 = vrot.slane %v3639_v24, %v6162_v22  ;;  %v9218_v53 = vld [vmem:[#allocation60_spill] sm:$0xff] }
 0x2b0   : > { %v7302_v0 = vrot.slane %v2822_v39, %v6162_v22  ;;  %v2022_v6 = vcombine.low %v9215_v12, %v9214_v20  ;;  %v3911_v18 = vcombine.high %v9217_v21, %v9216_v2  ;;  %v9219_v4 = vld [vmem:[#allocation8_spill] sm:$0xff]  ;;  %v2023_v47 = vcombine.high %v9215_v12, %v9214_v20  ;;  %v9223_v12 = vld [vmem:[#allocation62_spill] sm:$0xff] }
 0x2b1   : > { %v4046_v33 = vcombine.low %v9219_v4, %v9218_v53  ;;  %v1934_v24 = vcombine.low %v7200_v11, %v1894_v37  ;;  %v4047_v39 = vcombine.high %v9219_v4, %v9218_v53  ;;  %v3110_v59 = vcombine.low %v9221_v49, %v9220_v61 }
 0x2b2   : > { %v7151_v17 = vpop.permute.xlu1 %1398  ;;  %9213 = vst [vmem:[#allocation10_spill] sm:$0xff] %v7302_v0  ;;  %v1935_v21 = vcombine.high %v7200_v11, %v1894_v37  ;;  %v1950_v2 = vcombine.low %v7203_v8, %v1901_v44  ;;  %v1951_v53 = vcombine.high %v7203_v8, %v1901_v44  ;;  %v2030_v4 = vrot.slane %v2022_v6, %v6162_v22 }
 0x2b3   : > { %v7169_v16 = vpop.permute.xlu0 %1509  ;;  %v7338_v11 = vrot.slane %v2823_v50, %v6162_v22  ;;  %v2037_v37 = vrot.slane %v2023_v47, %v6162_v22  ;;  %v2294_v20 = vcombine.low %v9224_v41, %v9223_v12  ;;  %v2295_v28 = vcombine.high %v9224_v41, %v9223_v12 }
 0x2b4   : > { %v7346_v8 = vrot.slane %v3910_v13, %v6162_v22  ;;  %v7349_v44 = vrot.slane %v3911_v18, %v6162_v22  ;;  %v3118_v6 = vrot.slane %v3110_v59, %v6162_v22  ;;  %v3125_v49 = vrot.slane %v3111_v1, %v6162_v22 }
 0x2b5   : > { %9222 = vst [vmem:[#allocation21_spill] sm:$0xff] %v7338_v11  ;;  %v7356_v47 = vrot.slane %v1934_v24, %v6443_v58  ;;  %v7359_v61 = vrot.slane %v1935_v21, %v6443_v58  ;;  %v7362_v41 = vrot.slane %v4046_v33, %v6162_v22  ;;  %v7365_v13 = vrot.slane %v4047_v39, %v6162_v22 }
 0x2b6   : > { %v7189_v45 = vpop.permute.xlu1 %1503  ;;  %v2070_v59 = vcombine.low %v7206_v19, %v2030_v4  ;;  %v2071_v1 = vcombine.high %v7206_v19, %v2030_v4  ;;  %v7372_v12 = vrot.slane %v1950_v2, %v6443_v58  ;;  %v7375_v24 = vrot.slane %v1951_v53, %v6443_v58  ;;  %v9231_v4 = vld [vmem:[#allocation63_spill] sm:$0xff]  ;;  %v9232_v2 = vld [vmem:[#allocation14_spill] sm:$0xff] }
 0x2b7   : > { %v7208_v31 = vpop.permute.xlu0 %1549  ;;  %9225 = vst [vmem:[#allocation5_spill] sm:$0xff] %v7356_v47  ;;  %9226 = vst [vmem:[#allocation24_spill] sm:$0xff] %v7359_v61  ;;  %v2086_v21 = vcombine.low %v7213_v3, %v2037_v37  ;;  %v2087_v33 = vcombine.high %v7213_v3, %v2037_v37  ;;  %v2302_v55 = vrot.slane %v2294_v20, %v6162_v22 }
 0x2b8   : > { %9227 = vst [vmem:[#allocation3_spill] sm:$0xff] %v7362_v41  ;;  %9228 = vst [vmem:[#allocation25_spill] sm:$0xff] %v7365_v13  ;;  %v2309_v39 = vrot.slane %v2295_v28, %v6162_v22  ;;  %v3158_v63 = vcombine.low %v7216_v38, %v3118_v6  ;;  %v3159_v26 = vcombine.high %v7216_v38, %v3118_v6  ;;  %v9233_v38 = vld [vmem:[#allocation16_spill] sm:$0xff] }
 0x2b9   : > { %9229 = vst [vmem:[#allocation9_spill] sm:$0xff] %v7372_v12  ;;  %9230 = vst [vmem:[#allocation61_spill] sm:$0xff] %v7375_v24  ;;  %v3174_v19 = vcombine.low %v7219_v43, %v3125_v49  ;;  %v3246_v30 = vcombine.low %v9232_v2, %v9231_v4  ;;  %v3175_v53 = vcombine.high %v7219_v43, %v3125_v49 }
 0x2ba   : > { %v7240_v57 = vpop.permute.xlu1 %1511  ;;  %v3247_v3 = vcombine.high %v9232_v2, %v9231_v4  ;;  %v2430_v6 = vcombine.low %v9233_v38, %v7051_v29  ;;  %v2431_v24 = vcombine.high %v9233_v38, %v7051_v29  ;;  %v7406_v4 = vrot.slane %v2070_v59, %v6443_v58 }
 0x2bb   : > { %v7250_v54 = vpop.permute.xlu0 %1557  ;;  %v7409_v2 = vrot.slane %v2071_v1, %v6443_v58  ;;  %v2342_v28 = vcombine.low %v7224_v27, %v2302_v55  ;;  %v2343_v20 = vcombine.high %v7224_v27, %v2302_v55  ;;  %v7414_v12 = vrot.slane %v2086_v21, %v6443_v58 }
 0x2bc   : > { %9234 = vst [vmem:[#allocation11_spill] sm:$0xff] %v7406_v4  ;;  %v7417_v29 = vrot.slane %v2087_v33, %v6443_v58  ;;  %v2358_v38 = vcombine.low %v7261_v5, %v2309_v39  ;;  %v3254_v49 = vrot.slane %v3246_v30, %v6162_v22  ;;  %v7424_v59 = vrot.slane %v3158_v63, %v6443_v58 }
 0x2bd   : > { %9235 = vst [vmem:[#allocation59_spill] sm:$0xff] %v7409_v2  ;;  %9236 = vst [vmem:[#allocation6_spill] sm:$0xff] %v7414_v12  ;;  %v7427_v1 = vrot.slane %v3159_v26, %v6443_v58  ;;  %v2359_v55 = vcombine.high %v7261_v5, %v2309_v39  ;;  %v3261_v27 = vrot.slane %v3247_v3, %v6162_v22  ;;  %v9244_v5 = vld [vmem:[#allocation64_spill] sm:$0xff] }
 0x2be   : > { %v7282_v48 = vpop.permute.xlu1 %1551  ;;  %9237 = vst [vmem:[#allocation60_spill] sm:$0xff] %v7417_v29  ;;  %9238 = vst [vmem:[#allocation8_spill] sm:$0xff] %v7424_v59  ;;  %v7434_v33 = vrot.slane %v3174_v19, %v6443_v58  ;;  %v7437_v2 = vrot.slane %v3175_v53, %v6443_v58  ;;  %v2438_v30 = vrot.slane %v2430_v6, %v6162_v22  ;;  %v9245_v39 = vld [vmem:[#allocation12_spill] sm:$0xff]  ;;  %v9246_v6 = vld [vmem:[#allocation17_spill] sm:$0xff] }
 0x2bf   : > { %v7293_v9 = vpop.permute.xlu0 %1654  ;;  %9239 = vst [vmem:[#allocation30_spill] sm:$0xff] %v7427_v1  ;;  %v2445_v63 = vrot.slane %v2431_v24, %v6162_v22  ;;  %v7442_v29 = vrot.slane %v2342_v28, %v6443_v58  ;;  %v7445_v26 = vrot.slane %v2343_v20, %v6443_v58  ;;  %v3518_v3 = vcombine.low %v9245_v39, %v9244_v5  ;;  %v9266_v59 = vld [vmem:[#allocation58_spill] sm:$0xff] }
 0x2c0   : > { %9240 = vst [vmem:[#allocation13_spill] sm:$0xff] %v7434_v33  ;;  %9241 = vst [vmem:[#allocation62_spill] sm:$0xff] %v7437_v2  ;;  %v3519_v19 = vcombine.high %v9245_v39, %v9244_v5  ;;  %v3294_v1 = vcombine.low %v7264_v15, %v3254_v49  ;;  %v3295_v53 = vcombine.high %v7264_v15, %v3254_v49 }
 0x2c1   : > { %9242 = vst [vmem:[#allocation15_spill] sm:$0xff] %v7442_v29  ;;  %9243 = vst [vmem:[#allocation63_spill] sm:$0xff] %v7445_v26  ;;  %v2702_v2 = vcombine.low %v9246_v6, %v7055_v25  ;;  %v2703_v24 = vcombine.high %v9246_v6, %v7055_v25  ;;  %v3310_v20 = vcombine.low %v7267_v56, %v3261_v27 }
 0x2c2   : > { %v7321_v14 = vpop.permute.xlu1 %1559  ;;  %v3311_v26 = vcombine.high %v7267_v56, %v3261_v27  ;;  %v7468_v15 = vrot.slane %v2358_v38, %v6443_v58  ;;  %v2478_v49 = vcombine.low %v7270_v34, %v2438_v30  ;;  %v2479_v25 = vcombine.high %v7270_v34, %v2438_v30 }
 0x2c3   : > { %v7329_v51 = vpop.permute.xlu0 %1662  ;;  %v2494_v6 = vcombine.low %v7273_v35, %v2445_v63  ;;  %v7474_v33 = vrot.slane %v2359_v55, %v6443_v58  ;;  %v2495_v56 = vcombine.high %v7273_v35, %v2445_v63  ;;  %v3526_v27 = vrot.slane %v3518_v3, %v6162_v22  ;;  %v9254_v63 = vld [vmem:[#allocation65_spill] sm:$0xff]  ;;  %v9255_v3 = vld [vmem:[#allocation18_spill] sm:$0xff] }
 0x2c4   : > { %9248 = vst [vmem:[#allocation16_spill] sm:$0xff] %v7468_v15  ;;  %v3533_v5 = vrot.slane %v3519_v19, %v6162_v22  ;;  %v7480_v29 = vrot.slane %v3294_v1, %v6443_v58  ;;  %v7483_v38 = vrot.slane %v3295_v53, %v6443_v58  ;;  %v2710_v15 = vrot.slane %v2702_v2, %v6162_v22 }
 0x2c5   : > { %9249 = vst [vmem:[#allocation64_spill] sm:$0xff] %v7474_v33  ;;  %v2717_v34 = vrot.slane %v2703_v24, %v6162_v22  ;;  %v7490_v55 = vrot.slane %v3310_v20, %v6443_v58  ;;  %v7493_v35 = vrot.slane %v3311_v26, %v6443_v58  ;;  %v3654_v19 = vcombine.low %v9255_v3, %v9254_v63  ;;  %v9260_v26 = vld [vmem:[#allocation57_spill] sm:$0xff] }
 0x2c6   : > { %v7353_v50 = vpop.permute.xlu1 %1656  ;;  %9250 = vst [vmem:[#allocation12_spill] sm:$0xff] %v7480_v29  ;;  %9251 = vst [vmem:[#allocation17_spill] sm:$0xff] %v7483_v38  ;;  %v3655_v1 = vcombine.high %v9255_v3, %v9254_v63  ;;  %v7502_v2 = vrot.slane %v2478_v49, %v6443_v58  ;;  %v7505_v24 = vrot.slane %v2479_v25, %v6443_v58  ;;  %v9259_v38 = vld [vmem:[#allocation67_spill] sm:$0xff] }
 0x2c7   : > { %v7367_v18 = vpop.permute.xlu0 %1702  ;;  %9252 = vst [vmem:[#allocation84_spill] sm:$0xff] %v7490_v55  ;;  %9253 = vst [vmem:[#allocation85_spill] sm:$0xff] %v7493_v35  ;;  %v7508_v20 = vrot.slane %v2494_v6, %v6443_v58  ;;  %v3926_v35 = vcombine.low %v9260_v26, %v9259_v38  ;;  %v7513_v33 = vrot.slane %v2495_v56, %v6443_v58  ;;  %v9263_v6 = vld [vmem:[#allocation56_spill] sm:$0xff] }
 0x2c8   : > { %9256 = vst [vmem:[#allocation65_spill] sm:$0xff] %v7502_v2  ;;  %9257 = vst [vmem:[#allocation18_spill] sm:$0xff] %v7505_v24  ;;  %v3566_v55 = vcombine.low %v7276_v62, %v3526_v27  ;;  %v3567_v63 = vcombine.high %v7276_v62, %v3526_v27  ;;  %v3927_v49 = vcombine.high %v9260_v26, %v9259_v38  ;;  %v9262_v24 = vld [vmem:[#allocation66_spill] sm:$0xff]  ;;  %v9265_v26 = vld [vmem:[#allocation69_spill] sm:$0xff] }
 0x2c9   : > { %9258 = vst [vmem:[#allocation86_spill] sm:$0xff] %v7508_v20  ;;  %9261 = vst [vmem:[#allocation67_spill] sm:$0xff] %v7513_v33  ;;  %v3582_v3 = vcombine.low %v7279_v60, %v3533_v5  ;;  %v3583_v25 = vcombine.high %v7279_v60, %v3533_v5  ;;  %v2838_v20 = vcombine.low %v9263_v6, %v9262_v24 }
 0x2ca   : > { %v7386_v61 = vpop.permute.xlu1 %1664  ;;  %v2839_v2 = vcombine.high %v9263_v6, %v9262_v24  ;;  %v2750_v56 = vcombine.low %v7285_v52, %v2710_v15  ;;  %v2751_v33 = vcombine.high %v7285_v52, %v2710_v15  ;;  %v3662_v62 = vrot.slane %v3654_v19, %v6162_v22 }
 0x2cb   : > { %v7395_v37 = vpop.permute.xlu0 %1710  ;;  %v3669_v27 = vrot.slane %v3655_v1, %v6162_v22  ;;  %v2766_v60 = vcombine.low %v7288_v40, %v2717_v34  ;;  %v3934_v5 = vrot.slane %v3926_v35, %v6162_v22  ;;  %v4063_v24 = vcombine.high %v9266_v59, %v9265_v26 }
 0x2cc   : > { %v7540_v6 = vrot.slane %v3566_v55, %v6443_v58  ;;  %v7543_v52 = vrot.slane %v3567_v63, %v6443_v58  ;;  %v2767_v15 = vcombine.high %v7288_v40, %v2717_v34  ;;  %v3941_v19 = vrot.slane %v3927_v49, %v6162_v22 }
 0x2cd   : > { %v7548_v1 = vrot.slane %v3582_v3, %v6443_v58  ;;  %v7551_v35 = vrot.slane %v3583_v25, %v6443_v58  ;;  %v3702_v63 = vcombine.low %v7296_v36, %v3662_v62  ;;  %v3703_v40 = vcombine.high %v7296_v36, %v3662_v62 }
 0x2ce   : > { %v7421_v43 = vpop.permute.xlu1 %1704  ;;  %9267 = vst [vmem:[#allocation66_spill] sm:$0xff] %v7540_v6  ;;  %9268 = vst [vmem:[#allocation56_spill] sm:$0xff] %v7543_v52  ;;  %v3718_v34 = vcombine.low %v7299_v7, %v3669_v27  ;;  %v3719_v49 = vcombine.high %v7299_v7, %v3669_v27  ;;  %v3974_v25 = vcombine.low %v7346_v8, %v3934_v5 }
 0x2cf   : > { %v7431_v21 = vpop.permute.xlu0 %1344  ;;  %9269 = vst [vmem:[#allocation69_spill] sm:$0xff] %v7548_v1  ;;  %9270 = vst [vmem:[#allocation58_spill] sm:$0xff] %v7551_v35  ;;  %v7576_v52 = vrot.slane %v2750_v56, %v6443_v58  ;;  %v7579_v36 = vrot.slane %v2751_v33, %v6443_v58  ;;  %v7582_v7 = vrot.slane %v2766_v60, %v6443_v58  ;;  %v9354_v1 = vld [vmem:[#allocation38_spill] sm:$0xff] }
 0x2d0   : > { %v3990_v62 = vcombine.low %v7349_v44, %v3941_v19  ;;  %v7586_v27 = vrot.slane %v2767_v15, %v6443_v58  ;;  %v3991_v56 = vcombine.high %v7349_v44, %v3941_v19  ;;  %v7596_v33 = vrot.slane %v3702_v63, %v6443_v58  ;;  %v9288_v63 = vld [vmem:[#allocation71_spill] sm:$0xff] }
 0x2d1   : > { %9275 = vst [vmem:[#allocation91_spill] sm:$0xff] %v7576_v52  ;;  %9276 = vst [vmem:[#allocation92_spill] sm:$0xff] %v7579_v36  ;;  %v7599_v60 = vrot.slane %v3703_v40, %v6443_v58  ;;  %v7605_v15 = vrot.slane %v3719_v49, %v6443_v58 }
 0x2d2   : > { %v7457_v28 = vpop.permute.xlu1 %1712  ;;  %9277 = vst [vmem:[#allocation93_spill] sm:$0xff] %v7586_v27  ;;  %9278 = vst [vmem:[#allocation94_spill] sm:$0xff] %v7596_v33  ;;  %v7620_v40 = vrot.slane %v3990_v62, %v6443_v58  ;;  %v2039_v62 = vcombine.high %v9288_v63, %v7081_v42 }
 0x2d3   : > { %9247 = vst [vmem:[#allocation14_spill] sm:$0xff] %v7457_v28  ;;  %v7465_v39 = vpop.permute.xlu0 %1392  ;;  %v4062_v28 = vcombine.low %v9266_v59, %v9265_v26  ;;  %v7557_v59 = vrot.slane %v2839_v2, %v6162_v22  ;;  %v7573_v2 = vrot.slane %v4063_v24, %v6162_v22  ;;  %9279 = vst [vmem:[#allocation95_spill] sm:$0xff] %v7599_v60 }
 0x2d4   : > { %v7602_v24 = vrot.slane %v3718_v34, %v6443_v58  ;;  %9281 = vst [vmem:[#allocation97_spill] sm:$0xff] %v7605_v15  ;;  %9284 = vst [vmem:[#allocation100_spill] sm:$0xff] %v7620_v40  ;;  %v9285_v34 = vld [vmem:[#allocation68_spill] sm:$0xff] }
 0x2d5   : > { %9272 = vst [vmem:[#allocation88_spill] sm:$0xff] %v7557_v59  ;;  %v7570_v26 = vrot.slane %v4062_v28, %v6162_v22  ;;  %9274 = vst [vmem:[#allocation90_spill] sm:$0xff] %v7573_v2  ;;  %v2902_v28 = vcombine.low %v7338_v11, %v7557_v59  ;;  %v7610_v11 = vrot.slane %v3974_v25, %v6443_v58  ;;  %v9286_v25 = vld [vmem:[#allocation70_spill] sm:$0xff] }
 0x2d6   : > { %v7487_v30 = vpop.permute.xlu1 %1346  ;;  %9280 = vst [vmem:[#allocation96_spill] sm:$0xff] %v7602_v24  ;;  %v1902_v49 = vcombine.low %v9285_v34, %v7067_v46  ;;  %v1903_v59 = vcombine.high %v9285_v34, %v7067_v46  ;;  %v3127_v19 = vcombine.high %v9286_v25, %v7079_v10  ;;  %v3262_v46 = vcombine.low %v7095_v23, %v7151_v17 }
 0x2d7   : > { %v7499_v53 = vpop.permute.xlu0 %1505  ;;  %9273 = vst [vmem:[#allocation89_spill] sm:$0xff] %v7570_v26  ;;  %9282 = vst [vmem:[#allocation98_spill] sm:$0xff] %v7610_v11  ;;  %v2038_v26 = vcombine.low %v9288_v63, %v7081_v42  ;;  %v3263_v34 = vcombine.high %v7095_v23, %v7151_v17  ;;  %v3534_v2 = vcombine.low %v7189_v45, %v7240_v57 }
 0x2d8   : > { %v3535_v42 = vcombine.high %v7189_v45, %v7240_v57  ;;  %v7654_v0 = vrot.slane %v1902_v49, %v6162_v22  ;;  %v7657_v23 = vrot.slane %v1903_v59, %v6162_v22  ;;  %v7678_v59 = vrot.slane %v2039_v62, %v6162_v22 }
 0x2d9   : > { %v7669_v57 = vrot.slane %v2038_v26, %v6162_v22 }
 0x2da   : > { %v7525_v29 = vpop.permute.xlu1 %1394  ;;  %v9309_v27 = vld [vmem:[#allocation14_spill] sm:$0xff] }
 0x2db   : > { %v7531_v38 = vpop.permute.xlu0 %1553  ;;  %v9310_v40 = vcombine.low %v7421_v43, %v9309_v27 }
 0x2dc   : > { %9264 = vst [vmem:[#allocation57_spill] sm:$0xff] %v7531_v38  ;;  %v7554_v38 = vrot.slane %v2838_v20, %v6162_v22  ;;  %v3975_v20 = vcombine.high %v7346_v8, %v3934_v5 }
 0x2dd   : > { %v7818_v11 = vrot.slane %v9310_v40, %v6162_v22 }
 0x2de   : > { %9271 = vst [vmem:[#allocation87_spill] sm:$0xff] %v7554_v38  ;;  %v7559_v55 = vpop.permute.xlu1 %1507  ;;  %v7613_v44 = vrot.slane %v3975_v20, %v6443_v58  ;;  %v3126_v38 = vcombine.low %v9286_v25, %v7079_v10  ;;  %v7629_v20 = vrot.slane %v3991_v56, %v6443_v58  ;;  %v2310_v56 = vcombine.low %v7106_v32, %v7169_v16 }
 0x2df   : > { %v7565_v3 = vpop.permute.xlu0 %1658  ;;  %v2311_v10 = vcombine.high %v7106_v32, %v7169_v16  ;;  %v7663_v32 = vrot.slane %v2902_v28, %v6443_v58  ;;  %v7666_v16 = vrot.slane %v3127_v19, %v6162_v22  ;;  %v7684_v28 = vrot.slane %v3263_v34, %v6162_v22  ;;  %9311 = vst [vmem:[#allocation14_spill] sm:$0xff] %v7818_v11 }
 0x2e0   : > { %9283 = vst [vmem:[#allocation99_spill] sm:$0xff] %v7613_v44  ;;  %9287 = vst [vmem:[#allocation68_spill] sm:$0xff] %v7629_v20  ;;  %v7660_v17 = vrot.slane %v3126_v38, %v6162_v22  ;;  %v7681_v38 = vrot.slane %v3262_v46, %v6162_v22  ;;  %v7687_v19 = vrot.slane %v2310_v56, %v6162_v22 }
 0x2e1   : > { %9290 = vst [vmem:[#allocation71_spill] sm:$0xff] %v7663_v32  ;;  %v9292_v46 = vcombine.low %v7208_v31, %v7250_v54  ;;  %v9293_v56 = vcombine.high %v7208_v31, %v7250_v54  ;;  %v9294_v32 = vcombine.low %v7282_v48, %v7321_v14 }
 0x2e2   : > { %v7593_v5 = vpop.permute.xlu1 %1555 }
 0x2e3   : > { %v7607_v8 = vpop.permute.xlu0 %1706  ;;  %v7704_v34 = vrot.slane %v9292_v46, %v6162_v22  ;;  %v7718_v44 = vrot.slane %v9294_v32, %v6162_v22  ;;  %v9295_v46 = vcombine.high %v7282_v48, %v7321_v14  ;;  %v9297_v14 = vcombine.low %v7293_v9, %v7329_v51 }
 0x2e5   : > { %v7724_v20 = vrot.slane %v9295_v46, %v6162_v22  ;;  %v7742_v48 = vrot.slane %v9297_v14, %v6162_v22 }
 0x2e6   : > { %v7637_v41 = vpop.permute.xlu1 %1660 }
 0x2e7   : > { %9289 = vst [vmem:[#allocation70_spill] sm:$0xff] %v7637_v41  ;;  %v1353_v25 = vpop.permute.xlu0 %1352 }
 0x2e8   : > { %v1918_v63 = vcombine.low %v7431_v21, %v1353_v25  ;;  %v1919_v13 = vcombine.high %v7431_v21, %v1353_v25  ;;  %v7690_v25 = vrot.slane %v2311_v10, %v6162_v22  ;;  %v7710_v10 = vrot.slane %v9293_v56, %v6162_v22 }
 0x2ea   : > { %v7672_v45 = vrot.slane %v1918_v63, %v6162_v22  ;;  %v1933_v21 = vrot.slane %v1919_v13, %v6162_v22  ;;  %v7675_v49 = vpop.permute.xlu1 %1708  ;;  %v7693_v13 = vrot.slane %v3534_v2, %v6162_v22  ;;  %v7696_v63 = vrot.slane %v3535_v42, %v6162_v22 }
 0x2eb   : > { %9291 = vst [vmem:[#allocation101_spill] sm:$0xff] %v7675_v49  ;;  %v1401_v26 = vpop.permute.xlu0 %1400  ;;  %v9320_v49 = vld [vmem:[#allocation57_spill] sm:$0xff] }
 0x2ec   : > { %v1966_v62 = vcombine.low %v7654_v0, %v7672_v45  ;;  %v2054_v2 = vcombine.low %v7465_v39, %v1401_v26  ;;  %v2055_v42 = vcombine.high %v7465_v39, %v1401_v26  ;;  %v1982_v31 = vcombine.low %v7657_v23, %v1933_v21 }
 0x2ed   : > { %v1967_v4 = vcombine.high %v7654_v0, %v7672_v45 }
 0x2ee   : > { %v7727_v54 = vrot.slane %v1966_v62, %v6443_v58  ;;  %v1355_v56 = vpop.permute.xlu1 %1354  ;;  %v7731_v39 = vrot.slane %v2054_v2, %v6162_v22  ;;  %v7734_v26 = vrot.slane %v2055_v42, %v6162_v22  ;;  %v9298_v42 = vcombine.high %v7293_v9, %v7329_v51 }
 0x2ef   : > { %v3142_v32 = vcombine.low %v7487_v30, %v1355_v56  ;;  %v3143_v60 = vcombine.high %v7487_v30, %v1355_v56  ;;  %v1514_v15 = vpop.permute.xlu0 %1513  ;;  %v9299_v30 = vcombine.low %v7353_v50, %v7386_v61 }
 0x2f0   : > { %9296 = vst [vmem:[#allocation102_spill] sm:$0xff] %v7727_v54  ;;  %v2326_v2 = vcombine.low %v7499_v53, %v1514_v15  ;;  %v2327_v46 = vcombine.high %v7499_v53, %v1514_v15  ;;  %v7752_v35 = vrot.slane %v9298_v42, %v6162_v22  ;;  %v2102_v14 = vcombine.low %v7669_v57, %v7731_v39 }
 0x2f1   : > { %v7758_v56 = vrot.slane %v9299_v30, %v6162_v22  ;;  %v2118_v62 = vcombine.low %v7678_v59, %v7734_v26  ;;  %v7765_v53 = vrot.slane %v1982_v31, %v6443_v58  ;;  %v7768_v15 = vrot.slane %v3142_v32, %v6162_v22 }
 0x2f2   : > { %v7771_v51 = vrot.slane %v3143_v60, %v6162_v22  ;;  %v7774_v9 = vrot.slane %v2326_v2, %v6162_v22  ;;  %v1983_v42 = vcombine.high %v7657_v23, %v1933_v21  ;;  %v7778_v30 = vrot.slane %v2102_v14, %v6443_v58 }
 0x2f3   : > { %9300 = vst [vmem:[#allocation103_spill] sm:$0xff] %v7758_v56  ;;  %9301 = vst [vmem:[#allocation104_spill] sm:$0xff] %v7765_v53  ;;  %v7781_v36 = vrot.slane %v2118_v62, %v6443_v58  ;;  %v7784_v31 = vrot.slane %v2327_v46, %v6162_v22  ;;  %v9304_v32 = vcombine.high %v7353_v50, %v7386_v61  ;;  %v9314_v61 = vld [vmem:[#allocation9_spill] sm:$0xff] }
 0x2f4   : > { %9302 = vst [vmem:[#allocation105_spill] sm:$0xff] %v7778_v30  ;;  %v9306_v2 = vcombine.low %v7367_v18, %v7395_v37  ;;  %v3190_v21 = vcombine.low %v7660_v17, %v7768_v15  ;;  %v3206_v62 = vcombine.low %v7666_v16, %v7771_v51  ;;  %v9307_v46 = vcombine.high %v7367_v18, %v7395_v37 }
 0x2f5   : > { %9303 = vst [vmem:[#allocation106_spill] sm:$0xff] %v7781_v36  ;;  %v7790_v60 = vrot.slane %v9304_v32, %v6162_v22  ;;  %v2374_v32 = vcombine.low %v7687_v19, %v7774_v9  ;;  %v2003_v50 = vcombine.high %v9314_v61, %v7765_v53  ;;  %v7831_v30 = vrot.slane %v1983_v42, %v6443_v58 }
 0x2f6   : > { %v7796_v23 = vrot.slane %v9306_v2, %v6162_v22  ;;  %v7806_v14 = vrot.slane %v9307_v46, %v6162_v22  ;;  %v1403_v2 = vpop.permute.xlu1 %1402  ;;  %v7821_v18 = vrot.slane %v3190_v21, %v6443_v58  ;;  %v7824_v37 = vrot.slane %v3206_v62, %v6443_v58  ;;  %v1562_v46 = vpop.permute.xlu0 %1561 }
 0x2f7   : > { %9305 = vst [vmem:[#allocation107_spill] sm:$0xff] %v7790_v60  ;;  %v7834_v60 = vrot.slane %v2374_v32, %v6443_v58  ;;  %v2390_v40 = vcombine.low %v7690_v25, %v7784_v31  ;;  %v3278_v12 = vcombine.low %v7525_v29, %v1403_v2  ;;  %v3279_v36 = vcombine.high %v7525_v29, %v1403_v2  ;;  %v9321_v29 = vld [vmem:[#allocation19_spill] sm:$0xff]  ;;  %v9322_v2 = vld [vmem:[#allocation28_spill] sm:$0xff] }
 0x2f8   : > { %9308 = vst [vmem:[#allocation108_spill] sm:$0xff] %v7806_v14  ;;  %9312 = vst [vmem:[#allocation109_spill] sm:$0xff] %v7821_v18  ;;  %v2103_v0 = vcombine.high %v7669_v57, %v7731_v39  ;;  %v2462_v41 = vcombine.low %v9320_v49, %v1562_v46  ;;  %v2463_v21 = vcombine.high %v9320_v49, %v1562_v46  ;;  %v9339_v39 = vld [vmem:[#allocation36_spill] sm:$0xff] }
 0x2f9   : > { %9313 = vst [vmem:[#allocation110_spill] sm:$0xff] %v7824_v37  ;;  %9315 = vst [vmem:[#allocation111_spill] sm:$0xff] %v7834_v60  ;;  %v7847_v45 = vrot.slane %v2390_v40, %v6443_v58  ;;  %v7853_v62 = vrot.slane %v3278_v12, %v6162_v22  ;;  %v7856_v56 = vrot.slane %v3279_v36, %v6162_v22  ;;  %v9325_v12 = vld [vmem:[#allocation61_spill] sm:$0xff] }
 0x2fa   : > { %v9323_v18 = vcombine.high %v9321_v29, %v9322_v2  ;;  %v7865_v11 = vrot.slane %v2462_v41, %v6162_v22  ;;  %v2004_v42 = vcombine.low %v9325_v12, %v7831_v30  ;;  %v1516_v36 = vpop.permute.xlu1 %1515  ;;  %v9326_v49 = vcombine.high %v7421_v43, %v9309_v27  ;;  %v1667_v61 = vpop.permute.xlu0 %1666 }
 0x2fb   : > { %9318 = vst [vmem:[#allocation112_spill] sm:$0xff] %v7847_v45  ;;  %v3326_v41 = vcombine.low %v7681_v38, %v7853_v62  ;;  %v7886_v40 = vrot.slane %v2463_v21, %v6162_v22  ;;  %v7896_v29 = vrot.slane %v2103_v0, %v6443_v58  ;;  %v2119_v53 = vcombine.high %v7678_v59, %v7734_v26 }
 0x2fc   : > { %v5488_v57 = vpack.i.bf16 %v2003_v50, %v9323_v18  ;;  %v7875_v46 = vrot.slane %v9326_v49, %v6162_v22  ;;  %v7878_v50 = vrot.slane %v1967_v4, %v6443_v58  ;;  %v3342_v18 = vcombine.low %v7684_v28, %v7856_v56  ;;  %v9327_v4 = vld [vmem:[#allocation20_spill] sm:$0xff]  ;;  %v9328_v49 = vld [vmem:[#allocation29_spill] sm:$0xff] }
 0x2fd   : > { %v2510_v43 = vcombine.low %v7704_v34, %v7865_v11  ;;  %v9329_v32 = vcombine.low %v9327_v4, %v9328_v49  ;;  %v3191_v27 = vcombine.high %v7660_v17, %v7768_v15  ;;  %v2526_v0 = vcombine.low %v7710_v10, %v7886_v40 }
 0x2fe   : > { %5489 = vrot.lane.b32.xlu0 %v5488_v57, %s5777_s30  ;;  %v7901_v57 = vrot.slane %v3326_v41, %v6443_v58  ;;  %v7904_v21 = vrot.slane %v3342_v18, %v6443_v58  ;;  %v3550_v17 = vcombine.low %v7559_v55, %v1516_v36  ;;  %v3551_v15 = vcombine.high %v7559_v55, %v1516_v36  ;;  %v1564_v45 = vpop.permute.xlu1 %1563 }
 0x2ff   : > { %v5498_v2 = vpack.i.bf16 %v2004_v42, %v9329_v32  ;;  %v7909_v60 = vrot.slane %v2510_v43, %v6443_v58  ;;  %v9334_v32 = vld [vmem:[#allocation84_spill] sm:$0xff]  ;;  %v3207_v18 = vcombine.high %v7666_v16, %v7771_v51  ;;  %v7925_v43 = vrot.slane %v2526_v0, %v6443_v58  ;;  %v9337_v0 = vld [vmem:[#allocation86_spill] sm:$0xff] }
 0x300   : > { %9330 = vst [vmem:[#allocation57_spill] sm:$0xff] %v7901_v57  ;;  %9331 = vst [vmem:[#allocation61_spill] sm:$0xff] %v7904_v21  ;;  %v7931_v26 = vrot.slane %v3550_v17, %v6162_v22  ;;  %v7934_v41 = vrot.slane %v3551_v15, %v6162_v22  ;;  %v2735_v55 = vcombine.high %v7565_v3, %v1667_v61 }
 0x301   : > { %9332 = vst [vmem:[#allocation20_spill] sm:$0xff] %v7909_v60  ;;  %5499 = vrot.lane.b32.xlu1 %v5498_v2, %s5778_s7  ;;  %9335 = vst [vmem:[#allocation29_spill] sm:$0xff] %v7925_v43  ;;  %v2734_v2 = vcombine.low %v7565_v3, %v1667_v61  ;;  %v1999_v16 = vcombine.high %v7356_v47, %v7727_v54  ;;  %v7940_v51 = vrot.slane %v2119_v53, %v6443_v58 }
 0x302   : > { %v2375_v36 = vcombine.high %v7687_v19, %v7774_v9  ;;  %v3598_v15 = vcombine.low %v7693_v13, %v7931_v26  ;;  %v3614_v3 = vcombine.low %v7696_v63, %v7934_v41  ;;  %v2005_v61 = vcombine.high %v9325_v12, %v7831_v30 }
 0x303   : > { %v7947_v17 = vrot.slane %v2734_v2, %v6162_v22  ;;  %v3686_v53 = vcombine.low %v7593_v5, %v1564_v45  ;;  %v7957_v54 = vrot.slane %v2735_v55, %v6162_v22  ;;  %v9338_v2 = vld [vmem:[#allocation22_spill] sm:$0xff]  ;;  %v7967_v57 = vrot.slane %v3191_v27, %v6443_v58 }
 0x304   : > { %v9340_v47 = vcombine.high %v9338_v2, %v9339_v39  ;;  %v7970_v30 = vrot.slane %v3207_v18, %v6443_v58  ;;  %v7973_v12 = vrot.slane %v3598_v15, %v6443_v58  ;;  %v7976_v55 = vrot.slane %v3614_v3, %v6443_v58  ;;  %v1715_v18 = vpop.permute.xlu0 %1714  ;;  %v1669_v39 = vpop.permute.xlu1 %1668 }
 0x305   : > { %v2782_v19 = vcombine.low %v7742_v48, %v7947_v17  ;;  %v2391_v42 = vcombine.high %v7690_v25, %v7784_v31  ;;  %v9344_v25 = vcombine.high %v9327_v4, %v9328_v49  ;;  %v3687_v3 = vcombine.high %v7593_v5, %v1564_v45  ;;  %v9350_v49 = vld [vmem:[#allocation23_spill] sm:$0xff] }
 0x306   : > { %v5493_v59 = vpack.i.bf16 %v1999_v16, %v9340_v47  ;;  %9341 = vst [vmem:[#allocation113_spill] sm:$0xff] %v7973_v12  ;;  %9342 = vst [vmem:[#allocation114_spill] sm:$0xff] %v7976_v55  ;;  %v2798_v47 = vcombine.low %v7752_v35, %v7957_v54  ;;  %v8004_v16 = vrot.slane %v3686_v53, %v6162_v22  ;;  %v9351_v53 = vld [vmem:[#allocation37_spill] sm:$0xff]  ;;  %v9353_v12 = vld [vmem:[#allocation26_spill] sm:$0xff] }
 0x307   : > { %v7981_v9 = vrot.slane %v2782_v19, %v6443_v58  ;;  %v5508_v31 = vpack.i.bf16 %v2005_v61, %v9344_v25  ;;  %v3327_v19 = vcombine.high %v7681_v38, %v7853_v62  ;;  %v8008_v4 = vrot.slane %v3687_v3, %v6162_v22  ;;  %v9346_v62 = vld [vmem:[#allocation24_spill] sm:$0xff] }
 0x308   : > { %5494 = vrot.lane.b32.xlu0 %v5493_v59, %s5777_s30  ;;  %v7999_v27 = vrot.slane %v2798_v47, %v6443_v58  ;;  %v2870_v5 = vcombine.low %v7607_v8, %v1715_v18  ;;  %v2871_v38 = vcombine.high %v7607_v8, %v1715_v18  ;;  %v2000_v45 = vcombine.low %v9346_v62, %v7878_v50  ;;  %v9347_v47 = vld [vmem:[#allocation60_spill] sm:$0xff] }
 0x309   : > { %9343 = vst [vmem:[#allocation115_spill] sm:$0xff] %v7981_v9  ;;  %5509 = vrot.lane.b32.xlu1 %v5508_v31, %s5779_s8  ;;  %v3734_v61 = vcombine.low %v7718_v44, %v8004_v16  ;;  %v2140_v25 = vcombine.low %v9347_v47, %v7940_v51  ;;  %v3750_v31 = vcombine.low %v7724_v20, %v8008_v4 }
 0x30a   : > { %9345 = vst [vmem:[#allocation116_spill] sm:$0xff] %v7999_v27  ;;  %v8027_v18 = vrot.slane %v2870_v5, %v6162_v22  ;;  %v8030_v3 = vrot.slane %v2871_v38, %v6162_v22  ;;  %v3343_v15 = vcombine.high %v7684_v28, %v7856_v56  ;;  %v9352_v2 = vcombine.low %v9350_v49, %v9351_v53 }
 0x30b   : > { %v8035_v59 = vrot.slane %v3734_v61, %v6443_v58  ;;  %v9355_v55 = vcombine.low %v9353_v12, %v9354_v1  ;;  %v8044_v5 = vrot.slane %v2375_v36, %v6443_v58  ;;  %v8047_v38 = vrot.slane %v3750_v31, %v6443_v58  ;;  %v1717_v36 = vpop.permute.xlu1 %1716  ;;  %v9357_v61 = vld [vmem:[#allocation70_spill] sm:$0xff] }
 0x30c   : > { %9348 = vst [vmem:[#allocation24_spill] sm:$0xff] %v8030_v3  ;;  %v5503_v6 = vpack.i.bf16 %v2000_v45, %v9352_v2  ;;  %v2934_v2 = vcombine.low %v7806_v14, %v8030_v3  ;;  %v8062_v45 = vrot.slane %v2391_v42, %v6443_v58  ;;  %v3958_v56 = vcombine.low %v9357_v61, %v1669_v39  ;;  %v9358_v3 = vld [vmem:[#allocation101_spill] sm:$0xff] }
 0x30d   : > { %9349 = vst [vmem:[#allocation60_spill] sm:$0xff] %v8035_v59  ;;  %v5528_v8 = vpack.i.bf16 %v9355_v55, %v2140_v25  ;;  %9356 = vst [vmem:[#allocation23_spill] sm:$0xff] %v8047_v38  ;;  %v8065_v25 = vrot.slane %v3327_v19, %v6443_v58  ;;  %v8071_v28 = vrot.slane %v3343_v15, %v6443_v58 }
 0x30e   : > { %5504 = vrot.lane.b32.xlu0 %v5503_v6, %s5778_s7  ;;  %v3599_v6 = vcombine.high %v7693_v13, %v7931_v26  ;;  %v2001_v42 = vcombine.high %v9346_v62, %v7878_v50  ;;  %v3966_v55 = vrot.slane %v3958_v56, %v6162_v22  ;;  %v2141_v19 = vcombine.high %v9347_v47, %v7940_v51  ;;  %v9360_v26 = vld [vmem:[#allocation106_spill] sm:$0xff]  ;;  %v9362_v50 = vld [vmem:[#allocation13_spill] sm:$0xff]  ;;  %v9363_v56 = vld [vmem:[#allocation103_spill] sm:$0xff] }
 0x30f   : > { %5529 = vrot.lane.b32.xlu1 %v5528_v8, %s5778_s7  ;;  %v3959_v8 = vcombine.high %v9357_v61, %v1669_v39  ;;  %v4094_v31 = vcombine.low %v9358_v3, %v1717_v36  ;;  %v4095_v14 = vcombine.high %v9358_v3, %v1717_v36  ;;  %v9359_v33 = vcombine.high %v9350_v49, %v9351_v53  ;;  %v9361_v39 = vld [vmem:[#allocation6_spill] sm:$0xff]  ;;  %v9366_v49 = vld [vmem:[#allocation107_spill] sm:$0xff] }
 0x310   : > { %v2139_v61 = vcombine.high %v9361_v39, %v9360_v26  ;;  %v3227_v62 = vcombine.high %v9362_v50, %v7824_v37  ;;  %v4006_v59 = vcombine.low %v9363_v56, %v3966_v55  ;;  %v4007_v51 = vcombine.high %v9363_v56, %v3966_v55  ;;  %v9393_v50 = vld [vmem:[#allocation34_spill] sm:$0xff] }
 0x311   : > { %v3973_v15 = vrot.slane %v3959_v8, %v6162_v22  ;;  %v5513_v13 = vpack.i.bf16 %v2001_v42, %v9359_v33  ;;  %v9364_v47 = vcombine.high %v9353_v12, %v9354_v1  ;;  %v8097_v36 = vrot.slane %v4094_v31, %v6162_v22 }
 0x312   : > { %v3615_v33 = vcombine.high %v7696_v63, %v7934_v41  ;;  %v8105_v42 = vrot.slane %v4095_v14, %v6162_v22  ;;  %v9368_v1 = vcombine.high %v7704_v34, %v7865_v11  ;;  %v8114_v55 = vrot.slane %v4006_v59, %v6443_v58  ;;  %v9370_v63 = vld [vmem:[#allocation14_spill] sm:$0xff]  ;;  %v9372_v34 = vld [vmem:[#allocation27_spill] sm:$0xff] }
 0x313   : > { %v5538_v3 = vpack.i.bf16 %v9364_v47, %v2141_v19  ;;  %9365 = vst [vmem:[#allocation37_spill] sm:$0xff] %v8097_v36  ;;  %v4022_v53 = vcombine.low %v9366_v49, %v3973_v15  ;;  %v4023_v8 = vcombine.high %v9366_v49, %v3973_v15  ;;  %5514 = vrot.lane.b32.xlu0 %v5513_v13, %s5779_s8  ;;  %v9373_v59 = vld [vmem:[#allocation39_spill] sm:$0xff] }
 0x314   : > { %9367 = vst [vmem:[#allocation26_spill] sm:$0xff] %v8105_v42  ;;  %v8111_v12 = vrot.slane %v9368_v1, %v6443_v58  ;;  %9369 = vst [vmem:[#allocation38_spill] sm:$0xff] %v8114_v55  ;;  %v4142_v41 = vcombine.low %v9370_v63, %v8097_v36  ;;  %v4158_v14 = vcombine.low %v7875_v46, %v8105_v42  ;;  %v9378_v1 = vld [vmem:[#allocation42_spill] sm:$0xff]  ;;  %v9409_v36 = vld [vmem:[#allocation45_spill] sm:$0xff] }
 0x315   : > { %5539 = vrot.lane.b32.xlu1 %v5538_v3, %s5779_s8  ;;  %v8122_v22 = vrot.slane %v4022_v53, %v6443_v58  ;;  %v9374_v19 = vcombine.high %v9372_v34, %v9373_v59  ;;  %v9375_v13 = vcombine.high %v7710_v10, %v7886_v40  ;;  %v8136_v47 = vrot.slane %v3599_v6, %v6443_v58  ;;  %v9376_v3 = vld [vmem:[#allocation98_spill] sm:$0xff]  ;;  %v9377_v53 = vld [vmem:[#allocation31_spill] sm:$0xff]  ;;  %v9381_v10 = vld [vmem:[#allocation100_spill] sm:$0xff] }
 0x316   : > { %v9379_v31 = vcombine.high %v9377_v53, %v9378_v1  ;;  %v8144_v11 = vrot.slane %v3615_v33, %v6443_v58  ;;  %v9382_v6 = vld [vmem:[#allocation105_spill] sm:$0xff]  ;;  %v9391_v1 = vld [vmem:[#allocation30_spill] sm:$0xff]  ;;  %v9397_v34 = vld [vmem:[#allocation8_spill] sm:$0xff] }
 0x317   : > { %9371 = vst [vmem:[#allocation70_spill] sm:$0xff] %v8122_v22  ;;  %v5518_v15 = vpack.i.bf16 %v9374_v19, %v2139_v61  ;;  %v2541_v56 = vrot.slane %v9375_v13, %v6443_v58  ;;  %v9380_v61 = vcombine.high %v7742_v48, %v7947_v17  ;;  %v9383_v13 = vld [vmem:[#allocation11_spill] sm:$0xff]  ;;  %v3225_v53 = vcombine.high %v9391_v1, %v7967_v57  ;;  %v9396_v59 = vld [vmem:[#allocation109_spill] sm:$0xff]  ;;  %v9410_v63 = vld [vmem:[#allocation46_spill] sm:$0xff] }
 0x318   : > { %v5548_v37 = vpack.i.bf16 %v3227_v62, %v9379_v31  ;;  %v2135_v49 = vcombine.high %v9383_v13, %v9382_v6  ;;  %v9384_v62 = vcombine.high %v7752_v35, %v7957_v54  ;;  %v9385_v31 = vld [vmem:[#allocation62_spill] sm:$0xff]  ;;  %v9386_v17 = vld [vmem:[#allocation59_spill] sm:$0xff]  ;;  %v9388_v13 = vld [vmem:[#allocation32_spill] sm:$0xff] }
 0x319   : > { %v8150_v19 = vrot.slane %v9380_v61, %v6443_v58  ;;  %5519 = vrot.lane.b32.xlu0 %v5518_v15, %s5777_s30  ;;  %v3228_v48 = vcombine.low %v9385_v31, %v7970_v30  ;;  %v2136_v61 = vcombine.low %v9386_v17, %v7896_v29  ;;  %v3229_v40 = vcombine.high %v9385_v31, %v7970_v30  ;;  %v9389_v35 = vld [vmem:[#allocation40_spill] sm:$0xff]  ;;  %v9412_v42 = vld [vmem:[#allocation53_spill] sm:$0xff] }
 0x31a   : > { %v2813_v33 = vrot.slane %v9384_v62, %v6443_v58  ;;  %5549 = vrot.lane.b32.xlu1 %v5548_v37, %s5777_s30  ;;  %v9387_v15 = vcombine.high %v7718_v44, %v8004_v16  ;;  %v9390_v54 = vcombine.high %v9388_v13, %v9389_v35  ;;  %v2137_v37 = vcombine.high %v9386_v17, %v7896_v29  ;;  %v9394_v44 = vld [vmem:[#allocation43_spill] sm:$0xff] }
 0x31b   : > { %v9392_v30 = vcombine.high %v7724_v20, %v8008_v4  ;;  %v9395_v16 = vcombine.low %v9393_v50, %v9394_v44  ;;  %v3223_v35 = vcombine.high %v9397_v34, %v9396_v59  ;;  %v9398_v29 = vcombine.low %v7796_v23, %v8027_v18  ;;  %v9404_v59 = vld [vmem:[#allocation35_spill] sm:$0xff] }
 0x31c   : > { %v8172_v6 = vrot.slane %v9387_v15, %v6443_v58  ;;  %v5523_v62 = vpack.i.bf16 %v9390_v54, %v2135_v49  ;;  %v3363_v49 = vcombine.high %v9334_v32, %v7904_v21  ;;  %v8201_v20 = vrot.slane %v2934_v2, %v6443_v58 }
 0x31d   : > { %v8185_v31 = vrot.slane %v9392_v30, %v6443_v58  ;;  %v5558_v15 = vpack.i.bf16 %v3228_v48, %v9395_v16  ;;  %v8198_v17 = vrot.slane %v9398_v29, %v6443_v58  ;;  %v8204_v4 = vrot.slane %v4007_v51, %v6443_v58  ;;  %v9399_v16 = vld [vmem:[#allocation33_spill] sm:$0xff] }
 0x31e   : > { %v8207_v48 = vrot.slane %v4023_v8, %v6443_v58  ;;  %5524 = vrot.lane.b32.xlu0 %v5523_v62, %s5777_s30  ;;  %v8211_v54 = vrot.slane %v4142_v41, %v6443_v58  ;;  %v8214_v30 = vrot.slane %v4158_v14, %v6443_v58  ;;  %v9400_v29 = vld [vmem:[#allocation41_spill] sm:$0xff]  ;;  %v9402_v51 = vcombine.high %v9393_v50, %v9394_v44  ;;  %v9405_v41 = vld [vmem:[#allocation44_spill] sm:$0xff]  ;;  %v9413_v50 = vld [vmem:[#allocation47_spill] sm:$0xff] }
 0x31f   : > { %5559 = vrot.lane.b32.xlu1 %v5558_v15, %s5778_s7  ;;  %v9401_v2 = vcombine.low %v9399_v16, %v9400_v29  ;;  %v9403_v8 = vcombine.high %v9399_v16, %v9400_v29  ;;  %v9406_v34 = vcombine.high %v9404_v59, %v9405_v41  ;;  %v9407_v14 = vld [vmem:[#allocation64_spill] sm:$0xff]  ;;  %v9408_v15 = vld [vmem:[#allocation67_spill] sm:$0xff]  ;;  %v9415_v16 = vld [vmem:[#allocation85_spill] sm:$0xff] }
 0x320   : > { %v5568_v32 = vpack.i.bf16 %v3229_v40, %v9402_v51  ;;  %v2412_v26 = vcombine.low %v9407_v14, %v8062_v45  ;;  %v2548_v39 = vcombine.low %v9408_v15, %v2541_v56  ;;  %v9414_v40 = vcombine.high %v9412_v42, %v9413_v50  ;;  %v9416_v51 = vld [vmem:[#allocation112_spill] sm:$0xff]  ;;  %v9421_v50 = vld [vmem:[#allocation93_spill] sm:$0xff] }
 0x321   : > { %v5533_v21 = vpack.i.bf16 %v9401_v2, %v2136_v61  ;;  %v5543_v62 = vpack.i.bf16 %v9403_v8, %v2137_v37  ;;  %v5573_v13 = vpack.i.bf16 %v3225_v53, %v9406_v34  ;;  %v9411_v61 = vcombine.high %v9409_v36, %v9410_v63  ;;  %v9417_v8 = vld [vmem:[#allocation16_spill] sm:$0xff]  ;;  %v9420_v34 = vld [vmem:[#allocation65_spill] sm:$0xff] }
 0x322   : > { %v5578_v44 = vpack.i.bf16 %v9414_v40, %v3363_v49  ;;  %v3224_v37 = vcombine.low %v9391_v1, %v7967_v57  ;;  %v3364_v29 = vcombine.low %v9415_v16, %v8071_v28  ;;  %v8245_v53 = vpack.i.bf16 %v2548_v39, %v2412_v26  ;;  %v9418_v49 = vld [vmem:[#allocation111_spill] sm:$0xff]  ;;  %v9424_v42 = vld [vmem:[#allocation57_spill] sm:$0xff] }
 0x323   : > { %v5553_v2 = vpack.i.bf16 %v3223_v35, %v9411_v61  ;;  %5534 = vrot.lane.b32.xlu0 %v5533_v21, %s5778_s7  ;;  %v2411_v35 = vcombine.high %v9417_v8, %v9416_v51  ;;  %v2547_v61 = vcombine.high %v9337_v0, %v7925_v43  ;;  %5569 = vrot.lane.b32.xlu1 %v5568_v32, %s5779_s8  ;;  %v9419_v21 = vld [vmem:[#allocation15_spill] sm:$0xff]  ;;  %v9423_v32 = vld [vmem:[#allocation18_spill] sm:$0xff] }
 0x324   : > { %v2413_v57 = vcombine.high %v9407_v14, %v8062_v45  ;;  %v2549_v1 = vcombine.high %v9408_v15, %v2541_v56  ;;  %v2407_v40 = vcombine.high %v9419_v21, %v9418_v49  ;;  %v2543_v26 = vcombine.high %v9420_v34, %v7909_v60  ;;  %v9422_v8 = vld [vmem:[#allocation63_spill] sm:$0xff]  ;;  %v9425_v45 = vld [vmem:[#allocation12_spill] sm:$0xff] }
 0x325   : > { %v8259_v39 = vpack.i.bf16 %v2547_v61, %v2411_v35  ;;  %v2820_v51 = vcombine.low %v9421_v50, %v2813_v33  ;;  %v2408_v43 = vcombine.low %v9422_v8, %v8044_v5  ;;  %v2544_v0 = vcombine.low %v9423_v32, %v8111_v12  ;;  %v9426_v35 = vld [vmem:[#allocation77_spill] sm:$0xff]  ;;  %v9427_v61 = vld [vmem:[#allocation75_spill] sm:$0xff] }
 0x326   : > { %v3359_v14 = vcombine.high %v9425_v45, %v9424_v42  ;;  %v8268_v56 = vpack.i.bf16 %v2549_v1, %v2413_v57  ;;  %v8270_v15 = vpack.i.bf16 %v2543_v26, %v2407_v40  ;;  %v2821_v49 = vcombine.high %v9421_v50, %v2813_v33  ;;  %v9429_v1 = vld [vmem:[#allocation17_spill] sm:$0xff]  ;;  %v9434_v26 = vld [vmem:[#allocation55_spill] sm:$0xff] }
 0x327   : > { %5544 = vrot.lane.b32.xlu0 %v5543_v62, %s5779_s8  ;;  %v9428_v21 = vcombine.low %v9426_v35, %v9427_v61  ;;  %v8279_v34 = vpack.i.bf16 %v2544_v0, %v2408_v43  ;;  %v2409_v63 = vcombine.high %v9422_v8, %v8044_v5  ;;  %v2545_v57 = vcombine.high %v9423_v32, %v8111_v12  ;;  %v9432_v12 = vld [vmem:[#allocation69_spill] sm:$0xff] }
 0x328   : > { %5574 = vrot.lane.b32.xlu1 %v5573_v13, %s5779_s8  ;;  %v3361_v33 = vcombine.high %v9429_v1, %v8065_v25  ;;  %v9430_v62 = vcombine.high %v9426_v35, %v9427_v61  ;;  %v2819_v43 = vcombine.high %v7582_v7, %v7999_v27  ;;  %v2815_v0 = vcombine.high %v7576_v52, %v7981_v9  ;;  %v9437_v61 = vld [vmem:[#allocation2_spill] sm:$0xff] }
 0x329   : > { %v8277_v60 = vpack.i.bf16 %v2820_v51, %v9428_v21  ;;  %v8297_v5 = vpack.i.bf16 %v2545_v57, %v2409_v63  ;;  %v9431_v51 = vld [vmem:[#allocation114_spill] sm:$0xff]  ;;  %v3771_v13 = vcombine.high %v7602_v24, %v8047_v38  ;;  %v9433_v21 = vld [vmem:[#allocation92_spill] sm:$0xff]  ;;  %v9442_v38 = vcombine.low %v9404_v59, %v9405_v41 }
 0x32a   : > { %v8291_v50 = vpack.i.bf16 %v2821_v49, %v9430_v62  ;;  %v3635_v8 = vcombine.high %v9432_v12, %v9431_v51  ;;  %v2816_v40 = vcombine.low %v9433_v21, %v8150_v19  ;;  %v9435_v49 = vld [vmem:[#allocation49_spill] sm:$0xff]  ;;  %v9438_v62 = vld [vmem:[#allocation50_spill] sm:$0xff] }
 0x32b   : > { %v9436_v32 = vcombine.high %v9434_v26, %v9435_v49  ;;  %v9439_v27 = vcombine.high %v9437_v61, %v9438_v62  ;;  %v9440_v63 = vld [vmem:[#allocation58_spill] sm:$0xff]  ;;  %v9441_v51 = vld [vmem:[#allocation97_spill] sm:$0xff]  ;;  %5554 = vrot.lane.b32.xlu0 %v5553_v2, %s5777_s30  ;;  %v5563_v24 = vpack.i.bf16 %v3224_v37, %v9442_v38 }
 0x32c   : > { %v3636_v57 = vcombine.low %v9440_v63, %v8144_v11  ;;  %v3772_v12 = vcombine.low %v9441_v51, %v8185_v31  ;;  %v8323_v52 = vpack.i.bf16 %v3771_v13, %v3635_v8  ;;  %5579 = vrot.lane.b32.xlu1 %v5578_v44, %s5777_s30  ;;  %v3637_v38 = vcombine.high %v9440_v63, %v8144_v11  ;;  %v9447_v8 = vld [vmem:[#allocation56_spill] sm:$0xff]  ;;  %v9448_v44 = vld [vmem:[#allocation95_spill] sm:$0xff]  ;;  %v9454_v63 = vld [vmem:[#allocation66_spill] sm:$0xff] }
 0x32d   : > { %v8308_v35 = vpack.i.bf16 %v2819_v43, %v9436_v32  ;;  %v8313_v9 = vpack.i.bf16 %v2815_v0, %v9439_v27  ;;  %v9443_v43 = vld [vmem:[#allocation78_spill] sm:$0xff]  ;;  %v9444_v32 = vld [vmem:[#allocation81_spill] sm:$0xff]  ;;  %v2817_v27 = vcombine.high %v9433_v21, %v8150_v19  ;;  %v3360_v0 = vcombine.low %v9429_v1, %v8065_v25 }
 0x32e   : > { %v9445_v49 = vcombine.low %v9443_v43, %v9444_v32  ;;  %v8335_v2 = vpack.i.bf16 %v3772_v12, %v3636_v57  ;;  %v3773_v59 = vcombine.high %v9441_v51, %v8185_v31  ;;  %v9446_v41 = vcombine.high %v9443_v43, %v9444_v32  ;;  %v9449_v1 = vld [vmem:[#allocation74_spill] sm:$0xff]  ;;  %v9450_v12 = vld [vmem:[#allocation72_spill] sm:$0xff] }
 0x32f   : > { %v3633_v19 = vcombine.high %v9447_v8, %v8136_v47  ;;  %v3769_v13 = vcombine.high %v9448_v44, %v8172_v6  ;;  %v4043_v25 = vcombine.high %v9381_v10, %v8122_v22  ;;  %v9451_v21 = vcombine.low %v9449_v1, %v9450_v12  ;;  %v9452_v31 = vld [vmem:[#allocation68_spill] sm:$0xff]  ;;  %5564 = vrot.lane.b32.xlu0 %v5563_v24, %s5778_s7  ;;  %v9459_v10 = vld [vmem:[#allocation94_spill] sm:$0xff] }
 0x330   : > { %v8328_v62 = vpack.i.bf16 %v2816_v40, %v9445_v49  ;;  %v5663_v37 = vpack.i.bf16 %v2817_v27, %v9446_v41  ;;  %v5688_v40 = vpack.i.bf16 %v3773_v59, %v3637_v38  ;;  %v4044_v51 = vcombine.low %v9452_v31, %v8207_v48  ;;  %v9453_v49 = vld [vmem:[#allocation113_spill] sm:$0xff]  ;;  %v9455_v32 = vld [vmem:[#allocation4_spill] sm:$0xff]  ;;  %v9456_v27 = vld [vmem:[#allocation51_spill] sm:$0xff] }
 0x331   : > { %v5588_v11 = vpack.i.bf16 %v9451_v21, %v3364_v29  ;;  %v3631_v57 = vcombine.high %v9454_v63, %v9453_v49  ;;  %v5693_v43 = vpack.i.bf16 %v3769_v13, %v3633_v19  ;;  %v9457_v41 = vcombine.high %v9455_v32, %v9456_v27  ;;  %v9458_v22 = vld [vmem:[#allocation60_spill] sm:$0xff]  ;;  %v9460_v38 = vld [vmem:[#allocation79_spill] sm:$0xff]  ;;  %v9461_v59 = vld [vmem:[#allocation82_spill] sm:$0xff] }
 0x332   : > { %v3767_v26 = vcombine.high %v9459_v10, %v9458_v22  ;;  %v4045_v29 = vcombine.high %v9452_v31, %v8207_v48  ;;  %v9462_v21 = vcombine.low %v9460_v38, %v9461_v59  ;;  %v3632_v24 = vcombine.low %v9447_v8, %v8136_v47  ;;  %v9463_v13 = vld [vmem:[#allocation99_spill] sm:$0xff]  ;;  %v9465_v63 = vld [vmem:[#allocation48_spill] sm:$0xff] }
 0x333   : > { %v8361_v61 = vpack.i.bf16 %v4043_v25, %v9457_v41  ;;  %5589 = vrot.lane.b32.xlu1 %v5588_v11, %s5778_s7  ;;  %v3768_v19 = vcombine.low %v9448_v44, %v8172_v6  ;;  %v4041_v25 = vcombine.high %v9463_v13, %v8204_v4  ;;  %v9464_v41 = vld [vmem:[#allocation54_spill] sm:$0xff]  ;;  %v9467_v11 = vcombine.high %v9460_v38, %v9461_v59  ;;  %v9471_v27 = vld [vmem:[#allocation83_spill] sm:$0xff]  ;;  %v9479_v59 = vld [vmem:[#allocation25_spill] sm:$0xff] }
 0x334   : > { %v5708_v49 = vpack.i.bf16 %v4044_v51, %v9462_v21  ;;  %v9466_v22 = vcombine.high %v9464_v41, %v9465_v63  ;;  %v5673_v48 = vpack.i.bf16 %v3767_v26, %v3631_v57  ;;  %v4039_v51 = vcombine.high %v9376_v3, %v8114_v55  ;;  %v9470_v21 = vld [vmem:[#allocation80_spill] sm:$0xff]  ;;  %v9473_v26 = vld [vmem:[#allocation10_spill] sm:$0xff]  ;;  %v9474_v57 = vld [vmem:[#allocation87_spill] sm:$0xff] }
 0x335   : > { %v5718_v31 = vpack.i.bf16 %v4045_v29, %v9467_v11  ;;  %v9468_v47 = vcombine.high %v9415_v16, %v8071_v28  ;;  %v9469_v6 = vcombine.high %v9449_v1, %v9450_v12  ;;  %v5683_v44 = vpack.i.bf16 %v3768_v19, %v3632_v24  ;;  %v9476_v28 = vld [vmem:[#allocation7_spill] sm:$0xff]  ;;  %v9477_v16 = vld [vmem:[#allocation52_spill] sm:$0xff]  ;;  %v9480_v24 = vld [vmem:[#allocation90_spill] sm:$0xff] }
 0x336   : > { %v5583_v10 = vpack.i.bf16 %v9466_v22, %v3359_v14  ;;  %v9472_v32 = vcombine.high %v9470_v21, %v9471_v27  ;;  %v4040_v14 = vcombine.low %v9463_v13, %v8204_v4  ;;  %v9475_v29 = vcombine.low %v9473_v26, %v9474_v57  ;;  %v9482_v4 = vld [vmem:[#allocation3_spill] sm:$0xff]  ;;  %v9483_v13 = vld [vmem:[#allocation89_spill] sm:$0xff] }
 0x337   : > { %v5598_v8 = vpack.i.bf16 %v9469_v6, %v9468_v47  ;;  %v9478_v1 = vcombine.high %v9476_v28, %v9477_v16  ;;  %v9481_v19 = vcombine.low %v9479_v59, %v9480_v24  ;;  %v9485_v11 = vld [vmem:[#allocation73_spill] sm:$0xff]  ;;  %v9486_v47 = vld [vmem:[#allocation76_spill] sm:$0xff]  ;;  %v9489_v16 = vld [vmem:[#allocation71_spill] sm:$0xff] }
 0x338   : > { %v5723_v22 = vpack.i.bf16 %v4041_v25, %v9472_v32  ;;  %5584 = vrot.lane.b32.xlu0 %v5583_v10, %s5777_s30  ;;  %v8401_v38 = vrot.slane %v9475_v29, %v6443_v58  ;;  %v9484_v10 = vcombine.low %v9482_v4, %v9483_v13  ;;  %v3497_v6 = vcombine.high %v9486_v47, %v9485_v11 }
 0x339   : > { %v5703_v12 = vpack.i.bf16 %v4039_v51, %v9478_v1  ;;  %v8410_v32 = vrot.slane %v9481_v19, %v6443_v58  ;;  %5599 = vrot.lane.b32.xlu1 %v5598_v8, %s5779_s8  ;;  %v9487_v51 = vcombine.low %v9486_v47, %v9485_v11  ;;  %v9488_v1 = vcombine.low %v9470_v21, %v9471_v27 }
 0x33a   : > { %v8416_v25 = vrot.slane %v9484_v10, %v6443_v58  ;;  %v2954_v28 = vcombine.low %v9489_v16, %v8201_v20  ;;  %v2950_v10 = vcombine.low %v8401_v38, %v8198_v17  ;;  %v5603_v3 = vpack.i.bf16 %v3497_v6, %v3361_v33  ;;  %v9490_v33 = vld [vmem:[#allocation88_spill] sm:$0xff]  ;;  %v9501_v6 = vld [vmem:[#allocation9_spill] sm:$0xff] }
 0x33b   : > { %v5593_v29 = vpack.i.bf16 %v9487_v51, %v3360_v0  ;;  %v5713_v19 = vpack.i.bf16 %v4040_v14, %v9488_v1  ;;  %v4178_v8 = vcombine.low %v8410_v32, %v8214_v30  ;;  %v9491_v0 = vld [vmem:[#allocation21_spill] sm:$0xff]  ;;  %v9502_v51 = vld [vmem:[#allocation104_spill] sm:$0xff] }
 0x33c   : > { %v4174_v55 = vcombine.low %v8416_v25, %v8211_v54  ;;  %v2903_v27 = vcombine.high %v9491_v0, %v9490_v33 }
 0x33d   : > { %5594 = vrot.lane.b32.xlu0 %v5593_v29, %s5778_s7  ;;  %5604 = vrot.lane.b32.xlu1 %v5603_v3, %s5779_s8  ;;  %v9492_v3 = vld [vmem:[#allocation108_spill] sm:$0xff]  ;;  %v9503_v29 = vcombine.low %v9501_v6, %v9502_v51 }
 0x341   : > { %5609 = vrot.lane.b32.xlu0 %v8259_v39, %s5777_s30  ;;  %5619 = vrot.lane.b32.xlu1 %v8245_v53, %s5778_s7  ;;  %v9493_v39 = vld [vmem:[#allocation24_spill] sm:$0xff] }
 0x342   : > { %v9494_v21 = vcombine.high %v9492_v3, %v9493_v39 }
 0x344   : > { %v2949_v53 = vrot.slane %v9494_v21, %v6443_v58 }
 0x345   : > { %5614 = vrot.lane.b32.xlu0 %v8270_v15, %s5777_s30  ;;  %5629 = vrot.lane.b32.xlu1 %v8268_v56, %s5779_s8  ;;  %v2917_v56 = vrot.slane %v2903_v27, %v6443_v58  ;;  %v2955_v15 = vcombine.high %v9489_v16, %v8201_v20 }
 0x349   : > { %5624 = vrot.lane.b32.xlu0 %v8279_v34, %s5778_s7  ;;  %5649 = vrot.lane.b32.xlu1 %v8277_v60, %s5778_s7  ;;  %v2956_v34 = vcombine.low %v2917_v56, %v2949_v53  ;;  %v2957_v60 = vcombine.high %v2917_v56, %v2949_v53 }
 0x34d   : > { %5634 = vrot.lane.b32.xlu0 %v8297_v5, %s5779_s8  ;;  %5659 = vrot.lane.b32.xlu1 %v8291_v50, %s5779_s8  ;;  %v2887_v50 = vcombine.high %v9473_v26, %v9474_v57  ;;  %v2951_v5 = vcombine.high %v8401_v38, %v8198_v17  ;;  %v5780_v26 = vmov 0  }
 0x34e   : > { %5728 = vset.pattern.permute.xlu0 %v5780_v26  ;;  %5729 = vset.pattern.permute.xlu1 %v5780_v26 }
 0x351   : > { %5639 = vrot.lane.b32.xlu0 %v8308_v35, %s5777_s30  ;;  %4351 = vrot.lane.b32.xlu1 %v2956_v34, %s5778_s7  ;;  %v2901_v35 = vrot.slane %v2887_v50, %v6443_v58 }
 0x355   : > { %5644 = vrot.lane.b32.xlu0 %v8313_v9, %s5777_s30  ;;  %4387 = vrot.lane.b32.xlu1 %v2957_v60, %s5779_s8  ;;  %v9495_v9 = vcombine.high %v7796_v23, %v8027_v18  ;;  %v4127_v23 = vcombine.high %v9479_v59, %v9480_v24  ;;  %v9496_v18 = vld [vmem:[#allocation26_spill] sm:$0xff] }
 0x359   : > { %5654 = vrot.lane.b32.xlu0 %v8328_v62, %s5778_s7  ;;  %5669 = vrot.lane.b32.xlu1 %v8323_v52, %s5777_s30  ;;  %v2933_v52 = vrot.slane %v9495_v9, %v6443_v58 }
 0x35b   : > { %v2952_v62 = vcombine.low %v2901_v35, %v2933_v52  ;;  %v2953_v27 = vcombine.high %v2901_v35, %v2933_v52  ;;  %v1307_v52 = vld [vmem:[%s8776_s5] sm:$0xff] }
 0x35d   : > { %5664 = vrot.lane.b32.xlu0 %v5663_v37, %s5779_s8  ;;  %5679 = vrot.lane.b32.xlu1 %v8335_v2, %s5778_s7  ;;  %v9497_v2 = vcombine.high %v7875_v46, %v9496_v18  ;;  %v4179_v37 = vcombine.high %v8410_v32, %v8214_v30  ;;  %v4175_v46 = vcombine.high %v8416_v25, %v8211_v54 }
 0x361   : > { %4315 = vrot.lane.b32.xlu0 %v2955_v15, %s5777_s30  ;;  %5689 = vrot.lane.b32.xlu1 %v5688_v40, %s5779_s8  ;;  %v4111_v40 = vcombine.high %v9482_v4, %v9483_v13  ;;  %v1306_v15 = vld [vmem:[%s8775_s4] sm:$0xff] }
 0x363   : > { %v4125_v57 = vrot.slane %v4111_v40, %v6443_v58  ;;  %v9507_v40 = vld [vmem:[#allocation5_spill] sm:$0xff] }
 0x365   : > { %4207 = vrot.lane.b32.xlu0 %v2951_v5, %s5777_s30  ;;  %5694 = vrot.lane.b32.xlu1 %v5693_v43, %s5779_s8  ;;  %v9498_v43 = vld [vmem:[#allocation14_spill] sm:$0xff] }
 0x369   : > { %4243 = vrot.lane.b32.xlu0 %v2952_v62, %s5778_s7  ;;  %5699 = vrot.lane.b32.xlu1 %v8361_v61, %s5777_s30  ;;  %v4173_v61 = vrot.slane %v9497_v2, %v6443_v58 }
 0x36d   : > { %5674 = vrot.lane.b32.xlu0 %v5673_v48, %s5777_s30  ;;  %5709 = vrot.lane.b32.xlu1 %v5708_v49, %s5778_s7  ;;  %v4141_v49 = vrot.slane %v4127_v23, %v6443_v58  ;;  %v9499_v48 = vld [vmem:[#allocation37_spill] sm:$0xff] }
 0x36f   : > { %v4181_v13 = vcombine.high %v4141_v49, %v4173_v61 }
 0x370   : > { %v5490_v14 = vpop.permute.xlu0 %5489 }
 0x371   : > { %5684 = vrot.lane.b32.xlu0 %v5683_v44, %s5778_s7  ;;  %5719 = vrot.lane.b32.xlu1 %v5718_v31, %s5779_s8  ;;  %v9500_v31 = vcombine.high %v9498_v43, %v9499_v48  ;;  %v5492_v24 = vunpack.i.h.bf16 %v5490_v14  ;;  %v5491_v4 = vunpack.i.l.bf16 %v5490_v14 }
 0x373   : > { %v4157_v44 = vrot.slane %v9500_v31, %v6443_v58  ;;  %v4644_v1 = vsel %vm331_vm0, %v9503_v29, %v5492_v24  ;;  %v9505_v58 = vld [vmem:[#allocation28_spill] sm:$0xff]  ;;  %v9510_v31 = vld [vmem:[#allocation22_spill] sm:$0xff] }
 0x375   : > { %5704 = vrot.lane.b32.xlu0 %v5703_v12, %s5777_s30  ;;  %5724 = vrot.lane.b32.xlu1 %v5723_v22, %s5779_s8  ;;  %v4180_v22 = vcombine.low %v4141_v49, %v4173_v61  ;;  %v5500_v12 = vpop.permute.xlu1 %5499  ;;  %v4176_v59 = vcombine.low %v4125_v57, %v4157_v44  ;;  %v4177_v39 = vcombine.high %v4125_v57, %v4157_v44  ;;  %v9508_v49 = vld [vmem:[#allocation102_spill] sm:$0xff]  ;;  %v9511_v44 = vld [vmem:[#allocation36_spill] sm:$0xff] }
 0x376   : > { %v5502_v11 = vunpack.i.h.bf16 %v5500_v12  ;;  %v5501_v47 = vunpack.i.l.bf16 %v5500_v12  ;;  %v9509_v43 = vcombine.low %v9507_v40, %v9508_v49  ;;  %v9520_v40 = vld [vmem:[#allocation110_spill] sm:$0xff] }
 0x378   : > { %v4653_v34 = vsel %vm4623_vm4, %v4644_v1, %v5502_v11 }
 0x379   : > { %5714 = vrot.lane.b32.xlu0 %v5713_v19, %s5778_s7  ;;  %4531 = vrot.lane.b32.xlu1 %v4179_v37, %s5777_s30  ;;  %v9504_v19 = vld [vmem:[#allocation19_spill] sm:$0xff] }
 0x37a   : > { %v9506_v33 = vcombine.low %v9504_v19, %v9505_v58  ;;  %v5495_v3 = vpop.permute.xlu0 %5494 }
 0x37b   : > { %v5510_v21 = vpop.permute.xlu1 %5509  ;;  %v5497_v23 = vunpack.i.h.bf16 %v5495_v3  ;;  %v5496_v18 = vunpack.i.l.bf16 %v5495_v3 }
 0x37c   : > { %v4643_v0 = vsel %vm331_vm0, %v9506_v33, %v5491_v4  ;;  %v5512_v53 = vunpack.i.h.bf16 %v5510_v21  ;;  %v5511_v56 = vunpack.i.l.bf16 %v5510_v21  ;;  %v9513_v33 = vld [vmem:[#allocation6_spill] sm:$0xff]  ;;  %v9517_v21 = vld [vmem:[#allocation39_spill] sm:$0xff] }
 0x37d   : > { %4423 = vrot.lane.b32.xlu0 %v4175_v46, %s5777_s30  ;;  %4567 = vrot.lane.b32.xlu1 %v4180_v22, %s5778_s7  ;;  %v4652_v60 = vsel %vm4623_vm4, %v4643_v0, %v5501_v47  ;;  %v4615_v48 = vsel %vm331_vm0, %v9509_v43, %v5497_v23  ;;  %v9512_v46 = vcombine.low %v9510_v31, %v9511_v44  ;;  %v9514_v0 = vld [vmem:[#allocation106_spill] sm:$0xff] }
 0x37e   : > { %v4661_v50 = vsel %vm4633_vm5, %v4652_v60, %v5511_v56  ;;  %v4662_v9 = vsel %vm4633_vm5, %v4653_v34, %v5512_v53  ;;  %v9523_v31 = vld [vmem:[#allocation42_spill] sm:$0xff] }
 0x37f   : > { %v5404_v5 = vpack.c.bf16 %v4662_v9, %v4661_v50  ;;  %v4614_v22 = vsel %vm331_vm0, %v9512_v46, %v5496_v18 }
 0x380   : > { %v5505_v35 = vpop.permute.xlu0 %5504 }
 0x381   : > { %4459 = vrot.lane.b32.xlu0 %v4176_v59, %s5778_s7  ;;  %4603 = vrot.lane.b32.xlu1 %v4181_v13, %s5779_s8  ;;  %v5530_v62 = vpop.permute.xlu1 %5529  ;;  %v5507_v2 = vunpack.i.h.bf16 %v5505_v35  ;;  %v5506_v61 = vunpack.i.l.bf16 %v5505_v35 }
 0x382   : > { %5405 = vmatprep.subr.bf16.mxu0 %v5404_v5  ;;  %v5532_v29 = vunpack.i.h.bf16 %v5530_v62  ;;  %v5531_v1 = vunpack.i.l.bf16 %v5530_v62 }
 0x383   : > { %v4624_v12 = vsel %vm4623_vm4, %v4614_v22, %v5506_v61  ;;  %v4625_v59 = vsel %vm4623_vm4, %v4615_v48, %v5507_v2  ;;  %v9522_v48 = vld [vmem:[#allocation31_spill] sm:$0xff] }
 0x384   : > { %v9524_v44 = vcombine.low %v9522_v48, %v9523_v31  ;;  %v9533_v31 = vld [vmem:[#allocation8_spill] sm:$0xff] }
 0x385   : > { %4279 = vrot.lane.b32.xlu0 %v2953_v27, %s5779_s8  ;;  %4495 = vrot.lane.b32.xlu1 %v4177_v39, %s5779_s8  ;;  %v5515_v37 = vpop.permute.xlu0 %5514  ;;  %v9515_v27 = vcombine.low %v9513_v33, %v9514_v0  ;;  %v9516_v39 = vld [vmem:[#allocation27_spill] sm:$0xff] }
 0x386   : > { %v5517_v14 = vunpack.i.h.bf16 %v5515_v37  ;;  %v5516_v26 = vunpack.i.l.bf16 %v5515_v37  ;;  %v9518_v53 = vcombine.low %v9516_v39, %v9517_v21  ;;  %v9519_v37 = vld [vmem:[#allocation13_spill] sm:$0xff] }
 0x387   : > { %v5540_v57 = vpop.permute.xlu1 %5539  ;;  %v9521_v49 = vcombine.low %v9519_v37, %v9520_v40 }
 0x388   : > { %v4634_v24 = vsel %vm4633_vm5, %v4624_v12, %v5516_v26  ;;  %v4635_v4 = vsel %vm4633_vm5, %v4625_v59, %v5517_v14  ;;  %v5542_v19 = vunpack.i.h.bf16 %v5540_v57  ;;  %v5541_v58 = vunpack.i.l.bf16 %v5540_v57 }
 0x389   : > { %4872 = vperm.xlu0 %5728, %v1306_v15   ;;  %4881 = vperm.xlu1 %5729, %v1307_v52   ;;  %v5406_v13 = vpack.c.bf16 %v4635_v4, %v4634_v24 }
 0x38b   : > { %v5520_v11 = vpop.permute.xlu0 %5519  ;;  %5407 = vmatpush1.bf16.msra.mxu0 %v5406_v13  ;;  %v9525_v13 = vld [vmem:[#allocation11_spill] sm:$0xff] }
 0x38c   : > { %v5522_v47 = vunpack.i.h.bf16 %v5520_v11  ;;  %v5521_v6 = vunpack.i.l.bf16 %v5520_v11  ;;  %v5550_v51 = vpop.permute.xlu1 %5549  ;;  %v9526_v11 = vld [vmem:[#allocation105_spill] sm:$0xff] }
 0x38d   : > { %v5552_v50 = vunpack.i.h.bf16 %v5550_v51  ;;  %v5551_v9 = vunpack.i.l.bf16 %v5550_v51 }
 0x38e   : > { %v4645_v3 = vsel %vm331_vm0, %v9515_v27, %v5521_v6  ;;  %v4646_v56 = vsel %vm331_vm0, %v9518_v53, %v5522_v47  ;;  %v9527_v47 = vcombine.low %v9525_v13, %v9526_v11  ;;  %v9536_v13 = vld [vmem:[#allocation84_spill] sm:$0xff] }
 0x38f   : > { %v4654_v60 = vsel %vm4623_vm4, %v4645_v3, %v5531_v1  ;;  %v4655_v15 = vsel %vm4623_vm4, %v4646_v56, %v5532_v29  ;;  %v4698_v43 = vsel %vm331_vm0, %v9521_v49, %v5552_v50  ;;  %v4697_v46 = vsel %vm331_vm0, %v9524_v44, %v5551_v9  ;;  %v9531_v49 = vld [vmem:[#allocation46_spill] sm:$0xff]  ;;  %v9534_v44 = vld [vmem:[#allocation109_spill] sm:$0xff] }
 0x390   : > { %v5525_v34 = vpop.permute.xlu0 %5524  ;;  %v4663_v5 = vsel %vm4633_vm5, %v4654_v60, %v5541_v58  ;;  %v4664_v35 = vsel %vm4633_vm5, %v4655_v15, %v5542_v19  ;;  %v9528_v19 = vld [vmem:[#allocation32_spill] sm:$0xff] }
 0x391   : > { %v5560_v52 = vpop.permute.xlu1 %5559  ;;  %v5408_v62 = vpack.c.bf16 %v4664_v35, %v4663_v5  ;;  %v5526_v2 = vunpack.i.l.bf16 %v5525_v34  ;;  %v5527_v22 = vunpack.i.h.bf16 %v5525_v34  ;;  %v9529_v58 = vld [vmem:[#allocation40_spill] sm:$0xff] }
 0x392   : > { %v5562_v23 = vunpack.i.h.bf16 %v5560_v52  ;;  %v5561_v18 = vunpack.i.l.bf16 %v5560_v52  ;;  %v9530_v33 = vcombine.low %v9528_v19, %v9529_v58 }
 0x393   : > { %5409 = vmatprep.subr.bf16.mxu0 %v5408_v62  ;;  %v4616_v6 = vsel %vm331_vm0, %v9527_v47, %v5526_v2 }
 0x394   : > { %v4706_v24 = vsel %vm4623_vm4, %v4697_v46, %v5561_v18  ;;  %v4707_v4 = vsel %vm4623_vm4, %v4698_v43, %v5562_v23  ;;  %v4617_v0 = vsel %vm331_vm0, %v9530_v33, %v5527_v22  ;;  %v9532_v43 = vcombine.low %v9409_v36, %v9531_v49  ;;  %v9537_v36 = vld [vmem:[#allocation61_spill] sm:$0xff] }
 0x395   : > { %v5535_v61 = vpop.permute.xlu0 %5534  ;;  %v5570_v14 = vpop.permute.xlu1 %5569  ;;  %v9535_v46 = vcombine.low %v9533_v31, %v9534_v44  ;;  %v9538_v11 = vcombine.low %v9536_v13, %v9537_v36  ;;  %v9545_v44 = vld [vmem:[#allocation29_spill] sm:$0xff] }
 0x396   : > { %v5537_v26 = vunpack.i.h.bf16 %v5535_v61  ;;  %v5536_v57 = vunpack.i.l.bf16 %v5535_v61  ;;  %v5572_v12 = vunpack.i.h.bf16 %v5570_v14  ;;  %v5571_v59 = vunpack.i.l.bf16 %v5570_v14 }
 0x398   : > { %v4715_v29 = vsel %vm4633_vm5, %v4706_v24, %v5571_v59  ;;  %v4716_v1 = vsel %vm4633_vm5, %v4707_v4, %v5572_v12  ;;  %v4626_v53 = vsel %vm4623_vm4, %v4616_v6, %v5536_v57  ;;  %v4627_v56 = vsel %vm4623_vm4, %v4617_v0, %v5537_v26  ;;  %v9539_v6 = vld [vmem:[#allocation53_spill] sm:$0xff] }
 0x399   : > { %v5545_v51 = vpop.permute.xlu0 %5544  ;;  %v5420_v21 = vpack.c.bf16 %v4716_v1, %v4715_v29 }
 0x39a   : > { %v5547_v27 = vunpack.i.h.bf16 %v5545_v51  ;;  %v5546_v3 = vunpack.i.l.bf16 %v5545_v51  ;;  %v5575_v39 = vpop.permute.xlu1 %5574  ;;  %v9540_v51 = vld [vmem:[#allocation47_spill] sm:$0xff] }
 0x39b   : > { %5421 = vmatprep.subr.bf16.mxu1 %v5420_v21  ;;  %v5577_v37 = vunpack.i.h.bf16 %v5575_v39  ;;  %v5576_v40 = vunpack.i.l.bf16 %v5575_v39  ;;  %v9541_v29 = vcombine.low %v9539_v6, %v9540_v51 }
 0x39c   : > { %v4636_v34 = vsel %vm4633_vm5, %v4626_v53, %v5546_v3  ;;  %v4637_v60 = vsel %vm4633_vm5, %v4627_v56, %v5547_v27 }
 0x39d   : > { %v5410_v15 = vpack.c.bf16 %v4637_v60, %v4636_v34  ;;  %v5555_v50 = vpop.permute.xlu0 %5554 }
 0x39e   : > { %v5580_v9 = vpop.permute.xlu1 %5579  ;;  %v5557_v52 = vunpack.i.h.bf16 %v5555_v50  ;;  %v5556_v5 = vunpack.i.l.bf16 %v5555_v50 }
 0x39f   : > { %5411 = vmatpush1.bf16.msra.mxu0 %v5410_v15  ;;  %v5582_v62 = vunpack.i.h.bf16 %v5580_v9  ;;  %v5581_v23 = vunpack.i.l.bf16 %v5580_v9 }
 0x3a0   : > { %v4670_v48 = vsel %vm331_vm0, %v9532_v43, %v5556_v5  ;;  %v4671_v22 = vsel %vm331_vm0, %v9535_v46, %v5557_v52  ;;  %v9542_v52 = vcombine.low %v9425_v45, %v9424_v42 }
 0x3a1   : > { %v5565_v35 = vpop.permute.xlu0 %5564  ;;  %v4699_v47 = vsel %vm331_vm0, %v9538_v11, %v5581_v23  ;;  %v4700_v1 = vsel %vm331_vm0, %v9541_v29, %v5582_v62 }
 0x3a2   : > { %v5567_v18 = vunpack.i.h.bf16 %v5565_v35  ;;  %v5566_v2 = vunpack.i.l.bf16 %v5565_v35  ;;  %v9543_v35 = vcombine.low %v9464_v41, %v9465_v63  ;;  %v9544_v41 = vld [vmem:[#allocation86_spill] sm:$0xff] }
 0x3a3   : > { %v9546_v46 = vcombine.low %v9544_v41, %v9545_v44  ;;  %v9558_v41 = vld [vmem:[#allocation55_spill] sm:$0xff]  ;;  %v9559_v44 = vld [vmem:[#allocation49_spill] sm:$0xff] }
 0x3a4   : > { %v4679_v14 = vsel %vm4623_vm4, %v4670_v48, %v5566_v2  ;;  %v4680_v26 = vsel %vm4623_vm4, %v4671_v22, %v5567_v18 }
 0x3a5   : > { %v5590_v61 = vpop.permute.xlu1 %5589  ;;  %v4688_v24 = vsel %vm4633_vm5, %v4679_v14, %v5576_v40  ;;  %v4689_v4 = vsel %vm4633_vm5, %v4680_v26, %v5577_v37  ;;  %v9547_v14 = vld [vmem:[#allocation16_spill] sm:$0xff] }
 0x3a6   : > { %v5592_v57 = vunpack.i.h.bf16 %v5590_v61  ;;  %v5591_v12 = vunpack.i.l.bf16 %v5590_v61  ;;  %v5422_v58 = vpack.c.bf16 %v4689_v4, %v4688_v24  ;;  %v9548_v26 = vld [vmem:[#allocation112_spill] sm:$0xff] }
 0x3a8   : > { %v4708_v39 = vsel %vm4623_vm4, %v4699_v47, %v5591_v12  ;;  %v4709_v21 = vsel %vm4623_vm4, %v4700_v1, %v5592_v57  ;;  %5423 = vmatpush1.bf16.msra.mxu1 %v5422_v58  ;;  %v9549_v57 = vcombine.low %v9547_v14, %v9548_v26 }
 0x3aa   : > { %v5585_v59 = vpop.permute.xlu0 %5584 }
 0x3ab   : > { %v5600_v19 = vpop.permute.xlu1 %5599  ;;  %v5587_v27 = vunpack.i.h.bf16 %v5585_v59  ;;  %v5586_v3 = vunpack.i.l.bf16 %v5585_v59 }
 0x3ac   : > { %v5602_v33 = vunpack.i.h.bf16 %v5600_v19  ;;  %v5601_v0 = vunpack.i.l.bf16 %v5600_v19 }
 0x3ad   : > { %v4672_v5 = vsel %vm331_vm0, %v9542_v52, %v5586_v3  ;;  %v4673_v62 = vsel %vm331_vm0, %v9543_v35, %v5587_v27  ;;  %v9550_v3 = vld [vmem:[#allocation65_spill] sm:$0xff] }
 0x3ae   : > { %v4717_v56 = vsel %vm4633_vm5, %v4708_v39, %v5601_v0  ;;  %v4718_v34 = vsel %vm4633_vm5, %v4709_v21, %v5602_v33  ;;  %v9551_v39 = vld [vmem:[#allocation20_spill] sm:$0xff] }
 0x3af   : > { %v5595_v53 = vpop.permute.xlu0 %5594  ;;  %v5605_v60 = vpop.permute.xlu1 %5604  ;;  %v5424_v9 = vpack.c.bf16 %v4718_v34, %v4717_v56  ;;  %v9552_v21 = vcombine.low %v9550_v3, %v9551_v39  ;;  %v9553_v56 = vld [vmem:[#allocation15_spill] sm:$0xff] }
 0x3b0   : > { %v5597_v15 = vunpack.i.h.bf16 %v5595_v53  ;;  %v5596_v50 = vunpack.i.l.bf16 %v5595_v53  ;;  %v5607_v23 = vunpack.i.h.bf16 %v5605_v60  ;;  %v5606_v18 = vunpack.i.l.bf16 %v5605_v60  ;;  %v9554_v34 = vld [vmem:[#allocation111_spill] sm:$0xff] }
 0x3b1   : > { %5425 = vmatprep.subr.bf16.mxu1 %v5424_v9  ;;  %v9555_v60 = vcombine.low %v9553_v56, %v9554_v34 }
 0x3b2   : > { %v4681_v2 = vsel %vm4623_vm4, %v4672_v5, %v5596_v50  ;;  %v4682_v61 = vsel %vm4623_vm4, %v4673_v62, %v5597_v15 }
 0x3b3   : > { %v5610_v37 = vpop.permute.xlu0 %5609  ;;  %v4690_v40 = vsel %vm4633_vm5, %v4681_v2, %v5606_v18  ;;  %v4691_v49 = vsel %vm4633_vm5, %v4682_v61, %v5607_v23  ;;  %v5620_v42 = vpop.permute.xlu1 %5619 }
 0x3b4   : > { %v5612_v45 = vunpack.i.h.bf16 %v5610_v37  ;;  %v5611_v43 = vunpack.i.l.bf16 %v5610_v37  ;;  %v5426_v48 = vpack.c.bf16 %v4691_v49, %v4690_v40  ;;  %v5622_v31 = vunpack.i.h.bf16 %v5620_v42 }
 0x3b5   : > { %v5621_v63 = vunpack.i.l.bf16 %v5620_v42 }
 0x3b6   : > { %5427 = vmatpush1.bf16.msra.mxu1 %v5426_v48  ;;  %v4648_v22 = vsel %vm331_vm0, %v9546_v46, %v5612_v45  ;;  %v4647_v12 = vsel %vm331_vm0, %v9549_v57, %v5611_v43  ;;  %v9556_v48 = vld [vmem:[#allocation116_spill] sm:$0xff]  ;;  %v9560_v46 = vcombine.low %v9558_v41, %v9559_v44 }
 0x3b7   : > { %v5615_v59 = vpop.permute.xlu0 %5614  ;;  %v5630_v24 = vpop.permute.xlu1 %5629  ;;  %v4656_v36 = vsel %vm4623_vm4, %v4647_v12, %v5621_v63  ;;  %v4657_v11 = vsel %vm4623_vm4, %v4648_v22, %v5622_v31  ;;  %v9557_v31 = vcombine.low %v7582_v7, %v9556_v48 }
 0x3b8   : > { %v5632_v4 = vunpack.i.h.bf16 %v5630_v24  ;;  %v5631_v13 = vunpack.i.l.bf16 %v5630_v24  ;;  %v5617_v29 = vunpack.i.h.bf16 %v5615_v59  ;;  %v5616_v1 = vunpack.i.l.bf16 %v5615_v59 }
 0x3ba   : > { %v4665_v6 = vsel %vm4633_vm5, %v4656_v36, %v5631_v13  ;;  %v4666_v51 = vsel %vm4633_vm5, %v4657_v11, %v5632_v4  ;;  %v4619_v53 = vsel %vm331_vm0, %v9552_v21, %v5617_v29  ;;  %v4618_v15 = vsel %vm331_vm0, %v9555_v60, %v5616_v1  ;;  %v9562_v29 = vld [vmem:[#allocation115_spill] sm:$0xff] }
 0x3bb   : > { %v5625_v47 = vpop.permute.xlu0 %5624  ;;  %v5650_v19 = vpop.permute.xlu1 %5649  ;;  %v5412_v58 = vpack.c.bf16 %v4666_v51, %v4665_v6  ;;  %v9561_v51 = vld [vmem:[#allocation91_spill] sm:$0xff] }
 0x3bc   : > { %v5627_v33 = vunpack.i.h.bf16 %v5625_v47  ;;  %v5626_v0 = vunpack.i.l.bf16 %v5625_v47  ;;  %v5652_v49 = vunpack.i.h.bf16 %v5650_v19  ;;  %v5651_v42 = vunpack.i.l.bf16 %v5650_v19 }
 0x3bd   : > { %5413 = vmatprep.subr.bf16.mxu0 %v5412_v58  ;;  %v9563_v1 = vcombine.low %v9561_v51, %v9562_v29  ;;  %v9573_v29 = vld [vmem:[#allocation100_spill] sm:$0xff] }
 0x3be   : > { %v4628_v5 = vsel %vm4623_vm4, %v4618_v15, %v5626_v0  ;;  %v4629_v35 = vsel %vm4623_vm4, %v4619_v53, %v5627_v33  ;;  %v9564_v33 = vld [vmem:[#allocation2_spill] sm:$0xff] }
 0x3bf   : > { %v5635_v27 = vpop.permute.xlu0 %5634  ;;  %v5660_v50 = vpop.permute.xlu1 %5659  ;;  %v9565_v0 = vld [vmem:[#allocation50_spill] sm:$0xff] }
 0x3c0   : > { %v5637_v9 = vunpack.i.h.bf16 %v5635_v27  ;;  %v5636_v52 = vunpack.i.l.bf16 %v5635_v27  ;;  %v5662_v45 = vunpack.i.h.bf16 %v5660_v50  ;;  %v5661_v43 = vunpack.i.l.bf16 %v5660_v50 }
 0x3c1   : > { %v9566_v27 = vcombine.low %v9564_v33, %v9565_v0  ;;  %v9576_v33 = vld [vmem:[#allocation4_spill] sm:$0xff]  ;;  %v9577_v0 = vld [vmem:[#allocation51_spill] sm:$0xff] }
 0x3c2   : > { %v4638_v62 = vsel %vm4633_vm5, %v4628_v5, %v5636_v52  ;;  %v4639_v23 = vsel %vm4633_vm5, %v4629_v35, %v5637_v9 }
 0x3c3   : > { %v5414_v18 = vpack.c.bf16 %v4639_v23, %v4638_v62  ;;  %v5640_v2 = vpop.permute.xlu0 %5639  ;;  %v4352_v61 = vpop.permute.xlu1 %4351  ;;  %v9567_v23 = vld [vmem:[#allocation96_spill] sm:$0xff] }
 0x3c4   : > { %v5642_v37 = vunpack.i.h.bf16 %v5640_v2  ;;  %v5641_v40 = vunpack.i.l.bf16 %v5640_v2 }
 0x3c5   : > { %5415 = vmatpush1.bf16.msra.mxu0 %v5414_v18  ;;  %v9568_v18 = vld [vmem:[#allocation23_spill] sm:$0xff] }
 0x3c6   : > { %v4650_v63 = vsel %vm331_vm0, %v9557_v31, %v5642_v37  ;;  %v4649_v22 = vsel %vm331_vm0, %v9560_v46, %v5641_v40  ;;  %v9569_v2 = vcombine.low %v9567_v23, %v9568_v18 }
 0x3c7   : > { %v5645_v14 = vpop.permute.xlu0 %5644  ;;  %v4658_v26 = vsel %vm4623_vm4, %v4649_v22, %v5651_v42  ;;  %v4659_v57 = vsel %vm4623_vm4, %v4650_v63, %v5652_v49  ;;  %v4388_v12 = vpop.permute.xlu1 %4387  ;;  %v9570_v42 = vld [vmem:[#allocation69_spill] sm:$0xff] }
 0x3c8   : > { %v4667_v59 = vsel %vm4633_vm5, %v4658_v26, %v5661_v43  ;;  %v4668_v24 = vsel %vm4633_vm5, %v4659_v57, %v5662_v45  ;;  %v5647_v13 = vunpack.i.h.bf16 %v5645_v14  ;;  %v5646_v36 = vunpack.i.l.bf16 %v5645_v14  ;;  %v9571_v45 = vld [vmem:[#allocation114_spill] sm:$0xff] }
 0x3c9   : > { %v5416_v4 = vpack.c.bf16 %v4668_v24, %v4667_v59  ;;  %v9572_v43 = vcombine.low %v9570_v42, %v9571_v45 }
 0x3ca   : > { %v4621_v19 = vsel %vm331_vm0, %v9563_v1, %v5647_v13  ;;  %v4620_v3 = vsel %vm331_vm0, %v9566_v27, %v5646_v36  ;;  %v9574_v1 = vld [vmem:[#allocation70_spill] sm:$0xff]  ;;  %v9578_v27 = vcombine.low %v9576_v33, %v9577_v0 }
 0x3cb   : > { %v5655_v7 = vpop.permute.xlu0 %5654  ;;  %5417 = vmatprep.subr.bf16.mxu0 %v5416_v4  ;;  %v5670_v11 = vpop.permute.xlu1 %5669 }
 0x3cc   : > { %v5657_v47 = vunpack.i.h.bf16 %v5655_v7  ;;  %v5656_v6 = vunpack.i.l.bf16 %v5655_v7  ;;  %v5672_v39 = vunpack.i.h.bf16 %v5670_v11  ;;  %v5671_v34 = vunpack.i.l.bf16 %v5670_v11 }
 0x3ce   : > { %v4630_v60 = vsel %vm4623_vm4, %v4620_v3, %v5656_v6  ;;  %v4631_v15 = vsel %vm4623_vm4, %v4621_v19, %v5657_v47  ;;  %v4702_v37 = vsel %vm331_vm0, %v9569_v2, %v5672_v39  ;;  %v4701_v48 = vsel %vm331_vm0, %v9572_v43, %v5671_v34  ;;  %v9580_v34 = vld [vmem:[#allocation60_spill] sm:$0xff] }
 0x3cf   : > { %v5665_v58 = vpop.permute.xlu0 %5664  ;;  %v5680_v21 = vpop.permute.xlu1 %5679  ;;  %v9575_v19 = vcombine.low %v9573_v29, %v9574_v1 }
 0x3d0   : > { %v5667_v53 = vunpack.i.h.bf16 %v5665_v58  ;;  %v5666_v56 = vunpack.i.l.bf16 %v5665_v58  ;;  %v5682_v50 = vunpack.i.h.bf16 %v5680_v21  ;;  %v5681_v9 = vunpack.i.l.bf16 %v5680_v21 }
 0x3d2   : > { %v4640_v52 = vsel %vm4633_vm5, %v4630_v60, %v5666_v56  ;;  %v4641_v5 = vsel %vm4633_vm5, %v4631_v15, %v5667_v53  ;;  %v4710_v44 = vsel %vm4623_vm4, %v4701_v48, %v5681_v9  ;;  %v4711_v46 = vsel %vm4623_vm4, %v4702_v37, %v5682_v50  ;;  %v9579_v56 = vld [vmem:[#allocation94_spill] sm:$0xff]  ;;  %v9583_v9 = vld [vmem:[#allocation113_spill] sm:$0xff] }
 0x3d3   : > { %v5418_v35 = vpack.c.bf16 %v4641_v5, %v4640_v52  ;;  %v4316_v62 = vpop.permute.xlu0 %4315  ;;  %v5690_v40 = vpop.permute.xlu1 %5689  ;;  %v9581_v60 = vcombine.low %v9579_v56, %v9580_v34  ;;  %v9582_v50 = vld [vmem:[#allocation66_spill] sm:$0xff] }
 0x3d4   : > { %v4651_v49 = vsel %vm331_vm0, %v2954_v28, %v4316_v62  ;;  %v5692_v31 = vunpack.i.h.bf16 %v5690_v40  ;;  %v5691_v63 = vunpack.i.l.bf16 %v5690_v40  ;;  %v9584_v52 = vcombine.low %v9582_v50, %v9583_v9 }
 0x3d5   : > { %5419 = vmatpush1.bf16.msra.mxu0 %v5418_v35  ;;  %v4660_v41 = vsel %vm4623_vm4, %v4651_v49, %v4352_v61 }
 0x3d6   : > { %v4669_v22 = vsel %vm4633_vm5, %v4660_v41, %v4388_v12  ;;  %v4719_v20 = vsel %vm4633_vm5, %v4710_v44, %v5691_v63  ;;  %v4720_v28 = vsel %vm4633_vm5, %v4711_v46, %v5692_v31 }
 0x3d7   : > { %v8689_v14 = vpop.permute.xlu0 %4207  ;;  %4744 = vmatprep.subr.mxu0 %v4669_v22  ;;  %v5695_v16 = vpop.permute.xlu1 %5694  ;;  %v5428_v26 = vpack.c.bf16 %v4720_v28, %v4719_v20 }
 0x3d8   : > { %v5697_v47 = vunpack.i.h.bf16 %v5695_v16  ;;  %v5696_v6 = vunpack.i.l.bf16 %v5695_v16 }
 0x3d9   : > { %5429 = vmatprep.subr.bf16.mxu1 %v5428_v26 }
 0x3db   : > { %v4244_v57 = vpop.permute.xlu0 %4243  ;;  %v5700_v59 = vpop.permute.xlu1 %5699 }
 0x3dc   : > { %v5702_v61 = vunpack.i.h.bf16 %v5700_v59  ;;  %v5701_v4 = vunpack.i.l.bf16 %v5700_v59  ;;  %v9585_v59 = vld [vmem:[#allocation98_spill] sm:$0xff] }
 0x3de   : > { %v4704_v58 = vsel %vm331_vm0, %v9575_v19, %v5702_v61  ;;  %v4703_v3 = vsel %vm331_vm0, %v9578_v27, %v5701_v4 }
 0x3df   : > { %v5675_v24 = vpop.permute.xlu0 %5674  ;;  %v5710_v13 = vpop.permute.xlu1 %5709 }
 0x3e0   : > { %v5677_v7 = vunpack.i.h.bf16 %v5675_v24  ;;  %v5676_v36 = vunpack.i.l.bf16 %v5675_v24  ;;  %v5712_v11 = vunpack.i.h.bf16 %v5710_v13  ;;  %v5711_v12 = vunpack.i.l.bf16 %v5710_v13  ;;  %v9586_v24 = vld [vmem:[#allocation38_spill] sm:$0xff]  ;;  %v9588_v13 = vld [vmem:[#allocation7_spill] sm:$0xff] }
 0x3e1   : > { %v9587_v61 = vcombine.low %v9585_v59, %v9586_v24 }
 0x3e2   : > { %v4675_v15 = vsel %vm331_vm0, %v9581_v60, %v5677_v7  ;;  %v4674_v5 = vsel %vm331_vm0, %v9584_v52, %v5676_v36  ;;  %v4712_v23 = vsel %vm4623_vm4, %v4703_v3, %v5711_v12  ;;  %v4713_v18 = vsel %vm4623_vm4, %v4704_v58, %v5712_v11  ;;  %v9589_v7 = vld [vmem:[#allocation52_spill] sm:$0xff] }
 0x3e3   : > { %v5685_v51 = vpop.permute.xlu0 %5684  ;;  %v5720_v39 = vpop.permute.xlu1 %5719  ;;  %v9590_v36 = vcombine.low %v9588_v13, %v9589_v7 }
 0x3e4   : > { %v5687_v21 = vunpack.i.h.bf16 %v5685_v51  ;;  %v5686_v53 = vunpack.i.l.bf16 %v5685_v51  ;;  %v5722_v35 = vunpack.i.h.bf16 %v5720_v39  ;;  %v5721_v62 = vunpack.i.l.bf16 %v5720_v39 }
 0x3e5   : > { %v4622_v39 = vsel %vm331_vm0, %v2950_v10, %v8689_v14 }
 0x3e6   : > { %v4683_v2 = vsel %vm4623_vm4, %v4674_v5, %v5686_v53  ;;  %v4684_v37 = vsel %vm4623_vm4, %v4675_v15, %v5687_v21  ;;  %v4721_v45 = vsel %vm4633_vm5, %v4712_v23, %v5721_v62  ;;  %v4722_v43 = vsel %vm4633_vm5, %v4713_v18, %v5722_v35 }
 0x3e7   : > { %v5705_v40 = vpop.permute.xlu0 %5704  ;;  %v4692_v49 = vsel %vm4633_vm5, %v4683_v2, %v5696_v6  ;;  %v4693_v42 = vsel %vm4633_vm5, %v4684_v37, %v5697_v47  ;;  %v5725_v48 = vpop.permute.xlu1 %5724  ;;  %v5432_v63 = vpack.c.bf16 %v4722_v43, %v4721_v45  ;;  %v4632_v21 = vsel %vm4623_vm4, %v4622_v39, %v4244_v57 }
 0x3e8   : > { %v5430_v31 = vpack.c.bf16 %v4693_v42, %v4692_v49  ;;  %v5707_v41 = vunpack.i.h.bf16 %v5705_v40  ;;  %v5706_v44 = vunpack.i.l.bf16 %v5705_v40  ;;  %v5727_v16 = vunpack.i.h.bf16 %v5725_v48 }
 0x3e9   : > { %v5726_v26 = vunpack.i.l.bf16 %v5725_v48 }
 0x3ea   : > { %5431 = vmatpush1.bf16.msra.mxu1 %v5430_v31  ;;  %v4677_v4 = vsel %vm331_vm0, %v9587_v61, %v5707_v41  ;;  %v4676_v11 = vsel %vm331_vm0, %v9590_v36, %v5706_v44 }
 0x3eb   : > { %v5715_v46 = vpop.permute.xlu0 %5714  ;;  %5433 = vmatprep.subr.bf16.mxu1 %v5432_v63  ;;  %v4532_v22 = vpop.permute.xlu1 %4531 }
 0x3ec   : > { %v5717_v20 = vunpack.i.h.bf16 %v5715_v46  ;;  %v5716_v28 = vunpack.i.l.bf16 %v5715_v46  ;;  %v4705_v58 = vsel %vm331_vm0, %v4178_v8, %v4532_v22  ;;  %v1305_v8 = vld [vmem:[%s8774_s3] sm:$0xff] }
 0x3ee   : > { %v4685_v12 = vsel %vm4623_vm4, %v4676_v11, %v5716_v28  ;;  %v4686_v47 = vsel %vm4623_vm4, %v4677_v4, %v5717_v20 }
 0x3ef   : > { %v4424_v6 = vpop.permute.xlu0 %4423  ;;  %v4694_v51 = vsel %vm4633_vm5, %v4685_v12, %v5726_v26  ;;  %v4695_v29 = vsel %vm4633_vm5, %v4686_v47, %v5727_v16  ;;  %v4568_v1 = vpop.permute.xlu1 %4567 }
 0x3f0   : > { %v5434_v19 = vpack.c.bf16 %v4695_v29, %v4694_v51  ;;  %v4714_v0 = vsel %vm4623_vm4, %v4705_v58, %v4568_v1  ;;  %v4678_v30 = vsel %vm331_vm0, %v4174_v55, %v4424_v6 }
 0x3f2   : > { %5435 = vmatpush1.bf16.msra.mxu1 %v5434_v19 }
 0x3f3   : > { %v4460_v33 = vpop.permute.xlu0 %4459  ;;  %v4604_v27 = vpop.permute.xlu1 %4603 }
 0x3f4   : > { %v4723_v3 = vsel %vm4633_vm5, %v4714_v0, %v4604_v27  ;;  %v4687_v17 = vsel %vm4623_vm4, %v4678_v30, %v4460_v33 }
 0x3f5   : > { %4815 = vmatprep.subr.mxu1 %v4723_v3 }
 0x3f7   : > { %v4280_v32 = vpop.permute.xlu0 %4279  ;;  %v4496_v38 = vpop.permute.xlu1 %4495 }
 0x3f8   : > { %v4642_v10 = vsel %vm4633_vm5, %v4632_v21, %v4280_v32  ;;  %v4696_v14 = vsel %vm4633_vm5, %v4687_v17, %v4496_v38 }
 0x3f9   : > { %4745 = vmatpush1.msra.mxu0 %v4642_v10  ;;  %4816 = vmatpush1.msra.mxu1 %v4696_v14 }
 0x3fa   : > { %5059 = vmatmul.mubr.msk.f32.vlgmr.msra.gmra.mrb[38].mxu0 %vm4724_vm6, %v1305_v8  ;;  %5060 = vmatmul.mubr.msk.f32.vlgmr.msra.gmra.mrb[42].mxu1 %vm4724_vm6, %v1305_v8 }
 0x408   : > { %v4873_v55 = vpop.permute.xlu0 %4872  ;;  %v4882_v25 = vpop.permute.xlu1 %4881 }
 0x4cd   : > { %v4794_v54 = vpop.f32.mrb[38].mxu0  ;;  %v4865_v57 = vpop.f32.mrb[42].mxu1 }
 0x4ce   : > { %v4875_v53 = vmul.f32 %v4873_v55, %v4794_v54  ;;  %v4796_v56 = vpop.f32.mrb[39].mxu0  ;;  %v4877_v34 = vmul.f32 %v4873_v55, %v4865_v57  ;;  %v4867_v15 = vpop.f32.mrb[43].mxu1 }
 0x4cf   : > { %v4876_v60 = vmul.f32 %v4873_v55, %v4796_v56  ;;  %v4878_v50 = vmul.f32 %v4873_v55, %v4867_v15 }
 0x4d0   : > { %v4884_v9 = vadd.f32 %v4882_v25, %v4875_v53  ;;  %v4886_v5 = vadd.f32 %v4882_v25, %v4877_v34 }
 0x4d1   : > { %v4885_v52 = vadd.f32 %v4882_v25, %v4876_v60  ;;  %v4887_v35 = vadd.f32 %v4882_v25, %v4878_v50 }
 0x4d2   : > { %v4888_v62 = vmax.f32 %v4884_v9, 0.0  ;;  %v4890_v18 = vmax.f32 %v4886_v5, 0.0 }
 0x4d3   : > { %v4889_v23 = vmax.f32 %v4885_v52, 0.0  ;;  %v4891_v2 = vmax.f32 %v4887_v35, 0.0 }
 0x4d4   : > { %4892 = vst [vmem:[%s293_s21] sm:$0xff] %v4888_v62  ;;  %4894 = vst [vmem:[%s293_s21 + $0x10] sm:$0xff] %v4890_v18 }
 0x4d5   : > { %4893 = vst [vmem:[%s293_s21 + $0x8] sm:$0xff] %v4889_v23  ;;  %4895 = vst [vmem:[%s293_s21 + $0x18] sm:$0xff] %v4891_v2 }
 0x4d6 PF: > { %s16_s25 = sadd.s32 1, %s5768_s25   ;;  %s9591_s21 = smov %s5760_s23 }
 0x4d7   : > { %p13_p8 = scmp.ge.s32.totalorder %s16_s25, 6   ;;  %s9592_s22 = smov %s5764_s24 }
 0x4d8   : > { %s9593_s23 = smov %s9596_s26  ;;  %s9594_s24 = smov %s9600_s27 }
 0x4d9   :  { %15 = sbr.rel (!%p13_p8) target bundleno = 3 (0x3), region = 77 }

// kernel: a_call__.2
= control target key start
LH: loop header
LB: loop body
LE: loop exit
PB: predicated region body
PF: predicated region fallthrough
CT: control target
= control target key end

     0   :  { %s8551_s30 = smov 0   ;;  %s8553_s10 = smov 0   ;;  %s13067_s0 = inlined_call_operand.vmem [shape: f32[2,4,16,16], index: 0, kind: input, shape index: {}]   ;;  %s13068_s1 = inlined_call_operand.vmem [shape: f32[2,8,32,32], index: 1, kind: input, shape index: {}]   ;;  %s13069_s2 = inlined_call_operand.vmem [shape: f32[2,18,16], index: 2, kind: input, shape index: {}]   ;;  %s13070_s3 = inlined_call_operand.vmem [shape: f32[16,34], index: 3, kind: input, shape index: {}]   ;;  %s13071_s4 = inlined_call_operand.vmem [shape: f32[2,18,32], index: 4, kind: input, shape index: {}]   ;;  %s13072_s5 = inlined_call_operand.vmem [shape: f32[32,34], index: 5, kind: input, shape index: {}]   ;;  %s13073_s6 = inlined_call_operand.vmem [shape: f32[8,108], index: 6, kind: input, shape index: {}]   ;;  %s13074_s7 = inlined_call_operand.vmem [shape: f32[8,1], index: 7, kind: input, shape index: {}]   ;;  %s13075_s8 = inlined_call_operand.vmem [shape: f32[8,1], index: 8, kind: input, shape index: {}]   ;;  %s13076_s9 = inlined_call_operand.vmem [shape: f32[2,8,1024], index: 9, kind: output, shape index: {}]  }
   0x1   :  { %s8555_s11 = smov 0   ;;  %s8557_s12 = smov 0  }
   0x2   :  { %s8559_s13 = smov 0  }
   0x3 LB: > { %s28_s14 = sadd.s32 1, %s8479_s11  ;;  %s31_s15 = sadd.s32 1, %s8483_s12  ;;  %s8487_s13 = sphi %s8559_s13, %s19_s13   ;;  %s8483_s12 = sphi %s8557_s12, %s14571_s12   ;;  %s8479_s11 = sphi %s8555_s11, %s14570_s11   ;;  %s8475_s10 = sphi %s8553_s10, %s14569_s10   ;;  %s8471_s30 = sphi %s8551_s30, %s14568_s30  }
   0x4   : > { %p29_p0 = scmp.ge.s32.totalorder %s28_s14, 2  ;;  %p7362_p1 = scmp.ge.s32.totalorder %s8487_s13, 1 }
   0x5   : > { %p331_p2 = scmp.lt.s32.totalorder %s8487_s13, 5 }
   0x6   : > { %s14573_s14 = smov (%p29_p0, %s28_s14), 0  ;;  %s14575_s15 = smov (!%p29_p0, %s31_s15), %s8483_s12 }
   0x7   : > { %p332_p3 = pnand %p7362_p1, %p331_p2  ;;  %p33_p4 = scmp.ge.s32.totalorder %s14575_s15, 2 }
   0x9   : > { %s14577_s15 = smov (%p33_p4, %s14575_s15), 0  ;;  %335 = sbr.rel (%p332_p3) target bundleno = 1503 (0x5df), region = 56 }
  0x10   : > { %v424_v0 = vld [vmem:[%s13070_s3] sm:$0xff]  ;;  %v425_v1 = vld [vmem:[%s13070_s3 + $0x8] sm:$0xff]  ;;  %p386_p5 = scmp.lt.s32.totalorder %s8475_s10, 1  ;;  %vm426_vm0 = vcmask 130048   ;;  %v8489_v11 = vmov 0.0|0.0   ;;  %vm8490_vm1 = vmmov 0  }
  0x11   : > { %v7840_v2 = vpack.c.bf16 %v425_v1, %v424_v0  ;;  %v13077_v12 = vmov 0.0   ;;  %p396_p6 = scmp.lt.s32.totalorder %s8471_s30, 1  ;;  %v920_v23 = vld [vmem:[%s13072_s5] sm:$0xff]  ;;  %v921_v24 = vld [vmem:[%s13072_s5 + $0x8] sm:$0xff]  ;;  %v922_v30 = vld [vmem:[%s13072_s5 + $0x10] sm:$0xff]  ;;  %vm924_vm2 = vcmask 261120  }
  0x12   : > { %s14579_s10 = smov (!%p386_p5, %s8475_s10), 1  ;;  %v7856_v28 = vpack.c.bf16 %v921_v24, %v920_v23  ;;  %v923_v31 = vld [vmem:[%s13072_s5 + $0x18] sm:$0xff]  ;;  %vm2081_vm3 = vcmask 1046528   ;;  %vm2310_vm4 = vcmask 1045504   ;;  %s8493_s16 = smov 126   ;;  %v2544_v24 = vlaneseq }
  0x13   : > { %7841 = vmatprep.subr.bf16.mxu0 %v7840_v2  ;;  %7972 = vmatprep.subr.bf16.mxu1 %v7840_v2  ;;  %s7456_s20 = sshll.u32 %s14579_s10, 6  ;;  %v7860_v33 = vpack.c.bf16 %v923_v31, %v922_v30  ;;  %vm6897_vm5 = vcmask 523264   ;;  %vm6912_vm6 = vcmask 785408   ;;  %vm7057_vm7 = vcmask 1043456  }
  0x14   : > { %7843 = vmatpush3.bf16.msra.mxu0 %v7840_v2  ;;  %7973 = vmatpush3.bf16.msra.mxu1 %v7840_v2  ;;  %s390_s23 = scalar_lea.vmem %s13067_s0, %s7456_s20  ;;  %s8498_s20 = smov 96   ;;  %vm8500_vm8 = vmmov 1   ;;  %vm7053_vm10 = vcmask 883712  }
  0x15   : > { %v416_v3 = vld [vmem:[%s390_s23] sm:$0xff]  ;;  %v417_v4 = vld [vmem:[%s390_s23 + $0x8] sm:$0xff]  ;;  %v418_v5 = vld [vmem:[%s390_s23 + $0x10] sm:$0xff]  ;;  %7844 = vmatprep.subr.bf16.mxu1 %v8489_v11  ;;  %7850 = vmatprep.subr.bf16.mxu0 %v8489_v11  ;;  %s8611_s24 = scalar_select %p396_p6, %s8471_s30, 1 }
  0x16   : > { %7584 = vmatprep.mubr.msk.f32.mxu0 %vm426_vm0, %v416_v3  ;;  %v422_v6 = vld [vmem:[%s390_s23 + $0x30] sm:$0xff]  ;;  %v423_v7 = vld [vmem:[%s390_s23 + $0x38] sm:$0xff]  ;;  %v420_v9 = vld [vmem:[%s390_s23 + $0x20] sm:$0xff] }
  0x17   : > { %7585 = vmatmul.mubr.msk.f32.vlgmr.msra.gmra.mrb[0].mxu0 %vm426_vm0, %v417_v4  ;;  %v419_v8 = vld [vmem:[%s390_s23 + $0x18] sm:$0xff]  ;;  %7593 = vmatprep.mubr.msk.f32.mxu1 %vm426_vm0, %v422_v6  ;;  %v421_v10 = vld [vmem:[%s390_s23 + $0x28] sm:$0xff]  ;;  %s7974_s25 = smul.u32 24, %s8611_s24  ;;  %s7457_s23 = sshll.u32 %s14579_s10, 8  ;;  %vm12932_vm9 = vmpackc.low %vm7057_vm7, %vm8500_vm8 }
  0x18   : > { %7587 = vmatprep.mubr.msk.f32.mxu0 %vm426_vm0, %v418_v5  ;;  %7594 = vmatmul.mubr.msk.f32.vlgmr.msra.gmra.mrb[0].mxu1 %vm426_vm0, %v423_v7  ;;  %s8649_s29 = scalar_lea.vmem %s13068_s1, %s7457_s23  ;;  %s8496_s24 = smov 64  }
  0x19   : > { %7600 = vmatprep.mubr.msk.f32.mxu1 %vm8490_vm1, %v13077_v12  ;;  %s400_s28 = scalar_lea.vmem %s13069_s2, %s7974_s25  ;;  %v888_v34 = vld [vmem:[%s8649_s29] sm:$0xff]  ;;  %v889_v35 = vld [vmem:[%s8649_s29 + $0x8] sm:$0xff]  ;;  %v890_v36 = vld [vmem:[%s8649_s29 + $0x10] sm:$0xff]  ;;  %s8865_s19 = scalar_lea.vmem %s13071_s4, %s7974_s25 }
  0x1a   : > { %v556_v19 = vld [vmem:[%s400_s28] sm:$0xff]  ;;  %v557_v26 = vld [vmem:[%s400_s28 + $0x8] sm:$0xff]  ;;  %v558_v32 = vld [vmem:[%s400_s28 + $0x10] sm:$0x3]  ;;  %s8492_s28 = smov 127   ;;  %s8497_s25 = smov 32  }
  0x1b   : > { %7588 = vmatmul.mubr.msk.f32.gmra.mrb[2].mxu0 %vm426_vm0, %v419_v8  ;;  %v891_v37 = vld [vmem:[%s8649_s29 + $0x18] sm:$0xff]  ;;  %v892_v38 = vld [vmem:[%s8649_s29 + $0x20] sm:$0xff]  ;;  %v893_v39 = vld [vmem:[%s8649_s29 + $0x28] sm:$0xff] }
  0x1c   : > { %7590 = vmatprep.mubr.msk.f32.mxu0 %vm426_vm0, %v420_v9  ;;  %v894_v40 = vld [vmem:[%s8649_s29 + $0x30] sm:$0xff]  ;;  %v895_v41 = vld [vmem:[%s8649_s29 + $0x38] sm:$0xff]  ;;  %v896_v42 = vld [vmem:[%s8649_s29 + $0x40] sm:$0xff] }
  0x1d   : > { %v897_v43 = vld [vmem:[%s8649_s29 + $0x48] sm:$0xff]  ;;  %v898_v44 = vld [vmem:[%s8649_s29 + $0x50] sm:$0xff]  ;;  %v899_v45 = vld [vmem:[%s8649_s29 + $0x58] sm:$0xff] }
  0x1e   : > { %v900_v46 = vld [vmem:[%s8649_s29 + $0x60] sm:$0xff]  ;;  %v901_v47 = vld [vmem:[%s8649_s29 + $0x68] sm:$0xff]  ;;  %v902_v48 = vld [vmem:[%s8649_s29 + $0x70] sm:$0xff] }
  0x1f   : > { %7591 = vmatmul.mubr.msk.f32.gmra.mrb[4].mxu0 %vm426_vm0, %v421_v10  ;;  %v903_v49 = vld [vmem:[%s8649_s29 + $0x78] sm:$0xff]  ;;  %v904_v50 = vld [vmem:[%s8649_s29 + $0x80] sm:$0xff]  ;;  %v905_v51 = vld [vmem:[%s8649_s29 + $0x88] sm:$0xff] }
  0x20   : > { %7626 = vmatprep.mubr.msk.f32.mxu0 %vm8490_vm1, %v13077_v12  ;;  %v906_v52 = vld [vmem:[%s8649_s29 + $0x90] sm:$0xff]  ;;  %v907_v53 = vld [vmem:[%s8649_s29 + $0x98] sm:$0xff]  ;;  %v908_v54 = vld [vmem:[%s8649_s29 + $0xa0] sm:$0xff] }
  0x21   : > { %v909_v55 = vld [vmem:[%s8649_s29 + $0xa8] sm:$0xff]  ;;  %v910_v56 = vld [vmem:[%s8649_s29 + $0xb0] sm:$0xff]  ;;  %v911_v57 = vld [vmem:[%s8649_s29 + $0xb8] sm:$0xff] }
  0x22   : > { %v912_v58 = vld [vmem:[%s8649_s29 + $0xc0] sm:$0xff]  ;;  %v913_v59 = vld [vmem:[%s8649_s29 + $0xc8] sm:$0xff]  ;;  %v914_v60 = vld [vmem:[%s8649_s29 + $0xd0] sm:$0xff] }
  0x23   : > { %v915_v61 = vld [vmem:[%s8649_s29 + $0xd8] sm:$0xff]  ;;  %v916_v62 = vld [vmem:[%s8649_s29 + $0xe0] sm:$0xff]  ;;  %v917_v63 = vld [vmem:[%s8649_s29 + $0xe8] sm:$0xff] }
  0x24   : > { %v918_v0 = vld [vmem:[%s8649_s29 + $0xf0] sm:$0xff]  ;;  %v919_v1 = vld [vmem:[%s8649_s29 + $0xf8] sm:$0xff] }
  0xea   : > { %v7586_v13 = vpop.f32.mrb[0].mxu0 }
  0xeb   : > { %v517_v14 = vpop.f32.mrb[1].mxu0  ;;  %v7595_v16 = vpop.f32.mrb[0].mxu1 }
  0xec   : > { %v7845_v15 = vpack.c.bf16 %v7586_v13, %v517_v14  ;;  %v547_v17 = vpop.f32.mrb[1].mxu1 }
  0xed   : > { %v7854_v20 = vpack.c.bf16 %v7595_v16, %v547_v17 }
  0xee   : > { %v7589_v18 = vpop.f32.mrb[2].mxu0  ;;  %7846 = vmatpush3.bf16.msra.mxu1 %v7845_v15 }
  0xef   : > { %v527_v21 = vpop.f32.mrb[3].mxu0  ;;  %7847 = vmatprep.subr.bf16.mxu1 %v8489_v11 }
  0xf0   : > { %v7848_v22 = vpack.c.bf16 %v7589_v18, %v527_v21 }
  0xf1   : > { %7601 = vmatmul.mubr.msk.f32.vlgmr.msra.gmra.mrb[2].mxu1 %vm426_vm0, %v556_v19 }
  0xf2   : > { %v7592_v25 = vpop.f32.mrb[4].mxu0  ;;  %7849 = vmatpush3.bf16.msra.mxu1 %v7848_v22  ;;  %7603 = vmatprep.mubr.msk.f32.mxu1 %vm8490_vm1, %v13077_v12  ;;  %v8494_v22 = vmov 1983009808  }
  0xf3   : > { %v537_v27 = vpop.f32.mrb[5].mxu0  ;;  %7853 = vmatprep.subr.bf16.mxu1 %v8489_v11  ;;  %v2542_v23 = vunpack.c.l.s4 %v8494_v22 }
  0xf4   : > { %v7851_v29 = vpack.c.bf16 %v7592_v25, %v537_v27 }
  0xf5   : > { %7604 = vmatmul.mubr.msk.f32.gmra.mrb[4].mxu1 %vm426_vm0, %v557_v26 }
  0xf6   : > { %7852 = vmatpush3.bf16.msra.mxu0 %v7851_v29  ;;  %7606 = vmatprep.mubr.msk.f32.mxu1 %vm8490_vm1, %v13077_v12 }
  0xf7   : > { %7857 = vmatprep.subr.bf16.mxu0 %v7856_v28 }
  0xf9   : > { %7607 = vmatmul.mubr.msk.f32.gmra.mrb[6].mxu1 %vm426_vm0, %v558_v32  ;;  %7627 = vmatmul.mubr.msk.f32.vlgmr.msra.gmra.mrb[6].mxu0 %vm426_vm0, %v556_v19 }
  0xfa   : > { %7613 = vmatprep.mubr.msk.f32.mxu1 %vm8490_vm1, %v13077_v12  ;;  %7629 = vmatprep.mubr.msk.f32.mxu0 %vm8490_vm1, %v13077_v12 }
  0xfb   : > { %7859 = vmatpush3.bf16.msra.mxu0 %v7856_v28 }
  0xfc   : > { %7861 = vmatprep.subr.bf16.mxu0 %v7860_v33 }
  0xfd   : > { %7614 = vmatmul.mubr.msk.f32.vlgmr.msra.gmra.mrb[8].mxu1 %vm426_vm0, %v556_v19  ;;  %7630 = vmatmul.mubr.msk.f32.gmra.mrb[8].mxu0 %vm426_vm0, %v557_v26 }
  0xfe   : > { %7616 = vmatprep.mubr.msk.f32.mxu1 %vm8490_vm1, %v13077_v12  ;;  %7632 = vmatprep.mubr.msk.f32.mxu0 %vm8490_vm1, %v13077_v12 }
  0xff   : > { %7863 = vmatpush3.bf16.msra.mxu0 %v7860_v33  ;;  %7855 = vmatpush3.bf16.msra.mxu1 %v7854_v20 }
 0x100   : > { %7864 = vmatprep.subr.bf16.mxu1 %v8489_v11  ;;  %7894 = vmatprep.subr.bf16.mxu0 %v8489_v11 }
 0x101   : > { %7617 = vmatmul.mubr.msk.f32.gmra.mrb[10].mxu1 %vm426_vm0, %v557_v26  ;;  %7633 = vmatmul.mubr.msk.f32.gmra.mrb[10].mxu0 %vm426_vm0, %v558_v32 }
 0x102   : > { %7619 = vmatprep.mubr.msk.f32.mxu1 %vm8490_vm1, %v13077_v12  ;;  %7656 = vmatprep.mubr.msk.f32.mxu0 %vm924_vm2, %v888_v34 }
 0x105   : > { %7620 = vmatmul.mubr.msk.f32.gmra.mrb[12].mxu1 %vm426_vm0, %v558_v32  ;;  %7657 = vmatmul.mubr.msk.f32.vlgmr.msra.gmra.mrb[12].mxu0 %vm924_vm2, %v889_v35 }
 0x106   : > { %7639 = vmatprep.mubr.msk.f32.mxu1 %vm8490_vm1, %v13077_v12  ;;  %7659 = vmatprep.mubr.msk.f32.mxu0 %vm924_vm2, %v890_v36 }
 0x109   : > { %7640 = vmatmul.mubr.msk.f32.vlgmr.msra.gmra.mrb[14].mxu1 %vm426_vm0, %v556_v19  ;;  %7660 = vmatmul.mubr.msk.f32.gmra.mrb[14].mxu0 %vm924_vm2, %v891_v37  ;;  %v2543_v37 = vunpack.c.0.s8 %v2542_v23 }
 0x10a   : > { %7642 = vmatprep.mubr.msk.f32.mxu1 %vm8490_vm1, %v13077_v12  ;;  %7662 = vmatprep.mubr.msk.f32.mxu0 %vm924_vm2, %v892_v38  ;;  %v8791_v38 = vshrl.u32 %v2544_v24, 7 }
 0x10d   : > { %7643 = vmatmul.mubr.msk.f32.gmra.mrb[16].mxu1 %vm426_vm0, %v557_v26  ;;  %7663 = vmatmul.mubr.msk.f32.gmra.mrb[16].mxu0 %vm924_vm2, %v893_v39 }
 0x10e   : > { %7645 = vmatprep.mubr.msk.f32.mxu1 %vm8490_vm1, %v13077_v12  ;;  %7665 = vmatprep.mubr.msk.f32.mxu0 %vm924_vm2, %v894_v40 }
 0x111   : > { %7646 = vmatmul.mubr.msk.f32.gmra.mrb[18].mxu1 %vm426_vm0, %v558_v32  ;;  %7666 = vmatmul.mubr.msk.f32.gmra.mrb[18].mxu0 %vm924_vm2, %v895_v41 }
 0x112   : > { %7668 = vmatprep.mubr.msk.f32.mxu0 %vm924_vm2, %v896_v42  ;;  %7712 = vmatprep.mubr.msk.f32.mxu1 %vm8490_vm1, %v13077_v12 }
 0x115   : > { %7669 = vmatmul.mubr.msk.f32.gmra.mrb[20].mxu0 %vm924_vm2, %v897_v43 }
 0x116   : > { %7671 = vmatprep.mubr.msk.f32.mxu0 %vm924_vm2, %v898_v44 }
 0x119   : > { %7672 = vmatmul.mubr.msk.f32.gmra.mrb[22].mxu0 %vm924_vm2, %v899_v45 }
 0x11a   : > { %7674 = vmatprep.mubr.msk.f32.mxu0 %vm924_vm2, %v900_v46 }
 0x11d   : > { %7675 = vmatmul.mubr.msk.f32.gmra.mrb[24].mxu0 %vm924_vm2, %v901_v47 }
 0x11e   : > { %7677 = vmatprep.mubr.msk.f32.mxu0 %vm924_vm2, %v902_v48 }
 0x121   : > { %7678 = vmatmul.mubr.msk.f32.gmra.mrb[26].mxu0 %vm924_vm2, %v903_v49 }
 0x122   : > { %7680 = vmatprep.mubr.msk.f32.mxu0 %vm924_vm2, %v904_v50 }
 0x125   : > { %7681 = vmatmul.mubr.msk.f32.gmra.mrb[28].mxu0 %vm924_vm2, %v905_v51 }
 0x126   : > { %7683 = vmatprep.mubr.msk.f32.mxu0 %vm924_vm2, %v906_v52 }
 0x129   : > { %7684 = vmatmul.mubr.msk.f32.gmra.mrb[30].mxu0 %vm924_vm2, %v907_v53 }
 0x12a   : > { %7686 = vmatprep.mubr.msk.f32.mxu0 %vm924_vm2, %v908_v54 }
 0x12d   : > { %7687 = vmatmul.mubr.msk.f32.gmra.mrb[32].mxu0 %vm924_vm2, %v909_v55  ;;  %v8818_v55 = vsub.s32 %v2543_v37, %v8791_v38 }
 0x12e   : > { %7689 = vmatprep.mubr.msk.f32.mxu0 %vm924_vm2, %v910_v56 }
 0x12f   : > { %13573 = vst [vmem:[#allocation2_spill] sm:$0xff] %v8818_v55 }
 0x131   : > { %7690 = vmatmul.mubr.msk.f32.gmra.mrb[34].mxu0 %vm924_vm2, %v911_v57 }
 0x132   : > { %7692 = vmatprep.mubr.msk.f32.mxu0 %vm924_vm2, %v912_v58 }
 0x135   : > { %7693 = vmatmul.mubr.msk.f32.gmra.mrb[36].mxu0 %vm924_vm2, %v913_v59 }
 0x136   : > { %7695 = vmatprep.mubr.msk.f32.mxu0 %vm924_vm2, %v914_v60 }
 0x139   : > { %7696 = vmatmul.mubr.msk.f32.gmra.mrb[38].mxu0 %vm924_vm2, %v915_v61 }
 0x13a   : > { %7698 = vmatprep.mubr.msk.f32.mxu0 %vm924_vm2, %v916_v62 }
 0x13d   : > { %7699 = vmatmul.mubr.msk.f32.gmra.mrb[40].mxu0 %vm924_vm2, %v917_v63 }
 0x13e   : > { %7701 = vmatprep.mubr.msk.f32.mxu0 %vm924_vm2, %v918_v0 }
 0x141   : > { %7702 = vmatmul.mubr.msk.f32.gmra.mrb[42].mxu0 %vm924_vm2, %v919_v1 }
 0x142   : > { %7797 = vmatprep.mubr.msk.f32.mxu0 %vm8490_vm1, %v13077_v12 }
 0x1c4   : > { %v8741_v2 = vpop.f32.mrb[2].mxu1 }
 0x1c5   : > { %1925 = vrot.lane.b32.xlu0 %v8741_v2, %s8492_s28  ;;  %v7602_v3 = vpop.f32.mrb[3].mxu1  ;;  %v2082_v4 = vrot.slane %v8741_v2, 1  ;;  %v2311_v5 = vrot.slane %v8741_v2, 2 }
 0x1c8   : > { %v8747_v6 = vpop.f32.mrb[4].mxu1 }
 0x1c9   : > { %1997 = vrot.lane.b32.xlu0 %v8741_v2, %s8493_s16  ;;  %v7605_v7 = vpop.f32.mrb[5].mxu1  ;;  %1999 = vrot.lane.b32.xlu1 %v8747_v6, %s8493_s16  ;;  %v2083_v8 = vrot.slane %v8747_v6, 1  ;;  %v2312_v9 = vrot.slane %v8747_v6, 2 }
 0x1cb   : > { %v8756_v10 = vsel %vm2081_vm3, %v2082_v4, %v2083_v8  ;;  %v8759_v13 = vsel %vm2310_vm4, %v2311_v5, %v2312_v9 }
 0x1cc   : > { %v644_v14 = vpop.f32.mrb[6].mxu1  ;;  %v8761_v15 = vpop.f32.mrb[6].mxu0 }
 0x1cd   : > { %v2085_v16 = vrot.slane %v644_v14, 1  ;;  %v2314_v17 = vrot.slane %v644_v14, 2  ;;  %v2539_v18 = vcombine.low %v8741_v2, %v8761_v15  ;;  %v2540_v19 = vcombine.high %v8741_v2, %v8761_v15  ;;  %1927 = vrot.lane.b32.xlu0 %v8747_v6, %s8492_s28  ;;  %v7628_v20 = vpop.f32.mrb[7].mxu0  ;;  %v7608_v21 = vpop.f32.mrb[7].mxu1 }
 0x1ce   : > { %v2092_v29 = vrot.slane %v8761_v15, 1  ;;  %v2321_v30 = vrot.slane %v8761_v15, 2 }
 0x1cf   : > { %v8770_v25 = vsel %vm2081_vm3, %v2083_v8, %v2085_v16  ;;  %v8773_v26 = vsel %vm2310_vm4, %v2312_v9, %v2314_v17  ;;  %v8871_v17 = vrot.slane %v2540_v19, %v8818_v55 }
 0x1d0   : > { %2168 = vrot.lane.b32.xlu1 %v8770_v25, %s8492_s28  ;;  %v8777_v27 = vpop.f32.mrb[8].mxu0  ;;  %v8779_v28 = vpop.f32.mrb[8].mxu1 }
 0x1d1   : > { %v4375_v31 = vcombine.low %v8747_v6, %v8777_v27  ;;  %v4376_v32 = vcombine.high %v8747_v6, %v8777_v27  ;;  %2166 = vrot.lane.b32.xlu0 %v8756_v10, %s8492_s28  ;;  %v7631_v33 = vpop.f32.mrb[9].mxu0  ;;  %v7615_v34 = vpop.f32.mrb[9].mxu1  ;;  %v2093_v35 = vrot.slane %v8777_v27, 1  ;;  %v2322_v36 = vrot.slane %v8777_v27, 2 }
 0x1d2   : > { %v2087_v41 = vrot.slane %v8779_v28, 1  ;;  %v2316_v42 = vrot.slane %v8779_v28, 2  ;;  %v8898_v33 = vld [vmem:[%s8865_s19] sm:$0xff] }
 0x1d3   : > { %v8794_v39 = vsel %vm2081_vm3, %v2092_v29, %v2093_v35  ;;  %v8797_v40 = vsel %vm2310_vm4, %v2321_v30, %v2322_v36  ;;  %v8881_v23 = vrot.slane %v4375_v31, %v8818_v55  ;;  %v8884_v2 = vrot.slane %v4376_v32, %v8818_v55 }
 0x1d4   : > { %2240 = vrot.lane.b32.xlu1 %v8770_v25, %s8493_s16  ;;  %v804_v43 = vpop.f32.mrb[10].mxu0  ;;  %v8803_v44 = vpop.f32.mrb[10].mxu1  ;;  %v3115_v45 = vcombine.low %v8756_v10, %v8794_v39  ;;  %v3116_v46 = vcombine.high %v8756_v10, %v8794_v39  ;;  %v3763_v47 = vcombine.low %v8759_v13, %v8797_v40  ;;  %v3764_v48 = vcombine.high %v8759_v13, %v8797_v40 }
 0x1d5   : > { %v2095_v49 = vrot.slane %v804_v43, 1  ;;  %v2324_v50 = vrot.slane %v804_v43, 2  ;;  %2238 = vrot.lane.b32.xlu0 %v8756_v10, %s8493_s16  ;;  %v7634_v51 = vpop.f32.mrb[11].mxu0  ;;  %v7618_v52 = vpop.f32.mrb[11].mxu1  ;;  %v2088_v53 = vrot.slane %v8803_v44, 1  ;;  %v2317_v54 = vrot.slane %v8803_v44, 2 }
 0x1d6   : > { %v8854_v10 = vrot.slane %v2539_v18, %v8818_v55  ;;  %v8887_v24 = vrot.slane %v3115_v45, %v8818_v55  ;;  %v8905_v34 = vrot.slane %v3116_v46, %v8818_v55 }
 0x1d7   : > { %v8821_v56 = vsel %vm2081_vm3, %v2093_v35, %v2095_v49  ;;  %v8824_v57 = vsel %vm2310_vm4, %v2322_v36, %v2324_v50  ;;  %v8827_v58 = vsel %vm2081_vm3, %v2087_v41, %v2088_v53  ;;  %v8830_v59 = vsel %vm2310_vm4, %v2316_v42, %v2317_v54 }
 0x1d8   : > { %2397 = vrot.lane.b32.xlu1 %v8773_v26, %s8492_s28  ;;  %v7658_v60 = vpop.f32.mrb[12].mxu0  ;;  %v724_v61 = vpop.f32.mrb[12].mxu1  ;;  %v4951_v62 = vcombine.low %v8770_v25, %v8821_v56  ;;  %v4952_v63 = vcombine.high %v8770_v25, %v8821_v56  ;;  %v5599_v0 = vcombine.low %v8773_v26, %v8824_v57  ;;  %v5600_v1 = vcombine.high %v8773_v26, %v8824_v57 }
 0x1d9   : > { %2395 = vrot.lane.b32.xlu0 %v8759_v13, %s8492_s28  ;;  %v1087_v3 = vpop.f32.mrb[13].mxu0  ;;  %v2090_v4 = vrot.slane %v724_v61, 1  ;;  %v2319_v5 = vrot.slane %v724_v61, 2  ;;  %v7621_v6 = vpop.f32.mrb[13].mxu1  ;;  %13574 = vst [vmem:[#allocation3_spill] sm:$0xff] %v8887_v24  ;;  %13575 = vst [vmem:[#allocation4_spill] sm:$0xff] %v8905_v34  ;;  %v8908_v35 = vrot.slane %v3763_v47, %v8818_v55  ;;  %v8911_v36 = vrot.slane %v3764_v48, %v8818_v55 }
 0x1da   : > { %v7865_v7 = vpack.c.bf16 %v7658_v60, %v1087_v3  ;;  %v8931_v51 = vrot.slane %v4951_v62, %v8818_v55  ;;  %v8934_v52 = vrot.slane %v4952_v63, %v8818_v55  ;;  %v8943_v60 = vld [vmem:[%s8865_s19 + $0x8] sm:$0xff] }
 0x1db   : > { %v8845_v8 = vsel %vm2081_vm3, %v2088_v53, %v2090_v4  ;;  %v8848_v9 = vsel %vm2310_vm4, %v2317_v54, %v2319_v5 }
 0x1dc   : > { %2469 = vrot.lane.b32.xlu1 %v8773_v26, %s8493_s16  ;;  %v8858_v14 = vpop.f32.mrb[14].mxu1  ;;  %v7661_v16 = vpop.f32.mrb[14].mxu0  ;;  %7866 = vmatpush3.bf16.msra.mxu1 %v7865_v7  ;;  %13576 = vst [vmem:[#allocation5_spill] sm:$0xff] %v8931_v51  ;;  %13577 = vst [vmem:[#allocation6_spill] sm:$0xff] %v8934_v52 }
 0x1dd   : > { %v2555_v18 = vcombine.low %v8779_v28, %v8858_v14  ;;  %v2556_v20 = vcombine.high %v8779_v28, %v8858_v14  ;;  %2467 = vrot.lane.b32.xlu0 %v8759_v13, %s8493_s16  ;;  %v1097_v21 = vpop.f32.mrb[15].mxu0  ;;  %v7641_v22 = vpop.f32.mrb[15].mxu1  ;;  %7867 = vmatprep.subr.bf16.mxu1 %v8489_v11  ;;  %v2097_v13 = vrot.slane %v8858_v14, 1  ;;  %v2326_v30 = vrot.slane %v8858_v14, 2 }
 0x1de   : > { %v7868_v19 = vpack.c.bf16 %v7661_v16, %v1097_v21 }
 0x1df   : > { %v8890_v25 = vrot.slane %v2555_v18, %v8818_v55  ;;  %v8893_v29 = vrot.slane %v2556_v20, %v8818_v55 }
 0x1e0   : > { %1929 = vrot.lane.b32.xlu1 %v8779_v28, %s8492_s28  ;;  %v8902_v31 = vpop.f32.mrb[16].mxu1  ;;  %v7664_v32 = vpop.f32.mrb[16].mxu0  ;;  %7869 = vmatpush3.bf16.msra.mxu1 %v7868_v19 }
 0x1e1   : > { %v4391_v37 = vcombine.low %v8803_v44, %v8902_v31  ;;  %v4392_v41 = vcombine.high %v8803_v44, %v8902_v31  ;;  %1933 = vrot.lane.b32.xlu0 %v8761_v15, %s8492_s28  ;;  %v1107_v42 = vpop.f32.mrb[17].mxu0  ;;  %v7644_v43 = vpop.f32.mrb[17].mxu1  ;;  %7870 = vmatprep.subr.bf16.mxu1 %v8489_v11  ;;  %v2098_v45 = vrot.slane %v8902_v31, 1  ;;  %v2327_v46 = vrot.slane %v8902_v31, 2 }
 0x1e2   : > { %v7871_v47 = vpack.c.bf16 %v7664_v32, %v1107_v42  ;;  %v8987_v42 = vld [vmem:[%s8865_s19 + $0x10] sm:$0x3] }
 0x1e3   : > { %7713 = vmatmul.mubr.msk.f32.vlgmr.msra.gmra.mrb[20].mxu1 %vm924_vm2, %v8898_v33  ;;  %v8937_v53 = vsel %vm2081_vm3, %v2097_v13, %v2098_v45  ;;  %v8940_v54 = vsel %vm2310_vm4, %v2326_v30, %v2327_v46  ;;  %v8954_v5 = vrot.slane %v4391_v37, %v8818_v55 }
 0x1e4   : > { %v884_v61 = vpop.f32.mrb[18].mxu1  ;;  %1935 = vrot.lane.b32.xlu1 %v8777_v27, %s8492_s28  ;;  %v7667_v3 = vpop.f32.mrb[18].mxu0  ;;  %7872 = vmatpush3.bf16.msra.mxu1 %v7871_v47  ;;  %v3131_v62 = vcombine.low %v8827_v58, %v8937_v53  ;;  %v3132_v63 = vcombine.high %v8827_v58, %v8937_v53  ;;  %v3779_v4 = vcombine.low %v8830_v59, %v8940_v54 }
 0x1e5   : > { %v2100_v6 = vrot.slane %v884_v61, 1  ;;  %v2329_v7 = vrot.slane %v884_v61, 2  ;;  %2005 = vrot.lane.b32.xlu0 %v8761_v15, %s8493_s16  ;;  %v1117_v16 = vpop.f32.mrb[19].mxu0  ;;  %7715 = vmatprep.mubr.msk.f32.mxu1 %vm8490_vm1, %v13077_v12  ;;  %v3780_v18 = vcombine.high %v8830_v59, %v8940_v54  ;;  %v7647_v20 = vpop.f32.mrb[19].mxu1  ;;  %v8973_v15 = vrot.slane %v4392_v41, %v8818_v55 }
 0x1e6   : > { %v7874_v21 = vpack.c.bf16 %v7667_v3, %v1117_v16  ;;  %7873 = vmatprep.subr.bf16.mxu1 %v8489_v11  ;;  %v8964_v22 = vrot.slane %v3131_v62, %v8818_v55  ;;  %v8967_v19 = vrot.slane %v3132_v63, %v8818_v55  ;;  %v8970_v13 = vrot.slane %v3779_v4, %v8818_v55 }
 0x1e7   : > { %7716 = vmatmul.mubr.msk.f32.gmra.mrb[22].mxu1 %vm924_vm2, %v8943_v60  ;;  %v8978_v30 = vsel %vm2081_vm3, %v2098_v45, %v2100_v6  ;;  %v8981_v32 = vrot.slane %v3780_v18, %v8818_v55  ;;  %v8984_v37 = vsel %vm2310_vm4, %v2327_v46, %v2329_v7  ;;  %v9054_v41 = vrot.slane %v5600_v1, %v8818_v55 }
 0x1e8   : > { %13578 = vst [vmem:[#allocation7_spill] sm:$0xff] %v8964_v22  ;;  %13579 = vst [vmem:[#allocation8_spill] sm:$0xff] %v8967_v19  ;;  %2007 = vrot.lane.b32.xlu1 %v8777_v27, %s8493_s16  ;;  %v7670_v43 = vpop.f32.mrb[20].mxu0  ;;  %7875 = vmatpush3.bf16.msra.mxu1 %v7874_v21  ;;  %v4967_v61 = vcombine.low %v8845_v8, %v8978_v30  ;;  %v4968_v3 = vcombine.high %v8845_v8, %v8978_v30 }
 0x1e9   : > { %2001 = vrot.lane.b32.xlu0 %v8779_v28, %s8493_s16  ;;  %v1127_v46 = vpop.f32.mrb[21].mxu0  ;;  %7718 = vmatprep.mubr.msk.f32.mxu1 %vm8490_vm1, %v13077_v12  ;;  %v5615_v18 = vcombine.low %v8848_v9, %v8984_v37  ;;  %v9034_v21 = vrot.slane %v5599_v0, %v8818_v55 }
 0x1ea   : > { %v7877_v62 = vpack.c.bf16 %v7670_v43, %v1127_v46  ;;  %7876 = vmatprep.subr.bf16.mxu1 %v8489_v11  ;;  %v9017_v6 = vrot.slane %v4967_v61, %v8818_v55  ;;  %v9020_v7 = vrot.slane %v4968_v3, %v8818_v55  ;;  %v5616_v43 = vcombine.high %v8848_v9, %v8984_v37 }
 0x1eb   : > { %7719 = vmatmul.mubr.msk.f32.gmra.mrb[24].mxu1 %vm924_vm2, %v8987_v42  ;;  %13582 = vst [vmem:[#allocation11_spill] sm:$0xff] %v9034_v21  ;;  %v9057_v28 = vrot.slane %v5615_v18, %v8818_v55 }
 0x1ec   : > { %13580 = vst [vmem:[#allocation9_spill] sm:$0xff] %v9017_v6  ;;  %13581 = vst [vmem:[#allocation10_spill] sm:$0xff] %v9020_v7  ;;  %1931 = vrot.lane.b32.xlu1 %v8803_v44, %s8492_s28  ;;  %v7673_v20 = vpop.f32.mrb[22].mxu0  ;;  %7729 = vmatprep.mubr.msk.f32.mxu1 %vm8490_vm1, %v13077_v12  ;;  %v9060_v3 = vrot.slane %v5616_v43, %v8818_v55 }
 0x1ed   : > { %2174 = vrot.lane.b32.xlu0 %v8794_v39, %s8492_s28  ;;  %v1137_v61 = vpop.f32.mrb[23].mxu0  ;;  %13583 = vst [vmem:[#allocation12_spill] sm:$0xff] %v9057_v28 }
 0x1ee   : > { %v7880_v45 = vpack.c.bf16 %v7673_v20, %v1137_v61 }
 0x1ef   : > { %7730 = vmatmul.mubr.msk.f32.vlgmr.msra.gmra.mrb[26].mxu1 %vm924_vm2, %v8898_v33 }
 0x1f0   : > { %7878 = vmatpush3.bf16.msra.mxu1 %v7877_v62  ;;  %2003 = vrot.lane.b32.xlu1 %v8803_v44, %s8493_s16  ;;  %v7676_v18 = vpop.f32.mrb[24].mxu0 }
 0x1f1   : > { %2246 = vrot.lane.b32.xlu0 %v8794_v39, %s8493_s16  ;;  %v1147_v47 = vpop.f32.mrb[25].mxu0  ;;  %7732 = vmatprep.mubr.msk.f32.mxu1 %vm8490_vm1, %v13077_v12 }
 0x1f2   : > { %v7883_v62 = vpack.c.bf16 %v7676_v18, %v1147_v47  ;;  %7879 = vmatprep.subr.bf16.mxu1 %v8489_v11 }
 0x1f3   : > { %7733 = vmatmul.mubr.msk.f32.gmra.mrb[28].mxu1 %vm924_vm2, %v8943_v60 }
 0x1f4   : > { %7881 = vmatpush3.bf16.msra.mxu1 %v7880_v45  ;;  %2176 = vrot.lane.b32.xlu1 %v8821_v56, %s8492_s28  ;;  %v7679_v61 = vpop.f32.mrb[26].mxu0 }
 0x1f5   : > { %2403 = vrot.lane.b32.xlu0 %v8797_v40, %s8492_s28  ;;  %v1157_v39 = vpop.f32.mrb[27].mxu0  ;;  %7735 = vmatprep.mubr.msk.f32.mxu1 %vm8490_vm1, %v13077_v12 }
 0x1f6   : > { %v7886_v43 = vpack.c.bf16 %v7679_v61, %v1157_v39  ;;  %7882 = vmatprep.subr.bf16.mxu1 %v8489_v11 }
 0x1f7   : > { %7736 = vmatmul.mubr.msk.f32.gmra.mrb[30].mxu1 %vm924_vm2, %v8987_v42 }
 0x1f8   : > { %2248 = vrot.lane.b32.xlu1 %v8821_v56, %s8493_s16  ;;  %v7682_v45 = vpop.f32.mrb[28].mxu0  ;;  %7746 = vmatprep.mubr.msk.f32.mxu1 %vm8490_vm1, %v13077_v12 }
 0x1f9   : > { %2475 = vrot.lane.b32.xlu0 %v8797_v40, %s8493_s16  ;;  %v1167_v47 = vpop.f32.mrb[29].mxu0 }
 0x1fa   : > { %v7889_v18 = vpack.c.bf16 %v7682_v45, %v1167_v47 }
 0x1fb   : > { %7747 = vmatmul.mubr.msk.f32.vlgmr.msra.gmra.mrb[32].mxu1 %vm924_vm2, %v8898_v33 }
 0x1fc   : > { %7884 = vmatpush3.bf16.msra.mxu1 %v7883_v62  ;;  %2405 = vrot.lane.b32.xlu1 %v8824_v57, %s8492_s28  ;;  %v7685_v61 = vpop.f32.mrb[30].mxu0 }
 0x1fd   : > { %2170 = vrot.lane.b32.xlu0 %v8827_v58, %s8492_s28  ;;  %v1177_v56 = vpop.f32.mrb[31].mxu0  ;;  %7749 = vmatprep.mubr.msk.f32.mxu1 %vm8490_vm1, %v13077_v12 }
 0x1fe   : > { %v7892_v39 = vpack.c.bf16 %v7685_v61, %v1177_v56  ;;  %7885 = vmatprep.subr.bf16.mxu1 %v8489_v11 }
 0x1ff   : > { %7750 = vmatmul.mubr.msk.f32.gmra.mrb[34].mxu1 %vm924_vm2, %v8943_v60 }
 0x200   : > { %7887 = vmatpush3.bf16.msra.mxu1 %v7886_v43  ;;  %2477 = vrot.lane.b32.xlu1 %v8824_v57, %s8493_s16  ;;  %v7688_v40 = vpop.f32.mrb[32].mxu0 }
 0x201   : > { %2242 = vrot.lane.b32.xlu0 %v8827_v58, %s8493_s16  ;;  %v1187_v62 = vpop.f32.mrb[33].mxu0  ;;  %7752 = vmatprep.mubr.msk.f32.mxu1 %vm8490_vm1, %v13077_v12 }
 0x202   : > { %v7895_v45 = vpack.c.bf16 %v7688_v40, %v1187_v62  ;;  %7888 = vmatprep.subr.bf16.mxu1 %v8489_v11 }
 0x203   : > { %7753 = vmatmul.mubr.msk.f32.gmra.mrb[36].mxu1 %vm924_vm2, %v8987_v42 }
 0x204   : > { %2172 = vrot.lane.b32.xlu1 %v8845_v8, %s8492_s28  ;;  %7896 = vmatpush3.bf16.msra.mxu0 %v7895_v45  ;;  %v7691_v43 = vpop.f32.mrb[34].mxu0 }
 0x205   : > { %2399 = vrot.lane.b32.xlu0 %v8830_v59, %s8492_s28  ;;  %7763 = vmatprep.mubr.msk.f32.mxu1 %vm8490_vm1, %v13077_v12  ;;  %v1197_v57 = vpop.f32.mrb[35].mxu0 }
 0x206   : > { %v7898_v58 = vpack.c.bf16 %v7691_v43, %v1197_v57  ;;  %7897 = vmatprep.subr.bf16.mxu0 %v8489_v11 }
 0x207   : > { %7764 = vmatmul.mubr.msk.f32.vlgmr.msra.gmra.mrb[38].mxu1 %vm924_vm2, %v8898_v33 }
 0x208   : > { %7890 = vmatpush3.bf16.msra.mxu1 %v7889_v18  ;;  %2244 = vrot.lane.b32.xlu1 %v8845_v8, %s8493_s16  ;;  %v7694_v47 = vpop.f32.mrb[36].mxu0 }
 0x209   : > { %2471 = vrot.lane.b32.xlu0 %v8830_v59, %s8493_s16  ;;  %7766 = vmatprep.mubr.msk.f32.mxu1 %vm8490_vm1, %v13077_v12  ;;  %v1207_v61 = vpop.f32.mrb[37].mxu0 }
 0x20a   : > { %7891 = vmatprep.subr.bf16.mxu1 %v8489_v11  ;;  %7899 = vmatpush3.bf16.msra.mxu0 %v7898_v58  ;;  %v7901_v56 = vpack.c.bf16 %v7694_v47, %v1207_v61 }
 0x20b   : > { %7767 = vmatmul.mubr.msk.f32.gmra.mrb[40].mxu1 %vm924_vm2, %v8943_v60  ;;  %7906 = vmatprep.subr.bf16.mxu0 %v8489_v11 }
 0x20c   : > { %7893 = vmatpush3.bf16.msra.mxu1 %v7892_v39  ;;  %2401 = vrot.lane.b32.xlu1 %v8848_v9, %s8492_s28  ;;  %v7697_v8 = vpop.f32.mrb[38].mxu0 }
 0x20d   : > { %1937 = vrot.lane.b32.xlu0 %v8858_v14, %s8492_s28  ;;  %7769 = vmatprep.mubr.msk.f32.mxu1 %vm8490_vm1, %v13077_v12  ;;  %v1217_v59 = vpop.f32.mrb[39].mxu0 }
 0x20e   : > { %v7904_v18 = vpack.c.bf16 %v7697_v8, %v1217_v59  ;;  %7798 = vmatmul.mubr.msk.f32.vlgmr.msra.gmra.mrb[44].mxu0 %vm924_vm2, %v8898_v33  ;;  %7900 = vmatprep.subr.bf16.mxu1 %v8489_v11 }
 0x20f   : > { %7770 = vmatmul.mubr.msk.f32.gmra.mrb[42].mxu1 %vm924_vm2, %v8987_v42  ;;  %7800 = vmatprep.mubr.msk.f32.mxu0 %vm8490_vm1, %v13077_v12 }
 0x210   : > { %2473 = vrot.lane.b32.xlu1 %v8848_v9, %s8493_s16  ;;  %7780 = vmatprep.mubr.msk.f32.mxu1 %vm8490_vm1, %v13077_v12  ;;  %v7700_v39 = vpop.f32.mrb[40].mxu0 }
 0x211   : > { %2009 = vrot.lane.b32.xlu0 %v8858_v14, %s8493_s16  ;;  %v1227_v40 = vpop.f32.mrb[41].mxu0 }
 0x212   : > { %v7907_v62 = vpack.c.bf16 %v7700_v39, %v1227_v40  ;;  %7801 = vmatmul.mubr.msk.f32.gmra.mrb[46].mxu0 %vm924_vm2, %v8943_v60 }
 0x213   : > { %7781 = vmatmul.mubr.msk.f32.vlgmr.msra.gmra.mrb[44].mxu1 %vm924_vm2, %v8898_v33  ;;  %7803 = vmatprep.mubr.msk.f32.mxu0 %vm8490_vm1, %v13077_v12 }
 0x214   : > { %1939 = vrot.lane.b32.xlu1 %v8902_v31, %s8492_s28  ;;  %7783 = vmatprep.mubr.msk.f32.mxu1 %vm8490_vm1, %v13077_v12  ;;  %v7703_v9 = vpop.f32.mrb[42].mxu0 }
 0x215   : > { %2178 = vrot.lane.b32.xlu0 %v8937_v53, %s8492_s28  ;;  %7902 = vmatpush3.bf16.msra.mxu1 %v7901_v56  ;;  %v1237_v14 = vpop.f32.mrb[43].mxu0 }
 0x216   : > { %7908 = vmatpush3.bf16.msra.mxu0 %v7907_v62  ;;  %v7910_v45 = vpack.c.bf16 %v7703_v9, %v1237_v14  ;;  %7903 = vmatprep.subr.bf16.mxu1 %v8489_v11 }
 0x217   : > { %7784 = vmatmul.mubr.msk.f32.gmra.mrb[46].mxu1 %vm924_vm2, %v8943_v60  ;;  %7804 = vmatmul.mubr.msk.f32.gmra.mrb[48].mxu0 %vm924_vm2, %v8987_v42 }
 0x218   : > { %2011 = vrot.lane.b32.xlu1 %v8902_v31, %s8493_s16  ;;  %7786 = vmatprep.mubr.msk.f32.mxu1 %vm8490_vm1, %v13077_v12 }
 0x219   : > { %2250 = vrot.lane.b32.xlu0 %v8937_v53, %s8493_s16  ;;  %7909 = vmatprep.subr.bf16.mxu0 %v8489_v11 }
 0x21a   : > { %7905 = vmatpush3.bf16.msra.mxu1 %v7904_v18  ;;  %7911 = vmatpush3.bf16.msra.mxu0 %v7910_v45 }
 0x21b   : > { %7787 = vmatmul.mubr.msk.f32.gmra.mrb[48].mxu1 %vm924_vm2, %v8987_v42  ;;  %7831 = vmatprep.mubr.msk.f32.mxu0 %vm8490_vm1, %v13077_v12 }
 0x21c   : > { %2180 = vrot.lane.b32.xlu1 %v8978_v30, %s8492_s28  ;;  %7814 = vmatprep.mubr.msk.f32.mxu1 %vm8490_vm1, %v13077_v12 }
 0x21d   : > { %2407 = vrot.lane.b32.xlu0 %v8940_v54, %s8492_s28  ;;  %7832 = vmatmul.mubr.msk.f32.vlgmr.msra.gmra.mrb[50].mxu0 %vm924_vm2, %v8898_v33 }
 0x21e   : > { %7834 = vmatprep.mubr.msk.f32.mxu0 %vm8490_vm1, %v13077_v12 }
 0x21f   : > { %7815 = vmatmul.mubr.msk.f32.vlgmr.msra.gmra.mrb[50].mxu1 %vm924_vm2, %v8898_v33 }
 0x220   : > { %2252 = vrot.lane.b32.xlu1 %v8978_v30, %s8493_s16  ;;  %7817 = vmatprep.mubr.msk.f32.mxu1 %vm8490_vm1, %v13077_v12 }
 0x221   : > { %2479 = vrot.lane.b32.xlu0 %v8940_v54, %s8493_s16  ;;  %7835 = vmatmul.mubr.msk.f32.gmra.mrb[52].mxu0 %vm924_vm2, %v8943_v60 }
 0x222   : > { %7837 = vmatprep.mubr.msk.f32.mxu0 %vm8490_vm1, %v13077_v12 }
 0x223   : > { %7818 = vmatmul.mubr.msk.f32.gmra.mrb[52].mxu1 %vm924_vm2, %v8943_v60 }
 0x224   : > { %2409 = vrot.lane.b32.xlu1 %v8984_v37, %s8492_s28  ;;  %7820 = vmatprep.mubr.msk.f32.mxu1 %vm8490_vm1, %v13077_v12 }
 0x225   : > { %7838 = vmatmul.mubr.msk.f32.gmra.mrb[54].mxu0 %vm924_vm2, %v8987_v42 }
 0x226   : > { %7205 = vmatprep.mubr.f32.mxu0 %v13077_v12 }
 0x227   : > { %7821 = vmatmul.mubr.msk.f32.gmra.mrb[54].mxu1 %vm924_vm2, %v8987_v42 }
 0x228   : > { %2481 = vrot.lane.b32.xlu1 %v8984_v37, %s8493_s16  ;;  %7134 = vmatprep.mubr.f32.mxu1 %v13077_v12 }
 0x237   : > { %v9232_v53 = vpop.permute.xlu0 %1925 }
 0x23b   : > { %v9226_v11 = vpop.permute.xlu1 %1999  ;;  %v9238_v30 = vpop.permute.xlu0 %1997 }
 0x23c   : > { %13584 = vst [vmem:[#allocation13_spill] sm:$0xff] %v9226_v11  ;;  %13589 = vst [vmem:[#allocation18_spill] sm:$0xff] %v9238_v30 }
 0x23f   : > { %v9242_v43 = vpop.permute.xlu0 %1927 }
 0x242   : > { %v9228_v33 = vpop.permute.xlu1 %2168 }
 0x243   : > { %13585 = vst [vmem:[#allocation14_spill] sm:$0xff] %v9228_v33  ;;  %v9248_v58 = vpop.permute.xlu0 %2166 }
 0x244   : > { %13591 = vst [vmem:[#allocation20_spill] sm:$0xff] %v9248_v58 }
 0x246   : > { %v9230_v31 = vpop.permute.xlu1 %2240 }
 0x247   : > { %13586 = vst [vmem:[#allocation15_spill] sm:$0xff] %v9230_v31  ;;  %v9252_v61 = vpop.permute.xlu0 %2238 }
 0x248   : > { %13592 = vst [vmem:[#allocation21_spill] sm:$0xff] %v9252_v61 }
 0x24a   : > { %v9234_v54 = vpop.permute.xlu1 %2397 }
 0x24b   : > { %13587 = vst [vmem:[#allocation16_spill] sm:$0xff] %v9234_v54  ;;  %v9258_v59 = vpop.permute.xlu0 %2395 }
 0x24c   : > { %13595 = vst [vmem:[#allocation24_spill] sm:$0xff] %v9258_v59 }
 0x24e   : > { %v9236_v60 = vpop.permute.xlu1 %2469 }
 0x24f   : > { %13588 = vst [vmem:[#allocation17_spill] sm:$0xff] %v9236_v60  ;;  %v9262_v39 = vpop.permute.xlu0 %2467 }
 0x250   : > { %13597 = vst [vmem:[#allocation26_spill] sm:$0xff] %v9262_v39 }
 0x252   : > { %v9240_v42 = vpop.permute.xlu1 %1929 }
 0x253   : > { %v9268_v9 = vpop.permute.xlu0 %1933 }
 0x256   : > { %v9244_v37 = vpop.permute.xlu1 %1935 }
 0x257   : > { %v9272_v45 = vpop.permute.xlu0 %2005  ;;  %v4543_v34 = vcombine.low %v9242_v43, %v9244_v37  ;;  %v4544_v58 = vcombine.high %v9242_v43, %v9244_v37  ;;  %v13642_v43 = vcombine.high %v9054_v41, %v9060_v3 }
 0x258   : > { %13601 = vst [vmem:[#allocation30_spill] sm:$0xff] %v9272_v45 }
 0x25a   : > { %v9246_v57 = vpop.permute.xlu1 %2007 }
 0x25b   : > { %13590 = vst [vmem:[#allocation19_spill] sm:$0xff] %v9246_v57  ;;  %v9278_v44 = vpop.permute.xlu0 %2001  ;;  %v4784_v20 = vcombine.high %v9226_v11, %v9246_v57 }
 0x25c   : > { %13604 = vst [vmem:[#allocation33_spill] sm:$0xff] %v9278_v44 }
 0x25d   : > { %v9295_v50 = vrot.slane %v4784_v20, %v8818_v55  ;;  %v8495_v20 = vmov 1934713408  }
 0x25e   : > { %v9250_v47 = vpop.permute.xlu1 %1931 }
 0x25f   : > { %v9282_v4 = vpop.permute.xlu0 %2174  ;;  %13609 = vst [vmem:[#allocation38_spill] sm:$0xff] %v9295_v50 }
 0x260   : > { %13606 = vst [vmem:[#allocation35_spill] sm:$0xff] %v9282_v4  ;;  %v4558_v4 = vrot.slane %v4544_v58, %v8818_v55 }
 0x262   : > { %v9254_v56 = vpop.permute.xlu1 %2003 }
 0x263   : > { %13593 = vst [vmem:[#allocation22_spill] sm:$0xff] %v9254_v56  ;;  %v9286_v1 = vpop.permute.xlu0 %2246 }
 0x264   : > { %13607 = vst [vmem:[#allocation36_spill] sm:$0xff] %v9286_v1 }
 0x266   : > { %v9256_v8 = vpop.permute.xlu1 %2176 }
 0x267   : > { %13594 = vst [vmem:[#allocation23_spill] sm:$0xff] %v9256_v8  ;;  %v9297_v46 = vpop.permute.xlu0 %2403 }
 0x268   : > { %13610 = vst [vmem:[#allocation39_spill] sm:$0xff] %v9297_v46 }
 0x26a   : > { %v9260_v18 = vpop.permute.xlu1 %2248 }
 0x26b   : > { %13596 = vst [vmem:[#allocation25_spill] sm:$0xff] %v9260_v18 }
 0x26e   : > { %v9264_v40 = vpop.permute.xlu1 %2405 }
 0x26f   : > { %13598 = vst [vmem:[#allocation27_spill] sm:$0xff] %v9264_v40 }
 0x272   : > { %v9266_v62 = vpop.permute.xlu1 %2477 }
 0x273   : > { %13599 = vst [vmem:[#allocation28_spill] sm:$0xff] %v9266_v62  ;;  %v2606_v62 = vunpack.c.l.s4 %v8495_v20 }
 0x275   : > { %v2607_v48 = vunpack.c.0.s8 %v2606_v62 }
 0x276   : > { %v9270_v14 = vpop.permute.xlu1 %2172 }
 0x277   : > { %13600 = vst [vmem:[#allocation29_spill] sm:$0xff] %v9270_v14  ;;  %v9339_v33 = vsub.s32 %v2607_v48, %v8791_v38  ;;  %v13618_v48 = vcombine.high %v8854_v10, %v8890_v25 }
 0x279   : > { %v9474_v37 = vrot.slane %v13642_v43, %v9339_v33  ;;  %v13646_v43 = vcombine.low %v9034_v21, %v9057_v28 }
 0x27a   : > { %v9274_v12 = vpop.permute.xlu1 %2244 }
 0x27b   : > { %13602 = vst [vmem:[#allocation31_spill] sm:$0xff] %v9274_v12  ;;  %13643 = vst [vmem:[#allocation59_spill] sm:$0xff] %v9474_v37 }
 0x27e   : > { %v9276_v0 = vpop.permute.xlu1 %2401 }
 0x27f   : > { %13603 = vst [vmem:[#allocation32_spill] sm:$0xff] %v9276_v0 }
 0x282   : > { %v9280_v16 = vpop.permute.xlu1 %2473 }
 0x283   : > { %13605 = vst [vmem:[#allocation34_spill] sm:$0xff] %v9280_v16  ;;  %v9304_v16 = vpop.permute.xlu0 %2475 }
 0x284   : > { %13612 = vst [vmem:[#allocation41_spill] sm:$0xff] %v9304_v16 }
 0x286   : > { %v9284_v63 = vpop.permute.xlu1 %1939 }
 0x287   : > { %v9306_v12 = vpop.permute.xlu0 %2170 }
 0x288   : > { %13613 = vst [vmem:[#allocation42_spill] sm:$0xff] %v9306_v12 }
 0x28a   : > { %v9288_v26 = vpop.permute.xlu1 %2011 }
 0x28b   : > { %13608 = vst [vmem:[#allocation37_spill] sm:$0xff] %v9288_v26  ;;  %v4800_v27 = vcombine.high %v9254_v56, %v9288_v26  ;;  %v9308_v31 = vpop.permute.xlu0 %2242 }
 0x28c   : > { %13614 = vst [vmem:[#allocation43_spill] sm:$0xff] %v9308_v31 }
 0x28d   : > { %v9300_v49 = vrot.slane %v4800_v27, %v8818_v55 }
 0x28f   : > { %13611 = vst [vmem:[#allocation40_spill] sm:$0xff] %v9300_v49  ;;  %v9310_v18 = vpop.permute.xlu0 %2399 }
 0x293   : > { %v9312_v60 = vpop.permute.xlu0 %2471 }
 0x294   : > { %13615 = vst [vmem:[#allocation44_spill] sm:$0xff] %v9312_v60 }
 0x297   : > { %v9314_v39 = vpop.permute.xlu0 %1937 }
 0x298   : > { %v2724_v12 = vcombine.high %v9240_v42, %v9314_v39 }
 0x29b   : > { %v9330_v56 = vpop.permute.xlu0 %2009 }
 0x29c   : > { %13616 = vst [vmem:[#allocation45_spill] sm:$0xff] %v9330_v56 }
 0x2b6   : > { %v9316_v14 = vpop.f32.mrb[20].mxu1 }
 0x2b7   : > { %1941 = vrot.lane.b32.xlu0 %v9316_v14, %s8492_s28  ;;  %v7714_v27 = vpop.f32.mrb[21].mxu1  ;;  %v2102_v20 = vrot.slane %v9316_v14, 1  ;;  %v2331_v50 = vrot.slane %v9316_v14, 2 }
 0x2ba   : > { %v9320_v49 = vpop.f32.mrb[22].mxu1 }
 0x2bb   : > { %2013 = vrot.lane.b32.xlu0 %v9316_v14, %s8493_s16  ;;  %1943 = vrot.lane.b32.xlu1 %v9320_v49, %s8492_s28  ;;  %v7717_v60 = vpop.f32.mrb[23].mxu1  ;;  %v2103_v31 = vrot.slane %v9320_v49, 1  ;;  %v2332_v16 = vrot.slane %v9320_v49, 2 }
 0x2bd   : > { %v9333_v62 = vsel %vm2081_vm3, %v2102_v20, %v2103_v31  ;;  %v9336_v27 = vsel %vm2310_vm4, %v2331_v50, %v2332_v16  ;;  %v9351_v50 = vpop.permute.xlu0 %2178 }
 0x2be   : > { %v1334_v26 = vpop.f32.mrb[24].mxu1  ;;  %13617 = vst [vmem:[#allocation46_spill] sm:$0xff] %v9351_v50 }
 0x2bf   : > { %2015 = vrot.lane.b32.xlu1 %v9320_v49, %s8493_s16  ;;  %2182 = vrot.lane.b32.xlu0 %v9333_v62, %s8492_s28  ;;  %v2105_v60 = vrot.slane %v1334_v26, 1  ;;  %v2334_v8 = vrot.slane %v1334_v26, 2  ;;  %v7720_v61 = vpop.f32.mrb[25].mxu1  ;;  %v9363_v26 = vrot.slane %v13618_v48, %v9339_v33  ;;  %v13624_v48 = vcombine.high %v8871_v17, %v8893_v29 }
 0x2c0   : > { %v13621_v61 = vcombine.high %v8884_v2, %v8973_v15 }
 0x2c1   : > { %v9346_v1 = vsel %vm2081_vm3, %v2103_v31, %v2105_v60  ;;  %v9349_v20 = vsel %vm2310_vm4, %v2332_v16, %v2334_v8  ;;  %v13619_v16 = vcombine.low %v8871_v17, %v8893_v29  ;;  %v13622_v60 = vcombine.low %v8854_v10, %v8890_v25  ;;  %v9453_v50 = vpop.permute.xlu0 %2250 }
 0x2c2   : > { %v9353_v6 = vpop.f32.mrb[26].mxu1  ;;  %v9375_v8 = vrot.slane %v13621_v61, %v9339_v33  ;;  %v9387_v51 = vrot.slane %v13624_v48, %v9339_v33  ;;  %v13628_v10 = vcombine.low %v8881_v23, %v8954_v5  ;;  %v13630_v17 = vcombine.high %v8881_v23, %v8954_v5  ;;  %13640 = vst [vmem:[#allocation57_spill] sm:$0xff] %v9453_v50 }
 0x2c3   : > { %2254 = vrot.lane.b32.xlu0 %v9333_v62, %s8493_s16  ;;  %2184 = vrot.lane.b32.xlu1 %v9346_v1, %s8492_s28  ;;  %v7731_v38 = vpop.f32.mrb[27].mxu1  ;;  %v9369_v31 = vrot.slane %v13619_v16, %v9339_v33  ;;  %v13626_v16 = vcombine.low %v8884_v2, %v8973_v15  ;;  %v2107_v61 = vrot.slane %v9353_v6, 1  ;;  %v2336_v52 = vrot.slane %v9353_v6, 2 }
 0x2c4   : > { %v9381_v38 = vrot.slane %v13622_v60, %v9339_v33  ;;  %13625 = vst [vmem:[#allocation49_spill] sm:$0xff] %v9387_v51  ;;  %v9401_v25 = vrot.slane %v13628_v10, %v9339_v33  ;;  %v9407_v29 = vrot.slane %v13630_v17, %v9339_v33  ;;  %v2723_v2 = vcombine.low %v9240_v42, %v9314_v39 }
 0x2c5   : > { %13620 = vst [vmem:[#allocation47_spill] sm:$0xff] %v9369_v31  ;;  %v9393_v7 = vrot.slane %v13626_v16, %v9339_v33  ;;  %v13632_v60 = vcombine.low %v8908_v35, %v8970_v13  ;;  %v13634_v16 = vcombine.low %v8911_v36, %v8981_v32  ;;  %v13636_v23 = vcombine.high %v8911_v36, %v8981_v32  ;;  %v2408_v57 = vpop.permute.xlu0 %2407 }
 0x2c6   : > { %13623 = vst [vmem:[#allocation48_spill] sm:$0xff] %v9381_v38  ;;  %13629 = vst [vmem:[#allocation51_spill] sm:$0xff] %v9401_v25  ;;  %v9411_v15 = vpop.f32.mrb[28].mxu1  ;;  %v2707_v17 = vcombine.low %v9232_v53, %v9268_v9  ;;  %v13638_v36 = vcombine.high %v8908_v35, %v8970_v13  ;;  %v4560_v35 = vcombine.high %v9250_v47, %v9284_v63  ;;  %v9459_v13 = vpop.permute.xlu1 %2180 }
 0x2c7   : > { %13627 = vst [vmem:[#allocation50_spill] sm:$0xff] %v9393_v7  ;;  %13631 = vst [vmem:[#allocation52_spill] sm:$0xff] %v9407_v29  ;;  %v9417_v48 = vrot.slane %v13632_v60, %v9339_v33  ;;  %v9423_v10 = vrot.slane %v13634_v16, %v9339_v33  ;;  %v9429_v5 = vrot.slane %v13636_v23, %v9339_v33  ;;  %2411 = vrot.lane.b32.xlu0 %v9336_v27, %s8492_s28  ;;  %v7734_v60 = vpop.f32.mrb[29].mxu1 }
 0x2c8   : > { %2256 = vrot.lane.b32.xlu1 %v9346_v1, %s8493_s16  ;;  %v2108_v19 = vrot.slane %v9411_v15, 1  ;;  %v2337_v16 = vrot.slane %v9411_v15, 2  ;;  %v9443_v32 = vrot.slane %v13638_v36, %v9339_v33  ;;  %v2708_v23 = vcombine.high %v9232_v53, %v9268_v9  ;;  %13641 = vst [vmem:[#allocation58_spill] sm:$0xff] %v9459_v13 }
 0x2c9   : > { %13633 = vst [vmem:[#allocation53_spill] sm:$0xff] %v9417_v48  ;;  %13635 = vst [vmem:[#allocation54_spill] sm:$0xff] %v9423_v10  ;;  %v4559_v60 = vcombine.low %v9250_v47, %v9284_v63  ;;  %v3931_v42 = vcombine.low %v9258_v59, %v9297_v46  ;;  %v2731_v39 = vrot.slane %v2723_v2, %v8818_v55 }
 0x2ca   : > { %13637 = vst [vmem:[#allocation55_spill] sm:$0xff] %v9429_v5  ;;  %13639 = vst [vmem:[#allocation56_spill] sm:$0xff] %v9443_v32  ;;  %v9462_v53 = vsel %vm2081_vm3, %v2107_v61, %v2108_v19  ;;  %v9465_v9 = vsel %vm2310_vm4, %v2336_v52, %v2337_v16  ;;  %v1414_v36 = vpop.f32.mrb[30].mxu1  ;;  %v13644_v63 = vcombine.low %v9054_v41, %v9060_v3 }
 0x2cb   : > { %v2715_v52 = vrot.slane %v2707_v17, %v8818_v55  ;;  %2483 = vrot.lane.b32.xlu0 %v9336_v27, %s8493_s16  ;;  %v2110_v61 = vrot.slane %v1414_v36, 1  ;;  %v2339_v2 = vrot.slane %v1414_v36, 2  ;;  %v7737_v50 = vpop.f32.mrb[31].mxu1  ;;  %v9491_v13 = vrot.slane %v13646_v43, %v9339_v33 }
 0x2cc   : > { %v9480_v47 = vrot.slane %v13644_v63, %v9339_v33  ;;  %2413 = vrot.lane.b32.xlu1 %v9349_v20, %s8492_s28  ;;  %v2722_v41 = vrot.slane %v2708_v23, %v8818_v55  ;;  %v4551_v3 = vrot.slane %v4543_v34, %v8818_v55  ;;  %v2738_v17 = vrot.slane %v2724_v12, %v8818_v55 }
 0x2cd   : > { %13647 = vst [vmem:[#allocation61_spill] sm:$0xff] %v9491_v13  ;;  %v4567_v63 = vrot.slane %v4559_v60, %v8818_v55  ;;  %v4574_v11 = vrot.slane %v4560_v35, %v8818_v55  ;;  %v9500_v50 = vsel %vm2081_vm3, %v2108_v19, %v2110_v61  ;;  %v9503_v36 = vsel %vm2310_vm4, %v2337_v16, %v2339_v2  ;;  %v9514_v35 = vpop.permute.xlu1 %2252 }
 0x2ce   : > { %13645 = vst [vmem:[#allocation60_spill] sm:$0xff] %v9480_v47  ;;  %v9508_v23 = vrot.slane %v3931_v42, %v8818_v55  ;;  %v2771_v34 = vcombine.low %v2715_v52, %v2731_v39  ;;  %v2772_v12 = vcombine.high %v2715_v52, %v2731_v39  ;;  %v9510_v60 = vpop.f32.mrb[32].mxu1  ;;  %13649 = vst [vmem:[#allocation63_spill] sm:$0xff] %v9514_v35 }
 0x2cf   : > { %v2571_v19 = vcombine.low %v9316_v14, %v9510_v60  ;;  %v2572_v16 = vcombine.high %v9316_v14, %v9510_v60  ;;  %1945 = vrot.lane.b32.xlu0 %v9353_v6, %s8492_s28  ;;  %v7748_v42 = vpop.f32.mrb[33].mxu1  ;;  %v2787_v52 = vcombine.low %v2722_v41, %v2738_v17  ;;  %v2788_v61 = vcombine.high %v2722_v41, %v2738_v17 }
 0x2d0   : > { %13648 = vst [vmem:[#allocation62_spill] sm:$0xff] %v9508_v23  ;;  %2485 = vrot.lane.b32.xlu1 %v9349_v20, %s8493_s16  ;;  %v4607_v2 = vcombine.low %v4551_v3, %v4567_v63  ;;  %v4608_v58 = vcombine.high %v4551_v3, %v4567_v63  ;;  %v4623_v43 = vcombine.low %v4558_v4, %v4574_v11  ;;  %v2112_v35 = vrot.slane %v9510_v60, 1 }
 0x2d1   : > { %v2341_v22 = vrot.slane %v9510_v60, 2  ;;  %v9529_v14 = vrot.slane %v2771_v34, %v9339_v33  ;;  %v9532_v24 = vrot.slane %v2772_v12, %v9339_v33  ;;  %v4624_v30 = vcombine.high %v4558_v4, %v4574_v11  ;;  %v9563_v44 = vpop.permute.xlu1 %2409 }
 0x2d2   : > { %v3947_v42 = vcombine.low %v9310_v18, %v2408_v57  ;;  %v9535_v45 = vpop.f32.mrb[34].mxu1  ;;  %v9548_v11 = vrot.slane %v2787_v52, %v9339_v33  ;;  %v9551_v34 = vrot.slane %v2788_v61, %v9339_v33  ;;  %v9554_v12 = vrot.slane %v4607_v2, %v9339_v33  ;;  %13655 = vst [vmem:[#allocation69_spill] sm:$0xff] %v9563_v44 }
 0x2d3   : > { %13650 = vst [vmem:[#allocation64_spill] sm:$0xff] %v9529_v14  ;;  %v4407_v41 = vcombine.low %v9320_v49, %v9535_v45  ;;  %v4408_v3 = vcombine.high %v9320_v49, %v9535_v45  ;;  %2017 = vrot.lane.b32.xlu0 %v9353_v6, %s8493_s16  ;;  %v7751_v17 = vpop.f32.mrb[35].mxu1  ;;  %v2113_v63 = vrot.slane %v9535_v45, 1  ;;  %v2342_v4 = vrot.slane %v9535_v45, 2 }
 0x2d4   : > { %1947 = vrot.lane.b32.xlu1 %v9411_v15, %s8492_s28  ;;  %13651 = vst [vmem:[#allocation65_spill] sm:$0xff] %v9548_v11  ;;  %13652 = vst [vmem:[#allocation66_spill] sm:$0xff] %v9554_v12  ;;  %v3948_v49 = vcombine.high %v9310_v18, %v2408_v57  ;;  %v9558_v39 = vrot.slane %v4608_v58, %v9339_v33  ;;  %v9561_v17 = vrot.slane %v4623_v43, %v9339_v33 }
 0x2d5   : > { %v9566_v56 = vsel %vm2081_vm3, %v2112_v35, %v2113_v63  ;;  %v9569_v52 = vsel %vm2310_vm4, %v2341_v22, %v2342_v4  ;;  %v9580_v58 = vrot.slane %v4624_v30, %v9339_v33  ;;  %v9583_v35 = vrot.slane %v3947_v42, %v8818_v55 }
 0x2d6   : > { %13653 = vst [vmem:[#allocation67_spill] sm:$0xff] %v9558_v39  ;;  %13654 = vst [vmem:[#allocation68_spill] sm:$0xff] %v9561_v17  ;;  %v1494_v61 = vpop.f32.mrb[36].mxu1  ;;  %v3219_v2 = vcombine.low %v9333_v62, %v9566_v56  ;;  %v3220_v57 = vcombine.high %v9333_v62, %v9566_v56  ;;  %v3795_v18 = vcombine.low %v9336_v27, %v9569_v52 }
 0x2d7   : > { %v3796_v43 = vcombine.high %v9336_v27, %v9569_v52  ;;  %13656 = vst [vmem:[#allocation70_spill] sm:$0xff] %v9580_v58  ;;  %13657 = vst [vmem:[#allocation71_spill] sm:$0xff] %v9583_v35  ;;  %v2115_v22 = vrot.slane %v1494_v61, 1  ;;  %v2344_v13 = vrot.slane %v1494_v61, 2  ;;  %2186 = vrot.lane.b32.xlu0 %v9462_v53, %s8492_s28  ;;  %v7754_v62 = vpop.f32.mrb[37].mxu1  ;;  %v9590_v47 = vrot.slane %v3948_v49, %v8818_v55 }
 0x2d8   : > { %2019 = vrot.lane.b32.xlu1 %v9411_v15, %s8493_s16  ;;  %v9597_v42 = vrot.slane %v2571_v19, %v8818_v55  ;;  %v9600_v61 = vrot.slane %v2572_v16, %v8818_v55  ;;  %v9603_v37 = vrot.slane %v4407_v41, %v8818_v55 }
 0x2d9   : > { %13658 = vst [vmem:[#allocation72_spill] sm:$0xff] %v9590_v47  ;;  %v9606_v62 = vsel %vm2081_vm3, %v2113_v63, %v2115_v22  ;;  %v9609_v49 = vsel %vm2310_vm4, %v2342_v4, %v2344_v13  ;;  %v9622_v63 = vrot.slane %v4408_v3, %v8818_v55  ;;  %v9633_v22 = vrot.slane %v3219_v2, %v8818_v55 }
 0x2da   : > { %v9611_v47 = vpop.f32.mrb[38].mxu1  ;;  %v5055_v30 = vcombine.low %v9346_v1, %v9606_v62  ;;  %v5056_v19 = vcombine.high %v9346_v1, %v9606_v62  ;;  %v5631_v16 = vcombine.low %v9349_v20, %v9609_v49  ;;  %v5632_v41 = vcombine.high %v9349_v20, %v9609_v49 }
 0x2db   : > { %v2587_v13 = vcombine.low %v9353_v6, %v9611_v47  ;;  %v2588_v4 = vcombine.high %v9353_v6, %v9611_v47  ;;  %2258 = vrot.lane.b32.xlu0 %v9462_v53, %s8493_s16  ;;  %v7765_v1 = vpop.f32.mrb[39].mxu1  ;;  %13659 = vst [vmem:[#allocation73_spill] sm:$0xff] %v9633_v22  ;;  %v9636_v20 = vrot.slane %v3220_v57, %v8818_v55  ;;  %v2346_v2 = vrot.slane %v9611_v47, 2 }
 0x2dc   : > { %2188 = vrot.lane.b32.xlu1 %v9500_v50, %s8492_s28  ;;  %v9639_v3 = vrot.slane %v3795_v18, %v8818_v55  ;;  %v9642_v27 = vrot.slane %v3796_v43, %v8818_v55  ;;  %v2117_v1 = vrot.slane %v9611_v47, 1  ;;  %v9655_v57 = vrot.slane %v5055_v30, %v8818_v55 }
 0x2dd   : > { %13660 = vst [vmem:[#allocation74_spill] sm:$0xff] %v9636_v20  ;;  %v9645_v6 = vrot.slane %v2587_v13, %v8818_v55  ;;  %v9648_v28 = vrot.slane %v2588_v4, %v8818_v55  ;;  %v9658_v18 = vrot.slane %v5056_v19, %v8818_v55  ;;  %v9661_v43 = vrot.slane %v5631_v16, %v8818_v55 }
 0x2de   : > { %13661 = vst [vmem:[#allocation75_spill] sm:$0xff] %v9639_v3  ;;  %13662 = vst [vmem:[#allocation76_spill] sm:$0xff] %v9642_v27  ;;  %v9652_v21 = vpop.f32.mrb[40].mxu1  ;;  %v9664_v13 = vrot.slane %v5632_v41, %v8818_v55 }
 0x2df   : > { %13663 = vst [vmem:[#allocation77_spill] sm:$0xff] %v9655_v57  ;;  %13664 = vst [vmem:[#allocation78_spill] sm:$0xff] %v9658_v18  ;;  %v4423_v4 = vcombine.low %v9411_v15, %v9652_v21  ;;  %v4424_v32 = vcombine.high %v9411_v15, %v9652_v21  ;;  %2415 = vrot.lane.b32.xlu0 %v9465_v9, %s8492_s28  ;;  %v7768_v30 = vpop.f32.mrb[41].mxu1  ;;  %v2118_v19 = vrot.slane %v9652_v21, 1  ;;  %v2347_v16 = vrot.slane %v9652_v21, 2 }
 0x2e0   : > { %13665 = vst [vmem:[#allocation79_spill] sm:$0xff] %v9661_v43  ;;  %13666 = vst [vmem:[#allocation80_spill] sm:$0xff] %v9664_v13  ;;  %2260 = vrot.lane.b32.xlu1 %v9500_v50, %s8493_s16  ;;  %v2636_v41 = vcombine.high %v9597_v42, %v9645_v6  ;;  %v2651_v23 = vcombine.low %v9600_v61, %v9648_v28 }
 0x2e1   : > { %v9685_v5 = vrot.slane %v4423_v4, %v8818_v55  ;;  %v9688_v30 = vrot.slane %v4424_v32, %v8818_v55  ;;  %v9690_v10 = vpop.f32.mrb[44].mxu0  ;;  %v9693_v48 = vsel %vm2081_vm3, %v2117_v1, %v2118_v19  ;;  %v9696_v40 = vsel %vm2310_vm4, %v2346_v2, %v2347_v16 }
 0x2e2   : > { %13667 = vst [vmem:[#allocation81_spill] sm:$0xff] %v9693_v48  ;;  %13668 = vst [vmem:[#allocation82_spill] sm:$0xff] %v9696_v40  ;;  %v1574_v54 = vpop.f32.mrb[42].mxu1  ;;  %v7799_v46 = vpop.f32.mrb[45].mxu0  ;;  %v3235_v15 = vcombine.low %v9462_v53, %v9693_v48  ;;  %v3236_v4 = vcombine.high %v9462_v53, %v9693_v48  ;;  %v3811_v32 = vcombine.low %v9465_v9, %v9696_v40  ;;  %v2127_v2 = vrot.slane %v9690_v10, 1 }
 0x2e3   : > { %v3812_v35 = vcombine.high %v9465_v9, %v9696_v40  ;;  %v2120_v59 = vrot.slane %v1574_v54, 1  ;;  %v2349_v1 = vrot.slane %v1574_v54, 2  ;;  %2487 = vrot.lane.b32.xlu0 %v9465_v9, %s8493_s16  ;;  %v7771_v46 = vpop.f32.mrb[43].mxu1  ;;  %v2356_v44 = vrot.slane %v9690_v10, 2 }
 0x2e4   : > { %2417 = vrot.lane.b32.xlu1 %v9503_v36, %s8492_s28  ;;  %v9713_v53 = vrot.slane %v3235_v15, %v8818_v55  ;;  %v9716_v0 = vrot.slane %v3236_v4, %v8818_v55  ;;  %v9719_v40 = vrot.slane %v3811_v32, %v8818_v55  ;;  %v9733_v15 = vrot.slane %v2636_v41, %v9339_v33 }
 0x2e5   : > { %v9722_v54 = vrot.slane %v3812_v35, %v8818_v55  ;;  %v9724_v9 = vpop.f32.mrb[46].mxu0  ;;  %v9727_v46 = vsel %vm2081_vm3, %v2118_v19, %v2120_v59  ;;  %v9730_v39 = vsel %vm2310_vm4, %v2347_v16, %v2349_v1  ;;  %v9736_v4 = vrot.slane %v2651_v23, %v9339_v33 }
 0x2e6   : > { %13669 = vst [vmem:[#allocation83_spill] sm:$0xff] %v9713_v53  ;;  %13670 = vst [vmem:[#allocation84_spill] sm:$0xff] %v9716_v0  ;;  %v9738_v29 = vpop.f32.mrb[44].mxu1  ;;  %v7802_v32 = vpop.f32.mrb[47].mxu0  ;;  %v5071_v16 = vcombine.low %v9500_v50, %v9727_v46  ;;  %v5072_v41 = vcombine.high %v9500_v50, %v9727_v46  ;;  %v5647_v58 = vcombine.low %v9503_v36, %v9730_v39 }
 0x2e7   : > { %13671 = vst [vmem:[#allocation85_spill] sm:$0xff] %v9719_v40  ;;  %13672 = vst [vmem:[#allocation86_spill] sm:$0xff] %v9722_v54  ;;  %1949 = vrot.lane.b32.xlu0 %v9510_v60, %s8492_s28  ;;  %v7782_v23 = vpop.f32.mrb[45].mxu1  ;;  %v2128_v32 = vrot.slane %v9724_v9, 1  ;;  %v5648_v1 = vcombine.high %v9503_v36, %v9730_v39  ;;  %v2357_v54 = vrot.slane %v9724_v9, 2  ;;  %v2351_v27 = vrot.slane %v9738_v29, 2 }
 0x2e8   : > { %13673 = vst [vmem:[#allocation87_spill] sm:$0xff] %v9727_v46  ;;  %13674 = vst [vmem:[#allocation88_spill] sm:$0xff] %v9730_v39  ;;  %2489 = vrot.lane.b32.xlu1 %v9503_v36, %s8493_s16  ;;  %v9768_v35 = vrot.slane %v5071_v16, %v8818_v55  ;;  %v9771_v50 = vrot.slane %v5072_v41, %v8818_v55  ;;  %v9781_v23 = vrot.slane %v5647_v58, %v8818_v55 }
 0x2e9   : > { %13675 = vst [vmem:[#allocation89_spill] sm:$0xff] %v9736_v4  ;;  %13676 = vst [vmem:[#allocation90_spill] sm:$0xff] %v9738_v29  ;;  %v9776_v19 = vsel %vm2081_vm3, %v2127_v2, %v2128_v32  ;;  %v2122_v16 = vrot.slane %v9738_v29, 1  ;;  %v9809_v58 = vsel %vm2310_vm4, %v2356_v44, %v2357_v54 }
 0x2ea   : > { %13677 = vst [vmem:[#allocation91_spill] sm:$0xff] %v9768_v35  ;;  %13678 = vst [vmem:[#allocation92_spill] sm:$0xff] %v9771_v50  ;;  %v9778_v40 = vpop.f32.mrb[46].mxu1  ;;  %v1734_v59 = vpop.f32.mrb[48].mxu0 }
 0x2eb   : > { %13679 = vst [vmem:[#allocation93_spill] sm:$0xff] %v9776_v19  ;;  %13680 = vst [vmem:[#allocation94_spill] sm:$0xff] %v9778_v40  ;;  %2021 = vrot.lane.b32.xlu0 %v9510_v60, %s8493_s16  ;;  %v7785_v36 = vpop.f32.mrb[47].mxu1  ;;  %v2130_v2 = vrot.slane %v1734_v59, 1  ;;  %v2359_v41 = vrot.slane %v1734_v59, 2  ;;  %v7805_v3 = vpop.f32.mrb[49].mxu0  ;;  %v9799_v60 = vrot.slane %v5648_v1, %v8818_v55 }
 0x2ec   : > { %13681 = vst [vmem:[#allocation95_spill] sm:$0xff] %v9781_v23  ;;  %1951 = vrot.lane.b32.xlu1 %v9535_v45, %s8492_s28  ;;  %13684 = vst [vmem:[#allocation98_spill] sm:$0xff] %v9809_v58  ;;  %v2123_v36 = vrot.slane %v9778_v40, 1  ;;  %v2352_v3 = vrot.slane %v9778_v40, 2 }
 0x2ed   : > { %13682 = vst [vmem:[#allocation96_spill] sm:$0xff] %v9799_v60  ;;  %v9806_v59 = vsel %vm2081_vm3, %v2128_v32, %v2130_v2  ;;  %v9812_v39 = vsel %vm2310_vm4, %v2357_v54, %v2359_v41 }
 0x2ee   : > { %13683 = vst [vmem:[#allocation97_spill] sm:$0xff] %v9806_v59  ;;  %13685 = vst [vmem:[#allocation99_spill] sm:$0xff] %v9812_v39  ;;  %v1654_v0 = vpop.f32.mrb[48].mxu1  ;;  %v9831_v20 = vsel %vm2081_vm3, %v2122_v16, %v2123_v36  ;;  %v9834_v23 = vsel %vm2310_vm4, %v2351_v27, %v2352_v3 }
 0x2ef   : > { %2190 = vrot.lane.b32.xlu0 %v9566_v56, %s8492_s28  ;;  %v2125_v44 = vrot.slane %v1654_v0, 1  ;;  %v2354_v54 = vrot.slane %v1654_v0, 2  ;;  %v7788_v32 = vpop.f32.mrb[49].mxu1  ;;  %13687 = vst [vmem:[#allocation101_spill] sm:$0xff] %v9831_v20  ;;  %v13688_v0 = vcombine.low %v9597_v42, %v9645_v6 }
 0x2f0   : > { %2023 = vrot.lane.b32.xlu1 %v9535_v45, %s8493_s16  ;;  %v9828_v1 = vpop.f32.mrb[50].mxu0  ;;  %v4488_v45 = vcombine.high %v9622_v63, %v9688_v30 }
 0x2f1   : > { %13686 = vst [vmem:[#allocation100_spill] sm:$0xff] %v9828_v1  ;;  %v9842_v32 = vrot.slane %v13688_v0, %v9339_v33  ;;  %v2691_v41 = vcombine.low %v9690_v10, %v9828_v1  ;;  %v2692_v2 = vcombine.high %v9690_v10, %v9828_v1  ;;  %v7833_v16 = vpop.f32.mrb[51].mxu0  ;;  %v9849_v43 = vsel %vm2081_vm3, %v2123_v36, %v2125_v44 }
 0x2f2   : > { %v9852_v27 = vsel %vm2310_vm4, %v2352_v3, %v2354_v54  ;;  %v9854_v60 = vpop.f32.mrb[50].mxu1  ;;  %v2137_v13 = vrot.slane %v9828_v1, 1  ;;  %v2366_v42 = vrot.slane %v9828_v1, 2  ;;  %v9859_v6 = vrot.slane %v4488_v45, %v9339_v33 }
 0x2f3   : > { %13689 = vst [vmem:[#allocation102_spill] sm:$0xff] %v9842_v32  ;;  %v2675_v16 = vcombine.low %v9738_v29, %v9854_v60  ;;  %v2676_v36 = vcombine.high %v9738_v29, %v9854_v60  ;;  %v9868_v3 = vrot.slane %v2691_v41, %v8818_v55  ;;  %v9871_v44 = vrot.slane %v2692_v2, %v8818_v55  ;;  %v7816_v54 = vpop.f32.mrb[51].mxu1 }
 0x2f4   : > { %2262 = vrot.lane.b32.xlu0 %v9566_v56, %s8493_s16  ;;  %2192 = vrot.lane.b32.xlu1 %v9606_v62, %s8492_s28  ;;  %v9877_v45 = vpop.f32.mrb[52].mxu0  ;;  %v2132_v0 = vrot.slane %v9854_v60, 1 }
 0x2f5   : > { %13690 = vst [vmem:[#allocation103_spill] sm:$0xff] %v9877_v45  ;;  %v9886_v29 = vrot.slane %v2675_v16, %v8818_v55  ;;  %v9889_v56 = vrot.slane %v2676_v36, %v8818_v55  ;;  %v4527_v54 = vcombine.low %v9724_v9, %v9877_v45  ;;  %v4528_v35 = vcombine.high %v9724_v9, %v9877_v45  ;;  %v7836_v57 = vpop.f32.mrb[53].mxu0 }
 0x2f6   : > { %v9895_v1 = vpop.f32.mrb[52].mxu1  ;;  %v2138_v41 = vrot.slane %v9877_v45, 1  ;;  %v2367_v50 = vrot.slane %v9877_v45, 2  ;;  %v13691_v16 = vcombine.high %v9600_v61, %v9648_v28 }
 0x2f7   : > { %v4511_v18 = vcombine.low %v9778_v40, %v9895_v1  ;;  %v4512_v57 = vcombine.high %v9778_v40, %v9895_v1  ;;  %v9912_v46 = vrot.slane %v4527_v54, %v8818_v55  ;;  %v9915_v45 = vrot.slane %v4528_v35, %v8818_v55  ;;  %v7819_v28 = vpop.f32.mrb[53].mxu1 }
 0x2f8   : > { %v9903_v2 = vrot.slane %v13691_v16, %v9339_v33  ;;  %2419 = vrot.lane.b32.xlu0 %v9569_v52, %s8492_s28  ;;  %2264 = vrot.lane.b32.xlu1 %v9606_v62, %s8493_s16  ;;  %v1894_v61 = vpop.f32.mrb[54].mxu0  ;;  %v9922_v16 = vsel %vm2081_vm3, %v2137_v13, %v2138_v41  ;;  %v9925_v36 = vsel %vm2310_vm4, %v2366_v42, %v2367_v50 }
 0x2f9   : > { %13693 = vst [vmem:[#allocation105_spill] sm:$0xff] %v9922_v16  ;;  %13694 = vst [vmem:[#allocation106_spill] sm:$0xff] %v9925_v36  ;;  %v2740_v35 = vcombine.high %v9886_v29, %v9868_v3  ;;  %v9931_v40 = vrot.slane %v4511_v18, %v8818_v55  ;;  %v9934_v28 = vrot.slane %v4512_v57, %v8818_v55  ;;  %v2140_v53 = vrot.slane %v1894_v61, 1  ;;  %v7839_v22 = vpop.f32.mrb[55].mxu0 }
 0x2fa   : > { %13692 = vst [vmem:[#allocation104_spill] sm:$0xff] %v9903_v2  ;;  %v2369_v62 = vrot.slane %v1894_v61, 2  ;;  %v9936_v48 = vpop.f32.mrb[54].mxu1  ;;  %v3267_v13 = vcombine.low %v9776_v19, %v9922_v16  ;;  %v3268_v42 = vcombine.high %v9776_v19, %v9922_v16  ;;  %v3915_v54 = vcombine.low %v9809_v58, %v9925_v36 }
 0x2fb   : > { %v3916_v18 = vcombine.high %v9809_v58, %v9925_v36  ;;  %v2135_v57 = vrot.slane %v9936_v48, 1  ;;  %v9951_v22 = vsel %vm2081_vm3, %v2138_v41, %v2140_v53  ;;  %v7822_v16 = vpop.f32.mrb[55].mxu1 }
 0x2fc   : > { %2491 = vrot.lane.b32.xlu0 %v9569_v52, %s8493_s16  ;;  %13695 = vst [vmem:[#allocation107_spill] sm:$0xff] %v9951_v22  ;;  %v9954_v61 = vsel %vm2310_vm4, %v2367_v50, %v2369_v62  ;;  %2421 = vrot.lane.b32.xlu1 %v9609_v49, %s8492_s28  ;;  %v9959_v19 = vrot.slane %v3267_v13, %v8818_v55 }
 0x2fd   : > { %13696 = vst [vmem:[#allocation108_spill] sm:$0xff] %v9954_v61  ;;  %v9962_v36 = vrot.slane %v3268_v42, %v8818_v55  ;;  %v5103_v12 = vcombine.low %v9806_v59, %v9951_v22  ;;  %v5104_v52 = vcombine.high %v9806_v59, %v9951_v22  ;;  %v9969_v53 = vrot.slane %v3915_v54, %v8818_v55 }
 0x2fe   : > { %v9972_v50 = vrot.slane %v3916_v18, %v8818_v55  ;;  %v5751_v41 = vcombine.low %v9812_v39, %v9954_v61  ;;  %v5752_v16 = vcombine.high %v9812_v39, %v9954_v61  ;;  %v13699_v42 = vrot.slane %v9895_v1, 1 }
 0x2ff   : > { %13697 = vst [vmem:[#allocation109_spill] sm:$0xff] %v9969_v53  ;;  %v9979_v62 = vrot.slane %v5103_v12, %v8818_v55  ;;  %v9982_v13 = vrot.slane %v5104_v52, %v8818_v55  ;;  %v2754_v18 = vrot.slane %v2740_v35, %v9339_v33  ;;  %v2362_v35 = vrot.slane %v9895_v1, 2 }
 0x300   : > { %13698 = vst [vmem:[#allocation110_spill] sm:$0xff] %v9972_v50  ;;  %v9987_v54 = vsel %vm2081_vm3, %v2132_v0, %v13699_v42  ;;  %1953 = vrot.lane.b32.xlu0 %v9611_v47, %s8492_s28  ;;  %v9993_v22 = vrot.slane %v5751_v41, %v8818_v55  ;;  %v9996_v61 = vrot.slane %v5752_v16, %v8818_v55  ;;  %v13704_v59 = vrot.slane %v9854_v60, 2 }
 0x301   : > { %13700 = vst [vmem:[#allocation111_spill] sm:$0xff] %v9987_v54  ;;  %v3251_v12 = vcombine.low %v9831_v20, %v9987_v54  ;;  %v3252_v52 = vcombine.high %v9831_v20, %v9987_v54  ;;  %2493 = vrot.lane.b32.xlu1 %v9609_v49, %s8493_s16  ;;  %v2805_v0 = vcombine.low %v2754_v18, %v9532_v24 }
 0x302   : > { %13701 = vst [vmem:[#allocation112_spill] sm:$0xff] %v9993_v22  ;;  %13702 = vst [vmem:[#allocation113_spill] sm:$0xff] %v9996_v61  ;;  %v2755_v41 = vcombine.low %v9889_v56, %v9871_v44  ;;  %v2756_v16 = vcombine.high %v9889_v56, %v9871_v44  ;;  %v2739_v54 = vcombine.low %v9886_v29, %v9868_v3 }
 0x303   : > { %v10011_v42 = vrot.slane %v3251_v12, %v8818_v55  ;;  %v10014_v39 = vrot.slane %v3252_v52, %v8818_v55  ;;  %v2806_v49 = vcombine.high %v2754_v18, %v9532_v24  ;;  %v13703_v20 = vcombine.low %v9363_v26, %v9733_v15 }
 0x304   : > { %v10027_v44 = vsel %vm2310_vm4, %v13704_v59, %v2362_v35  ;;  %v10030_v56 = vrot.slane %v2755_v41, %v9339_v33  ;;  %v2770_v12 = vrot.slane %v2756_v16, %v9339_v33  ;;  %2025 = vrot.lane.b32.xlu0 %v9611_v47, %s8493_s16  ;;  %v13708_v41 = vcombine.high %v9363_v26, %v9733_v15 }
 0x305   : > { %v10022_v58 = vpack.i.bf16 %v2805_v0, %v13703_v20  ;;  %13705 = vst [vmem:[#allocation114_spill] sm:$0xff] %v10027_v44  ;;  %1955 = vrot.lane.b32.xlu1 %v9652_v21, %s8492_s28  ;;  %v3899_v3 = vcombine.low %v9834_v23, %v10027_v44  ;;  %v3900_v47 = vcombine.high %v9834_v23, %v10027_v44 }
 0x306   : > { %13706 = vst [vmem:[#allocation115_spill] sm:$0xff] %v10030_v56  ;;  %v2808_v18 = vcombine.high %v10030_v56, %v9548_v11  ;;  %v2809_v52 = vcombine.low %v2770_v12, %v9551_v34  ;;  %v10053_v0 = vrot.slane %v2739_v54, %v9339_v33  ;;  %v10058_v16 = vpack.i.bf16 %v2806_v49, %v13708_v41 }
 0x307   : > { %v2674_v59 = vcombine.high %v9387_v51, %v9903_v2  ;;  %v2810_v20 = vcombine.high %v2770_v12, %v9551_v34  ;;  %v10064_v29 = vrot.slane %v3899_v3, %v8818_v55  ;;  %v10067_v24 = vrot.slane %v3900_v47, %v8818_v55 }
 0x308   : > { %13707 = vst [vmem:[#allocation116_spill] sm:$0xff] %v10053_v0  ;;  %13709 = vst [vmem:[#allocation117_spill] sm:$0xff] %v10058_v16  ;;  %v13712_v54 = vcombine.high %v9369_v31, %v9736_v4  ;;  %v13713_v26 = vcombine.low %v9375_v8, %v9859_v6  ;;  %1961 = vrot.lane.b32.xlu0 %v9690_v10, %s8492_s28  ;;  %v2804_v34 = vcombine.high %v10053_v0, %v9529_v14  ;;  %v13816_v14 = vld [vmem:[#allocation72_spill] sm:$0xff]  ;;  %v13829_v4 = vld [vmem:[#allocation97_spill] sm:$0xff] }
 0x309   : > { %13710 = vst [vmem:[#allocation118_spill] sm:$0xff] %v10064_v29  ;;  %13711 = vst [vmem:[#allocation119_spill] sm:$0xff] %v10067_v24  ;;  %v10083_v49 = vpack.i.bf16 %v2810_v20, %v2674_v59  ;;  %v13715_v12 = vrot.slane %v9895_v1, 1  ;;  %v13717_v47 = vcombine.low %v9622_v63, %v9688_v30  ;;  %2027 = vrot.lane.b32.xlu1 %v9652_v21, %s8493_s16 }
 0x30a   : > { %v10072_v44 = vpack.i.bf16 %v2808_v18, %v13712_v54  ;;  %v10077_v15 = vpack.i.bf16 %v13713_v26, %v2809_v52  ;;  %v13719_v63 = vcombine.high %v9381_v38, %v9842_v32  ;;  %v4591_v26 = vcombine.low %v9934_v28, %v9915_v45 }
 0x30b   : > { %13714 = vst [vmem:[#allocation120_spill] sm:$0xff] %v10083_v49  ;;  %v10088_v3 = vsel %vm2081_vm3, %v13715_v12, %v2135_v57  ;;  %v10094_v18 = vrot.slane %v13717_v47, %v9339_v33  ;;  %v4471_v12 = vcombine.low %v9603_v37, %v9685_v5  ;;  %v4575_v47 = vcombine.low %v9931_v40, %v9912_v46 }
 0x30c   : > { %13716 = vst [vmem:[#allocation121_spill] sm:$0xff] %v10088_v3  ;;  %v10109_v30 = vpack.i.bf16 %v2804_v34, %v13719_v63  ;;  %v5087_v21 = vcombine.low %v9849_v43, %v10088_v3  ;;  %v5088_v41 = vcombine.high %v9849_v43, %v10088_v3  ;;  %v13721_v34 = vrot.slane %v9936_v48, 2  ;;  %2033 = vrot.lane.b32.xlu0 %v9690_v10, %s8493_s16  ;;  %v13726_v3 = vld [vmem:[#allocation66_spill] sm:$0xff] }
 0x30d   : > { %13718 = vst [vmem:[#allocation122_spill] sm:$0xff] %v10094_v18  ;;  %v4508_v54 = vcombine.high %v9393_v7, %v10094_v18  ;;  %1963 = vrot.lane.b32.xlu1 %v9724_v9, %s8492_s28  ;;  %v10143_v48 = vrot.slane %v4591_v26, %v9339_v33  ;;  %v10146_v10 = vrot.slane %v4471_v12, %v9339_v33  ;;  %v13781_v18 = vld [vmem:[#allocation75_spill] sm:$0xff] }
 0x30e   : > { %13720 = vst [vmem:[#allocation123_spill] sm:$0xff] %v10109_v30  ;;  %v10126_v63 = vsel %vm2310_vm4, %v2362_v35, %v13721_v34  ;;  %v10131_v20 = vrot.slane %v5087_v21, %v8818_v55  ;;  %v10134_v57 = vrot.slane %v5088_v41, %v8818_v55  ;;  %v10149_v35 = vrot.slane %v4575_v47, %v9339_v33  ;;  %v13728_v41 = vld [vmem:[#allocation81_spill] sm:$0xff]  ;;  %v13740_v30 = vld [vmem:[#allocation52_spill] sm:$0xff] }
 0x30f   : > { %13722 = vst [vmem:[#allocation124_spill] sm:$0xff] %v10126_v63  ;;  %v5735_v59 = vcombine.low %v9852_v27, %v10126_v63  ;;  %v5736_v52 = vcombine.high %v9852_v27, %v10126_v63  ;;  %13723 = vst [vmem:[#allocation125_spill] sm:$0xff] %v10143_v48  ;;  %v4510_v21 = vcombine.high %v9375_v8, %v9859_v6 }
 0x310   : > { %13724 = vst [vmem:[#allocation126_spill] sm:$0xff] %v10146_v10  ;;  %13725 = vst [vmem:[#allocation127_spill] sm:$0xff] %v10149_v35  ;;  %v5167_v63 = vcombine.low %v10134_v57, %v9982_v13  ;;  %v5168_v26 = vcombine.high %v10134_v57, %v9982_v13  ;;  %v4644_v12 = vcombine.high %v10143_v48, %v9561_v17  ;;  %2194 = vrot.lane.b32.xlu0 %v13728_v41, %s8492_s28  ;;  %v13776_v17 = vld [vmem:[#allocation88_spill] sm:$0xff]  ;;  %v13788_v48 = vld [vmem:[#allocation86_spill] sm:$0xff] }
 0x311   : > { %v4504_v47 = vcombine.high %v9401_v25, %v10146_v10  ;;  %v4640_v8 = vcombine.high %v10149_v35, %v13726_v3  ;;  %v10168_v6 = vrot.slane %v5735_v59, %v8818_v55  ;;  %v10173_v34 = vrot.slane %v5736_v52, %v8818_v55  ;;  %2035 = vrot.lane.b32.xlu1 %v9724_v9, %s8493_s16  ;;  %v13798_v10 = vld [vmem:[#allocation27_spill] sm:$0xff] }
 0x312   : > { %v4592_v13 = vcombine.high %v9934_v28, %v9915_v45  ;;  %v4472_v57 = vcombine.high %v9603_v37, %v9685_v5  ;;  %v4576_v49 = vcombine.high %v9931_v40, %v9912_v46  ;;  %v10183_v59 = vpack.i.bf16 %v4644_v12, %v4508_v54  ;;  %v13733_v46 = vld [vmem:[#allocation73_spill] sm:$0xff]  ;;  %v13734_v28 = vld [vmem:[#allocation83_spill] sm:$0xff] }
 0x313   : > { %13727 = vst [vmem:[#allocation128_spill] sm:$0xff] %v10168_v6  ;;  %13729 = vst [vmem:[#allocation81_spill] sm:$0xff] %v10173_v34  ;;  %v10185_v16 = vpack.i.bf16 %v4640_v8, %v4504_v47  ;;  %v13735_v54 = vcombine.low %v13733_v46, %v13734_v28  ;;  %v13737_v47 = vcombine.low %v10011_v42, %v9959_v19  ;;  %v13741_v45 = vld [vmem:[#allocation87_spill] sm:$0xff] }
 0x314   : > { %13730 = vst [vmem:[#allocation129_spill] sm:$0xff] %v10183_v59  ;;  %v4606_v40 = vrot.slane %v4592_v13, %v9339_v33  ;;  %v4486_v37 = vrot.slane %v4472_v57, %v9339_v33  ;;  %v10198_v9 = vrot.slane %v4576_v49, %v9339_v33  ;;  %2266 = vrot.lane.b32.xlu0 %v13728_v41, %s8493_s16  ;;  %v13739_v49 = vld [vmem:[#allocation70_spill] sm:$0xff]  ;;  %v13748_v59 = vld [vmem:[#allocation84_spill] sm:$0xff] }
 0x315   : > { %13731 = vst [vmem:[#allocation130_spill] sm:$0xff] %v10185_v16  ;;  %v10204_v12 = vrot.slane %v13735_v54, %v9339_v33  ;;  %v10210_v8 = vrot.slane %v13737_v47, %v9339_v33  ;;  %2196 = vrot.lane.b32.xlu1 %v13741_v45, %s8492_s28  ;;  %v13742_v16 = vld [vmem:[#allocation67_spill] sm:$0xff]  ;;  %v13743_v2 = vcombine.high %v13733_v46, %v13734_v28  ;;  %v13747_v13 = vld [vmem:[#allocation74_spill] sm:$0xff] }
 0x316   : > { %13732 = vst [vmem:[#allocation131_spill] sm:$0xff] %v10198_v9  ;;  %v4646_v57 = vcombine.high %v4606_v40, %v13739_v49  ;;  %v4506_v5 = vcombine.high %v13740_v30, %v4486_v37  ;;  %v4505_v52 = vcombine.low %v13740_v30, %v4486_v37  ;;  %v4645_v54 = vcombine.low %v4606_v40, %v13739_v49 }
 0x317   : > { %13736 = vst [vmem:[#allocation73_spill] sm:$0xff] %v10204_v12  ;;  %13738 = vst [vmem:[#allocation83_spill] sm:$0xff] %v10210_v8  ;;  %v4642_v47 = vcombine.high %v10198_v9, %v13742_v16  ;;  %v10232_v51 = vrot.slane %v13743_v2, %v9339_v33  ;;  %v13745_v37 = vcombine.high %v10011_v42, %v9959_v19  ;;  %v13753_v42 = vld [vmem:[#allocation82_spill] sm:$0xff] }
 0x318   : > { %v10234_v30 = vpack.i.bf16 %v4646_v57, %v4510_v21  ;;  %v10236_v40 = vpack.i.bf16 %v4505_v52, %v4645_v54  ;;  %v13749_v41 = vcombine.low %v13747_v13, %v13748_v59  ;;  %v13751_v2 = vcombine.low %v10014_v39, %v9962_v36  ;;  %2423 = vrot.lane.b32.xlu0 %v13753_v42, %s8492_s28  ;;  %v13868_v8 = vld [vmem:[#allocation106_spill] sm:$0xff] }
 0x319   : > { %13744 = vst [vmem:[#allocation70_spill] sm:$0xff] %v10232_v51  ;;  %v10242_v49 = vrot.slane %v13745_v37, %v9339_v33  ;;  %v10250_v9 = vpack.i.bf16 %v4642_v47, %v4506_v5  ;;  %v13754_v28 = vcombine.high %v13747_v13, %v13748_v59  ;;  %v13756_v54 = vcombine.high %v10014_v39, %v9962_v36  ;;  %v13759_v39 = vld [vmem:[#allocation69_spill] sm:$0xff]  ;;  %v13762_v59 = vld [vmem:[#allocation78_spill] sm:$0xff]  ;;  %v13763_v5 = vld [vmem:[#allocation92_spill] sm:$0xff] }
 0x31a   : > { %v10248_v16 = vrot.slane %v13749_v41, %v9339_v33  ;;  %v10256_v21 = vrot.slane %v13751_v2, %v9339_v33  ;;  %2268 = vrot.lane.b32.xlu1 %v13741_v45, %s8493_s16  ;;  %v13758_v2 = vld [vmem:[#allocation32_spill] sm:$0xff]  ;;  %v13764_v52 = vcombine.high %v13762_v59, %v13763_v5  ;;  %v10309_v19 = vrot.slane %v5168_v26, %v9339_v33  ;;  %v13770_v26 = vld [vmem:[#allocation77_spill] sm:$0xff]  ;;  %v13771_v41 = vld [vmem:[#allocation91_spill] sm:$0xff] }
 0x31b   : > { %13746 = vst [vmem:[#allocation52_spill] sm:$0xff] %v10242_v49  ;;  %v10272_v57 = vrot.slane %v13754_v28, %v9339_v33  ;;  %v10278_v47 = vrot.slane %v13756_v54, %v9339_v33  ;;  %v13760_v36 = vcombine.low %v13758_v2, %v13759_v39  ;;  %v13767_v37 = vcombine.low %v13762_v59, %v13763_v5  ;;  %v13787_v5 = vld [vmem:[#allocation76_spill] sm:$0xff] }
 0x31c   : > { %13750 = vst [vmem:[#allocation87_spill] sm:$0xff] %v10248_v16  ;;  %13752 = vst [vmem:[#allocation74_spill] sm:$0xff] %v10256_v21  ;;  %v10306_v13 = vrot.slane %v13764_v52, %v9339_v33  ;;  %2495 = vrot.lane.b32.xlu0 %v13753_v42, %s8493_s16  ;;  %v10324_v52 = vrot.slane %v5167_v63, %v9339_v33  ;;  %v13772_v46 = vcombine.high %v13770_v26, %v13771_v41  ;;  %v13864_v21 = vld [vmem:[#allocation105_spill] sm:$0xff] }
 0x31d   : > { %13755 = vst [vmem:[#allocation84_spill] sm:$0xff] %v10272_v57  ;;  %13757 = vst [vmem:[#allocation82_spill] sm:$0xff] %v10278_v47  ;;  %v10294_v28 = vrot.slane %v13760_v36, %v8818_v55  ;;  %v10321_v54 = vrot.slane %v13767_v37, %v9339_v33  ;;  %v13774_v45 = vcombine.high %v10131_v20, %v9979_v62 }
 0x31e   : > { %13765 = vst [vmem:[#allocation69_spill] sm:$0xff] %v10306_v13  ;;  %13766 = vst [vmem:[#allocation78_spill] sm:$0xff] %v10309_v19  ;;  %v10330_v36 = vrot.slane %v13772_v46, %v9339_v33  ;;  %2425 = vrot.lane.b32.xlu1 %v13776_v17, %s8492_s28  ;;  %v13777_v46 = vcombine.low %v13770_v26, %v13771_v41  ;;  %v13779_v59 = vcombine.low %v10131_v20, %v9979_v62  ;;  %v13782_v41 = vld [vmem:[#allocation85_spill] sm:$0xff] }
 0x31f   : > { %13761 = vst [vmem:[#allocation32_spill] sm:$0xff] %v10294_v28  ;;  %13768 = vst [vmem:[#allocation92_spill] sm:$0xff] %v10321_v54  ;;  %v10336_v42 = vrot.slane %v13774_v45, %v9339_v33  ;;  %v13783_v26 = vcombine.low %v13781_v18, %v13782_v41  ;;  %v13785_v62 = vcombine.high %v13758_v2, %v13759_v39  ;;  %v13794_v2 = vld [vmem:[#allocation39_spill] sm:$0xff] }
 0x320   : > { %13769 = vst [vmem:[#allocation132_spill] sm:$0xff] %v10324_v52  ;;  %13773 = vst [vmem:[#allocation77_spill] sm:$0xff] %v10330_v36  ;;  %v10348_v37 = vrot.slane %v13777_v46, %v9339_v33  ;;  %v10354_v45 = vrot.slane %v13779_v59, %v9339_v33  ;;  %v13789_v7 = vcombine.low %v13787_v5, %v13788_v48  ;;  %v13793_v36 = vld [vmem:[#allocation24_spill] sm:$0xff] }
 0x321   : > { %13775 = vst [vmem:[#allocation91_spill] sm:$0xff] %v10336_v42  ;;  %v10366_v46 = vrot.slane %v13783_v26, %v9339_v33  ;;  %v10372_v20 = vrot.slane %v13785_v62, %v8818_v55  ;;  %v13791_v26 = vcombine.high %v13787_v5, %v13788_v48  ;;  %v13795_v39 = vcombine.high %v13793_v36, %v13794_v2  ;;  %v13797_v59 = vld [vmem:[#allocation16_spill] sm:$0xff] }
 0x322   : > { %13778 = vst [vmem:[#allocation88_spill] sm:$0xff] %v10348_v37  ;;  %13780 = vst [vmem:[#allocation133_spill] sm:$0xff] %v10354_v45  ;;  %v10380_v63 = vrot.slane %v13789_v7, %v9339_v33  ;;  %v13799_v25 = vcombine.low %v13797_v59, %v13798_v10  ;;  %v13801_v7 = vld [vmem:[#allocation93_spill] sm:$0xff]  ;;  %v13803_v5 = vcombine.high %v13781_v18, %v13782_v41  ;;  %2497 = vrot.lane.b32.xlu1 %v13776_v17, %s8493_s16  ;;  %v13809_v41 = vld [vmem:[#allocation71_spill] sm:$0xff] }
 0x323   : > { %13784 = vst [vmem:[#allocation75_spill] sm:$0xff] %v10366_v46  ;;  %13786 = vst [vmem:[#allocation85_spill] sm:$0xff] %v10372_v20  ;;  %v10386_v42 = vrot.slane %v13791_v26, %v9339_v33  ;;  %v10392_v62 = vrot.slane %v13795_v39, %v8818_v55  ;;  %2202 = vrot.lane.b32.xlu0 %v13801_v7, %s8492_s28  ;;  %v13805_v36 = vcombine.high %v13797_v59, %v13798_v10  ;;  %v13812_v17 = vld [vmem:[#allocation11_spill] sm:$0xff]  ;;  %v13817_v10 = vld [vmem:[#allocation80_spill] sm:$0xff] }
 0x324   : > { %13790 = vst [vmem:[#allocation76_spill] sm:$0xff] %v10380_v63  ;;  %v10398_v3 = vrot.slane %v13799_v25, %v8818_v55  ;;  %v10408_v26 = vrot.slane %v13803_v5, %v9339_v33  ;;  %v13810_v5 = vld [vmem:[#allocation62_spill] sm:$0xff]  ;;  %v13818_v48 = vld [vmem:[#allocation96_spill] sm:$0xff] }
 0x325   : > { %13792 = vst [vmem:[#allocation86_spill] sm:$0xff] %v10386_v42  ;;  %13796 = vst [vmem:[#allocation24_spill] sm:$0xff] %v10392_v62  ;;  %v10414_v2 = vrot.slane %v13805_v36, %v8818_v55  ;;  %v3995_v13 = vcombine.low %v13810_v5, %v13809_v41  ;;  %v13813_v36 = vld [vmem:[#allocation12_spill] sm:$0xff]  ;;  %v4011_v19 = vcombine.low %v10392_v62, %v13816_v14 }
 0x326   : > { %13800 = vst [vmem:[#allocation39_spill] sm:$0xff] %v10398_v3  ;;  %13804 = vst [vmem:[#allocation16_spill] sm:$0xff] %v10408_v26  ;;  %v13814_v38 = vcombine.high %v13812_v17, %v13813_v36  ;;  %v5831_v18 = vcombine.low %v10398_v3, %v10294_v28  ;;  %v13819_v0 = vcombine.high %v13817_v10, %v13818_v48  ;;  %v13823_v36 = vld [vmem:[#allocation79_spill] sm:$0xff]  ;;  %2204 = vrot.lane.b32.xlu1 %v13829_v4, %s8492_s28  ;;  %v13858_v46 = vld [vmem:[#allocation100_spill] sm:$0xff] }
 0x327   : > { %13806 = vst [vmem:[#allocation27_spill] sm:$0xff] %v10414_v2  ;;  %v5847_v42 = vcombine.low %v10414_v2, %v10372_v20  ;;  %2274 = vrot.lane.b32.xlu0 %v13801_v7, %s8493_s16  ;;  %v13824_v26 = vld [vmem:[#allocation95_spill] sm:$0xff]  ;;  %v10499_v56 = vrot.slane %v3995_v13, %v9339_v33  ;;  %v13844_v13 = vld [vmem:[#allocation98_spill] sm:$0xff]  ;;  %v13954_v28 = vld [vmem:[#allocation25_spill] sm:$0xff] }
 0x328   : > { %v10434_v39 = vrot.slane %v13814_v38, %v9339_v33  ;;  %v10446_v59 = vrot.slane %v13819_v0, %v9339_v33  ;;  %v13821_v38 = vcombine.low %v13817_v10, %v13818_v48  ;;  %v13825_v32 = vcombine.low %v13823_v36, %v13824_v26 }
 0x329   : > { %v13827_v0 = vcombine.high %v13823_v36, %v13824_v26  ;;  %v13830_v48 = vcombine.low %v10064_v29, %v9969_v53  ;;  %13837 = vst [vmem:[#allocation97_spill] sm:$0xff] %v10499_v56  ;;  %v10502_v26 = vrot.slane %v4011_v19, %v9339_v33  ;;  %v13839_v36 = vcombine.low %v10173_v34, %v9996_v61  ;;  %v13847_v19 = vld [vmem:[#allocation99_spill] sm:$0xff] }
 0x32a   : > { %13815 = vst [vmem:[#allocation93_spill] sm:$0xff] %v10434_v39  ;;  %13820 = vst [vmem:[#allocation11_spill] sm:$0xff] %v10446_v59  ;;  %v10454_v17 = vrot.slane %v13821_v38, %v9339_v33  ;;  %v10460_v47 = vrot.slane %v13825_v32, %v9339_v33  ;;  %v13832_v32 = vcombine.low %v10067_v24, %v9972_v50  ;;  %2276 = vrot.lane.b32.xlu1 %v13829_v4, %s8493_s16  ;;  %v10538_v59 = vpop.permute.xlu1 %2481 }
 0x32b   : > { %v10468_v7 = vrot.slane %v13827_v0, %v9339_v33  ;;  %v10476_v10 = vrot.slane %v13830_v48, %v9339_v33  ;;  %v10488_v0 = vpop.permute.xlu0 %2479  ;;  %13838 = vst [vmem:[#allocation134_spill] sm:$0xff] %v10502_v26  ;;  %v10508_v11 = vrot.slane %v13839_v36, %v9339_v33  ;;  %v13841_v53 = vcombine.low %v10168_v6, %v9993_v22  ;;  %v13849_v36 = vld [vmem:[#allocation90_spill] sm:$0xff] }
 0x32c   : > { %13822 = vst [vmem:[#allocation12_spill] sm:$0xff] %v10454_v17  ;;  %13826 = vst [vmem:[#allocation80_spill] sm:$0xff] %v10460_v47  ;;  %v10482_v38 = vrot.slane %v13832_v32, %v9339_v33  ;;  %v10517_v32 = vrot.slane %v5831_v18, %v9339_v33  ;;  %2431 = vrot.lane.b32.xlu0 %v13844_v13, %s8492_s28  ;;  %v10528_v39 = vrot.slane %v5847_v42, %v9339_v33  ;;  %v13852_v47 = vld [vmem:[#allocation101_spill] sm:$0xff] }
 0x32d   : > { %13828 = vst [vmem:[#allocation96_spill] sm:$0xff] %v10468_v7  ;;  %13831 = vst [vmem:[#allocation79_spill] sm:$0xff] %v10476_v10  ;;  %v10514_v29 = vrot.slane %v13841_v53, %v9339_v33  ;;  %v13916_v10 = vld [vmem:[#allocation6_spill] sm:$0xff] }
 0x32e   : > { %13833 = vst [vmem:[#allocation95_spill] sm:$0xff] %v10482_v38  ;;  %13840 = vst [vmem:[#allocation135_spill] sm:$0xff] %v10508_v11  ;;  %2433 = vrot.lane.b32.xlu1 %v13847_v19, %s8492_s28  ;;  %v10558_v42 = vpop.permute.xlu1 %1943 }
 0x32f   : > { %13842 = vst [vmem:[#allocation136_spill] sm:$0xff] %v10514_v29  ;;  %13843 = vst [vmem:[#allocation137_spill] sm:$0xff] %v10517_v32  ;;  %v10540_v7 = vpop.permute.xlu0 %1941  ;;  %v13880_v29 = vld [vmem:[#allocation18_spill] sm:$0xff] }
 0x330   : > { %13845 = vst [vmem:[#allocation98_spill] sm:$0xff] %v10528_v39  ;;  %13846 = vst [vmem:[#allocation138_spill] sm:$0xff] %v10540_v7  ;;  %2503 = vrot.lane.b32.xlu0 %v13844_v13, %s8493_s16  ;;  %v13850_v13 = vld [vmem:[#allocation94_spill] sm:$0xff] }
 0x331   : > { %13848 = vst [vmem:[#allocation99_spill] sm:$0xff] %v10558_v42 }
 0x332   : > { %2505 = vrot.lane.b32.xlu1 %v13847_v19, %s8493_s16  ;;  %v10564_v53 = vpop.permute.xlu1 %2015 }
 0x333   : > { %v10556_v63 = vpop.permute.xlu0 %2013 }
 0x334   : > { %1957 = vrot.lane.b32.xlu0 %v13849_v36, %s8492_s28 }
 0x336   : > { %1959 = vrot.lane.b32.xlu1 %v13850_v13, %s8492_s28  ;;  %v10574_v25 = vpop.permute.xlu1 %2184 }
 0x337   : > { %v10566_v4 = vpop.permute.xlu0 %2182 }
 0x338   : > { %2029 = vrot.lane.b32.xlu0 %v13849_v36, %s8493_s16 }
 0x33a   : > { %2031 = vrot.lane.b32.xlu1 %v13850_v13, %s8493_s16  ;;  %v10582_v48 = vpop.permute.xlu1 %2256 }
 0x33b   : > { %v10572_v18 = vpop.permute.xlu0 %2254  ;;  %13854 = vst [vmem:[#allocation101_spill] sm:$0xff] %v10582_v48  ;;  %v13875_v48 = vld [vmem:[#allocation114_spill] sm:$0xff] }
 0x33c   : > { %13851 = vst [vmem:[#allocation90_spill] sm:$0xff] %v10572_v18  ;;  %2198 = vrot.lane.b32.xlu0 %v13852_v47, %s8492_s28 }
 0x33e   : > { %2200 = vrot.lane.b32.xlu1 %v9849_v43, %s8492_s28  ;;  %v10590_v17 = vpop.permute.xlu1 %2413 }
 0x33f   : > { %v10580_v19 = vpop.permute.xlu0 %2411  ;;  %13855 = vst [vmem:[#allocation139_spill] sm:$0xff] %v10590_v17 }
 0x340   : > { %13853 = vst [vmem:[#allocation94_spill] sm:$0xff] %v10580_v19  ;;  %2270 = vrot.lane.b32.xlu0 %v13852_v47, %s8493_s16  ;;  %v13878_v19 = vld [vmem:[#allocation33_spill] sm:$0xff] }
 0x342   : > { %2272 = vrot.lane.b32.xlu1 %v9849_v43, %s8493_s16  ;;  %v10596_v13 = vpop.permute.xlu1 %2485 }
 0x343   : > { %v10588_v36 = vpop.permute.xlu0 %2483 }
 0x344   : > { %2427 = vrot.lane.b32.xlu0 %v9834_v23, %s8492_s28 }
 0x346   : > { %2429 = vrot.lane.b32.xlu1 %v9852_v27, %s8492_s28  ;;  %v10606_v57 = vpop.permute.xlu1 %1947 }
 0x347   : > { %v10598_v31 = vpop.permute.xlu0 %1945  ;;  %13857 = vst [vmem:[#allocation141_spill] sm:$0xff] %v10606_v57 }
 0x348   : > { %13856 = vst [vmem:[#allocation140_spill] sm:$0xff] %v10598_v31  ;;  %2499 = vrot.lane.b32.xlu0 %v9834_v23, %s8493_s16  ;;  %v13859_v23 = vld [vmem:[#allocation103_spill] sm:$0xff] }
 0x34a   : > { %2501 = vrot.lane.b32.xlu1 %v9852_v27, %s8493_s16  ;;  %v10612_v43 = vpop.permute.xlu1 %2019 }
 0x34b   : > { %v10604_v47 = vpop.permute.xlu0 %2017 }
 0x34c   : > { %1969 = vrot.lane.b32.xlu0 %v13858_v46, %s8492_s28 }
 0x34e   : > { %1971 = vrot.lane.b32.xlu1 %v13859_v23, %s8492_s28  ;;  %v10622_v37 = vpop.permute.xlu1 %2188 }
 0x34f   : > { %v10614_v35 = vpop.permute.xlu0 %2186 }
 0x350   : > { %2041 = vrot.lane.b32.xlu0 %v13858_v46, %s8493_s16 }
 0x352   : > { %2043 = vrot.lane.b32.xlu1 %v13859_v23, %s8493_s16  ;;  %v10630_v52 = vpop.permute.xlu1 %2260 }
 0x353   : > { %v10620_v45 = vpop.permute.xlu0 %2258  ;;  %13862 = vst [vmem:[#allocation142_spill] sm:$0xff] %v10630_v52 }
 0x354   : > { %13860 = vst [vmem:[#allocation100_spill] sm:$0xff] %v10620_v45  ;;  %1965 = vrot.lane.b32.xlu0 %v9854_v60, %s8492_s28 }
 0x356   : > { %1967 = vrot.lane.b32.xlu1 %v9895_v1, %s8492_s28  ;;  %v10638_v54 = vpop.permute.xlu1 %2417 }
 0x357   : > { %v10628_v27 = vpop.permute.xlu0 %2415  ;;  %13863 = vst [vmem:[#allocation143_spill] sm:$0xff] %v10638_v54 }
 0x358   : > { %13861 = vst [vmem:[#allocation103_spill] sm:$0xff] %v10628_v27  ;;  %2037 = vrot.lane.b32.xlu0 %v9854_v60, %s8493_s16  ;;  %v13866_v60 = vld [vmem:[#allocation107_spill] sm:$0xff] }
 0x359   : > { %v13871_v27 = vld [vmem:[#allocation111_spill] sm:$0xff] }
 0x35a   : > { %2039 = vrot.lane.b32.xlu1 %v9895_v1, %s8493_s16  ;;  %v10644_v23 = vpop.permute.xlu1 %2489 }
 0x35b   : > { %v10636_v46 = vpop.permute.xlu0 %2487 }
 0x35c   : > { %2210 = vrot.lane.b32.xlu0 %v13864_v21, %s8492_s28 }
 0x35e   : > { %2212 = vrot.lane.b32.xlu1 %v13866_v60, %s8492_s28  ;;  %v10652_v51 = vpop.permute.xlu1 %1951 }
 0x35f   : > { %v10646_v16 = vpop.permute.xlu0 %1949  ;;  %13867 = vst [vmem:[#allocation107_spill] sm:$0xff] %v10652_v51 }
 0x360   : > { %13865 = vst [vmem:[#allocation105_spill] sm:$0xff] %v10646_v16  ;;  %2282 = vrot.lane.b32.xlu0 %v13864_v21, %s8493_s16  ;;  %v13869_v21 = vld [vmem:[#allocation108_spill] sm:$0xff] }
 0x361   : > { %v13906_v16 = vld [vmem:[#allocation20_spill] sm:$0xff] }
 0x362   : > { %2284 = vrot.lane.b32.xlu1 %v13866_v60, %s8493_s16  ;;  %v10658_v1 = vpop.permute.xlu1 %2023 }
 0x363   : > { %v2022_v49 = vpop.permute.xlu0 %2021 }
 0x364   : > { %2439 = vrot.lane.b32.xlu0 %v13868_v8, %s8492_s28  ;;  %v2980_v39 = vcombine.high %v10556_v63, %v2022_v49 }
 0x366   : > { %2441 = vrot.lane.b32.xlu1 %v13869_v21, %s8492_s28  ;;  %v10668_v52 = vpop.permute.xlu1 %2192 }
 0x367   : > { %v10660_v12 = vpop.permute.xlu0 %2190 }
 0x368   : > { %2511 = vrot.lane.b32.xlu0 %v13868_v8, %s8493_s16 }
 0x36a   : > { %2513 = vrot.lane.b32.xlu1 %v13869_v21, %s8493_s16  ;;  %v10676_v45 = vpop.permute.xlu1 %2264 }
 0x36b   : > { %v10666_v54 = vpop.permute.xlu0 %2262  ;;  %13873 = vst [vmem:[#allocation111_spill] sm:$0xff] %v10676_v45  ;;  %v13877_v45 = vld [vmem:[#allocation45_spill] sm:$0xff] }
 0x36c   : > { %13870 = vst [vmem:[#allocation106_spill] sm:$0xff] %v10666_v54  ;;  %2206 = vrot.lane.b32.xlu0 %v13871_v27, %s8492_s28 }
 0x36e   : > { %8033 = vrot.lane.b32.xlu1 %v10022_v58, %s8496_s24  ;;  %v10684_v17 = vpop.permute.xlu1 %2421  ;;  %v2964_v58 = vcombine.high %v13878_v19, %v13877_v45 }
 0x36f   : > { %v10674_v60 = vpop.permute.xlu0 %2419  ;;  %13874 = vst [vmem:[#allocation144_spill] sm:$0xff] %v10684_v17  ;;  %v13879_v17 = vld [vmem:[#allocation30_spill] sm:$0xff] }
 0x370   : > { %13872 = vst [vmem:[#allocation108_spill] sm:$0xff] %v10674_v60  ;;  %2278 = vrot.lane.b32.xlu0 %v13871_v27, %s8493_s16  ;;  %v2963_v27 = vcombine.low %v13878_v19, %v13877_v45  ;;  %v2947_v32 = vcombine.low %v13880_v29, %v13879_v17  ;;  %v2948_v11 = vcombine.high %v13880_v29, %v13879_v17  ;;  %v13882_v29 = vld [vmem:[#allocation123_spill] sm:$0xff] }
 0x372   : > { %8038 = vrot.lane.b32.xlu1 %v10072_v44, %s8497_s25  ;;  %v2979_v44 = vcombine.low %v10556_v63, %v2022_v49  ;;  %v2971_v54 = vrot.slane %v2963_v27, %v8818_v55  ;;  %v10720_v17 = vrot.slane %v2948_v11, %v8818_v55  ;;  %v13883_v49 = vld [vmem:[#allocation117_spill] sm:$0xff]  ;;  %v10726_v27 = vrot.slane %v2980_v39, %v8818_v55 }
 0x373   : > { %v10682_v8 = vpop.permute.xlu0 %2491  ;;  %v10694_v60 = vpop.permute.xlu1 %2493 }
 0x374   : > { %2435 = vrot.lane.b32.xlu0 %v13875_v48, %s8492_s28  ;;  %v2987_v63 = vrot.slane %v2979_v44, %v8818_v55  ;;  %13884 = vst [vmem:[#allocation33_spill] sm:$0xff] %v10726_v27  ;;  %v13887_v44 = vld [vmem:[#allocation120_spill] sm:$0xff] }
 0x376   : > { %8043 = vrot.lane.b32.xlu1 %v10077_v15, %s8496_s24  ;;  %v2955_v15 = vrot.slane %v2947_v32, %v8818_v55 }
 0x377   : > { %v10690_v21 = vpop.permute.xlu0 %1953  ;;  %v10709_v45 = vpop.permute.xlu1 %1955 }
 0x378   : > { %13876 = vst [vmem:[#allocation114_spill] sm:$0xff] %v10690_v21  ;;  %2507 = vrot.lane.b32.xlu0 %v13875_v48, %s8493_s16  ;;  %13881 = vst [vmem:[#allocation45_spill] sm:$0xff] %v10709_v45  ;;  %v10712_v48 = vrot.slane %v2964_v58, %v8818_v55  ;;  %v3011_v32 = vcombine.low %v2955_v15, %v2971_v54  ;;  %v13901_v21 = vld [vmem:[#allocation13_spill] sm:$0xff] }
 0x37a   : > { %8053 = vrot.lane.b32.xlu1 %v13883_v49, %s8498_s20  ;;  %v3027_v45 = vcombine.low %v10720_v17, %v10712_v48 }
 0x37b   : > { %v2026_v18 = vpop.permute.xlu0 %2025  ;;  %v10734_v11 = vpop.permute.xlu1 %2027 }
 0x37c   : > { %v2995_v19 = vcombine.low %v10604_v47, %v2026_v18  ;;  %v2996_v57 = vcombine.high %v10604_v47, %v2026_v18  ;;  %8028 = vrot.lane.b32.xlu0 %v13882_v29, %s8497_s25  ;;  %v3012_v29 = vcombine.high %v2955_v15, %v2971_v54  ;;  %v4832_v7 = vcombine.high %v10612_v43, %v10734_v11 }
 0x37e   : > { %v3003_v58 = vrot.slane %v2995_v19, %v8818_v55  ;;  %v10730_v18 = vrot.slane %v2996_v57, %v8818_v55  ;;  %v13888_v57 = vld [vmem:[#allocation121_spill] sm:$0xff]  ;;  %v4816_v19 = vcombine.high %v10564_v53, %v10658_v1  ;;  %v10804_v6 = vrot.slane %v4832_v7, %v8818_v55 }
 0x37f   : > { %v10732_v47 = vpop.permute.xlu0 %1961  ;;  %2208 = vrot.lane.b32.xlu1 %v13888_v57, %s8492_s28 }
 0x380   : > { %13885 = vst [vmem:[#allocation30_spill] sm:$0xff] %v10730_v18  ;;  %13886 = vst [vmem:[#allocation18_spill] sm:$0xff] %v10732_v47  ;;  %v3043_v49 = vcombine.low %v2987_v63, %v3003_v58  ;;  %v3044_v42 = vcombine.high %v2987_v63, %v3003_v58  ;;  %v3059_v39 = vcombine.low %v10726_v27, %v10730_v18  ;;  %8048 = vrot.lane.b32.xlu0 %v13887_v44, %s8498_s20  ;;  %v10760_v44 = vpop.permute.xlu1 %1963  ;;  %v13894_v27 = vld [vmem:[#allocation3_spill] sm:$0xff] }
 0x381   : > { %v10758_v47 = vrot.slane %v3012_v29, %v9339_v33  ;;  %13893 = vst [vmem:[#allocation145_spill] sm:$0xff] %v10760_v44  ;;  %v13895_v18 = vld [vmem:[#allocation7_spill] sm:$0xff]  ;;  %v10777_v29 = vrot.slane %v3011_v32, %v9339_v33  ;;  %v10780_v44 = vrot.slane %v3027_v45, %v9339_v33  ;;  %v13909_v45 = vld [vmem:[#allocation4_spill] sm:$0xff] }
 0x382   : > { %v10747_v54 = vrot.slane %v3043_v49, %v9339_v33  ;;  %v10750_v15 = vrot.slane %v3044_v42, %v9339_v33  ;;  %v10753_v63 = vrot.slane %v3059_v39, %v9339_v33  ;;  %v13896_v51 = vcombine.low %v13894_v27, %v13895_v18  ;;  %v13900_v39 = vld [vmem:[#allocation19_spill] sm:$0xff]  ;;  %v13910_v32 = vld [vmem:[#allocation8_spill] sm:$0xff] }
 0x383   : > { %v10755_v58 = vpop.permute.xlu0 %2033  ;;  %v13898_v42 = vcombine.high %v13894_v27, %v13895_v18  ;;  %13902 = vst [vmem:[#allocation19_spill] sm:$0xff] %v10777_v29  ;;  %13903 = vst [vmem:[#allocation13_spill] sm:$0xff] %v10780_v44  ;;  %v13907_v18 = vld [vmem:[#allocation46_spill] sm:$0xff]  ;;  %2280 = vrot.lane.b32.xlu1 %v13888_v57, %s8493_s16  ;;  %v13914_v7 = vcombine.high %v13909_v45, %v13910_v32  ;;  %v13930_v44 = vld [vmem:[#allocation23_spill] sm:$0xff] }
 0x384   : > { %13889 = vst [vmem:[#allocation123_spill] sm:$0xff] %v10747_v54  ;;  %13890 = vst [vmem:[#allocation117_spill] sm:$0xff] %v10750_v15  ;;  %v10766_v31 = vrot.slane %v13896_v51, %v9339_v33  ;;  %v13904_v51 = vld [vmem:[#allocation129_spill] sm:$0xff]  ;;  %v13917_v57 = vld [vmem:[#allocation10_spill] sm:$0xff] }
 0x385   : > { %13891 = vst [vmem:[#allocation120_spill] sm:$0xff] %v10753_v63  ;;  %13892 = vst [vmem:[#allocation121_spill] sm:$0xff] %v10755_v58  ;;  %v10772_v49 = vrot.slane %v13898_v42, %v9339_v33  ;;  %v4783_v58 = vcombine.low %v13901_v21, %v13900_v39  ;;  %8058 = vrot.lane.b32.xlu0 %v13904_v51, %s8497_s25  ;;  %v13908_v42 = vld [vmem:[#allocation42_spill] sm:$0xff]  ;;  %v13911_v39 = vcombine.low %v13909_v45, %v13910_v32  ;;  %v13924_v45 = vld [vmem:[#allocation5_spill] sm:$0xff] }
 0x386   : > { %13897 = vst [vmem:[#allocation3_spill] sm:$0xff] %v10766_v31  ;;  %v13905_v31 = vld [vmem:[#allocation35_spill] sm:$0xff]  ;;  %v10801_v51 = vrot.slane %v4816_v19, %v8818_v55  ;;  %v10822_v19 = vrot.slane %v13914_v7, %v9339_v33  ;;  %v13918_v29 = vcombine.high %v13916_v10, %v13917_v57  ;;  %v13925_v32 = vld [vmem:[#allocation9_spill] sm:$0xff] }
 0x387   : > { %13899 = vst [vmem:[#allocation7_spill] sm:$0xff] %v10772_v49  ;;  %v3355_v27 = vcombine.low %v13906_v16, %v13905_v31  ;;  %v3371_v49 = vcombine.low %v13908_v42, %v13907_v18  ;;  %v10798_v22 = vrot.slane %v13911_v39, %v9339_v33  ;;  %v10806_v38 = vpop.permute.xlu0 %2194  ;;  %v3356_v26 = vcombine.high %v13906_v16, %v13905_v31  ;;  %v13921_v16 = vld [vmem:[#allocation130_spill] sm:$0xff] }
 0x388   : > { %v3372_v39 = vcombine.high %v13908_v42, %v13907_v18  ;;  %13915 = vst [vmem:[#allocation20_spill] sm:$0xff] %v10822_v19  ;;  %v10828_v54 = vrot.slane %v13918_v29, %v9339_v33  ;;  %v10831_v21 = vrot.slane %v4783_v58, %v8818_v55  ;;  %v4895_v31 = vcombine.low %v10801_v51, %v10804_v6  ;;  %v13929_v19 = vld [vmem:[#allocation21_spill] sm:$0xff] }
 0x389   : > { %13912 = vst [vmem:[#allocation129_spill] sm:$0xff] %v10798_v22  ;;  %v10816_v22 = vpop.permute.xlu1 %2035  ;;  %8063 = vrot.lane.b32.xlu0 %v13921_v16, %s8497_s25  ;;  %v13922_v18 = vcombine.low %v13916_v10, %v13917_v57  ;;  %v13926_v29 = vcombine.high %v13924_v45, %v13925_v32  ;;  %v10850_v58 = vrot.slane %v3355_v27, %v8818_v55  ;;  %v13931_v16 = vld [vmem:[#allocation14_spill] sm:$0xff]  ;;  %v13932_v10 = vld [vmem:[#allocation124_spill] sm:$0xff] }
 0x38a   : > { %13913 = vst [vmem:[#allocation35_spill] sm:$0xff] %v10816_v22  ;;  %13919 = vst [vmem:[#allocation46_spill] sm:$0xff] %v10828_v54  ;;  %v13928_v54 = vld [vmem:[#allocation36_spill] sm:$0xff]  ;;  %v5191_v63 = vcombine.low %v13931_v16, %v13930_v44  ;;  %v10857_v56 = vrot.slane %v3371_v49, %v8818_v55  ;;  %2437 = vrot.lane.b32.xlu1 %v13932_v10, %s8492_s28  ;;  %v5192_v57 = vcombine.high %v13931_v16, %v13930_v44  ;;  %v13935_v27 = vld [vmem:[#allocation58_spill] sm:$0xff]  ;;  %s7369_s28 = sshll.u32 %s8471_s30, 2 }
 0x38b   : > { %13920 = vst [vmem:[#allocation42_spill] sm:$0xff] %v10831_v21  ;;  %v10841_v42 = vrot.slane %v13922_v18, %v9339_v33  ;;  %v10847_v7 = vrot.slane %v13926_v29, %v9339_v33  ;;  %v3523_v22 = vcombine.low %v13929_v19, %v13928_v54  ;;  %v13933_v18 = vld [vmem:[#allocation37_spill] sm:$0xff]  ;;  %v13934_v29 = vld [vmem:[#allocation22_spill] sm:$0xff]  ;;  %v10869_v5 = vpop.permute.xlu0 %2266  ;;  %v10872_v49 = vrot.slane %v3356_v26, %v8818_v55  ;;  %p409_p7 = scmp.lt.s32.totalorder %s7369_s28, 7 }
 0x38c   : > { %13937 = vst [vmem:[#allocation6_spill] sm:$0xff] %v10869_v5  ;;  %v10877_v50 = vrot.slane %v3372_v39, %v8818_v55  ;;  %v10880_v44 = vrot.slane %v4895_v31, %v9339_v33  ;;  %v13942_v26 = vld [vmem:[#allocation17_spill] sm:$0xff]  ;;  %v10898_v31 = vrot.slane %v5191_v63, %v8818_v55  ;;  %v3419_v2 = vcombine.low %v10850_v58, %v10857_v56 }
 0x38d   : > { %13923 = vst [vmem:[#allocation4_spill] sm:$0xff] %v10841_v42  ;;  %13927 = vst [vmem:[#allocation8_spill] sm:$0xff] %v10847_v7  ;;  %v4799_v7 = vcombine.low %v13934_v29, %v13933_v18  ;;  %v13936_v42 = vld [vmem:[#allocation29_spill] sm:$0xff]  ;;  %v10882_v16 = vpop.permute.xlu1 %2196  ;;  %v13940_v29 = vld [vmem:[#allocation26_spill] sm:$0xff]  ;;  %8073 = vrot.lane.b32.xlu0 %v10234_v30, %s8498_s20  ;;  %v10895_v39 = vrot.slane %v3523_v22, %v8818_v55  ;;  %v10911_v30 = vrot.slane %v5192_v57, %v8818_v55  ;;  %s14581_s28 = smov (!%p409_p7, %s7369_s28), 7 }
 0x38e   : > { %v5207_v61 = vcombine.low %v13936_v42, %v13935_v27  ;;  %v5208_v34 = vcombine.high %v13936_v42, %v13935_v27  ;;  %13938 = vst [vmem:[#allocation10_spill] sm:$0xff] %v10880_v44  ;;  %v13939_v18 = vld [vmem:[#allocation41_spill] sm:$0xff]  ;;  %v13941_v27 = vld [vmem:[#allocation28_spill] sm:$0xff]  ;;  %13944 = vst [vmem:[#allocation36_spill] sm:$0xff] %v10898_v31  ;;  %2509 = vrot.lane.b32.xlu1 %v13932_v10, %s8493_s16  ;;  %v3435_v57 = vcombine.low %v10872_v49, %v10877_v50  ;;  %s7370_s16 = sshll.u32 %s14579_s10, 3 }
 0x38f   : > { %v4171_v24 = vcombine.low %v13940_v29, %v13939_v18  ;;  %v4172_v42 = vcombine.high %v13940_v29, %v13939_v18  ;;  %v6007_v5 = vcombine.low %v13942_v26, %v13941_v27  ;;  %v6008_v41 = vcombine.high %v13942_v26, %v13941_v27  ;;  %13943 = vst [vmem:[#allocation130_spill] sm:$0xff] %v10895_v39  ;;  %v13945_v18 = vld [vmem:[#allocation38_spill] sm:$0xff]  ;;  %v13946_v29 = vld [vmem:[#allocation40_spill] sm:$0xff]  ;;  %v10922_v26 = vpop.permute.xlu0 %2423  ;;  %v14107_v44 = vld [vmem:[#allocation13_spill] sm:$0xff]  ;;  %s412_s17 = sadd.s32 %s7370_s16, %s14581_s28 }
 0x390   : > { %v13947_v20 = vcombine.low %v13945_v18, %v13946_v29  ;;  %13949 = vst [vmem:[#allocation23_spill] sm:$0xff] %v10911_v30  ;;  %v10914_v22 = vrot.slane %v4799_v7, %v8818_v55  ;;  %v10917_v63 = vrot.slane %v5207_v61, %v8818_v55  ;;  %v10920_v27 = vrot.slane %v5208_v34, %v8818_v55  ;;  %v13961_v61 = vld [vmem:[#allocation43_spill] sm:$0xff]  ;;  %s7371_s18 = sshll.u32 %s412_s17, 3 }
 0x391   : > { %13953 = vst [vmem:[#allocation22_spill] sm:$0xff] %v10922_v26  ;;  %v10930_v45 = vpop.permute.xlu1 %2268  ;;  %v10935_v7 = vrot.slane %v4171_v24, %v8818_v55  ;;  %v10938_v34 = vrot.slane %v4172_v42, %v8818_v55  ;;  %v10941_v26 = vrot.slane %v6007_v5, %v8818_v55  ;;  %v10944_v32 = vrot.slane %v6008_v41, %v8818_v55  ;;  %s414_s30 = scalar_lea.vmem %s13076_s9, %s7371_s18 }
 0x392   : > { %v10906_v3 = vrot.slane %v13947_v20, %v9339_v33  ;;  %13950 = vst [vmem:[#allocation14_spill] sm:$0xff] %v10914_v22  ;;  %13951 = vst [vmem:[#allocation124_spill] sm:$0xff] %v10917_v63  ;;  %v13955_v20 = vld [vmem:[#allocation15_spill] sm:$0xff]  ;;  %8078 = vrot.lane.b32.xlu0 %v10250_v9, %s8498_s20  ;;  %v10949_v10 = vrot.slane %v3419_v2, %v9339_v33  ;;  %v4896_v42 = vcombine.high %v10801_v51, %v10804_v6 }
 0x393   : > { %13952 = vst [vmem:[#allocation37_spill] sm:$0xff] %v10920_v27  ;;  %13956 = vst [vmem:[#allocation58_spill] sm:$0xff] %v10930_v45  ;;  %v13960_v45 = vld [vmem:[#allocation57_spill] sm:$0xff]  ;;  %8068 = vrot.lane.b32.xlu1 %v10236_v40, %s8496_s24  ;;  %v4847_v41 = vcombine.low %v10831_v21, %v10914_v22  ;;  %v4864_v9 = vcombine.high %v13945_v18, %v13946_v29  ;;  %v5255_v2 = vcombine.low %v10898_v31, %v10917_v63  ;;  %v2496_v14 = vpop.permute.xlu0 %2495  ;;  %v13963_v6 = vld [vmem:[#allocation63_spill] sm:$0xff] }
 0x394   : > { %13948 = vst [vmem:[#allocation21_spill] sm:$0xff] %v10906_v3  ;;  %13957 = vst [vmem:[#allocation29_spill] sm:$0xff] %v10941_v26  ;;  %v3539_v62 = vcombine.low %v13961_v61, %v13960_v45  ;;  %v3540_v24 = vcombine.high %v13961_v61, %v13960_v45  ;;  %v5271_v5 = vcombine.low %v10911_v30, %v10920_v27  ;;  %v13964_v51 = vld [vmem:[#allocation31_spill] sm:$0xff]  ;;  %v13965_v40 = vld [vmem:[#allocation44_spill] sm:$0xff] }
 0x395   : > { %13958 = vst [vmem:[#allocation41_spill] sm:$0xff] %v10944_v32  ;;  %13959 = vst [vmem:[#allocation26_spill] sm:$0xff] %v10949_v10  ;;  %v10968_v45 = vrot.slane %v3435_v57, %v9339_v33  ;;  %v5375_v61 = vcombine.low %v13964_v51, %v13963_v6  ;;  %v4187_v39 = vcombine.low %v13965_v40, %v10488_v0  ;;  %v10976_v18 = vpop.permute.xlu1 %2425  ;;  %v13967_v29 = vld [vmem:[#allocation34_spill] sm:$0xff] }
 0x396   : > { %v4188_v21 = vcombine.high %v13965_v40, %v10488_v0  ;;  %13966 = vst [vmem:[#allocation17_spill] sm:$0xff] %v10976_v18  ;;  %v6023_v31 = vcombine.low %v13967_v29, %v10538_v59  ;;  %v6024_v63 = vcombine.high %v13967_v29, %v10538_v59  ;;  %v4815_v57 = vcombine.low %v10564_v53, %v10658_v1 }
 0x397   : > { %13962 = vst [vmem:[#allocation28_spill] sm:$0xff] %v10968_v45  ;;  %v3387_v30 = vcombine.low %v10566_v4, %v10660_v12  ;;  %v10987_v27 = vrot.slane %v3539_v62, %v8818_v55  ;;  %v10990_v22 = vrot.slane %v3540_v24, %v8818_v55  ;;  %v3388_v0 = vcombine.high %v10566_v4, %v10660_v12  ;;  %v11009_v24 = vpop.permute.xlu0 %2202  ;;  %v14060_v45 = vld [vmem:[#allocation105_spill] sm:$0xff] }
 0x398   : > { %v10995_v40 = vrot.slane %v4896_v42, %v9339_v33  ;;  %v10998_v59 = vrot.slane %v4847_v41, %v9339_v33  ;;  %v11001_v53 = vrot.slane %v4864_v9, %v9339_v33  ;;  %v11004_v1 = vrot.slane %v5255_v2, %v9339_v33  ;;  %13974 = vst [vmem:[#allocation63_spill] sm:$0xff] %v11009_v24 }
 0x399   : > { %13968 = vst [vmem:[#allocation38_spill] sm:$0xff] %v10990_v22  ;;  %v11007_v62 = vrot.slane %v5271_v5, %v9339_v33  ;;  %v11014_v4 = vrot.slane %v5375_v61, %v8818_v55  ;;  %v11017_v42 = vrot.slane %v4187_v39, %v8818_v55  ;;  %v11020_v41 = vrot.slane %v4188_v21, %v8818_v55  ;;  %v2498_v9 = vpop.permute.xlu1 %2497 }
 0x39a   : > { %13969 = vst [vmem:[#allocation40_spill] sm:$0xff] %v10995_v40  ;;  %13970 = vst [vmem:[#allocation25_spill] sm:$0xff] %v10998_v59  ;;  %v11023_v2 = vrot.slane %v6023_v31, %v8818_v55  ;;  %v11026_v5 = vrot.slane %v6024_v63, %v8818_v55  ;;  %v11029_v29 = vrot.slane %v4815_v57, %v8818_v55 }
 0x39b   : > { %13971 = vst [vmem:[#allocation15_spill] sm:$0xff] %v11001_v53  ;;  %13972 = vst [vmem:[#allocation57_spill] sm:$0xff] %v11004_v1  ;;  %v11032_v12 = vrot.slane %v3387_v30, %v8818_v55  ;;  %v11035_v61 = vrot.slane %v3388_v0, %v8818_v55  ;;  %v4831_v21 = vcombine.low %v10612_v43, %v10734_v11  ;;  %v11050_v24 = vpop.permute.xlu0 %2274 }
 0x39c   : > { %13973 = vst [vmem:[#allocation43_spill] sm:$0xff] %v11007_v62  ;;  %13975 = vst [vmem:[#allocation31_spill] sm:$0xff] %v11014_v4  ;;  %v3403_v39 = vcombine.low %v10614_v35, %v10806_v38  ;;  %v4917_v31 = vcombine.low %v11001_v53, %v10995_v40  ;;  %v5223_v63 = vcombine.low %v10574_v25, %v10668_v52  ;;  %v14027_v62 = vld [vmem:[#allocation85_spill] sm:$0xff] }
 0x39d   : > { %13976 = vst [vmem:[#allocation44_spill] sm:$0xff] %v11023_v2  ;;  %13977 = vst [vmem:[#allocation34_spill] sm:$0xff] %v11026_v5  ;;  %v5224_v57 = vcombine.high %v10574_v25, %v10668_v52  ;;  %v3404_v30 = vcombine.high %v10614_v35, %v10806_v38  ;;  %v4219_v0 = vcombine.low %v10636_v46, %v2496_v14  ;;  %v11059_v22 = vpop.permute.xlu1 %2204 }
 0x39e   : > { %v5239_v43 = vcombine.low %v10622_v37, %v10882_v16  ;;  %v5240_v11 = vcombine.high %v10622_v37, %v10882_v16  ;;  %v4220_v18 = vcombine.high %v10636_v46, %v2496_v14  ;;  %v3077_v4 = vcombine.low %v10758_v47, %v10750_v15  ;;  %13978 = vst [vmem:[#allocation146_spill] sm:$0xff] %v11059_v22 }
 0x39f   : > { %v4203_v35 = vcombine.low %v10588_v36, %v10682_v8  ;;  %v4204_v52 = vcombine.high %v10588_v36, %v10682_v8  ;;  %v6039_v25 = vcombine.low %v10596_v13, %v10694_v60  ;;  %v6040_v38 = vcombine.high %v10596_v13, %v10694_v60  ;;  %v11081_v15 = vpop.permute.xlu0 %2431 }
 0x3a0   : > { %v11070_v37 = vrot.slane %v4831_v21, %v8818_v55  ;;  %v11073_v14 = vrot.slane %v3403_v39, %v8818_v55  ;;  %v8082_v46 = vpack.i.bf16 %v3077_v4, %v4917_v31  ;;  %v6055_v16 = vcombine.low %v10644_v23, %v2498_v9 }
 0x3a1   : > { %v11077_v22 = vrot.slane %v3404_v30, %v8818_v55  ;;  %v4227_v36 = vrot.slane %v4219_v0, %v8818_v55  ;;  %v6056_v8 = vcombine.high %v10644_v23, %v2498_v9  ;;  %v11086_v60 = vrot.slane %v5223_v63, %v8818_v55  ;;  %v11098_v23 = vpop.permute.xlu1 %2276 }
 0x3a2   : > { %v11089_v21 = vrot.slane %v5239_v43, %v8818_v55  ;;  %v11092_v4 = vrot.slane %v5240_v11, %v8818_v55  ;;  %v11095_v39 = vrot.slane %v4220_v18, %v8818_v55  ;;  %8083 = vrot.lane.b32.xlu1 %v8082_v46, %s8496_s24  ;;  %13982 = vst [vmem:[#allocation150_spill] sm:$0xff] %v11098_v23 }
 0x3a3   : > { %13979 = vst [vmem:[#allocation147_spill] sm:$0xff] %v11086_v60  ;;  %v11101_v9 = vrot.slane %v5224_v57, %v8818_v55  ;;  %v4211_v31 = vrot.slane %v4203_v35, %v8818_v55  ;;  %v11105_v63 = vrot.slane %v6055_v16, %v8818_v55  ;;  %v11108_v30 = vrot.slane %v6056_v8, %v8818_v55  ;;  %v11125_v8 = vpop.permute.xlu0 %2503 }
 0x3a4   : > { %13980 = vst [vmem:[#allocation148_spill] sm:$0xff] %v11089_v21  ;;  %13981 = vst [vmem:[#allocation149_spill] sm:$0xff] %v11092_v4  ;;  %v11111_v0 = vrot.slane %v4204_v52, %v8818_v55  ;;  %v11114_v18 = vrot.slane %v6039_v25, %v8818_v55  ;;  %v11117_v43 = vrot.slane %v6040_v38, %v8818_v55 }
 0x3a5   : > { %13983 = vst [vmem:[#allocation151_spill] sm:$0xff] %v11101_v9  ;;  %13984 = vst [vmem:[#allocation152_spill] sm:$0xff] %v11105_v63  ;;  %v4879_v57 = vcombine.low %v11029_v29, %v11070_v37  ;;  %v3451_v11 = vcombine.low %v11032_v12, %v11073_v14  ;;  %v3467_v35 = vcombine.low %v11035_v61, %v11077_v22  ;;  %v11135_v40 = vpop.permute.xlu1 %2433 }
 0x3a6   : > { %13985 = vst [vmem:[#allocation153_spill] sm:$0xff] %v11108_v30  ;;  %13986 = vst [vmem:[#allocation154_spill] sm:$0xff] %v11114_v18  ;;  %v4267_v46 = vcombine.low %v4211_v31, %v4227_v36  ;;  %v4268_v16 = vcombine.high %v4211_v31, %v4227_v36  ;;  %v5287_v52 = vcombine.low %v11086_v60, %v11089_v21 }
 0x3a7   : > { %13987 = vst [vmem:[#allocation155_spill] sm:$0xff] %v11117_v43  ;;  %13988 = vst [vmem:[#allocation156_spill] sm:$0xff] %v11125_v8  ;;  %v5303_v25 = vcombine.low %v11101_v9, %v11092_v4  ;;  %v4283_v38 = vcombine.low %v11111_v0, %v11095_v39  ;;  %v6119_v13 = vcombine.low %v11117_v43, %v11108_v30 }
 0x3a8   : > { %13989 = vst [vmem:[#allocation157_spill] sm:$0xff] %v11135_v40  ;;  %v4235_v53 = vcombine.low %v10935_v7, %v11017_v42  ;;  %v4236_v36 = vcombine.high %v10935_v7, %v11017_v42  ;;  %v4251_v31 = vcombine.low %v10938_v34, %v11020_v41  ;;  %v6103_v60 = vcombine.low %v11114_v18, %v11105_v63  ;;  %v14102_v40 = vld [vmem:[#allocation142_spill] sm:$0xff] }
 0x3a9   : > { %v13990_v21 = vcombine.high %v13964_v51, %v13963_v6  ;;  %v6071_v4 = vcombine.low %v10941_v26, %v11023_v2  ;;  %v6087_v43 = vcombine.low %v10944_v32, %v11026_v5  ;;  %v11156_v7 = vrot.slane %v4879_v57, %v9339_v33  ;;  %v11170_v51 = vpop.permute.xlu0 %1957  ;;  %v11184_v26 = vpop.permute.xlu1 %2505 }
 0x3aa   : > { %v11159_v42 = vrot.slane %v3451_v11, %v9339_v33  ;;  %v11162_v18 = vrot.slane %v3467_v35, %v9339_v33  ;;  %v11165_v63 = vrot.slane %v4267_v46, %v9339_v33  ;;  %v11168_v6 = vrot.slane %v4268_v16, %v9339_v33  ;;  %14001 = vst [vmem:[#allocation168_spill] sm:$0xff] %v11184_v26 }
 0x3ab   : > { %v11149_v9 = vrot.slane %v13990_v21, %v8818_v55  ;;  %13992 = vst [vmem:[#allocation159_spill] sm:$0xff] %v11156_v7  ;;  %v11173_v21 = vrot.slane %v5287_v52, %v9339_v33  ;;  %v11176_v57 = vrot.slane %v5303_v25, %v9339_v33  ;;  %v11179_v11 = vrot.slane %v4283_v38, %v9339_v33 }
 0x3ac   : > { %13993 = vst [vmem:[#allocation160_spill] sm:$0xff] %v11159_v42  ;;  %13994 = vst [vmem:[#allocation161_spill] sm:$0xff] %v11162_v18  ;;  %v11182_v35 = vrot.slane %v6119_v13, %v9339_v33  ;;  %v11187_v46 = vrot.slane %v4235_v53, %v9339_v33  ;;  %v11190_v16 = vrot.slane %v4236_v36, %v9339_v33  ;;  %v14061_v18 = vld [vmem:[#allocation138_spill] sm:$0xff] }
 0x3ad   : > { %13991 = vst [vmem:[#allocation158_spill] sm:$0xff] %v11149_v9  ;;  %13995 = vst [vmem:[#allocation162_spill] sm:$0xff] %v11165_v63  ;;  %v11193_v52 = vrot.slane %v4251_v31, %v9339_v33  ;;  %v11196_v25 = vrot.slane %v6103_v60, %v9339_v33  ;;  %v11199_v38 = vrot.slane %v6071_v4, %v9339_v33  ;;  %v11208_v36 = vpop.permute.xlu0 %2029  ;;  %v11218_v32 = vpop.permute.xlu1 %1959  ;;  %v14071_v63 = vld [vmem:[#allocation90_spill] sm:$0xff] }
 0x3ae   : > { %13996 = vst [vmem:[#allocation163_spill] sm:$0xff] %v11168_v6  ;;  %13997 = vst [vmem:[#allocation164_spill] sm:$0xff] %v11173_v21  ;;  %v11202_v13 = vrot.slane %v6087_v43, %v9339_v33  ;;  %v14008_v4 = vcombine.high %v13929_v19, %v13928_v54  ;;  %v14009_v43 = vcombine.low %v13955_v20, %v13954_v28 }
 0x3af   : > { %13998 = vst [vmem:[#allocation165_spill] sm:$0xff] %v11176_v57  ;;  %13999 = vst [vmem:[#allocation166_spill] sm:$0xff] %v11179_v11  ;;  %v3028_v53 = vcombine.high %v10720_v17, %v10712_v48  ;;  %v14011_v60 = vcombine.high %v13955_v20, %v13954_v28  ;;  %v3420_v54 = vcombine.high %v10850_v58, %v10857_v56  ;;  %v14015_v48 = vld [vmem:[#allocation130_spill] sm:$0xff]  ;;  %v14018_v56 = vld [vmem:[#allocation24_spill] sm:$0xff] }
 0x3b0   : > { %14000 = vst [vmem:[#allocation167_spill] sm:$0xff] %v11182_v35  ;;  %14002 = vst [vmem:[#allocation169_spill] sm:$0xff] %v11187_v46  ;;  %v3538_v5 = vrot.slane %v14008_v4, %v8818_v55  ;;  %v11236_v30 = vrot.slane %v14009_v43, %v8818_v55  ;;  %v3436_v19 = vcombine.high %v10872_v49, %v10877_v50  ;;  %v14013_v4 = vld [vmem:[#allocation14_spill] sm:$0xff]  ;;  %v14019_v35 = vld [vmem:[#allocation31_spill] sm:$0xff] }
 0x3b1   : > { %14003 = vst [vmem:[#allocation170_spill] sm:$0xff] %v11190_v16  ;;  %14004 = vst [vmem:[#allocation171_spill] sm:$0xff] %v11193_v52  ;;  %v11246_v2 = vrot.slane %v14011_v60, %v8818_v55  ;;  %v14014_v43 = vld [vmem:[#allocation42_spill] sm:$0xff]  ;;  %v3587_v17 = vcombine.low %v14015_v48, %v10987_v27  ;;  %v3588_v31 = vcombine.high %v14015_v48, %v10987_v27  ;;  %v11260_v20 = vpop.permute.xlu0 %2198  ;;  %v14017_v60 = vld [vmem:[#allocation72_spill] sm:$0xff] }
 0x3b2   : > { %14005 = vst [vmem:[#allocation172_spill] sm:$0xff] %v11196_v25  ;;  %14006 = vst [vmem:[#allocation173_spill] sm:$0xff] %v11199_v38  ;;  %v14016_v38 = vld [vmem:[#allocation38_spill] sm:$0xff]  ;;  %v4012_v58 = vcombine.high %v14018_v56, %v14017_v60  ;;  %v5423_v50 = vcombine.low %v11236_v30, %v14019_v35  ;;  %v14022_v27 = vld [vmem:[#allocation9_spill] sm:$0xff]  ;;  %v11286_v35 = vrot.slane %v3420_v54, %v9339_v33 }
 0x3b3   : > { %14007 = vst [vmem:[#allocation174_spill] sm:$0xff] %v11202_v13  ;;  %14010 = vst [vmem:[#allocation175_spill] sm:$0xff] %v11236_v30  ;;  %v4848_v13 = vcombine.high %v14014_v43, %v14013_v4  ;;  %v3603_v25 = vcombine.low %v3538_v5, %v14016_v38  ;;  %v3604_v28 = vcombine.high %v3538_v5, %v14016_v38  ;;  %v11268_v4 = vpop.permute.xlu1 %2031  ;;  %v14021_v43 = vld [vmem:[#allocation5_spill] sm:$0xff]  ;;  %v14025_v60 = vld [vmem:[#allocation32_spill] sm:$0xff] }
 0x3b4   : > { %14012 = vst [vmem:[#allocation176_spill] sm:$0xff] %v11246_v2  ;;  %v5439_v49 = vcombine.low %v11246_v2, %v11149_v9  ;;  %14020 = vst [vmem:[#allocation14_spill] sm:$0xff] %v11268_v4  ;;  %v14023_v48 = vcombine.low %v14021_v43, %v14022_v27  ;;  %v11277_v5 = vrot.slane %v3028_v53, %v9339_v33  ;;  %v14026_v56 = vld [vmem:[#allocation39_spill] sm:$0xff]  ;;  %v14032_v27 = vld [vmem:[#allocation110_spill] sm:$0xff] }
 0x3b5   : > { %v4252_v38 = vcombine.high %v10938_v34, %v11020_v41  ;;  %v5832_v21 = vcombine.high %v14026_v56, %v14025_v60  ;;  %v14028_v57 = vld [vmem:[#allocation27_spill] sm:$0xff]  ;;  %14029 = vst [vmem:[#allocation130_spill] sm:$0xff] %v11286_v35  ;;  %v11289_v2 = vrot.slane %v3436_v19, %v9339_v33  ;;  %v11292_v43 = vrot.slane %v4848_v13, %v9339_v33  ;;  %v11312_v13 = vpop.permute.xlu0 %2270  ;;  %v14049_v56 = vld [vmem:[#allocation113_spill] sm:$0xff]  ;;  %v14063_v11 = vld [vmem:[#allocation140_spill] sm:$0xff] }
 0x3b6   : > { %v11274_v1 = vrot.slane %v14023_v48, %v9339_v33  ;;  %v5848_v30 = vcombine.high %v14028_v57, %v14027_v62  ;;  %v14031_v53 = vld [vmem:[#allocation119_spill] sm:$0xff]  ;;  %v11301_v41 = vrot.slane %v3587_v17, %v9339_v33  ;;  %v11304_v62 = vrot.slane %v3588_v31, %v9339_v33 }
 0x3b7   : > { %14030 = vst [vmem:[#allocation38_spill] sm:$0xff] %v11289_v2  ;;  %v14033_v48 = vcombine.high %v14031_v53, %v14032_v27  ;;  %v11307_v57 = vrot.slane %v3603_v25, %v9339_v33  ;;  %v11310_v54 = vrot.slane %v3604_v28, %v9339_v33  ;;  %v11317_v53 = vrot.slane %v4012_v58, %v9339_v33  ;;  %v11325_v27 = vpop.permute.xlu1 %2200  ;;  %v14048_v58 = vld [vmem:[#allocation81_spill] sm:$0xff]  ;;  %v14066_v19 = vld [vmem:[#allocation99_spill] sm:$0xff] }
 0x3b8   : > { %14024 = vst [vmem:[#allocation42_spill] sm:$0xff] %v11274_v1  ;;  %14035 = vst [vmem:[#allocation24_spill] sm:$0xff] %v11301_v41  ;;  %v11320_v17 = vrot.slane %v5423_v50, %v9339_v33  ;;  %v11323_v31 = vrot.slane %v5439_v49, %v9339_v33  ;;  %v11328_v25 = vrot.slane %v4252_v38, %v9339_v33  ;;  %v14065_v38 = vld [vmem:[#allocation107_spill] sm:$0xff] }
 0x3b9   : > { %v11298_v34 = vrot.slane %v14033_v48, %v9339_v33  ;;  %14036 = vst [vmem:[#allocation5_spill] sm:$0xff] %v11304_v62  ;;  %14037 = vst [vmem:[#allocation9_spill] sm:$0xff] %v11307_v57  ;;  %v11331_v28 = vrot.slane %v5832_v21, %v9339_v33  ;;  %v11334_v48 = vrot.slane %v5848_v30, %v9339_v33  ;;  %v14056_v21 = vld [vmem:[#allocation128_spill] sm:$0xff]  ;;  %v11362_v26 = vpop.permute.xlu0 %2427  ;;  %v14118_v57 = vld [vmem:[#allocation143_spill] sm:$0xff] }
 0x3ba   : > { %14038 = vst [vmem:[#allocation32_spill] sm:$0xff] %v11310_v54  ;;  %14041 = vst [vmem:[#allocation39_spill] sm:$0xff] %v11317_v53  ;;  %v14050_v9 = vcombine.high %v14048_v58, %v14049_v56  ;;  %v14057_v54 = vld [vmem:[#allocation112_spill] sm:$0xff]  ;;  %v2811_v56 = vcombine.low %v14061_v18, %v14060_v45  ;;  %v14062_v58 = vld [vmem:[#allocation114_spill] sm:$0xff]  ;;  %v4647_v52 = vcombine.low %v14066_v19, %v14065_v38 }
 0x3bb   : > { %14034 = vst [vmem:[#allocation72_spill] sm:$0xff] %v11298_v34  ;;  %14042 = vst [vmem:[#allocation85_spill] sm:$0xff] %v11320_v17  ;;  %v14058_v30 = vcombine.high %v14056_v21, %v14057_v54  ;;  %v2827_v62 = vcombine.low %v14063_v11, %v14062_v58  ;;  %v2828_v60 = vcombine.high %v14063_v11, %v14062_v58  ;;  %v14067_v21 = vld [vmem:[#allocation45_spill] sm:$0xff]  ;;  %v11370_v46 = vpop.permute.xlu1 %2272 }
 0x3bc   : > { %14043 = vst [vmem:[#allocation27_spill] sm:$0xff] %v11323_v31  ;;  %14044 = vst [vmem:[#allocation119_spill] sm:$0xff] %v11325_v27  ;;  %v11340_v50 = vrot.slane %v14050_v9, %v9339_v33  ;;  %v2812_v9 = vcombine.high %v14061_v18, %v14060_v45  ;;  %v4648_v54 = vcombine.high %v14066_v19, %v14065_v38  ;;  %v14070_v18 = vld [vmem:[#allocation106_spill] sm:$0xff]  ;;  %v14105_v27 = vld [vmem:[#allocation19_spill] sm:$0xff] }
 0x3bd   : > { %14045 = vst [vmem:[#allocation110_spill] sm:$0xff] %v11328_v25  ;;  %14046 = vst [vmem:[#allocation177_spill] sm:$0xff] %v11331_v28  ;;  %v11352_v2 = vrot.slane %v14058_v30, %v9339_v33  ;;  %v14068_v30 = vld [vmem:[#allocation141_spill] sm:$0xff]  ;;  %v3627_v35 = vcombine.low %v14071_v63, %v14070_v18  ;;  %v2835_v6 = vrot.slane %v2827_v62, %v8818_v55  ;;  %v11394_v58 = vpop.permute.xlu0 %2499  ;;  %v14079_v62 = vld [vmem:[#allocation94_spill] sm:$0xff] }
 0x3be   : > { %14047 = vst [vmem:[#allocation178_spill] sm:$0xff] %v11334_v48  ;;  %14051 = vst [vmem:[#allocation81_spill] sm:$0xff] %v11340_v50  ;;  %v4663_v49 = vcombine.low %v14068_v30, %v14067_v21  ;;  %v4664_v11 = vcombine.high %v14068_v30, %v14067_v21  ;;  %v2819_v21 = vrot.slane %v2811_v56, %v8818_v55  ;;  %v14084_v25 = vld [vmem:[#allocation30_spill] sm:$0xff] }
 0x3bf   : > { %14059 = vst [vmem:[#allocation113_spill] sm:$0xff] %v11352_v2  ;;  %14064 = vst [vmem:[#allocation128_spill] sm:$0xff] %v11362_v26  ;;  %v2826_v30 = vrot.slane %v2812_v9, %v8818_v55  ;;  %v2842_v19 = vrot.slane %v2828_v60, %v8818_v55  ;;  %v4655_v42 = vrot.slane %v4647_v52, %v8818_v55  ;;  %v11401_v53 = vpop.permute.xlu1 %2429  ;;  %v14078_v9 = vld [vmem:[#allocation108_spill] sm:$0xff]  ;;  %v14080_v2 = vld [vmem:[#allocation111_spill] sm:$0xff] }
 0x3c0   : > { %14069 = vst [vmem:[#allocation112_spill] sm:$0xff] %v11370_v46  ;;  %14076 = vst [vmem:[#allocation105_spill] sm:$0xff] %v11394_v58  ;;  %v4662_v1 = vrot.slane %v4648_v54, %v8818_v55  ;;  %v3628_v45 = vcombine.high %v14071_v63, %v14070_v18  ;;  %v4671_v38 = vrot.slane %v4663_v49, %v8818_v55  ;;  %v14081_v54 = vld [vmem:[#allocation101_spill] sm:$0xff]  ;;  %v14082_v49 = vld [vmem:[#allocation144_spill] sm:$0xff] }
 0x3c1   : > { %14077 = vst [vmem:[#allocation138_spill] sm:$0xff] %v11401_v53  ;;  %v11404_v56 = vrot.slane %v3627_v35, %v8818_v55  ;;  %v4035_v28 = vcombine.low %v14079_v62, %v14078_v9  ;;  %v4036_v60 = vcombine.high %v14079_v62, %v14078_v9  ;;  %v4678_v52 = vrot.slane %v4664_v11, %v8818_v55  ;;  %v14083_v18 = vld [vmem:[#allocation139_spill] sm:$0xff]  ;;  %v14085_v53 = vld [vmem:[#allocation33_spill] sm:$0xff]  ;;  %v11421_v62 = vpop.permute.xlu0 %1969  ;;  %v14103_v46 = vld [vmem:[#allocation18_spill] sm:$0xff] }
 0x3c2   : > { %v5463_v10 = vcombine.low %v14081_v54, %v14080_v2  ;;  %v5464_v63 = vcombine.high %v14081_v54, %v14080_v2  ;;  %v5871_v48 = vcombine.low %v14083_v18, %v14082_v49  ;;  %v5872_v35 = vcombine.high %v14083_v18, %v14082_v49 }
 0x3c3   : > { %v2875_v50 = vcombine.low %v2819_v21, %v2835_v6  ;;  %v2876_v16 = vcombine.high %v2819_v21, %v2835_v6  ;;  %v2891_v34 = vcombine.low %v2826_v30, %v2842_v19  ;;  %v3060_v9 = vcombine.high %v14085_v53, %v14084_v25  ;;  %v11426_v54 = vpop.permute.xlu1 %2501 }
 0x3c4   : > { %v11424_v11 = vrot.slane %v3628_v45, %v8818_v55  ;;  %v2892_v31 = vcombine.high %v2826_v30, %v2842_v19  ;;  %v4711_v17 = vcombine.low %v4655_v42, %v4671_v38  ;;  %v4712_v2 = vcombine.high %v4655_v42, %v4671_v38  ;;  %14086 = vst [vmem:[#allocation114_spill] sm:$0xff] %v11426_v54  ;;  %v14101_v54 = vld [vmem:[#allocation58_spill] sm:$0xff] }
 0x3c5   : > { %v11429_v58 = vrot.slane %v4035_v28, %v8818_v55  ;;  %v11432_v49 = vrot.slane %v4036_v60, %v8818_v55  ;;  %v4727_v6 = vcombine.low %v4662_v1, %v4678_v52  ;;  %v4728_v21 = vcombine.high %v4662_v1, %v4678_v52  ;;  %v11458_v38 = vpop.permute.xlu0 %2041  ;;  %v14095_v60 = vld [vmem:[#allocation6_spill] sm:$0xff] }
 0x3c6   : > { %v11435_v53 = vrot.slane %v5463_v10, %v8818_v55  ;;  %v11438_v25 = vrot.slane %v5464_v63, %v8818_v55  ;;  %v11441_v45 = vrot.slane %v5871_v48, %v8818_v55  ;;  %v11444_v42 = vrot.slane %v5872_v35, %v8818_v55  ;;  %v14099_v35 = vld [vmem:[#allocation22_spill] sm:$0xff] }
 0x3c7   : > { %14087 = vst [vmem:[#allocation140_spill] sm:$0xff] %v11429_v58  ;;  %14088 = vst [vmem:[#allocation107_spill] sm:$0xff] %v11432_v49  ;;  %v11447_v28 = vrot.slane %v2875_v50, %v9339_v33  ;;  %v11450_v19 = vrot.slane %v2876_v16, %v9339_v33  ;;  %v11453_v1 = vrot.slane %v2891_v34, %v9339_v33  ;;  %v14096_v16 = vld [vmem:[#allocation100_spill] sm:$0xff]  ;;  %v11471_v63 = vpop.permute.xlu1 %1971 }
 0x3c8   : > { %14089 = vst [vmem:[#allocation99_spill] sm:$0xff] %v11435_v53  ;;  %14090 = vst [vmem:[#allocation45_spill] sm:$0xff] %v11438_v25  ;;  %v11456_v10 = vrot.slane %v3060_v9, %v9339_v33  ;;  %v11461_v48 = vrot.slane %v2892_v31, %v9339_v33  ;;  %v11464_v30 = vrot.slane %v4711_v17, %v9339_v33  ;;  %v14100_v17 = vld [vmem:[#allocation103_spill] sm:$0xff] }
 0x3c9   : > { %14091 = vst [vmem:[#allocation141_spill] sm:$0xff] %v11447_v28  ;;  %14092 = vst [vmem:[#allocation106_spill] sm:$0xff] %v11453_v1  ;;  %v11467_v50 = vrot.slane %v4712_v2, %v9339_v33  ;;  %v3643_v52 = vcombine.low %v14096_v16, %v14095_v60  ;;  %v11474_v34 = vrot.slane %v4727_v6, %v9339_v33  ;;  %v14104_v6 = vld [vmem:[#allocation123_spill] sm:$0xff] }
 0x3ca   : > { %14093 = vst [vmem:[#allocation90_spill] sm:$0xff] %v11464_v30  ;;  %v11477_v18 = vrot.slane %v4728_v21, %v9339_v33  ;;  %v3644_v31 = vcombine.high %v14096_v16, %v14095_v60  ;;  %v4051_v9 = vcombine.low %v14100_v17, %v14099_v35  ;;  %v4052_v2 = vcombine.high %v14100_v17, %v14099_v35  ;;  %v1966_v16 = vpop.permute.xlu0 %1965 }
 0x3cb   : > { %14094 = vst [vmem:[#allocation108_spill] sm:$0xff] %v11467_v50  ;;  %14097 = vst [vmem:[#allocation94_spill] sm:$0xff] %v11474_v34  ;;  %v5479_v8 = vcombine.low %v14102_v40, %v14101_v54  ;;  %v2859_v50 = vcombine.low %v14103_v46, %v11421_v62  ;;  %v4880_v21 = vcombine.high %v11029_v29, %v11070_v37  ;;  %v11505_v37 = vpop.permute.xlu1 %2043 }
 0x3cc   : > { %14098 = vst [vmem:[#allocation111_spill] sm:$0xff] %v11477_v18  ;;  %v3452_v60 = vcombine.high %v11032_v12, %v11073_v14  ;;  %v14106_v18 = vld [vmem:[#allocation120_spill] sm:$0xff]  ;;  %v3468_v17 = vcombine.high %v11035_v61, %v11077_v22  ;;  %v3651_v23 = vrot.slane %v3643_v52, %v8818_v55  ;;  %v5480_v30 = vcombine.high %v14102_v40, %v14101_v54 }
 0x3cd   : > { %v2843_v29 = vcombine.low %v11170_v51, %v1966_v16  ;;  %v3658_v12 = vrot.slane %v3644_v31, %v8818_v55  ;;  %v11509_v14 = vrot.slane %v4051_v9, %v8818_v55  ;;  %v2844_v3 = vcombine.high %v11170_v51, %v1966_v16  ;;  %v14112_v9 = vld [vmem:[#allocation121_spill] sm:$0xff] }
 0x3ce   : > { %v11515_v22 = vrot.slane %v4052_v2, %v8818_v55  ;;  %v11518_v61 = vrot.slane %v5479_v8, %v8818_v55  ;;  %v11521_v40 = vrot.slane %v2859_v50, %v8818_v55  ;;  %v11527_v52 = vrot.slane %v4880_v21, %v9339_v33  ;;  %v2038_v8 = vpop.permute.xlu0 %2037 }
 0x3cf   : > { %14108 = vst [vmem:[#allocation101_spill] sm:$0xff] %v11509_v14  ;;  %v11524_v54 = vrot.slane %v2843_v29, %v8818_v55  ;;  %v11530_v51 = vrot.slane %v3452_v60, %v9339_v33  ;;  %v2860_v31 = vcombine.high %v14103_v46, %v11421_v62  ;;  %v3099_v2 = vcombine.low %v14112_v9, %v11458_v38  ;;  %v11545_v60 = vpop.permute.xlu1 %1967 }
 0x3d0   : > { %14109 = vst [vmem:[#allocation144_spill] sm:$0xff] %v11515_v22  ;;  %14110 = vst [vmem:[#allocation139_spill] sm:$0xff] %v11518_v61  ;;  %v11537_v16 = vrot.slane %v3468_v17, %v9339_v33  ;;  %v3691_v50 = vcombine.low %v11404_v56, %v3651_v23  ;;  %v11541_v29 = vrot.slane %v5480_v30, %v8818_v55 }
 0x3d1   : > { %14111 = vst [vmem:[#allocation30_spill] sm:$0xff] %v11530_v51  ;;  %v2907_v21 = vcombine.low %v11524_v54, %v11521_v40  ;;  %v3692_v35 = vcombine.high %v11404_v56, %v3651_v23  ;;  %v3707_v46 = vcombine.low %v11424_v11, %v3658_v12  ;;  %v2858_v62 = vrot.slane %v2844_v3, %v8818_v55 }
 0x3d2   : > { %14113 = vst [vmem:[#allocation33_spill] sm:$0xff] %v11537_v16  ;;  %14114 = vst [vmem:[#allocation6_spill] sm:$0xff] %v11541_v29  ;;  %v3083_v51 = vcombine.low %v11208_v36, %v2038_v8  ;;  %v3708_v17 = vcombine.high %v11424_v11, %v3658_v12  ;;  %v4099_v16 = vcombine.low %v11429_v58, %v11509_v14  ;;  %v11568_v11 = vpop.permute.xlu0 %2210  ;;  %v14117_v14 = vld [vmem:[#allocation17_spill] sm:$0xff] }
 0x3d3   : > { %v4115_v30 = vcombine.low %v11432_v49, %v11515_v22  ;;  %v5527_v34 = vcombine.low %v11435_v53, %v11518_v61  ;;  %v2874_v26 = vrot.slane %v2860_v31, %v8818_v55  ;;  %v11560_v23 = vrot.slane %v3099_v2, %v8818_v55  ;;  %v11579_v41 = vpop.permute.xlu1 %2039  ;;  %v14138_v49 = vld [vmem:[#allocation131_spill] sm:$0xff] }
 0x3d4   : > { %v11563_v3 = vrot.slane %v2907_v21, %v9339_v33  ;;  %v11566_v56 = vrot.slane %v3083_v51, %v8818_v55  ;;  %v11571_v12 = vrot.slane %v3691_v50, %v9339_v33  ;;  %v5543_v58 = vcombine.low %v11438_v25, %v11541_v29 }
 0x3d5   : > { %v5887_v31 = vcombine.low %v14118_v57, %v14117_v14  ;;  %v5888_v2 = vcombine.high %v14118_v57, %v14117_v14  ;;  %v11582_v21 = vrot.slane %v3692_v35, %v9339_v33  ;;  %v4284_v51 = vcombine.high %v11111_v0, %v11095_v39 }
 0x3d6   : > { %14115 = vst [vmem:[#allocation100_spill] sm:$0xff] %v11563_v3  ;;  %14116 = vst [vmem:[#allocation22_spill] sm:$0xff] %v11571_v12  ;;  %v2924_v4 = vcombine.high %v2858_v62, %v2874_v26  ;;  %v3147_v50 = vcombine.low %v11566_v56, %v11560_v23  ;;  %v11589_v25 = vrot.slane %v3707_v46, %v9339_v33  ;;  %v11607_v46 = vpop.permute.xlu0 %2282 }
 0x3d7   : > { %14119 = vst [vmem:[#allocation103_spill] sm:$0xff] %v11582_v21  ;;  %v11592_v29 = vrot.slane %v3708_v17, %v9339_v33  ;;  %v11595_v57 = vrot.slane %v4099_v16, %v9339_v33  ;;  %v11600_v14 = vrot.slane %v4115_v30, %v9339_v33  ;;  %v11605_v0 = vrot.slane %v5527_v34, %v9339_v33  ;;  %v11621_v39 = vpop.permute.xlu1 %2212 }
 0x3d8   : > { %14120 = vst [vmem:[#allocation58_spill] sm:$0xff] %v11589_v25  ;;  %v2940_v17 = vcombine.high %v11447_v28, %v11563_v3  ;;  %v11612_v16 = vrot.slane %v5543_v58, %v9339_v33  ;;  %v11615_v21 = vrot.slane %v5887_v31, %v8818_v55  ;;  %v11618_v30 = vrot.slane %v5888_v2, %v8818_v55  ;;  %v14129_v2 = vld [vmem:[#allocation145_spill] sm:$0xff] }
 0x3d9   : > { %14121 = vst [vmem:[#allocation142_spill] sm:$0xff] %v11592_v29  ;;  %14122 = vst [vmem:[#allocation18_spill] sm:$0xff] %v11595_v57  ;;  %v3084_v35 = vcombine.high %v11208_v36, %v2038_v8  ;;  %v11624_v34 = vrot.slane %v4284_v51, %v9339_v33  ;;  %v11627_v29 = vrot.slane %v2924_v4, %v9339_v33  ;;  %v14180_v25 = vld [vmem:[#allocation89_spill] sm:$0xff] }
 0x3da   : > { %14123 = vst [vmem:[#allocation121_spill] sm:$0xff] %v11600_v14  ;;  %14124 = vst [vmem:[#allocation17_spill] sm:$0xff] %v11605_v0  ;;  %v11630_v28 = vrot.slane %v3147_v50, %v9339_v33  ;;  %v4679_v58 = vcombine.low %v11218_v32, %v11545_v60  ;;  %v3100_v31 = vcombine.high %v14112_v9, %v11458_v38  ;;  %v11647_v53 = vpop.permute.xlu0 %2439  ;;  %v14133_v9 = vld [vmem:[#allocation35_spill] sm:$0xff] }
 0x3db   : > { %14125 = vst [vmem:[#allocation143_spill] sm:$0xff] %v11612_v16  ;;  %14126 = vst [vmem:[#allocation179_spill] sm:$0xff] %v11618_v30  ;;  %v4695_v36 = vcombine.low %v14129_v2, %v11471_v63  ;;  %v2908_v8 = vcombine.high %v11524_v54, %v11521_v40  ;;  %v2923_v51 = vcombine.low %v2858_v62, %v2874_v26  ;;  %v11656_v40 = vpop.permute.xlu1 %2284 }
 0x3dc   : > { %14127 = vst [vmem:[#allocation180_spill] sm:$0xff] %v11624_v34  ;;  %14128 = vst [vmem:[#allocation181_spill] sm:$0xff] %v11630_v28  ;;  %v4696_v4 = vcombine.high %v14129_v2, %v11471_v63  ;;  %v4680_v50 = vcombine.high %v11218_v32, %v11545_v60  ;;  %v14130_v3 = vcombine.high %v14105_v27, %v14104_v6  ;;  %v14131_v60 = vld [vmem:[#allocation3_spill] sm:$0xff] }
 0x3dd   : > { %v3098_v63 = vrot.slane %v3084_v35, %v8818_v55  ;;  %v11661_v54 = vrot.slane %v4679_v58, %v8818_v55  ;;  %v3212_v62 = vcombine.high %v11630_v28, %v14131_v60  ;;  %v3114_v35 = vrot.slane %v3100_v31, %v8818_v55  ;;  %v14134_v6 = vld [vmem:[#allocation63_spill] sm:$0xff] }
 0x3de   : > { %v8087_v61 = vpack.i.bf16 %v14130_v3, %v2940_v17  ;;  %v2945_v3 = vcombine.low %v11461_v48, %v11627_v29  ;;  %v11672_v2 = vrot.slane %v4695_v36, %v8818_v55  ;;  %v2922_v26 = vrot.slane %v2908_v8, %v9339_v33  ;;  %v11688_v31 = vpop.permute.xlu0 %2511  ;;  %v14136_v28 = vld [vmem:[#allocation83_spill] sm:$0xff] }
 0x3df   : > { %v11676_v58 = vrot.slane %v2923_v51, %v9339_v33  ;;  %v11686_v17 = vrot.slane %v4680_v50, %v8818_v55  ;;  %v3148_v36 = vcombine.high %v11566_v56, %v11560_v23  ;;  %v3163_v8 = vcombine.low %v3098_v63, %v3114_v35  ;;  %v11694_v27 = vpop.permute.xlu1 %2441  ;;  %v14135_v50 = vld [vmem:[#allocation73_spill] sm:$0xff]  ;;  %v14139_v34 = vld [vmem:[#allocation67_spill] sm:$0xff] }
 0x3e0   : > { %8088 = vrot.lane.b32.xlu1 %v8087_v61, %s8497_s25  ;;  %v11679_v61 = vrot.slane %v4696_v4, %v8818_v55  ;;  %v3164_v51 = vcombine.high %v3098_v63, %v3114_v35  ;;  %v3507_v4 = vcombine.low %v14134_v6, %v11568_v11  ;;  %v3508_v38 = vcombine.high %v14134_v6, %v11568_v11 }
 0x3e1   : > { %14132 = vst [vmem:[#allocation145_spill] sm:$0xff] %v11676_v58  ;;  %v14137_v60 = vcombine.high %v14135_v50, %v14136_v28  ;;  %v14140_v23 = vcombine.low %v14138_v49, %v14139_v34  ;;  %v3675_v35 = vcombine.low %v11050_v24, %v11607_v46  ;;  %v2941_v30 = vcombine.low %v11450_v19, %v2922_v26 }
 0x3e2   : > { %v2944_v32 = vcombine.high %v11453_v1, %v11676_v58  ;;  %v3676_v49 = vcombine.high %v11050_v24, %v11607_v46  ;;  %v2207_v34 = vpop.permute.xlu0 %2206  ;;  %v2946_v11 = vcombine.high %v11461_v48, %v11627_v29  ;;  %v14143_v24 = vld [vmem:[#allocation49_spill] sm:$0xff]  ;;  %v14144_v46 = vld [vmem:[#allocation104_spill] sm:$0xff]  ;;  %v11746_v28 = vrot.slane %v3508_v38, %v8818_v55 }
 0x3e3   : > { %v8092_v22 = vpack.i.bf16 %v14137_v60, %v3212_v62  ;;  %v8102_v56 = vpack.i.bf16 %v2945_v3, %v14140_v23  ;;  %v11722_v60 = vrot.slane %v3148_v36, %v9339_v33  ;;  %v11725_v62 = vrot.slane %v3163_v8, %v9339_v33  ;;  %v11730_v23 = vpop.permute.xlu1 %2513 }
 0x3e4   : > { %v11728_v3 = vrot.slane %v3164_v51, %v9339_v33  ;;  %14142 = vst [vmem:[#allocation63_spill] sm:$0xff] %v11730_v23  ;;  %v3491_v6 = vcombine.low %v11260_v20, %v2207_v34  ;;  %v3492_v8 = vcombine.high %v11260_v20, %v2207_v34  ;;  %v11743_v51 = vrot.slane %v3507_v4, %v8818_v55 }
 0x3e5   : > { %8093 = vrot.lane.b32.xlu0 %v8092_v22, %s8497_s25  ;;  %8103 = vrot.lane.b32.xlu1 %v8102_v56, %s8496_s24  ;;  %14141 = vst [vmem:[#allocation35_spill] sm:$0xff] %v11725_v62  ;;  %v14145_v22 = vcombine.low %v14143_v24, %v14144_v46  ;;  %v14146_v56 = vcombine.high %v14107_v44, %v14106_v18  ;;  %14147 = vst [vmem:[#allocation131_spill] sm:$0xff] %v11746_v28  ;;  %v14152_v46 = vld [vmem:[#allocation7_spill] sm:$0xff]  ;;  %v14158_v18 = vld [vmem:[#allocation14_spill] sm:$0xff] }
 0x3e6   : > { %v11749_v48 = vrot.slane %v3675_v35, %v8818_v55  ;;  %v2942_v29 = vcombine.high %v11450_v19, %v2922_v26  ;;  %v11758_v20 = vrot.slane %v3491_v6, %v8818_v55  ;;  %v2279_v38 = vpop.permute.xlu0 %2278  ;;  %v4083_v4 = vcombine.low %v11081_v15, %v11647_v53 }
 0x3e7   : > { %v8097_v63 = vpack.i.bf16 %v14145_v22, %v2941_v30  ;;  %v8107_v36 = vpack.i.bf16 %v14146_v56, %v2944_v32  ;;  %v11753_v30 = vrot.slane %v3676_v49, %v8818_v55  ;;  %v11761_v32 = vrot.slane %v3492_v8, %v8818_v55  ;;  %v14157_v8 = vld [vmem:[#allocation129_spill] sm:$0xff] }
 0x3e8   : > { %14148 = vst [vmem:[#allocation67_spill] sm:$0xff] %v11749_v48  ;;  %v4084_v19 = vcombine.high %v11081_v15, %v11647_v53  ;;  %v3659_v26 = vcombine.low %v11312_v13, %v2279_v38  ;;  %v3660_v35 = vcombine.high %v11312_v13, %v2279_v38  ;;  %v3555_v6 = vcombine.low %v11758_v20, %v11743_v51  ;;  %v14153_v15 = vld [vmem:[#allocation117_spill] sm:$0xff] }
 0x3e9   : > { %14149 = vst [vmem:[#allocation49_spill] sm:$0xff] %v11753_v30  ;;  %8098 = vrot.lane.b32.xlu0 %v8097_v63, %s8496_s24  ;;  %8108 = vrot.lane.b32.xlu1 %v8107_v36, %s8497_s25  ;;  %14150 = vst [vmem:[#allocation104_spill] sm:$0xff] %v11761_v32  ;;  %v11769_v63 = vpop.permute.xlu1 %8033  ;;  %v3571_v49 = vcombine.low %v11761_v32, %v11746_v28  ;;  %v14151_v34 = vcombine.high %v11277_v5, %v11456_v10 }
 0x3ea   : > { %v3213_v22 = vcombine.low %v11722_v60, %v14152_v46  ;;  %v14154_v53 = vcombine.high %v10758_v47, %v14153_v15  ;;  %v11784_v13 = vrot.slane %v3659_v26, %v8818_v55  ;;  %v11787_v36 = vrot.slane %v3660_v35, %v8818_v55  ;;  %v14161_v26 = vld [vmem:[#allocation146_spill] sm:$0xff] }
 0x3eb   : > { %v8112_v24 = vpack.i.bf16 %v14151_v34, %v2946_v11  ;;  %v3216_v38 = vcombine.high %v11725_v62, %v14157_v8  ;;  %v4919_v44 = vcombine.low %v14158_v18, %v11579_v41  ;;  %v4920_v11 = vcombine.high %v14158_v18, %v11579_v41  ;;  %v14173_v62 = vld [vmem:[#allocation128_spill] sm:$0xff] }
 0x3ec   : > { %v8117_v56 = vpack.i.bf16 %v14154_v53, %v2942_v29  ;;  %14155 = vst [vmem:[#allocation7_spill] sm:$0xff] %v11784_v13  ;;  %14156 = vst [vmem:[#allocation117_spill] sm:$0xff] %v11787_v36  ;;  %v11796_v34 = vrot.slane %v3555_v6, %v9339_v33  ;;  %v11799_v47 = vrot.slane %v3571_v49, %v9339_v33  ;;  %v2436_v29 = vpop.permute.xlu0 %2435  ;;  %v8035_v14 = vunpack.i.l.bf16 %v11769_v63 }
 0x3ed   : > { %8113 = vrot.lane.b32.xlu0 %v8112_v24, %s8498_s20  ;;  %v5343_v35 = vcombine.low %v14161_v26, %v11621_v39  ;;  %v5344_v15 = vcombine.high %v14161_v26, %v11621_v39  ;;  %v3723_v41 = vcombine.low %v11784_v13, %v11749_v48  ;;  %v3739_v18 = vcombine.low %v11787_v36, %v11753_v30  ;;  %v8039_v6 = vpop.permute.xlu1 %8038  ;;  %v14163_v24 = vld [vmem:[#allocation24_spill] sm:$0xff]  ;;  %v14165_v39 = vld [vmem:[#allocation70_spill] sm:$0xff] }
 0x3ee   : > { %14159 = vst [vmem:[#allocation14_spill] sm:$0xff] %v11796_v34  ;;  %14160 = vst [vmem:[#allocation182_spill] sm:$0xff] %v11799_v47  ;;  %8118 = vrot.lane.b32.xlu1 %v8117_v56, %s8498_s20  ;;  %v11812_v49 = vrot.slane %v4083_v4, %v8818_v55  ;;  %v14166_v26 = vld [vmem:[#allocation52_spill] sm:$0xff]  ;;  %v11822_v1 = vrot.slane %v4084_v19, %v8818_v55  ;;  %v14170_v4 = vld [vmem:[#allocation87_spill] sm:$0xff]  ;;  %v4067_v47 = vcombine.low %v14173_v62, %v2436_v29 }
 0x3ef   : > { %v14167_v56 = vcombine.low %v14165_v39, %v14166_v26  ;;  %v11825_v58 = vrot.slane %v3723_v41, %v9339_v33  ;;  %v11828_v23 = vrot.slane %v3739_v18, %v9339_v33  ;;  %v14171_v36 = vld [vmem:[#allocation74_spill] sm:$0xff]  ;;  %v4068_v50 = vcombine.high %v14173_v62, %v2436_v29  ;;  %v14177_v41 = vld [vmem:[#allocation65_spill] sm:$0xff]  ;;  %v14184_v48 = vld [vmem:[#allocation84_spill] sm:$0xff] }
 0x3f0   : > { %14162 = vst [vmem:[#allocation146_spill] sm:$0xff] %v11812_v49  ;;  %v14172_v30 = vcombine.high %v14170_v4, %v14171_v36  ;;  %v11836_v19 = vpop.permute.xlu0 %2507  ;;  %v11850_v62 = vrot.slane %v4067_v47, %v8818_v55  ;;  %v11869_v47 = vrot.slane %v4920_v11, %v8818_v55 }
 0x3f1   : > { %v8132_v8 = vpack.i.bf16 %v14167_v56, %v3213_v22  ;;  %14168 = vst [vmem:[#allocation70_spill] sm:$0xff] %v11825_v58  ;;  %14169 = vst [vmem:[#allocation52_spill] sm:$0xff] %v11828_v23  ;;  %v8041_v22 = vunpack.i.h.bf16 %v8039_v6  ;;  %v8040_v56 = vunpack.i.l.bf16 %v8039_v6  ;;  %v11847_v36 = vpop.permute.xlu1 %8043  ;;  %v11853_v29 = vrot.slane %v4068_v50, %v8818_v55  ;;  %v14176_v6 = vld [vmem:[#allocation115_spill] sm:$0xff] }
 0x3f2   : > { %v8122_v53 = vpack.i.bf16 %v14172_v30, %v3216_v38  ;;  %v3214_v30 = vcombine.high %v11722_v60, %v14152_v46  ;;  %14175 = vst [vmem:[#allocation128_spill] sm:$0xff] %v11850_v62  ;;  %v14178_v4 = vcombine.low %v14176_v6, %v14177_v41  ;;  %v11866_v46 = vrot.slane %v4919_v44, %v8818_v55  ;;  %v14185_v41 = vld [vmem:[#allocation82_spill] sm:$0xff] }
 0x3f3   : > { %8133 = vrot.lane.b32.xlu0 %v8132_v8, %s8496_s24  ;;  %v14174_v8 = vld [vmem:[#allocation20_spill] sm:$0xff]  ;;  %v14183_v50 = vcombine.high %v14165_v39, %v14166_v26  ;;  %v14186_v6 = vcombine.low %v14184_v48, %v14185_v41  ;;  %v14188_v44 = vcombine.low %v11686_v17, %v11679_v61  ;;  %v4131_v39 = vcombine.low %v11850_v62, %v11812_v49  ;;  %v14202_v62 = vld [vmem:[#allocation21_spill] sm:$0xff] }
 0x3f4   : > { %8123 = vrot.lane.b32.xlu1 %v8122_v53, %s8497_s25  ;;  %v3217_v38 = vcombine.low %v11728_v3, %v14174_v8  ;;  %v6928_v18 = vsel %vm924_vm2, %v14178_v4, %v8041_v22  ;;  %v14179_v53 = vld [vmem:[#allocation47_spill] sm:$0xff]  ;;  %v4147_v26 = vcombine.low %v11853_v29, %v11822_v1  ;;  %v8029_v22 = vpop.permute.xlu0 %8028 }
 0x3f5   : > { %v14181_v23 = vcombine.low %v14179_v53, %v14180_v25  ;;  %v8142_v13 = vpack.i.bf16 %v14183_v50, %v3214_v30  ;;  %v14187_v25 = vcombine.low %v14133_v9, %v11505_v37  ;;  %v11887_v11 = vrot.slane %v14188_v44, %v9339_v33 }
 0x3f6   : > { %v8127_v4 = vpack.i.bf16 %v14186_v6, %v3217_v38  ;;  %v14191_v38 = vcombine.low %v11661_v54, %v11672_v2  ;;  %v14192_v50 = vcombine.high %v11661_v54, %v11672_v2  ;;  %v11925_v54 = vrot.slane %v4147_v26, %v9339_v33  ;;  %v14199_v26 = vld [vmem:[#allocation94_spill] sm:$0xff] }
 0x3f7   : > { %v11863_v60 = vsel %vm924_vm2, %v14181_v23, %v8040_v56  ;;  %v11881_v23 = vrot.slane %v14187_v25, %v8818_v55  ;;  %14189 = vst [vmem:[#allocation115_spill] sm:$0xff] %v11887_v11  ;;  %v14190_v56 = vcombine.high %v14133_v9, %v11505_v37  ;;  %8143 = vrot.lane.b32.xlu0 %v8142_v13, %s8498_s20  ;;  %v8045_v37 = vunpack.i.l.bf16 %v11847_v36  ;;  %v8054_v9 = vpop.permute.xlu1 %8053  ;;  %v14200_v2 = vld [vmem:[#allocation150_spill] sm:$0xff] }
 0x3f8   : > { %14182 = vst [vmem:[#allocation20_spill] sm:$0xff] %v11863_v60  ;;  %v11903_v53 = vrot.slane %v14191_v38, %v9339_v33  ;;  %v11909_v6 = vrot.slane %v14192_v50, %v9339_v33  ;;  %8128 = vrot.lane.b32.xlu1 %v8127_v4, %s8496_s24  ;;  %v14193_v25 = vcombine.high %v11686_v17, %v11679_v61  ;;  %14196 = vst [vmem:[#allocation89_spill] sm:$0xff] %v11925_v54  ;;  %v11952_v60 = vpop.permute.xlu0 %8048 }
 0x3f9   : > { %v11897_v30 = vrot.slane %v14190_v56, %v8818_v55  ;;  %v11919_v56 = vrot.slane %v5343_v35, %v8818_v55  ;;  %v11922_v38 = vrot.slane %v4131_v39, %v9339_v33  ;;  %v4984_v13 = vcombine.high %v11866_v46, %v11881_v23  ;;  %14201 = vst [vmem:[#allocation150_spill] sm:$0xff] %v11952_v60 }
 0x3fa   : > { %v4774_v44 = vrot.slane %v14193_v25, %v9339_v33  ;;  %v11934_v17 = vrot.slane %v5344_v15, %v8818_v55  ;;  %v11941_v39 = vsel %vm6897_vm5, %v6928_v18, %v8045_v37  ;;  %v4780_v50 = vcombine.high %v14199_v26, %v11887_v11  ;;  %v14203_v18 = vld [vmem:[#allocation10_spill] sm:$0xff] }
 0x3fb   : > { %14194 = vst [vmem:[#allocation65_spill] sm:$0xff] %v11919_v56  ;;  %14195 = vst [vmem:[#allocation47_spill] sm:$0xff] %v11922_v38  ;;  %v5000_v25 = vcombine.high %v11869_v47, %v11897_v30  ;;  %v5511_v4 = vcombine.low %v14200_v2, %v11656_v40  ;;  %v5512_v15 = vcombine.high %v14200_v2, %v11656_v40  ;;  %v8036_v61 = vunpack.i.h.bf16 %v11769_v63  ;;  %v2209_v35 = vpop.permute.xlu1 %2208  ;;  %v14205_v40 = vld [vmem:[#allocation90_spill] sm:$0xff] }
 0x3fc   : > { %14197 = vst [vmem:[#allocation84_spill] sm:$0xff] %v11934_v17  ;;  %14198 = vst [vmem:[#allocation82_spill] sm:$0xff] %v11941_v39  ;;  %v14204_v37 = vcombine.high %v14202_v62, %v14203_v18  ;;  %v3218_v26 = vcombine.high %v11728_v3, %v14174_v8  ;;  %v8031_v11 = vunpack.i.h.bf16 %v8029_v22  ;;  %v8030_v49 = vunpack.i.l.bf16 %v8029_v22  ;;  %v14207_v18 = vld [vmem:[#allocation116_spill] sm:$0xff]  ;;  %v14211_v22 = vld [vmem:[#allocation102_spill] sm:$0xff] }
 0x3fd   : > { %v8056_v54 = vunpack.i.h.bf16 %v8054_v9  ;;  %v8055_v32 = vunpack.i.l.bf16 %v8054_v9  ;;  %v4776_v2 = vcombine.high %v14205_v40, %v11903_v53  ;;  %v14206_v60 = vcombine.high %v14184_v48, %v14185_v41  ;;  %v14210_v8 = vld [vmem:[#allocation48_spill] sm:$0xff]  ;;  %v14213_v9 = vld [vmem:[#allocation111_spill] sm:$0xff] }
 0x3fe   : > { %v8147_v39 = vpack.i.bf16 %v14204_v37, %v4780_v50  ;;  %v14208_v50 = vld [vmem:[#allocation64_spill] sm:$0xff]  ;;  %v14212_v62 = vcombine.low %v14210_v8, %v14211_v22  ;;  %v4781_v12 = vcombine.low %v14213_v9, %v4774_v44  ;;  %v11976_v40 = vrot.slane %v4984_v13, %v9339_v33 }
 0x3ff   : > { %v8137_v28 = vpack.i.bf16 %v14206_v60, %v3218_v26  ;;  %v14209_v37 = vcombine.low %v14207_v18, %v14208_v50  ;;  %v2281_v41 = vpop.permute.xlu1 %2280  ;;  %v14217_v26 = vld [vmem:[#allocation119_spill] sm:$0xff]  ;;  %v11995_v18 = vrot.slane %v5511_v4, %v8818_v55  ;;  %v14220_v4 = vld [vmem:[#allocation108_spill] sm:$0xff] }
 0x400   : > { %8148 = vrot.lane.b32.xlu0 %v8147_v39, %s8497_s25  ;;  %v6883_v63 = vsel %vm924_vm2, %v14212_v62, %v8030_v49  ;;  %v11979_v39 = vrot.slane %v5000_v25, %v9339_v33  ;;  %v14216_v62 = vcombine.high %v10998_v59, %v11156_v7  ;;  %v5327_v25 = vcombine.low %v14217_v26, %v2209_v35  ;;  %v14240_v7 = vld [vmem:[#allocation69_spill] sm:$0xff] }
 0x401   : > { %v6884_v3 = vsel %vm924_vm2, %v14209_v37, %v8031_v11  ;;  %v6898_v48 = vsel %vm6897_vm5, %v6883_v63, %v8035_v14  ;;  %8138 = vrot.lane.b32.xlu1 %v8137_v28, %s8498_s20  ;;  %v5328_v28 = vcombine.high %v14217_v26, %v2209_v35  ;;  %v4777_v37 = vcombine.low %v14220_v4, %v11909_v6  ;;  %v14228_v26 = vld [vmem:[#allocation105_spill] sm:$0xff]  ;;  %v14250_v14 = vld [vmem:[#allocation51_spill] sm:$0xff] }
 0x402   : > { %v6899_v60 = vsel %vm6897_vm5, %v6884_v3, %v8036_v61  ;;  %v11985_v11 = vsel %vm6912_vm6, %v6898_v48, %v8055_v32  ;;  %v8157_v13 = vpack.i.bf16 %v14216_v62, %v4776_v2  ;;  %v4782_v32 = vcombine.high %v14213_v9, %v4774_v44  ;;  %v12001_v61 = vpop.permute.xlu0 %8058  ;;  %v14221_v3 = vld [vmem:[#allocation112_spill] sm:$0xff]  ;;  %v14225_v48 = vld [vmem:[#allocation15_spill] sm:$0xff] }
 0x403   : > { %14214 = vst [vmem:[#allocation116_spill] sm:$0xff] %v11985_v11  ;;  %v11988_v49 = vsel %vm6912_vm6, %v6899_v60, %v8056_v54  ;;  %v14218_v54 = vcombine.low %v11277_v5, %v11456_v10  ;;  %v12008_v50 = vrot.slane %v5327_v25, %v8818_v55  ;;  %v5495_v8 = vcombine.low %v14221_v3, %v2281_v41  ;;  %v14222_v44 = vld [vmem:[#allocation156_spill] sm:$0xff]  ;;  %v14224_v10 = vld [vmem:[#allocation157_spill] sm:$0xff] }
 0x404   : > { %14215 = vst [vmem:[#allocation64_spill] sm:$0xff] %v11988_v49  ;;  %8158 = vrot.lane.b32.xlu0 %v8157_v13, %s8497_s25  ;;  %v12014_v35 = vrot.slane %v5512_v15, %v8818_v55  ;;  %v4324_v22 = vcombine.high %v14222_v44, %v11688_v31  ;;  %v12019_v63 = vrot.slane %v5328_v28, %v8818_v55  ;;  %v14226_v60 = vld [vmem:[#allocation40_spill] sm:$0xff] }
 0x405   : > { %v8152_v2 = vpack.i.bf16 %v4781_v12, %v14218_v54  ;;  %14219 = vst [vmem:[#allocation48_spill] sm:$0xff] %v12008_v50  ;;  %v5496_v5 = vcombine.high %v14221_v3, %v2281_v41  ;;  %v5919_v12 = vcombine.low %v14224_v10, %v11694_v27  ;;  %v5920_v9 = vcombine.high %v14224_v10, %v11694_v27  ;;  %v14231_v10 = vld [vmem:[#allocation46_spill] sm:$0xff] }
 0x406   : > { %14223 = vst [vmem:[#allocation102_spill] sm:$0xff] %v12019_v63  ;;  %v5391_v15 = vcombine.low %v12008_v50, %v11919_v56  ;;  %v14227_v62 = vcombine.high %v14225_v48, %v14226_v60  ;;  %v4308_v25 = vcombine.high %v14228_v26, %v11836_v19  ;;  %v5407_v41 = vcombine.low %v12019_v63, %v11934_v17  ;;  %v14274_v50 = vld [vmem:[#allocation91_spill] sm:$0xff] }
 0x407   : > { %8153 = vrot.lane.b32.xlu1 %v8152_v2, %s8496_s24  ;;  %v12037_v28 = vrot.slane %v5495_v8, %v8818_v55  ;;  %v12040_v27 = vrot.slane %v5496_v5, %v8818_v55  ;;  %v4778_v3 = vcombine.high %v14220_v4, %v11909_v6  ;;  %v5053_v48 = vcombine.low %v11979_v39, %v14231_v10  ;;  %v2438_v8 = vpop.permute.xlu1 %2437  ;;  %v8064_v6 = vpop.permute.xlu0 %8063 }
 0x408   : > { %v8167_v13 = vpack.i.bf16 %v14227_v62, %v4782_v32  ;;  %v12043_v54 = vrot.slane %v5391_v15, %v9339_v33  ;;  %v14230_v32 = vcombine.low %v11292_v43, %v11527_v52  ;;  %v14232_v5 = vcombine.low %v11869_v47, %v11897_v30 }
 0x409   : > { %v12060_v15 = vrot.slane %v4324_v22, %v8818_v55  ;;  %v12063_v62 = vrot.slane %v5407_v41, %v9339_v33  ;;  %v12068_v4 = vrot.slane %v5919_v12, %v8818_v55  ;;  %v5575_v47 = vcombine.low %v12040_v27, %v12014_v35 }
 0x40a   : > { %14229 = vst [vmem:[#allocation111_spill] sm:$0xff] %v12043_v54  ;;  %8168 = vrot.lane.b32.xlu0 %v8167_v13, %s8498_s20  ;;  %v8162_v2 = vpack.i.bf16 %v14230_v32, %v4777_v37  ;;  %v12057_v60 = vrot.slane %v14232_v5, %v9339_v33  ;;  %v5559_v37 = vcombine.low %v12037_v28, %v11995_v18  ;;  %v14241_v32 = vld [vmem:[#allocation78_spill] sm:$0xff]  ;;  %v8046_v17 = vunpack.i.h.bf16 %v11847_v36 }
 0x40b   : > { %14234 = vst [vmem:[#allocation108_spill] sm:$0xff] %v12060_v15  ;;  %14235 = vst [vmem:[#allocation112_spill] sm:$0xff] %v12063_v62  ;;  %v14237_v30 = vcombine.high %v11292_v43, %v11527_v52  ;;  %v12079_v41 = vrot.slane %v5920_v9, %v8818_v55  ;;  %v14242_v59 = vcombine.low %v14240_v7, %v14241_v32  ;;  %v8066_v43 = vunpack.i.h.bf16 %v8064_v6  ;;  %v14251_v9 = vld [vmem:[#allocation126_spill] sm:$0xff]  ;;  %v14271_v62 = vld [vmem:[#allocation180_spill] sm:$0xff] }
 0x40c   : > { %14233 = vst [vmem:[#allocation119_spill] sm:$0xff] %v12057_v60  ;;  %8163 = vrot.lane.b32.xlu1 %v8162_v2, %s8496_s24  ;;  %v12084_v12 = vrot.slane %v5559_v37, %v9339_v33  ;;  %v12090_v11 = vrot.slane %v4308_v25, %v8818_v55  ;;  %v12093_v49 = vrot.slane %v5575_v47, %v9339_v33  ;;  %v8065_v52 = vunpack.i.l.bf16 %v8064_v6  ;;  %v14247_v47 = vld [vmem:[#allocation66_spill] sm:$0xff]  ;;  %v14266_v25 = vld [vmem:[#allocation179_spill] sm:$0xff] }
 0x40d   : > { %v8172_v22 = vpack.i.bf16 %v14237_v30, %v4778_v3  ;;  %v8187_v2 = vpack.i.bf16 %v14242_v59, %v5053_v48  ;;  %v14245_v3 = vld [vmem:[#allocation138_spill] sm:$0xff]  ;;  %v5054_v59 = vcombine.high %v11979_v39, %v14231_v10  ;;  %v14246_v48 = vld [vmem:[#allocation127_spill] sm:$0xff]  ;;  %v14252_v54 = vcombine.low %v14250_v14, %v14251_v9  ;;  %v12117_v39 = vpop.permute.xlu1 %2509 }
 0x40e   : > { %14239 = vst [vmem:[#allocation156_spill] sm:$0xff] %v12084_v12  ;;  %14243 = vst [vmem:[#allocation157_spill] sm:$0xff] %v12090_v11  ;;  %v5903_v37 = vcombine.low %v14245_v3, %v2438_v8  ;;  %v5904_v30 = vcombine.high %v14245_v3, %v2438_v8  ;;  %v14253_v8 = vld [vmem:[#allocation4_spill] sm:$0xff]  ;;  %v4307_v10 = vcombine.low %v14228_v26, %v11836_v19 }
 0x40f   : > { %14244 = vst [vmem:[#allocation15_spill] sm:$0xff] %v12093_v49  ;;  %8173 = vrot.lane.b32.xlu0 %v8172_v22, %s8498_s20  ;;  %v14248_v22 = vcombine.low %v14246_v48, %v14247_v47  ;;  %v6969_v13 = vsel %vm924_vm2, %v14252_v54, %v8065_v52  ;;  %v5052_v3 = vcombine.high %v12057_v60, %v14253_v8  ;;  %14254 = vst [vmem:[#allocation105_spill] sm:$0xff] %v12117_v39  ;;  %v14258_v26 = vld [vmem:[#allocation92_spill] sm:$0xff] }
 0x410   : > { %8188 = vrot.lane.b32.xlu1 %v8187_v2, %s8496_s24  ;;  %v12122_v2 = vrot.slane %v5903_v37, %v8818_v55  ;;  %v12125_v48 = vrot.slane %v5904_v30, %v8818_v55  ;;  %v14256_v54 = vcombine.low %v11866_v46, %v11881_v23  ;;  %v4323_v9 = vcombine.low %v14222_v44, %v11688_v31  ;;  %v14259_v37 = vld [vmem:[#allocation132_spill] sm:$0xff]  ;;  %v14261_v31 = vld [vmem:[#allocation6_spill] sm:$0xff]  ;;  %v14262_v44 = vld [vmem:[#allocation45_spill] sm:$0xff] }
 0x411   : > { %v12109_v6 = vsel %vm924_vm2, %v14248_v22, %v8066_v43  ;;  %v14255_v43 = vcombine.high %v14240_v7, %v14241_v32  ;;  %v4356_v19 = vcombine.high %v12090_v11, %v12060_v15  ;;  %v14260_v30 = vcombine.high %v14258_v26, %v14259_v37  ;;  %v14281_v15 = vld [vmem:[#allocation133_spill] sm:$0xff]  ;;  %v14284_v8 = vld [vmem:[#allocation68_spill] sm:$0xff] }
 0x412   : > { %14249 = vst [vmem:[#allocation40_spill] sm:$0xff] %v12109_v6  ;;  %v12134_v52 = vrot.slane %v14256_v54, %v9339_v33  ;;  %v5967_v7 = vcombine.low %v12122_v2, %v12068_v4  ;;  %v5983_v46 = vcombine.low %v12125_v48, %v12079_v41  ;;  %v14263_v22 = vcombine.low %v11441_v45, %v11615_v21  ;;  %v14265_v54 = vld [vmem:[#allocation8_spill] sm:$0xff]  ;;  %v8069_v6 = vpop.permute.xlu1 %8068 }
 0x413   : > { %v8197_v14 = vpack.i.bf16 %v14255_v43, %v5054_v59  ;;  %v8177_v47 = vpack.i.bf16 %v14260_v30, %v5052_v3  ;;  %v5544_v59 = vcombine.high %v14262_v44, %v14261_v31  ;;  %v8060_v43 = vunpack.i.l.bf16 %v12001_v61 }
 0x414   : > { %14257 = vst [vmem:[#allocation46_spill] sm:$0xff] %v12134_v52  ;;  %v12157_v3 = vrot.slane %v14263_v22, %v9339_v33  ;;  %v5050_v30 = vcombine.high %v11976_v40, %v14265_v54  ;;  %v14267_v23 = vcombine.low %v11444_v42, %v14266_v25  ;;  %v4315_v44 = vrot.slane %v4307_v10, %v8818_v55 }
 0x415   : > { %8198 = vrot.lane.b32.xlu1 %v8197_v14, %s8498_s20  ;;  %8178 = vrot.lane.b32.xlu0 %v8177_v47, %s8497_s25  ;;  %v12172_v22 = vrot.slane %v5967_v7, %v9339_v33  ;;  %v12175_v32 = vrot.slane %v5983_v46, %v9339_v33  ;;  %v8074_v14 = vpop.permute.xlu0 %8073  ;;  %v4331_v47 = vrot.slane %v4323_v9, %v8818_v55  ;;  %v8061_v26 = vunpack.i.h.bf16 %v12001_v61  ;;  %v14273_v46 = vld [vmem:[#allocation77_spill] sm:$0xff]  ;;  %v14276_v9 = vld [vmem:[#allocation42_spill] sm:$0xff]  ;;  %v14280_v7 = vld [vmem:[#allocation88_spill] sm:$0xff] }
 0x416   : > { %14264 = vst [vmem:[#allocation69_spill] sm:$0xff] %v12157_v3  ;;  %v12168_v31 = vrot.slane %v14267_v23, %v9339_v33  ;;  %v12179_v37 = vrot.slane %v4356_v19, %v9339_v33  ;;  %v14272_v23 = vld [vmem:[#allocation110_spill] sm:$0xff]  ;;  %v14275_v56 = vcombine.high %v14273_v46, %v14274_v50  ;;  %v5048_v19 = vcombine.high %v12134_v52, %v14276_v9  ;;  %v14283_v9 = vld [vmem:[#allocation125_spill] sm:$0xff] }
 0x417   : > { %14269 = vst [vmem:[#allocation138_spill] sm:$0xff] %v12172_v22  ;;  %14270 = vst [vmem:[#allocation127_spill] sm:$0xff] %v12175_v32  ;;  %v4305_v5 = vcombine.low %v14272_v23, %v14271_v62  ;;  %v3556_v61 = vcombine.high %v11758_v20, %v11743_v51  ;;  %v14277_v55 = vld [vmem:[#allocation50_spill] sm:$0xff]  ;;  %v8075_v39 = vunpack.i.l.bf16 %v8074_v14  ;;  %v4340_v11 = vcombine.high %v4315_v44, %v4331_v47 }
 0x418   : > { %14268 = vst [vmem:[#allocation78_spill] sm:$0xff] %v12168_v31  ;;  %v8202_v63 = vpack.i.bf16 %v14275_v56, %v5050_v30  ;;  %v14278_v23 = vld [vmem:[#allocation122_spill] sm:$0xff]  ;;  %v14282_v56 = vcombine.high %v14280_v7, %v14281_v15  ;;  %v8071_v60 = vunpack.i.h.bf16 %v8069_v6  ;;  %v8070_v52 = vunpack.i.l.bf16 %v8069_v6 }
 0x419   : > { %v14279_v62 = vcombine.low %v14277_v55, %v14278_v23  ;;  %v14285_v51 = vcombine.low %v14283_v9, %v14284_v8  ;;  %v8076_v36 = vunpack.i.h.bf16 %v8074_v14  ;;  %v8207_v55 = vpack.i.bf16 %v12179_v37, %v4305_v5  ;;  %v14288_v23 = vld [vmem:[#allocation26_spill] sm:$0xff]  ;;  %v14289_v9 = vld [vmem:[#allocation101_spill] sm:$0xff] }
 0x41a   : > { %8203 = vrot.lane.b32.xlu1 %v8202_v63, %s8498_s20  ;;  %v8182_v30 = vpack.i.bf16 %v14282_v56, %v5048_v19  ;;  %v12213_v63 = vsel %vm6897_vm5, %v6969_v13, %v8071_v60  ;;  %v3620_v6 = vcombine.high %v11796_v34, %v14163_v24  ;;  %v14286_v5 = vcombine.low %v14273_v46, %v14274_v50  ;;  %v14291_v46 = vld [vmem:[#allocation163_spill] sm:$0xff] }
 0x41b   : > { %v7011_v10 = vsel %vm924_vm2, %v14279_v62, %v8060_v43  ;;  %v7012_v20 = vsel %vm924_vm2, %v14285_v51, %v8061_v26  ;;  %v5049_v62 = vcombine.low %v11976_v40, %v14265_v54  ;;  %v4148_v26 = vcombine.high %v11853_v29, %v11822_v1  ;;  %v14290_v1 = vld [vmem:[#allocation140_spill] sm:$0xff] }
 0x41c   : > { %8183 = vrot.lane.b32.xlu0 %v8182_v30, %s8497_s25  ;;  %v7026_v43 = vsel %vm6897_vm5, %v7012_v20, %v8070_v52  ;;  %v7025_v8 = vsel %vm6897_vm5, %v7011_v10, %v8046_v17  ;;  %v4339_v60 = vcombine.low %v4315_v44, %v4331_v47  ;;  %v12227_v13 = vrot.slane %v4340_v11, %v9339_v33  ;;  %v14287_v52 = vld [vmem:[#allocation160_spill] sm:$0xff]  ;;  %v14292_v44 = vld [vmem:[#allocation170_spill] sm:$0xff]  ;;  %v14293_v30 = vld [vmem:[#allocation107_spill] sm:$0xff] }
 0x41d   : > { %v8192_v14 = vpack.i.bf16 %v14286_v5, %v5049_v62  ;;  %v7039_v40 = vsel %vm6912_vm6, %v7025_v8, %v8075_v39  ;;  %v7040_v54 = vsel %vm6912_vm6, %v7026_v43, %v8076_v36  ;;  %v3484_v17 = vcombine.high %v14288_v23, %v14287_v52  ;;  %v14294_v51 = vld [vmem:[#allocation144_spill] sm:$0xff]  ;;  %v14300_v8 = vld [vmem:[#allocation22_spill] sm:$0xff]  ;;  %v14325_v52 = vld [vmem:[#allocation95_spill] sm:$0xff] }
 0x41e   : > { %8208 = vrot.lane.b32.xlu1 %v8207_v55, %s8496_s24  ;;  %v7942_v10 = vpack.c.bf16 %v7040_v54, %v7039_v40  ;;  %v5936_v50 = vcombine.high %v11441_v45, %v11615_v21  ;;  %v5952_v39 = vcombine.high %v11444_v42, %v14266_v25  ;;  %v4301_v47 = vcombine.low %v14292_v44, %v14291_v46  ;;  %v14296_v21 = vld [vmem:[#allocation99_spill] sm:$0xff]  ;;  %v14302_v40 = vld [vmem:[#allocation130_spill] sm:$0xff] }
 0x41f   : > { %v3570_v11 = vrot.slane %v3556_v61, %v9339_v33  ;;  %v8217_v19 = vpack.i.bf16 %v3620_v6, %v3484_v17  ;;  %v4164_v56 = vcombine.high %v11595_v57, %v11922_v38  ;;  %v14295_v20 = vcombine.high %v14293_v30, %v14294_v51  ;;  %v14297_v42 = vld [vmem:[#allocation139_spill] sm:$0xff]  ;;  %v14304_v17 = vld [vmem:[#allocation169_spill] sm:$0xff] }
 0x420   : > { %8193 = vrot.lane.b32.xlu0 %v8192_v14, %s8496_s24  ;;  %7943 = vmatprep.subr.bf16.mxu0 %v7942_v10  ;;  %v14298_v25 = vcombine.high %v14296_v21, %v14297_v42  ;;  %v5558_v61 = vrot.slane %v5544_v59, %v9339_v33  ;;  %v4162_v55 = vrot.slane %v4148_v26, %v9339_v33  ;;  %v14301_v26 = vld [vmem:[#allocation30_spill] sm:$0xff]  ;;  %v14308_v30 = vld [vmem:[#allocation97_spill] sm:$0xff]  ;;  %v14311_v42 = vld [vmem:[#allocation67_spill] sm:$0xff] }
 0x421   : > { %v4130_v45 = vrot.slane %v14295_v20, %v9339_v33  ;;  %v12257_v62 = vrot.slane %v4339_v60, %v9339_v33  ;;  %v5576_v43 = vcombine.high %v12040_v27, %v12014_v35  ;;  %v8212_v6 = vpack.i.bf16 %v12227_v13, %v4301_v47  ;;  %v14303_v60 = vld [vmem:[#allocation162_spill] sm:$0xff]  ;;  %v14305_v35 = vld [vmem:[#allocation131_spill] sm:$0xff]  ;;  %v14306_v27 = vld [vmem:[#allocation104_spill] sm:$0xff] }
 0x422   : > { %v12252_v36 = vrot.slane %v14298_v25, %v9339_v33  ;;  %8218 = vrot.lane.b32.xlu1 %v8217_v19, %s8497_s25  ;;  %v3756_v5 = vcombine.high %v14300_v8, %v11825_v58  ;;  %v12266_v14 = vrot.slane %v5936_v50, %v9339_v33  ;;  %v12269_v59 = vrot.slane %v5952_v39, %v9339_v33  ;;  %v14307_v47 = vld [vmem:[#allocation79_spill] sm:$0xff]  ;;  %v14310_v50 = vld [vmem:[#allocation5_spill] sm:$0xff] }
 0x423   : > { %14299 = vst [vmem:[#allocation66_spill] sm:$0xff] %v12257_v62  ;;  %v3485_v54 = vcombine.low %v14302_v40, %v14301_v26  ;;  %v4300_v10 = vcombine.high %v14304_v17, %v14303_v60  ;;  %v3572_v19 = vcombine.high %v14306_v27, %v14305_v35  ;;  %v14309_v51 = vcombine.high %v14307_v47, %v14308_v30  ;;  %v14312_v25 = vld [vmem:[#allocation7_spill] sm:$0xff]  ;;  %v14313_v38 = vld [vmem:[#allocation49_spill] sm:$0xff] }
 0x424   : > { %8213 = vrot.lane.b32.xlu0 %v8212_v6, %s8496_s24  ;;  %v3621_v21 = vcombine.low %v3570_v11, %v14310_v50  ;;  %v3486_v39 = vcombine.high %v14302_v40, %v14301_v26  ;;  %v3724_v29 = vcombine.high %v14312_v25, %v14311_v42  ;;  %v14314_v57 = vld [vmem:[#allocation117_spill] sm:$0xff]  ;;  %v5560_v35 = vcombine.high %v12037_v28, %v11995_v18  ;;  %v14324_v18 = vld [vmem:[#allocation38_spill] sm:$0xff] }
 0x425   : > { %v8227_v20 = vpack.i.bf16 %v4164_v56, %v14309_v51  ;;  %v3740_v58 = vcombine.high %v14314_v57, %v14313_v38  ;;  %v14315_v27 = vld [vmem:[#allocation89_spill] sm:$0xff]  ;;  %v5590_v30 = vrot.slane %v5576_v43, %v9339_v33  ;;  %v14318_v51 = vld [vmem:[#allocation75_spill] sm:$0xff]  ;;  %v14320_v40 = vmov 0.0   ;;  %v14322_v57 = vld [vmem:[#allocation28_spill] sm:$0xff] }
 0x426   : > { %v14316_v6 = vld [vmem:[#allocation121_spill] sm:$0xff]  ;;  %v4371_v42 = vcombine.high %v12257_v62, %v14320_v40  ;;  %v4169_v25 = vcombine.low %v4130_v45, %v4162_v55  ;;  %v12309_v23 = vrot.slane %v3572_v19, %v9339_v33  ;;  %v12319_v62 = vrot.slane %v3724_v29, %v9339_v33 }
 0x427   : > { %v4168_v8 = vcombine.high %v14316_v6, %v14315_v27  ;;  %8228 = vrot.lane.b32.xlu1 %v8227_v20, %s8497_s25  ;;  %v14317_v56 = vld [vmem:[#allocation53_spill] sm:$0xff]  ;;  %v14326_v27 = vld [vmem:[#allocation134_spill] sm:$0xff]  ;;  %v4170_v20 = vcombine.high %v4130_v45, %v4162_v55 }
 0x428   : > { %v14319_v47 = vcombine.high %v14317_v56, %v14318_v51  ;;  %v14321_v60 = vld [vmem:[#allocation161_spill] sm:$0xff]  ;;  %v14327_v6 = vcombine.high %v14325_v52, %v14326_v27  ;;  %v14328_v51 = vld [vmem:[#allocation72_spill] sm:$0xff]  ;;  %v14329_v56 = vld [vmem:[#allocation39_spill] sm:$0xff]  ;;  %v8232_v29 = vpack.i.bf16 %v4371_v42, %v4300_v10  ;;  %v14337_v27 = vcombine.high %v12122_v2, %v12068_v4 }
 0x429   : > { %v3488_v38 = vcombine.high %v14322_v57, %v14321_v60  ;;  %v14323_v17 = vld [vmem:[#allocation33_spill] sm:$0xff]  ;;  %v14330_v60 = vcombine.low %v14328_v51, %v14329_v56  ;;  %v14332_v55 = vld [vmem:[#allocation182_spill] sm:$0xff]  ;;  %v14339_v10 = vld [vmem:[#allocation52_spill] sm:$0xff] }
 0x42a   : > { %v8222_v26 = vpack.i.bf16 %v14319_v47, %v3756_v5  ;;  %v3489_v28 = vcombine.low %v14324_v18, %v14323_v17  ;;  %v12306_v43 = vpack.i.bf16 %v4168_v8, %v14327_v6  ;;  %v8247_v5 = vpack.i.bf16 %v3621_v21, %v3485_v54  ;;  %v14331_v45 = vld [vmem:[#allocation9_spill] sm:$0xff]  ;;  %v14340_v42 = vld [vmem:[#allocation58_spill] sm:$0xff]  ;;  %v14343_v4 = vld [vmem:[#allocation11_spill] sm:$0xff] }
 0x42b   : > { %v3622_v47 = vcombine.high %v3570_v11, %v14310_v50  ;;  %v12316_v57 = vpack.i.bf16 %v4169_v25, %v14330_v60  ;;  %v12322_v8 = vrot.slane %v3740_v58, %v9339_v33  ;;  %v3624_v19 = vcombine.high %v14332_v55, %v14331_v45  ;;  %v14334_v11 = vld [vmem:[#allocation146_spill] sm:$0xff]  ;;  %v14335_v50 = vld [vmem:[#allocation128_spill] sm:$0xff] }
 0x42c   : > { %8223 = vrot.lane.b32.xlu0 %v8222_v26, %s8497_s25  ;;  %v14333_v6 = vcombine.high %v14328_v51, %v14329_v56  ;;  %v4132_v21 = vcombine.high %v14335_v50, %v14334_v11  ;;  %v5574_v60 = vrot.slane %v5560_v35, %v9339_v33  ;;  %8248 = vrot.lane.b32.xlu1 %v8247_v5, %s8496_s24  ;;  %v14336_v25 = vld [vmem:[#allocation150_spill] sm:$0xff]  ;;  %v14342_v50 = vld [vmem:[#allocation59_spill] sm:$0xff] }
 0x42d   : > { %v5597_v26 = vcombine.low %v5558_v61, %v5590_v30  ;;  %v8051_v58 = vunpack.i.h.bf16 %v14336_v25  ;;  %v5982_v52 = vrot.slane %v14337_v27, %v9339_v33  ;;  %v14338_v56 = vcombine.high %v12125_v48, %v12079_v41  ;;  %v14345_v41 = vld [vmem:[#allocation60_spill] sm:$0xff] }
 0x42e   : > { %v12329_v54 = vpack.i.bf16 %v4170_v20, %v14333_v6  ;;  %v5596_v20 = vcombine.high %v11612_v16, %v12093_v49  ;;  %v8257_v35 = vpack.i.bf16 %v3622_v47, %v3486_v39  ;;  %v3760_v5 = vcombine.high %v14340_v42, %v14339_v10  ;;  %v14341_v6 = vld [vmem:[#allocation32_spill] sm:$0xff]  ;;  %v14348_v47 = vld [vmem:[#allocation142_spill] sm:$0xff] }
 0x42f   : > { %v5998_v51 = vrot.slane %v14338_v56, %v9339_v33  ;;  %v3625_v11 = vcombine.low %v12309_v23, %v14341_v6  ;;  %v14344_v2 = vcombine.low %v14342_v50, %v14343_v4  ;;  %v8237_v45 = vpack.i.bf16 %v3624_v19, %v3488_v38  ;;  %v14346_v48 = vld [vmem:[#allocation12_spill] sm:$0xff] }
 0x430   : > { %8233 = vrot.lane.b32.xlu0 %v8232_v29, %s8497_s25  ;;  %v14347_v56 = vcombine.high %v14345_v41, %v14346_v48  ;;  %v5598_v49 = vcombine.high %v5558_v61, %v5590_v30  ;;  %v5592_v39 = vcombine.high %v11605_v0, %v12084_v12  ;;  %8258 = vrot.lane.b32.xlu1 %v8257_v35, %s8498_s20  ;;  %v14350_v61 = vld [vmem:[#allocation61_spill] sm:$0xff]  ;;  %v14351_v30 = vld [vmem:[#allocation80_spill] sm:$0xff] }
 0x431   : > { %v12354_v27 = vpack.i.bf16 %v14344_v2, %v5597_v26  ;;  %v3761_v29 = vcombine.low %v14348_v47, %v12322_v8  ;;  %v3626_v16 = vcombine.high %v12309_v23, %v14341_v6  ;;  %v5594_v26 = vcombine.high %v12252_v36, %v5574_v60  ;;  %v14353_v23 = vld [vmem:[#allocation54_spill] sm:$0xff]  ;;  %v14354_v6 = vld [vmem:[#allocation76_spill] sm:$0xff]  ;;  %v14356_v0 = vld [vmem:[#allocation93_spill] sm:$0xff] }
 0x432   : > { %v12359_v55 = vpack.i.bf16 %v14347_v56, %v5596_v20  ;;  %v5593_v38 = vcombine.low %v12252_v36, %v5574_v60  ;;  %v14349_v19 = vcombine.high %v14342_v50, %v14343_v4  ;;  %v14352_v2 = vcombine.high %v14350_v61, %v14351_v30  ;;  %v14357_v50 = vld [vmem:[#allocation96_spill] sm:$0xff]  ;;  %v14363_v61 = vld [vmem:[#allocation81_spill] sm:$0xff] }
 0x433   : > { %v6004_v35 = vcombine.high %v12168_v31, %v12175_v32  ;;  %v6005_v12 = vcombine.low %v12269_v59, %v5998_v51  ;;  %v14355_v36 = vcombine.high %v14353_v23, %v14354_v6  ;;  %v14360_v32 = vld [vmem:[#allocation135_spill] sm:$0xff]  ;;  %v14361_v31 = vld [vmem:[#allocation98_spill] sm:$0xff]  ;;  %v14423_v41 = vld [vmem:[#allocation149_spill] sm:$0xff] }
 0x434   : > { %v12373_v20 = vpack.i.bf16 %v14349_v19, %v5598_v49  ;;  %v12378_v56 = vpack.i.bf16 %v14352_v2, %v5592_v39  ;;  %8238 = vrot.lane.b32.xlu0 %v8237_v45, %s8497_s25  ;;  %v14358_v49 = vcombine.high %v14356_v0, %v14357_v50  ;;  %v14359_v39 = vcombine.low %v14356_v0, %v14357_v50  ;;  %v14367_v50 = vld [vmem:[#allocation136_spill] sm:$0xff] }
 0x435   : > { %v8262_v60 = vpack.i.bf16 %v14355_v36, %v3760_v5  ;;  %v6000_v2 = vcombine.high %v12157_v3, %v12172_v22  ;;  %v14362_v45 = vcombine.high %v14360_v32, %v14361_v31  ;;  %v14364_v5 = vld [vmem:[#allocation178_spill] sm:$0xff]  ;;  %v14437_v6 = vld [vmem:[#allocation124_spill] sm:$0xff] }
 0x436   : > { %v12390_v4 = vpack.i.bf16 %v14358_v49, %v5594_v26  ;;  %v12395_v19 = vpack.i.bf16 %v14359_v39, %v5593_v38  ;;  %v14365_v36 = vcombine.low %v14363_v61, %v14364_v5  ;;  %v6006_v26 = vcombine.high %v12269_v59, %v5998_v51  ;;  %v14366_v49 = vld [vmem:[#allocation82_spill] sm:$0xff]  ;;  %v14368_v39 = vld [vmem:[#allocation137_spill] sm:$0xff]  ;;  %v14438_v23 = vld [vmem:[#allocation36_spill] sm:$0xff] }
 0x437   : > { %v12402_v30 = vpack.i.bf16 %v6004_v35, %v14362_v45  ;;  %v12412_v0 = vsel %vm6912_vm6, %v14366_v49, %v8051_v58  ;;  %8263 = vrot.lane.b32.xlu1 %v8262_v60, %s8497_s25  ;;  %v8242_v38 = vpack.i.bf16 %v3625_v11, %v3489_v28  ;;  %v14369_v22 = vcombine.high %v14367_v50, %v14368_v39  ;;  %v14371_v28 = vld [vmem:[#allocation115_spill] sm:$0xff]  ;;  %v14372_v11 = vld [vmem:[#allocation94_spill] sm:$0xff] }
 0x438   : > { %v12407_v48 = vpack.i.bf16 %v6005_v12, %v14365_v36  ;;  %v6001_v35 = vcombine.low %v12266_v14, %v5982_v52  ;;  %v6002_v45 = vcombine.high %v12266_v14, %v5982_v52  ;;  %v4146_v12 = vrot.slane %v4132_v21, %v9339_v33  ;;  %v14376_v14 = vld [vmem:[#allocation113_spill] sm:$0xff] }
 0x439   : > { %v12418_v3 = vpack.i.bf16 %v6000_v2, %v14369_v22  ;;  %v3490_v59 = vcombine.high %v14324_v18, %v14323_v17  ;;  %v14370_v58 = vcombine.high %v14363_v61, %v14364_v5  ;;  %8243 = vrot.lane.b32.xlu0 %v8242_v38, %s8496_s24  ;;  %v14373_v22 = vld [vmem:[#allocation55_spill] sm:$0xff]  ;;  %v14374_v2 = vld [vmem:[#allocation86_spill] sm:$0xff]  ;;  %v3762_v52 = vcombine.high %v14348_v47, %v12322_v8  ;;  %v14377_v21 = vld [vmem:[#allocation177_spill] sm:$0xff] }
 0x43a   : > { %v14375_v36 = vcombine.low %v14373_v22, %v14374_v2  ;;  %v14378_v17 = vcombine.low %v14376_v14, %v14377_v21  ;;  %v14379_v61 = vcombine.high %v14376_v14, %v14377_v21  ;;  %v14384_v47 = vld [vmem:[#allocation90_spill] sm:$0xff]  ;;  %v14385_v14 = vld [vmem:[#allocation103_spill] sm:$0xff]  ;;  %v5256_v24 = vcombine.high %v14438_v23, %v14437_v6  ;;  %v12604_v6 = vpop.permute.xlu1 %8083 }
 0x43b   : > { %v12428_v51 = vpack.i.bf16 %v6006_v26, %v14370_v58  ;;  %v14380_v26 = vcombine.high %v14290_v1, %v14289_v9  ;;  %v14382_v58 = vld [vmem:[#allocation109_spill] sm:$0xff]  ;;  %v3757_v21 = vcombine.low %v14385_v14, %v12319_v62  ;;  %v14387_v9 = vld [vmem:[#allocation119_spill] sm:$0xff]  ;;  %v14396_v1 = vcombine.high %v14373_v22, %v14374_v2 }
 0x43c   : > { %v8267_v49 = vpack.i.bf16 %v14375_v36, %v3761_v29  ;;  %v12441_v18 = vpack.i.bf16 %v6001_v35, %v14378_v17  ;;  %v12446_v5 = vpack.i.bf16 %v6002_v45, %v14379_v61  ;;  %v14381_v29 = vld [vmem:[#allocation118_spill] sm:$0xff]  ;;  %v4372_v35 = vcombine.high %v12227_v13, %v14320_v40  ;;  %v14386_v17 = vld [vmem:[#allocation4_spill] sm:$0xff]  ;;  %v14392_v13 = vld [vmem:[#allocation71_spill] sm:$0xff] }
 0x43d   : > { %v4114_v38 = vrot.slane %v14380_v26, %v9339_v33  ;;  %v14383_v36 = vcombine.high %v14381_v29, %v14382_v58  ;;  %v8252_v45 = vpack.i.bf16 %v3626_v16, %v3490_v59  ;;  %v14388_v61 = vld [vmem:[#allocation42_spill] sm:$0xff]  ;;  %v14390_v29 = vcombine.high %v14292_v44, %v14291_v46  ;;  %v14394_v16 = vld [vmem:[#allocation108_spill] sm:$0xff]  ;;  %v14395_v59 = vld [vmem:[#allocation157_spill] sm:$0xff] }
 0x43e   : > { %8268 = vrot.lane.b32.xlu1 %v8267_v49, %s8496_s24  ;;  %v14389_v26 = vld [vmem:[#allocation46_spill] sm:$0xff]  ;;  %v4355_v50 = vcombine.low %v14395_v59, %v14394_v16  ;;  %v8277_v31 = vpack.i.bf16 %v14396_v1, %v3762_v52  ;;  %v14397_v46 = vld [vmem:[#allocation56_spill] sm:$0xff]  ;;  %v14403_v52 = vld [vmem:[#allocation63_spill] sm:$0xff] }
 0x43f   : > { %v3978_v8 = vrot.slane %v14383_v36, %v9339_v33  ;;  %v12470_v58 = vpack.i.bf16 %v4372_v35, %v14390_v29  ;;  %v14391_v36 = vld [vmem:[#allocation62_spill] sm:$0xff]  ;;  %8253 = vrot.lane.b32.xlu0 %v8252_v45, %s8498_s20  ;;  %v4165_v39 = vcombine.low %v4114_v38, %v4146_v12  ;;  %v14398_v44 = vld [vmem:[#allocation16_spill] sm:$0xff]  ;;  %v4166_v2 = vcombine.high %v4114_v38, %v4146_v12  ;;  %v14407_v12 = vld [vmem:[#allocation153_spill] sm:$0xff] }
 0x440   : > { %v14393_v60 = vcombine.high %v14391_v36, %v14392_v13  ;;  %v14399_v35 = vcombine.low %v14397_v46, %v14398_v44  ;;  %v12489_v36 = vrot.slane %v4355_v50, %v9339_v33  ;;  %v14401_v13 = vld [vmem:[#allocation105_spill] sm:$0xff]  ;;  %v14402_v45 = vld [vmem:[#allocation114_spill] sm:$0xff]  ;;  %v14408_v38 = vld [vmem:[#allocation155_spill] sm:$0xff] }
 0x441   : > { %v6144_v16 = vcombine.high %v14402_v45, %v14401_v13 }
 0x442   : > { %v4010_v49 = vrot.slane %v14393_v60, %v9339_v33  ;;  %8278 = vrot.lane.b32.xlu1 %v8277_v31, %s8498_s20  ;;  %v8272_v29 = vpack.i.bf16 %v14399_v35, %v3757_v21  ;;  %v3758_v60 = vcombine.high %v14385_v14, %v12319_v62  ;;  %14400 = vst [vmem:[#allocation51_spill] sm:$0xff] %v12489_v36  ;;  %v14404_v31 = vld [vmem:[#allocation168_spill] sm:$0xff]  ;;  %v14406_v35 = vld [vmem:[#allocation2_spill] sm:$0xff] }
 0x443   : > { %v6160_v1 = vcombine.high %v14404_v31, %v14403_v52  ;;  %v6143_v21 = vcombine.low %v14402_v45, %v14401_v13  ;;  %v14405_v62 = vcombine.high %v14397_v46, %v14398_v44  ;;  %v6159_v59 = vcombine.low %v14404_v31, %v14403_v52  ;;  %v14410_v46 = vld [vmem:[#allocation171_spill] sm:$0xff]  ;;  %v14414_v52 = vld [vmem:[#allocation154_spill] sm:$0xff] }
 0x444   : > { %v4029_v32 = vcombine.low %v3978_v8, %v4010_v49  ;;  %8273 = vrot.lane.b32.xlu0 %v8272_v29, %s8496_s24  ;;  %v4030_v14 = vcombine.high %v3978_v8, %v4010_v49  ;;  %v12505_v29 = vrot.slane %v6144_v16, %v14406_v35  ;;  %v6120_v13 = vcombine.high %v14408_v38, %v14407_v12  ;;  %v14409_v49 = vld [vmem:[#allocation166_spill] sm:$0xff]  ;;  %v14412_v16 = vld [vmem:[#allocation41_spill] sm:$0xff] }
 0x445   : > { %v8282_v50 = vpack.i.bf16 %v14405_v62, %v3758_v60  ;;  %v12513_v45 = vrot.slane %v6160_v1, %v14406_v35  ;;  %v12516_v8 = vrot.slane %v6143_v21, %v14406_v35  ;;  %v4304_v44 = vcombine.high %v14410_v46, %v14409_v49  ;;  %v14411_v60 = vld [vmem:[#allocation34_spill] sm:$0xff]  ;;  %v14424_v49 = vld [vmem:[#allocation151_spill] sm:$0xff] }
 0x446   : > { %v8297_v22 = vpack.i.bf16 %v4165_v39, %v4029_v32  ;;  %v8307_v32 = vpack.i.bf16 %v4166_v2, %v4030_v14  ;;  %v4373_v39 = vcombine.high %v12489_v36, %v14320_v40  ;;  %v14413_v2 = vld [vmem:[#allocation152_spill] sm:$0xff]  ;;  %v12526_v62 = vrot.slane %v6159_v59, %v14406_v35  ;;  %v14434_v36 = vld [vmem:[#allocation147_spill] sm:$0xff] }
 0x447   : > { %v6104_v31 = vcombine.high %v14414_v52, %v14413_v2  ;;  %v6192_v1 = vcombine.high %v12505_v29, %v12513_v45  ;;  %v14415_v14 = vld [vmem:[#allocation44_spill] sm:$0xff]  ;;  %v12537_v38 = vrot.slane %v6120_v13, %v9339_v33 }
 0x448   : > { %8298 = vrot.lane.b32.xlu1 %v8297_v22, %s8496_s24  ;;  %8283 = vrot.lane.b32.xlu0 %v8282_v50, %s8498_s20  ;;  %v6088_v22 = vcombine.high %v14412_v16, %v14411_v60  ;;  %v8312_v21 = vpack.i.bf16 %v4373_v39, %v4304_v44  ;;  %v4374_v50 = vcombine.high %v12179_v37, %v14320_v40  ;;  %v14417_v60 = vld [vmem:[#allocation84_spill] sm:$0xff]  ;;  %v14418_v16 = vld [vmem:[#allocation102_spill] sm:$0xff] }
 0x449   : > { %v5408_v59 = vcombine.high %v14418_v16, %v14417_v60  ;;  %v6176_v35 = vcombine.high %v12516_v8, %v12526_v62  ;;  %v14419_v2 = vld [vmem:[#allocation180_spill] sm:$0xff]  ;;  %v14421_v44 = vld [vmem:[#allocation158_spill] sm:$0xff]  ;;  %v12557_v60 = vrot.slane %v6192_v1, %v9339_v33  ;;  %v14425_v16 = vld [vmem:[#allocation37_spill] sm:$0xff] }
 0x44a   : > { %v14422_v52 = vld [vmem:[#allocation176_spill] sm:$0xff]  ;;  %v12551_v13 = vrot.slane %v6088_v22, %v9339_v33  ;;  %v14427_v1 = vld [vmem:[#allocation65_spill] sm:$0xff] }
 0x44b   : > { %v5440_v37 = vcombine.high %v14422_v52, %v14421_v44  ;;  %v14430_v52 = vld [vmem:[#allocation112_spill] sm:$0xff] }
 0x44c   : > { %8308 = vrot.lane.b32.xlu1 %v8307_v32, %s8498_s20  ;;  %8288 = vrot.lane.b32.xlu0 %v12306_v43, %s8497_s25  ;;  %v14416_v32 = vld [vmem:[#allocation29_spill] sm:$0xff]  ;;  %v14420_v43 = vld [vmem:[#allocation110_spill] sm:$0xff]  ;;  %v6141_v22 = vcombine.low %v12551_v13, %v12537_v38 }
 0x44d   : > { %v6072_v12 = vcombine.high %v14416_v32, %v14415_v14  ;;  %v4306_v39 = vcombine.high %v14420_v43, %v14419_v2  ;;  %v5304_v14 = vcombine.high %v14424_v49, %v14423_v41  ;;  %v12554_v32 = vrot.slane %v6104_v31, %v9339_v33  ;;  %v14426_v2 = vld [vmem:[#allocation23_spill] sm:$0xff] }
 0x44e   : > { %v5272_v43 = vcombine.high %v14426_v2, %v14425_v16  ;;  %v5422_v41 = vrot.slane %v5408_v59, %v9339_v33  ;;  %v12568_v49 = vrot.slane %v6176_v35, %v9339_v33  ;;  %v5454_v31 = vrot.slane %v5440_v37, %v9339_v33  ;;  %v14429_v35 = vld [vmem:[#allocation27_spill] sm:$0xff] }
 0x44f   : > { %v12564_v44 = vrot.slane %v6072_v12, %v9339_v33  ;;  %v8322_v12 = vpack.i.bf16 %v12557_v60, %v6141_v22  ;;  %v14431_v2 = vld [vmem:[#allocation31_spill] sm:$0xff] }
 0x450   : > { %8313 = vrot.lane.b32.xlu1 %v8312_v21, %s8497_s25  ;;  %8293 = vrot.lane.b32.xlu0 %v12316_v57, %s8496_s24  ;;  %v8317_v21 = vpack.i.bf16 %v4374_v50, %v4306_v39  ;;  %v5318_v57 = vrot.slane %v5304_v14, %v9339_v33  ;;  %v14428_v50 = vld [vmem:[#allocation48_spill] sm:$0xff]  ;;  %v5286_v16 = vrot.slane %v5272_v43, %v9339_v33  ;;  %v14432_v37 = vld [vmem:[#allocation175_spill] sm:$0xff] }
 0x451   : > { %v5392_v39 = vcombine.high %v14428_v50, %v14427_v1  ;;  %v6137_v59 = vcombine.low %v12564_v44, %v12554_v32  ;;  %v5424_v46 = vcombine.high %v14432_v37, %v14431_v2  ;;  %v14433_v14 = vld [vmem:[#allocation148_spill] sm:$0xff]  ;;  %v14435_v1 = vld [vmem:[#allocation165_spill] sm:$0xff]  ;;  %v14436_v22 = vld [vmem:[#allocation43_spill] sm:$0xff]  ;;  %v5461_v42 = vcombine.low %v5422_v41, %v5454_v31 }
 0x452   : > { %v5288_v10 = vcombine.high %v14434_v36, %v14433_v14  ;;  %v5324_v50 = vcombine.high %v14436_v22, %v14435_v1  ;;  %v5325_v2 = vcombine.low %v5286_v16, %v5318_v57  ;;  %v14439_v37 = vld [vmem:[#allocation85_spill] sm:$0xff]  ;;  %v14441_v1 = vld [vmem:[#allocation164_spill] sm:$0xff]  ;;  %v5462_v23 = vcombine.high %v5422_v41, %v5454_v31  ;;  %v8079_v31 = vpop.permute.xlu0 %8078 }
 0x453   : > { %v14442_v22 = vld [vmem:[#allocation57_spill] sm:$0xff] }
 0x454   : > { %8318 = vrot.lane.b32.xlu1 %v8317_v21, %s8498_s20  ;;  %8303 = vrot.lane.b32.xlu0 %v12329_v54, %s8498_s20  ;;  %v5460_v21 = vcombine.high %v14430_v52, %v14429_v35  ;;  %v8327_v54 = vpack.i.bf16 %v12568_v49, %v6137_v59  ;;  %v5406_v35 = vrot.slane %v5392_v39, %v9339_v33  ;;  %v14440_v52 = vld [vmem:[#allocation111_spill] sm:$0xff] }
 0x455   : > { %v5456_v36 = vcombine.high %v14440_v52, %v14439_v37  ;;  %v5302_v59 = vrot.slane %v5288_v10, %v9339_v33  ;;  %v8342_v14 = vpack.i.bf16 %v5461_v42, %v5325_v2  ;;  %v5320_v34 = vcombine.high %v14442_v22, %v14441_v1 }
 0x456   : > { %v8332_v43 = vpack.i.bf16 %v5460_v21, %v5324_v50  ;;  %v5270_v39 = vrot.slane %v5256_v24, %v9339_v33  ;;  %v8081_v2 = vunpack.i.h.bf16 %v8079_v31 }
 0x457   : > { %v8337_v21 = vpack.i.bf16 %v5456_v36, %v5320_v34  ;;  %v12614_v34 = vpop.permute.xlu0 %8093  ;;  %v14443_v36 = vld [vmem:[#allocation40_spill] sm:$0xff] }
 0x458   : > { %8323 = vrot.lane.b32.xlu1 %v8322_v12, %s8496_s24  ;;  %8328 = vrot.lane.b32.xlu0 %v8327_v54, %s8496_s24  ;;  %v5438_v12 = vrot.slane %v5424_v46, %v9339_v33  ;;  %v5326_v54 = vcombine.high %v5286_v16, %v5318_v57  ;;  %v5321_v10 = vcombine.low %v5270_v39, %v5302_v59  ;;  %v8080_v16 = vunpack.i.l.bf16 %v8079_v31 }
 0x459   : > { %v5322_v41 = vcombine.high %v5270_v39, %v5302_v59  ;;  %v8050_v39 = vunpack.i.l.bf16 %v14336_v25 }
 0x45a   : > { %v5457_v50 = vcombine.low %v5406_v35, %v5438_v12  ;;  %v8352_v46 = vpack.i.bf16 %v5462_v23, %v5326_v54  ;;  %v5458_v37 = vcombine.high %v5406_v35, %v5438_v12 }
 0x45c   : > { %8333 = vrot.lane.b32.xlu1 %v8332_v43, %s8497_s25  ;;  %8343 = vrot.lane.b32.xlu0 %v8342_v14, %s8496_s24  ;;  %v12609_v43 = vpop.permute.xlu1 %8088  ;;  %v8347_v42 = vpack.i.bf16 %v5457_v50, %v5321_v10  ;;  %v8357_v24 = vpack.i.bf16 %v5458_v37, %v5322_v41  ;;  %v8099_v37 = vpop.permute.xlu0 %8098  ;;  %v14446_v41 = vld [vmem:[#allocation116_spill] sm:$0xff] }
 0x45d   : > { %v8101_v23 = vunpack.i.h.bf16 %v8099_v37 }
 0x460   : > { %8338 = vrot.lane.b32.xlu1 %v8337_v21, %s8497_s25  ;;  %8353 = vrot.lane.b32.xlu0 %v8352_v46, %s8498_s20  ;;  %v12616_v57 = vpop.permute.xlu1 %8103  ;;  %v12637_v50 = vpop.permute.xlu0 %8113 }
 0x461   : > { %v8105_v35 = vunpack.i.l.bf16 %v12616_v57 }
 0x463   : > { %v6984_v12 = vsel %vm6897_vm5, %v14443_v36, %v8105_v35  ;;  %v14451_v35 = vld [vmem:[#allocation173_spill] sm:$0xff]  ;;  %v14452_v36 = vld [vmem:[#allocation100_spill] sm:$0xff] }
 0x464   : > { %8348 = vrot.lane.b32.xlu1 %v8347_v42, %s8496_s24  ;;  %8358 = vrot.lane.b32.xlu0 %v8357_v24, %s8498_s20  ;;  %v12625_v59 = vpop.permute.xlu1 %8108  ;;  %v6998_v14 = vsel %vm6912_vm6, %v6984_v12, %v8081_v2  ;;  %v14445_v42 = vld [vmem:[#allocation64_spill] sm:$0xff]  ;;  %v6138_v24 = vcombine.high %v12564_v44, %v12554_v32  ;;  %v8086_v2 = vunpack.i.h.bf16 %v12604_v6  ;;  %v14453_v32 = vld [vmem:[#allocation141_spill] sm:$0xff]  ;;  %v8090_v12 = vunpack.i.l.bf16 %v12609_v43 }
 0x465   : > { %v12649_v10 = vpop.permute.xlu0 %8133  ;;  %v14447_v31 = vpack.c.bf16 %v14445_v42, %v14446_v41  ;;  %v2939_v44 = vcombine.low %v14453_v32, %v14452_v36 }
 0x468   : > { %8373 = vrot.lane.b32.xlu1 %v12354_v27, %s8496_s24  ;;  %8363 = vrot.lane.b32.xlu0 %v12359_v55, %s8497_s25  ;;  %v6997_v27 = vsel %vm6912_vm6, %v12213_v63, %v8080_v16  ;;  %v14444_v55 = vld [vmem:[#allocation20_spill] sm:$0xff]  ;;  %v8119_v63 = vpop.permute.xlu1 %8118 }
 0x469   : > { %v7944_v21 = vpack.c.bf16 %v6998_v14, %v6997_v27  ;;  %v6941_v54 = vsel %vm6897_vm5, %v14444_v55, %v8101_v23  ;;  %v14450_v16 = vld [vmem:[#allocation172_spill] sm:$0xff]  ;;  %v12686_v14 = vpop.permute.xlu0 %8143  ;;  %v6208_v23 = vcombine.high %v12568_v49, %v14320_v40  ;;  %v14454_v27 = vld [vmem:[#allocation3_spill] sm:$0xff] }
 0x46a   : > { %v6955_v46 = vsel %vm6912_vm6, %v6941_v54, %v8050_v39  ;;  %v8095_v54 = vunpack.i.l.bf16 %v12614_v34  ;;  %v14459_v49 = vld [vmem:[#allocation35_spill] sm:$0xff] }
 0x46b   : > { %7945 = vmatpush1.bf16.msra.mxu0 %v7944_v21  ;;  %v7912_v25 = vpack.c.bf16 %v12412_v0, %v6955_v46  ;;  %v8100_v21 = vunpack.i.l.bf16 %v8099_v37  ;;  %v14457_v46 = vld [vmem:[#allocation106_spill] sm:$0xff]  ;;  %v14461_v37 = vld [vmem:[#allocation123_spill] sm:$0xff] }
 0x46c   : > { %8383 = vrot.lane.b32.xlu1 %v12373_v20, %s8498_s20  ;;  %8368 = vrot.lane.b32.xlu0 %v12378_v56, %s8497_s25  ;;  %v6191_v20 = vcombine.low %v12505_v29, %v12513_v45  ;;  %v6175_v56 = vcombine.low %v12516_v8, %v12526_v62  ;;  %v14448_v45 = vld [vmem:[#allocation167_spill] sm:$0xff]  ;;  %v14449_v8 = vld [vmem:[#allocation174_spill] sm:$0xff] }
 0x46d   : > { %7913 = vmatprep.subr.bf16.mxu1 %v7912_v25  ;;  %v6140_v62 = vcombine.high %v14449_v8, %v14448_v45  ;;  %v8120_v25 = vunpack.i.l.bf16 %v8119_v63 }
 0x46e   : > { %7915 = vmatpush1.bf16.msra.mxu1 %v14447_v31  ;;  %v12655_v29 = vrot.slane %v6191_v20, %v9339_v33  ;;  %v12662_v0 = vrot.slane %v6175_v56, %v9339_v33  ;;  %v8091_v33 = vunpack.i.h.bf16 %v12609_v43  ;;  %v14456_v43 = vld [vmem:[#allocation145_spill] sm:$0xff]  ;;  %v14460_v31 = vld [vmem:[#allocation19_spill] sm:$0xff] }
 0x46f   : > { %v2943_v20 = vcombine.low %v14457_v46, %v14456_v43  ;;  %v14458_v56 = vld [vmem:[#allocation129_spill] sm:$0xff]  ;;  %v14462_v36 = vcombine.low %v14460_v31, %v14461_v37  ;;  %v8096_v43 = vunpack.i.h.bf16 %v12614_v34  ;;  %v8111_v46 = vunpack.i.h.bf16 %v12625_v59 }
 0x470   : > { %8388 = vrot.lane.b32.xlu1 %v12390_v4, %s8498_s20  ;;  %8378 = vrot.lane.b32.xlu0 %v12395_v19, %s8496_s24  ;;  %v12659_v4 = vpop.permute.xlu1 %8123  ;;  %v6142_v19 = vcombine.high %v12551_v13, %v12537_v38  ;;  %v6209_v38 = vcombine.high %v12655_v29, %v14320_v40  ;;  %v6207_v55 = vcombine.high %v12662_v0, %v14320_v40  ;;  %v8115_v31 = vunpack.i.l.bf16 %v12637_v50 }
 0x471   : > { %v3215_v42 = vcombine.low %v14459_v49, %v14458_v56  ;;  %v6886_v32 = vsel %vm924_vm2, %v14462_v36, %v8091_v33  ;;  %v8442_v13 = vpack.i.bf16 %v6208_v23, %v6138_v24  ;;  %v8135_v33 = vunpack.i.l.bf16 %v12649_v10 }
 0x472   : > { %v8136_v36 = vunpack.i.h.bf16 %v12649_v10 }
 0x474   : > { %8393 = vrot.lane.b32.xlu1 %v12402_v30, %s8497_s25  ;;  %8403 = vrot.lane.b32.xlu0 %v12407_v48, %s8496_s24  ;;  %v6136_v30 = vcombine.high %v14451_v35, %v14450_v16  ;;  %v6210_v48 = vcombine.high %v12557_v60, %v14320_v40  ;;  %v8110_v60 = vunpack.i.l.bf16 %v12625_v59  ;;  %v8129_v41 = vpop.permute.xlu1 %8128  ;;  %v8149_v59 = vpop.permute.xlu0 %8148 }
 0x476   : > { %v8437_v40 = vpack.i.bf16 %v6210_v48, %v6142_v19  ;;  %v6929_v49 = vsel %vm924_vm2, %v2943_v20, %v8110_v60  ;;  %v8106_v19 = vunpack.i.h.bf16 %v12616_v57  ;;  %v8126_v48 = vunpack.i.h.bf16 %v12659_v4 }
 0x477   : > { %v8131_v20 = vunpack.i.h.bf16 %v8129_v41 }
 0x478   : > { %8398 = vrot.lane.b32.xlu1 %v12418_v3, %s8497_s25  ;;  %v14455_v3 = vld [vmem:[#allocation181_spill] sm:$0xff]  ;;  %8413 = vrot.lane.b32.xlu0 %v12428_v51, %s8498_s20  ;;  %v8422_v51 = vpack.i.bf16 %v6209_v38, %v6140_v62  ;;  %v6901_v62 = vsel %vm6897_vm5, %v6886_v32, %v8086_v2  ;;  %v14464_v38 = vld [vmem:[#allocation83_spill] sm:$0xff]  ;;  %v8139_v60 = vpop.permute.xlu1 %8138  ;;  %v8150_v32 = vunpack.i.l.bf16 %v8149_v59 }
 0x479   : > { %v3211_v39 = vcombine.low %v14455_v3, %v14454_v27  ;;  %v8121_v27 = vunpack.i.h.bf16 %v8119_v63  ;;  %v6885_v3 = vsel %vm924_vm2, %v2939_v44, %v8090_v12  ;;  %v8427_v63 = vpack.i.bf16 %v6207_v55, %v6136_v30  ;;  %v14463_v30 = vld [vmem:[#allocation73_spill] sm:$0xff]  ;;  %v14467_v12 = vld [vmem:[#allocation120_spill] sm:$0xff] }
 0x47a   : > { %v6900_v56 = vsel %vm6897_vm5, %v6885_v3, %v8100_v21  ;;  %v14465_v57 = vcombine.low %v14463_v30, %v14464_v38  ;;  %v14466_v44 = vld [vmem:[#allocation13_spill] sm:$0xff]  ;;  %v8130_v21 = vunpack.i.l.bf16 %v8129_v41  ;;  %v6943_v55 = vsel %vm6897_vm5, %v6929_v49, %v8106_v19 }
 0x47b   : > { %v12720_v34 = vsel %vm6912_vm6, %v6900_v56, %v8120_v25  ;;  %v12723_v24 = vsel %vm6912_vm6, %v6901_v62, %v8121_v27  ;;  %v14468_v23 = vcombine.low %v14466_v44, %v14467_v12  ;;  %v6957_v25 = vsel %vm6912_vm6, %v6943_v55, %v8115_v31 }
 0x47c   : > { %8408 = vrot.lane.b32.xlu1 %v12441_v18, %s8496_s24  ;;  %8418 = vrot.lane.b32.xlu0 %v12446_v5, %s8498_s20  ;;  %v6887_v18 = vsel %vm924_vm2, %v3211_v39, %v8095_v54  ;;  %v8125_v5 = vunpack.i.l.bf16 %v12659_v4  ;;  %v6888_v2 = vsel %vm924_vm2, %v14465_v57, %v8096_v43  ;;  %v8116_v54 = vunpack.i.h.bf16 %v12637_v50  ;;  %v14469_v43 = vld [vmem:[#allocation87_spill] sm:$0xff]  ;;  %v8154_v19 = vpop.permute.xlu1 %8153 }
 0x47d   : > { %v6930_v39 = vsel %vm924_vm2, %v14468_v23, %v8111_v46  ;;  %v8151_v4 = vunpack.i.h.bf16 %v8149_v59  ;;  %v7918_v37 = vpack.c.bf16 %v12723_v24, %v12720_v34  ;;  %v8140_v27 = vunpack.i.l.bf16 %v8139_v60  ;;  %v14470_v46 = vld [vmem:[#allocation74_spill] sm:$0xff]  ;;  %v14472_v34 = vld [vmem:[#allocation21_spill] sm:$0xff] }
 0x47e   : > { %v6902_v3 = vsel %vm6897_vm5, %v6887_v18, %v8135_v33  ;;  %v14471_v56 = vcombine.low %v14469_v43, %v14470_v46  ;;  %v6931_v41 = vsel %vm924_vm2, %v3215_v42, %v8125_v5  ;;  %v8146_v49 = vunpack.i.h.bf16 %v12686_v14  ;;  %v1900_v18 = vld [vmem:[%s13075_s8] sm:$0xff] }
 0x47f   : > { %v8145_v31 = vunpack.i.l.bf16 %v12686_v14  ;;  %v6945_v10 = vsel %vm6897_vm5, %v6931_v41, %v8130_v21  ;;  %v14473_v59 = vld [vmem:[#allocation10_spill] sm:$0xff]  ;;  %v8155_v33 = vunpack.i.l.bf16 %v8154_v19  ;;  %v14475_v14 = vcombine.low %v14372_v11, %v14371_v28 }
 0x480   : > { %8438 = vrot.lane.b32.xlu1 %v8437_v40, %s8498_s20  ;;  %8423 = vrot.lane.b32.xlu0 %v8422_v51, %s8497_s25  ;;  %v8159_v40 = vpop.permute.xlu0 %8158  ;;  %v6932_v50 = vsel %vm924_vm2, %v14471_v56, %v8126_v48  ;;  %v8141_v51 = vunpack.i.h.bf16 %v8139_v60  ;;  %v14474_v24 = vcombine.low %v14472_v34, %v14473_v59  ;;  %v8499_v48 = vmov 0   ;;  %v8164_v28 = vpop.permute.xlu1 %8163  ;;  %v14477_v56 = vld [vmem:[#allocation25_spill] sm:$0xff] }
 0x481   : > { %v6946_v62 = vsel %vm6897_vm5, %v6932_v50, %v8131_v20  ;;  %8448 = vset.pattern.permute.xlu1 %v8499_v48  ;;  %v7013_v5 = vsel %vm924_vm2, %v14475_v14, %v8150_v32  ;;  %v8161_v30 = vunpack.i.h.bf16 %v8159_v40  ;;  %v8160_v38 = vunpack.i.l.bf16 %v8159_v40  ;;  %8447 = vset.pattern.permute.xlu0 %v8499_v48  ;;  %v14478_v50 = vld [vmem:[#allocation159_spill] sm:$0xff] }
 0x482   : > { %v7014_v42 = vsel %vm924_vm2, %v14474_v24, %v8151_v4  ;;  %v6959_v44 = vsel %vm6912_vm6, %v6945_v10, %v8140_v27  ;;  %v6944_v12 = vsel %vm6897_vm5, %v6930_v39, %v8155_v33  ;;  %v6903_v60 = vsel %vm6897_vm5, %v6888_v2, %v8136_v36 }
 0x483   : > { %v6958_v11 = vsel %vm6912_vm6, %v6944_v12, %v8116_v54  ;;  %v14476_v20 = vunpack.i.l.bf16 %v12604_v6  ;;  %v8166_v39 = vunpack.i.h.bf16 %v8164_v28  ;;  %v8165_v32 = vunpack.i.l.bf16 %v8164_v28  ;;  %v1899_v6 = vld [vmem:[%s13074_s7] sm:$0xff] }
 0x484   : > { %8443 = vrot.lane.b32.xlu1 %v8442_v13, %s8498_s20  ;;  %8428 = vrot.lane.b32.xlu0 %v8427_v63, %s8497_s25  ;;  %v8156_v13 = vunpack.i.h.bf16 %v8154_v19  ;;  %v8169_v57 = vpop.permute.xlu0 %8168  ;;  %v6960_v63 = vsel %vm6912_vm6, %v6946_v62, %v8141_v51  ;;  %v7916_v27 = vpack.c.bf16 %v6958_v11, %v6957_v25  ;;  %v6917_v43 = vsel %vm6912_vm6, %v6902_v3, %v8145_v31  ;;  %v8189_v19 = vpop.permute.xlu1 %8188 }
 0x485   : > { %v8171_v23 = vunpack.i.h.bf16 %v8169_v57  ;;  %v8170_v21 = vunpack.i.l.bf16 %v8169_v57  ;;  %v7028_v4 = vsel %vm6897_vm5, %v7014_v42, %v14476_v20  ;;  %v6918_v2 = vsel %vm6912_vm6, %v6903_v60, %v8146_v49  ;;  %v14483_v57 = vld [vmem:[#allocation132_spill] sm:$0xff] }
 0x486   : > { %v7027_v55 = vsel %vm6897_vm5, %v7013_v5, %v8156_v13  ;;  %v7920_v46 = vpack.c.bf16 %v6960_v63, %v6959_v44  ;;  %v14480_v25 = vcombine.low %v14384_v47, %v11903_v53  ;;  %7917 = vmatprep.subr.bf16.mxu1 %v7916_v27  ;;  %v7922_v59 = vpack.c.bf16 %v6918_v2, %v6917_v43 }
 0x487   : > { %v7041_v40 = vsel %vm6912_vm6, %v7027_v55, %v8170_v21  ;;  %v7042_v54 = vsel %vm6912_vm6, %v7028_v4, %v8171_v23  ;;  %7919 = vmatpush1.bf16.msra.mxu1 %v7918_v37  ;;  %v8191_v33 = vunpack.i.h.bf16 %v8189_v19  ;;  %v8190_v48 = vunpack.i.l.bf16 %v8189_v19 }
 0x488   : > { %7223 = vperm.xlu1 %8448, %v1900_v18   ;;  %8433 = vrot.lane.b32.xlu0 %v12470_v58, %s8498_s20  ;;  %v8174_v36 = vpop.permute.xlu0 %8173  ;;  %v14479_v58 = vcombine.low %v14477_v56, %v14478_v50  ;;  %v6971_v3 = vsel %vm924_vm2, %v14480_v25, %v8160_v38  ;;  %v7946_v18 = vpack.c.bf16 %v7042_v54, %v7041_v40  ;;  %v8199_v47 = vpop.permute.xlu1 %8198  ;;  %v14482_v38 = vld [vmem:[#allocation92_spill] sm:$0xff] }
 0x489   : > { %v8176_v51 = vunpack.i.h.bf16 %v8174_v36  ;;  %v8175_v49 = vunpack.i.l.bf16 %v8174_v36  ;;  %v6985_v10 = vsel %vm6897_vm5, %v6971_v3, %v8165_v32  ;;  %7921 = vmatprep.subr.bf16.mxu1 %v7920_v46  ;;  %v8201_v37 = vunpack.i.h.bf16 %v8199_v47 }
 0x48a   : > { %v6972_v41 = vsel %vm924_vm2, %v14479_v58, %v8161_v30  ;;  %7947 = vmatprep.subr.bf16.mxu0 %v7946_v18  ;;  %v8200_v14 = vunpack.i.l.bf16 %v8199_v47  ;;  %v14481_v5 = vcombine.low %v14387_v9, %v14386_v17  ;;  %v14484_v44 = vcombine.low %v14482_v38, %v14483_v57  ;;  %v14487_v18 = vld [vmem:[#allocation14_spill] sm:$0xff]  ;;  %v14491_v47 = vld [vmem:[#allocation160_spill] sm:$0xff] }
 0x48b   : > { %v6986_v31 = vsel %vm6897_vm5, %v6972_v41, %v8166_v39  ;;  %v6999_v62 = vsel %vm6912_vm6, %v6985_v10, %v8175_v49  ;;  %7923 = vmatpush1.bf16.msra.mxu1 %v7922_v59  ;;  %v14485_v43 = vcombine.low %v14389_v26, %v14388_v61  ;;  %v14486_v36 = vcombine.low %v14280_v7, %v14281_v15 }
 0x48c   : > { %v7000_v34 = vsel %vm6912_vm6, %v6986_v31, %v8176_v51  ;;  %7214 = vperm.xlu0 %8447, %v1899_v6   ;;  %v8179_v24 = vpop.permute.xlu0 %8178  ;;  %v8204_v63 = vpop.permute.xlu1 %8203 }
 0x48d   : > { %v7948_v53 = vpack.c.bf16 %v7000_v34, %v6999_v62  ;;  %v8181_v42 = vunpack.i.h.bf16 %v8179_v24  ;;  %v8180_v13 = vunpack.i.l.bf16 %v8179_v24  ;;  %v8206_v27 = vunpack.i.h.bf16 %v8204_v63  ;;  %v14488_v62 = vld [vmem:[#allocation24_spill] sm:$0xff] }
 0x48e   : > { %v8205_v40 = vunpack.i.l.bf16 %v8204_v63  ;;  %v14489_v34 = vcombine.low %v14487_v18, %v14488_v62  ;;  %v14506_v62 = vld [vmem:[#allocation58_spill] sm:$0xff] }
 0x48f   : > { %7949 = vmatpush1.bf16.msra.mxu0 %v7948_v53  ;;  %v7015_v30 = vsel %vm924_vm2, %v14481_v5, %v8180_v13  ;;  %v7016_v12 = vsel %vm924_vm2, %v14484_v44, %v8181_v42  ;;  %v14490_v53 = vld [vmem:[#allocation26_spill] sm:$0xff]  ;;  %v14494_v5 = vld [vmem:[#allocation169_spill] sm:$0xff] }
 0x490   : > { %v7029_v23 = vsel %vm6897_vm5, %v7015_v30, %v8190_v48  ;;  %v7030_v21 = vsel %vm6897_vm5, %v7016_v12, %v8191_v33  ;;  %v8184_v11 = vpop.permute.xlu0 %8183  ;;  %v12809_v20 = vpop.permute.xlu1 %8208  ;;  %v14492_v24 = vcombine.low %v14490_v53, %v14491_v47  ;;  %v14495_v30 = vld [vmem:[#allocation162_spill] sm:$0xff] }
 0x491   : > { %v7043_v60 = vsel %vm6912_vm6, %v7029_v23, %v8200_v14  ;;  %v7044_v55 = vsel %vm6912_vm6, %v7030_v21, %v8201_v37  ;;  %v8186_v17 = vunpack.i.h.bf16 %v8184_v11  ;;  %v8185_v9 = vunpack.i.l.bf16 %v8184_v11  ;;  %v14493_v37 = vld [vmem:[#allocation66_spill] sm:$0xff] }
 0x492   : > { %v7950_v28 = vpack.c.bf16 %v7044_v55, %v7043_v60  ;;  %v14496_v38 = vcombine.low %v14494_v5, %v14495_v30 }
 0x493   : > { %v6973_v2 = vsel %vm924_vm2, %v14485_v43, %v8185_v9  ;;  %v6974_v46 = vsel %vm924_vm2, %v14486_v36, %v8186_v17 }
 0x494   : > { %7951 = vmatprep.subr.bf16.mxu0 %v7950_v28  ;;  %v8194_v4 = vpop.permute.xlu0 %8193  ;;  %v8219_v54 = vpop.permute.xlu1 %8218 }
 0x495   : > { %v8196_v39 = vunpack.i.h.bf16 %v8194_v4  ;;  %v8195_v32 = vunpack.i.l.bf16 %v8194_v4  ;;  %v8221_v26 = vunpack.i.h.bf16 %v8219_v54  ;;  %v8220_v15 = vunpack.i.l.bf16 %v8219_v54 }
 0x497   : > { %v6987_v6 = vsel %vm6897_vm5, %v6973_v2, %v8195_v32  ;;  %v6988_v56 = vsel %vm6897_vm5, %v6974_v46, %v8196_v39  ;;  %v6890_v59 = vsel %vm924_vm2, %v14489_v34, %v8221_v26  ;;  %v6889_v42 = vsel %vm924_vm2, %v14492_v24, %v8220_v15  ;;  %v14501_v26 = vld [vmem:[#allocation161_spill] sm:$0xff]  ;;  %v14507_v34 = vld [vmem:[#allocation52_spill] sm:$0xff] }
 0x498   : > { %v8214_v50 = vpop.permute.xlu0 %8213  ;;  %v7001_v58 = vsel %vm6912_vm6, %v6987_v6, %v8205_v40  ;;  %v7002_v41 = vsel %vm6912_vm6, %v6988_v56, %v8206_v27  ;;  %v14497_v56 = vld [vmem:[#allocation182_spill] sm:$0xff] }
 0x499   : > { %v7952_v25 = vpack.c.bf16 %v7002_v41, %v7001_v58  ;;  %v12823_v3 = vpop.permute.xlu1 %8228  ;;  %v8216_v13 = vunpack.i.h.bf16 %v8214_v50  ;;  %v8215_v33 = vunpack.i.l.bf16 %v8214_v50  ;;  %v14498_v50 = vld [vmem:[#allocation9_spill] sm:$0xff] }
 0x49a   : > { %v14499_v58 = vcombine.low %v14497_v56, %v14498_v50  ;;  %v14515_v50 = vld [vmem:[#allocation18_spill] sm:$0xff] }
 0x49b   : > { %7953 = vmatpush1.bf16.msra.mxu0 %v7952_v25  ;;  %v14500_v25 = vld [vmem:[#allocation28_spill] sm:$0xff] }
 0x49c   : > { %v14502_v15 = vcombine.low %v14500_v25, %v14501_v26  ;;  %v14518_v25 = vld [vmem:[#allocation79_spill] sm:$0xff]  ;;  %v14519_v26 = vld [vmem:[#allocation97_spill] sm:$0xff] }
 0x49e   : > { %v12825_v61 = vpop.permute.xlu0 %8223  ;;  %v8249_v7 = vpop.permute.xlu1 %8248 }
 0x49f   : > { %v8251_v51 = vunpack.i.h.bf16 %v8249_v7  ;;  %v8250_v49 = vunpack.i.l.bf16 %v8249_v7 }
 0x4a1   : > { %v6904_v23 = vsel %vm6897_vm5, %v6889_v42, %v8250_v49  ;;  %v6905_v21 = vsel %vm6897_vm5, %v6890_v59, %v8251_v51  ;;  %v14508_v59 = vcombine.low %v14506_v62, %v14507_v34 }
 0x4a2   : > { %v8234_v31 = vpop.permute.xlu0 %8233  ;;  %v8259_v48 = vpop.permute.xlu1 %8258 }
 0x4a3   : > { %v8236_v10 = vunpack.i.h.bf16 %v8234_v31  ;;  %v8235_v19 = vunpack.i.l.bf16 %v8234_v31  ;;  %v8261_v44 = vunpack.i.h.bf16 %v8259_v48  ;;  %v8260_v12 = vunpack.i.l.bf16 %v8259_v48  ;;  %v14503_v31 = vld [vmem:[#allocation54_spill] sm:$0xff] }
 0x4a5   : > { %v6896_v14 = vsel %vm924_vm2, %v14493_v37, %v8236_v10  ;;  %v6895_v57 = vsel %vm924_vm2, %v14496_v38, %v8235_v19  ;;  %v6919_v28 = vsel %vm6912_vm6, %v6904_v23, %v8260_v12  ;;  %v6920_v11 = vsel %vm6912_vm6, %v6905_v21, %v8261_v44  ;;  %v14504_v10 = vld [vmem:[#allocation76_spill] sm:$0xff] }
 0x4a6   : > { %v8239_v63 = vpop.permute.xlu0 %8238  ;;  %v12844_v60 = vsel %vm6897_vm5, %v6895_v57, %v8215_v33  ;;  %v12847_v55 = vsel %vm6897_vm5, %v6896_v14, %v8216_v13  ;;  %v7926_v17 = vpack.c.bf16 %v6920_v11, %v6919_v28  ;;  %v14505_v19 = vcombine.low %v14503_v31, %v14504_v10 }
 0x4a7   : > { %v8241_v39 = vunpack.i.h.bf16 %v8239_v63  ;;  %v8240_v32 = vunpack.i.l.bf16 %v8239_v63  ;;  %v8231_v14 = vunpack.i.h.bf16 %v12823_v3  ;;  %v8226_v44 = vunpack.i.h.bf16 %v12825_v61 }
 0x4a8   : > { %v8225_v12 = vunpack.i.l.bf16 %v12825_v61  ;;  %v8230_v63 = vunpack.i.l.bf16 %v12823_v3 }
 0x4a9   : > { %v8264_v9 = vpop.permute.xlu1 %8263  ;;  %v6934_v41 = vsel %vm924_vm2, %v14499_v58, %v8241_v39  ;;  %v6933_v7 = vsel %vm924_vm2, %v14502_v15, %v8240_v32  ;;  %v14516_v58 = vld [vmem:[#allocation47_spill] sm:$0xff]  ;;  %v14520_v15 = vcombine.low %v14518_v25, %v14519_v26 }
 0x4aa   : > { %v8266_v27 = vunpack.i.h.bf16 %v8264_v9  ;;  %v8265_v40 = vunpack.i.l.bf16 %v8264_v9 }
 0x4ab   : > { %v8244_v4 = vpop.permute.xlu0 %8243 }
 0x4ac   : > { %v8246_v43 = vunpack.i.h.bf16 %v8244_v4  ;;  %v8245_v2 = vunpack.i.l.bf16 %v8244_v4  ;;  %v6936_v18 = vsel %vm924_vm2, %v14505_v19, %v8266_v27  ;;  %v6935_v53 = vsel %vm924_vm2, %v14508_v59, %v8265_v40  ;;  %v14509_v40 = vld [vmem:[#allocation53_spill] sm:$0xff] }
 0x4ae   : > { %v6947_v47 = vsel %vm6897_vm5, %v6933_v7, %v8245_v2  ;;  %v6948_v24 = vsel %vm6897_vm5, %v6934_v41, %v8246_v43  ;;  %v14510_v43 = vld [vmem:[#allocation75_spill] sm:$0xff]  ;;  %v14517_v41 = vcombine.low %v14515_v50, %v14516_v58  ;;  %v6893_v7 = vsel %vm924_vm2, %v14520_v15, %v8230_v63  ;;  %v14523_v63 = vld [vmem:[#allocation166_spill] sm:$0xff] }
 0x4af   : > { %v14511_v2 = vcombine.low %v14509_v40, %v14510_v43  ;;  %v14525_v40 = vld [vmem:[#allocation121_spill] sm:$0xff] }
 0x4b0   : > { %v8269_v36 = vpop.permute.xlu1 %8268  ;;  %v14526_v43 = vld [vmem:[#allocation89_spill] sm:$0xff] }
 0x4b1   : > { %v8271_v46 = vunpack.i.h.bf16 %v8269_v36  ;;  %v8270_v54 = vunpack.i.l.bf16 %v8269_v36  ;;  %v8254_v6 = vpop.permute.xlu0 %8253  ;;  %v6892_v61 = vsel %vm924_vm2, %v14511_v2, %v8226_v44  ;;  %v14512_v36 = vld [vmem:[#allocation22_spill] sm:$0xff]  ;;  %v14527_v2 = vcombine.low %v14525_v40, %v14526_v43 }
 0x4b2   : > { %v8256_v51 = vunpack.i.h.bf16 %v8254_v6  ;;  %v8255_v49 = vunpack.i.l.bf16 %v8254_v6  ;;  %v14541_v40 = vcombine.low %v14442_v22, %v14441_v1 }
 0x4b3   : > { %v6949_v5 = vsel %vm6897_vm5, %v6935_v53, %v8270_v54  ;;  %v6950_v30 = vsel %vm6897_vm5, %v6936_v18, %v8271_v46  ;;  %v14513_v46 = vld [vmem:[#allocation70_spill] sm:$0xff] }
 0x4b4   : > { %v8279_v42 = vpop.permute.xlu1 %8278  ;;  %v6961_v48 = vsel %vm6912_vm6, %v6947_v47, %v8255_v49  ;;  %v6962_v37 = vsel %vm6912_vm6, %v6948_v24, %v8256_v51  ;;  %v14514_v54 = vcombine.low %v14512_v36, %v14513_v46  ;;  %v14528_v36 = vld [vmem:[#allocation95_spill] sm:$0xff]  ;;  %v14529_v46 = vld [vmem:[#allocation134_spill] sm:$0xff] }
 0x4b5   : > { %v8281_v13 = vunpack.i.h.bf16 %v8279_v42  ;;  %v8280_v33 = vunpack.i.l.bf16 %v8279_v42  ;;  %v7924_v57 = vpack.c.bf16 %v6962_v37, %v6961_v48 }
 0x4b6   : > { %v8274_v38 = vpop.permute.xlu0 %8273  ;;  %v6891_v3 = vsel %vm924_vm2, %v14514_v54, %v8225_v12  ;;  %v14521_v12 = vld [vmem:[#allocation51_spill] sm:$0xff]  ;;  %v14530_v54 = vcombine.low %v14528_v36, %v14529_v46 }
 0x4b7   : > { %v6963_v23 = vsel %vm6912_vm6, %v6949_v5, %v8280_v33  ;;  %v6964_v21 = vsel %vm6912_vm6, %v6950_v30, %v8281_v13  ;;  %v8276_v28 = vunpack.i.h.bf16 %v8274_v38  ;;  %v8275_v11 = vunpack.i.l.bf16 %v8274_v38  ;;  %7925 = vmatprep.subr.bf16.mxu1 %v7924_v57 }
 0x4b8   : > { %v7928_v4 = vpack.c.bf16 %v6964_v21, %v6963_v23  ;;  %7927 = vmatpush1.bf16.msra.mxu1 %v7926_v17  ;;  %v6894_v17 = vsel %vm924_vm2, %v14517_v41, %v8231_v14  ;;  %v14522_v21 = vld [vmem:[#allocation171_spill] sm:$0xff] }
 0x4b9   : > { %v6906_v51 = vsel %vm6897_vm5, %v6891_v3, %v8275_v11  ;;  %v6907_v49 = vsel %vm6897_vm5, %v6892_v61, %v8276_v28  ;;  %v14524_v28 = vcombine.low %v14522_v21, %v14523_v63 }
 0x4ba   : > { %v8299_v9 = vpop.permute.xlu1 %8298  ;;  %v8284_v27 = vpop.permute.xlu0 %8283  ;;  %7929 = vmatprep.subr.bf16.mxu1 %v7928_v4 }
 0x4bb   : > { %v8301_v39 = vunpack.i.h.bf16 %v8299_v9  ;;  %v8300_v32 = vunpack.i.l.bf16 %v8299_v9  ;;  %v8286_v6 = vunpack.i.h.bf16 %v8284_v27  ;;  %v8285_v56 = vunpack.i.l.bf16 %v8284_v27 }
 0x4bd   : > { %v6921_v10 = vsel %vm6912_vm6, %v6906_v51, %v8285_v56  ;;  %v6922_v19 = vsel %vm6912_vm6, %v6907_v49, %v8286_v6  ;;  %v6908_v34 = vsel %vm6897_vm5, %v6893_v7, %v8300_v32  ;;  %v6909_v59 = vsel %vm6897_vm5, %v6894_v17, %v8301_v39 }
 0x4be   : > { %v8309_v31 = vpop.permute.xlu1 %8308  ;;  %v7930_v53 = vpack.c.bf16 %v6922_v19, %v6921_v10  ;;  %v8289_v47 = vpop.permute.xlu0 %8288  ;;  %v8211_v39 = vunpack.i.h.bf16 %v12809_v20  ;;  %v8210_v32 = vunpack.i.l.bf16 %v12809_v20 }
 0x4bf   : > { %v8311_v18 = vunpack.i.h.bf16 %v8309_v31  ;;  %v8310_v62 = vunpack.i.l.bf16 %v8309_v31  ;;  %v8291_v5 = vunpack.i.h.bf16 %v8289_v47  ;;  %v8290_v30 = vunpack.i.l.bf16 %v8289_v47 }
 0x4c0   : > { %7931 = vmatpush1.bf16.msra.mxu1 %v7930_v53 }
 0x4c1   : > { %v6923_v24 = vsel %vm6912_vm6, %v6908_v34, %v8310_v62  ;;  %v6924_v42 = vsel %vm6912_vm6, %v6909_v59, %v8311_v18  ;;  %v6938_v61 = vsel %vm924_vm2, %v14527_v2, %v8291_v5  ;;  %v6937_v3 = vsel %vm924_vm2, %v14530_v54, %v8290_v30 }
 0x4c2   : > { %v7934_v13 = vpack.c.bf16 %v6924_v42, %v6923_v24  ;;  %v8314_v33 = vpop.permute.xlu1 %8313  ;;  %v8294_v14 = vpop.permute.xlu0 %8293  ;;  %v14533_v24 = vld [vmem:[#allocation112_spill] sm:$0xff]  ;;  %v14534_v42 = vld [vmem:[#allocation27_spill] sm:$0xff] }
 0x4c3   : > { %v8316_v48 = vunpack.i.h.bf16 %v8314_v33  ;;  %v8315_v37 = vunpack.i.l.bf16 %v8314_v33  ;;  %v8296_v38 = vunpack.i.h.bf16 %v8294_v14  ;;  %v8295_v57 = vunpack.i.l.bf16 %v8294_v14  ;;  %v14537_v14 = vld [vmem:[#allocation165_spill] sm:$0xff] }
 0x4c4   : > { %v14535_v33 = vcombine.low %v14533_v24, %v14534_v42 }
 0x4c5   : > { %v6940_v23 = vsel %vm924_vm2, %v14521_v12, %v8316_v48  ;;  %v6939_v11 = vsel %vm924_vm2, %v14524_v28, %v8315_v37  ;;  %v6951_v50 = vsel %vm6897_vm5, %v6937_v3, %v8295_v57  ;;  %v6952_v58 = vsel %vm6897_vm5, %v6938_v61, %v8296_v38  ;;  %v14536_v37 = vld [vmem:[#allocation43_spill] sm:$0xff] }
 0x4c6   : > { %v8319_v44 = vpop.permute.xlu1 %8318  ;;  %v8304_v27 = vpop.permute.xlu0 %8303  ;;  %v6953_v20 = vsel %vm6897_vm5, %v6939_v11, %v8210_v32  ;;  %v6954_v41 = vsel %vm6897_vm5, %v6940_v23, %v8211_v39  ;;  %v14538_v5 = vcombine.low %v14536_v37, %v14537_v14  ;;  %v14539_v39 = vld [vmem:[#allocation85_spill] sm:$0xff] }
 0x4c7   : > { %v8321_v9 = vunpack.i.h.bf16 %v8319_v44  ;;  %v8320_v4 = vunpack.i.l.bf16 %v8319_v44  ;;  %v8306_v6 = vunpack.i.h.bf16 %v8304_v27  ;;  %v8305_v56 = vunpack.i.l.bf16 %v8304_v27 }
 0x4c8   : > { %v14540_v32 = vcombine.low %v14440_v52, %v14539_v39 }
 0x4c9   : > { %v6967_v25 = vsel %vm6912_vm6, %v6953_v20, %v8320_v4  ;;  %v6968_v26 = vsel %vm6912_vm6, %v6954_v41, %v8321_v9  ;;  %v6965_v15 = vsel %vm6912_vm6, %v6951_v50, %v8305_v56  ;;  %v6966_v7 = vsel %vm6912_vm6, %v6952_v58, %v8306_v6 }
 0x4ca   : > { %v12923_v17 = vpop.permute.xlu1 %8323  ;;  %v12929_v51 = vpop.permute.xlu0 %8328  ;;  %v7932_v49 = vpack.c.bf16 %v6966_v7, %v6965_v15  ;;  %v7936_v10 = vpack.c.bf16 %v6968_v26, %v6967_v25  ;;  %v14542_v26 = vld [vmem:[#allocation60_spill] sm:$0xff] }
 0x4cb   : > { %v14543_v15 = vld [vmem:[#allocation12_spill] sm:$0xff] }
 0x4cc   : > { %7933 = vmatprep.subr.bf16.mxu1 %v7932_v49  ;;  %v14544_v7 = vcombine.low %v14542_v26, %v14543_v15 }
 0x4cd   : > { %7935 = vmatpush1.bf16.msra.mxu1 %v7934_v13 }
 0x4ce   : > { %v8334_v19 = vpop.permute.xlu1 %8333  ;;  %v8344_v34 = vpop.permute.xlu0 %8343  ;;  %7938 = vmatprep.subr.msk.bf16.mxu1 %vm12932_vm9, %v7936_v10  ;;  %v14545_v10 = vld [vmem:[#allocation143_spill] sm:$0xff] }
 0x4cf   : > { %v8336_v18 = vunpack.i.h.bf16 %v8334_v19  ;;  %v8335_v62 = vunpack.i.l.bf16 %v8334_v19  ;;  %v8346_v59 = vunpack.i.h.bf16 %v8344_v34  ;;  %v8345_v53 = vunpack.i.l.bf16 %v8344_v34  ;;  %v14546_v19 = vld [vmem:[#allocation15_spill] sm:$0xff] }
 0x4d1   : > { %v7018_v48 = vsel %vm924_vm2, %v14535_v33, %v8336_v18  ;;  %v7017_v30 = vsel %vm924_vm2, %v14538_v5, %v8335_v62  ;;  %v14547_v18 = vcombine.low %v14545_v10, %v14546_v19 }
 0x4d2   : > { %v8339_v47 = vpop.permute.xlu1 %8338  ;;  %v8354_v57 = vpop.permute.xlu0 %8353  ;;  %v7032_v23 = vsel %vm6897_vm5, %v7018_v48, %v8346_v59  ;;  %v7031_v21 = vsel %vm6897_vm5, %v7017_v30, %v8345_v53 }
 0x4d3   : > { %v8341_v13 = vunpack.i.h.bf16 %v8339_v47  ;;  %v8340_v38 = vunpack.i.l.bf16 %v8339_v47  ;;  %v8356_v44 = vunpack.i.h.bf16 %v8354_v57  ;;  %v8355_v12 = vunpack.i.l.bf16 %v8354_v57 }
 0x4d5   : > { %v7045_v9 = vsel %vm6912_vm6, %v7031_v21, %v8355_v12  ;;  %v7046_v4 = vsel %vm6912_vm6, %v7032_v23, %v8356_v44  ;;  %v6976_v27 = vsel %vm924_vm2, %v14540_v32, %v8341_v13  ;;  %v6975_v43 = vsel %vm924_vm2, %v14541_v40, %v8340_v38  ;;  %v14548_v12 = vld [vmem:[#allocation61_spill] sm:$0xff]  ;;  %v14549_v23 = vld [vmem:[#allocation80_spill] sm:$0xff] }
 0x4d6   : > { %v8349_v63 = vpop.permute.xlu1 %8348  ;;  %v8359_v2 = vpop.permute.xlu0 %8358  ;;  %v7954_v61 = vpack.c.bf16 %v7046_v4, %v7045_v9  ;;  %v14550_v21 = vcombine.low %v14548_v12, %v14549_v23 }
 0x4d7   : > { %v8351_v28 = vunpack.i.h.bf16 %v8349_v63  ;;  %v8350_v11 = vunpack.i.l.bf16 %v8349_v63  ;;  %v8361_v54 = vunpack.i.h.bf16 %v8359_v2  ;;  %v8360_v3 = vunpack.i.l.bf16 %v8359_v2 }
 0x4d8   : > { %7955 = vmatprep.subr.bf16.mxu0 %v7954_v61 }
 0x4d9   : > { %v6989_v36 = vsel %vm6897_vm5, %v6975_v43, %v8350_v11  ;;  %v6990_v46 = vsel %vm6897_vm5, %v6976_v27, %v8351_v28  ;;  %v14551_v28 = vld [vmem:[#allocation17_spill] sm:$0xff]  ;;  %v14552_v11 = vld [vmem:[#allocation156_spill] sm:$0xff] }
 0x4da   : > { %v8374_v6 = vpop.permute.xlu1 %8373  ;;  %v7004_v56 = vsel %vm6912_vm6, %v6990_v46, %v8361_v54  ;;  %v7003_v52 = vsel %vm6912_vm6, %v6989_v36, %v8360_v3  ;;  %v8364_v1 = vpop.permute.xlu0 %8363  ;;  %v14553_v9 = vcombine.low %v14551_v28, %v14552_v11 }
 0x4db   : > { %v7956_v50 = vpack.c.bf16 %v7004_v56, %v7003_v52  ;;  %v8376_v58 = vunpack.i.h.bf16 %v8374_v6  ;;  %v8375_v20 = vunpack.i.l.bf16 %v8374_v6  ;;  %v8366_v22 = vunpack.i.h.bf16 %v8364_v1  ;;  %v14554_v56 = vld [vmem:[#allocation78_spill] sm:$0xff]  ;;  %v14555_v52 = vld [vmem:[#allocation127_spill] sm:$0xff] }
 0x4dc   : > { %v8365_v41 = vunpack.i.l.bf16 %v8364_v1  ;;  %v14558_v1 = vld [vmem:[#allocation98_spill] sm:$0xff] }
 0x4dd   : > { %7957 = vmatpush1.bf16.msra.mxu0 %v7956_v50  ;;  %v7020_v49 = vsel %vm924_vm2, %v14544_v7, %v8366_v22  ;;  %v14556_v50 = vcombine.low %v14554_v56, %v14555_v52 }
 0x4de   : > { %v8384_v25 = vpop.permute.xlu1 %8383  ;;  %v7019_v62 = vsel %vm924_vm2, %v14547_v18, %v8365_v41  ;;  %v8369_v53 = vpop.permute.xlu0 %8368  ;;  %v7034_v24 = vsel %vm6897_vm5, %v7020_v49, %v8376_v58 }
 0x4df   : > { %v8386_v34 = vunpack.i.h.bf16 %v8384_v25  ;;  %v8385_v59 = vunpack.i.l.bf16 %v8384_v25  ;;  %v7033_v47 = vsel %vm6897_vm5, %v7019_v62, %v8375_v20  ;;  %v8371_v48 = vunpack.i.h.bf16 %v8369_v53  ;;  %v14557_v20 = vld [vmem:[#allocation135_spill] sm:$0xff] }
 0x4e0   : > { %v8370_v37 = vunpack.i.l.bf16 %v8369_v53  ;;  %v14559_v22 = vcombine.low %v14557_v20, %v14558_v1  ;;  %v14567_v1 = vcombine.low %v14451_v35, %v14450_v16 }
 0x4e1   : > { %v7047_v42 = vsel %vm6912_vm6, %v7033_v47, %v8385_v59  ;;  %v7048_v33 = vsel %vm6912_vm6, %v7034_v24, %v8386_v34  ;;  %v6978_v63 = vsel %vm924_vm2, %v14550_v21, %v8371_v48  ;;  %v14560_v47 = vld [vmem:[#allocation69_spill] sm:$0xff]  ;;  %v14561_v24 = vld [vmem:[#allocation138_spill] sm:$0xff]  ;;  %v14563_v48 = vld [vmem:[#allocation136_spill] sm:$0xff] }
 0x4e2   : > { %v8389_v14 = vpop.permute.xlu1 %8388  ;;  %v7958_v5 = vpack.c.bf16 %v7048_v33, %v7047_v42  ;;  %v8379_v38 = vpop.permute.xlu0 %8378  ;;  %v6977_v4 = vsel %vm924_vm2, %v14553_v9, %v8370_v37  ;;  %v14562_v42 = vcombine.low %v14560_v47, %v14561_v24  ;;  %v14564_v37 = vld [vmem:[#allocation137_spill] sm:$0xff] }
 0x4e3   : > { %v8391_v30 = vunpack.i.h.bf16 %v8389_v14  ;;  %v8390_v13 = vunpack.i.l.bf16 %v8389_v14  ;;  %v8381_v57 = vunpack.i.h.bf16 %v8379_v38  ;;  %v8380_v44 = vunpack.i.l.bf16 %v8379_v38 }
 0x4e4   : > { %7959 = vmatprep.subr.bf16.mxu0 %v7958_v5  ;;  %v14565_v14 = vcombine.low %v14563_v48, %v14564_v37 }
 0x4e5   : > { %v6991_v32 = vsel %vm6897_vm5, %v6977_v4, %v8380_v44  ;;  %v6992_v27 = vsel %vm6897_vm5, %v6978_v63, %v8381_v57 }
 0x4e6   : > { %v8394_v39 = vpop.permute.xlu1 %8393  ;;  %v8404_v2 = vpop.permute.xlu0 %8403  ;;  %v7005_v61 = vsel %vm6912_vm6, %v6991_v32, %v8390_v13  ;;  %v7006_v36 = vsel %vm6912_vm6, %v6992_v27, %v8391_v30  ;;  %v8325_v32 = vunpack.i.l.bf16 %v12923_v17 }
 0x4e7   : > { %v8396_v40 = vunpack.i.h.bf16 %v8394_v39  ;;  %v8395_v43 = vunpack.i.l.bf16 %v8394_v39  ;;  %v8406_v46 = vunpack.i.h.bf16 %v8404_v2  ;;  %v8405_v54 = vunpack.i.l.bf16 %v8404_v2 }
 0x4e8   : > { %v7960_v3 = vpack.c.bf16 %v7006_v36, %v7005_v61  ;;  %v8326_v39 = vunpack.i.h.bf16 %v12923_v17  ;;  %v14566_v2 = vcombine.low %v14449_v8, %v14448_v45 }
 0x4e9   : > { %v7022_v58 = vsel %vm924_vm2, %v14556_v50, %v8396_v40  ;;  %v7021_v41 = vsel %vm924_vm2, %v14559_v22, %v8395_v43  ;;  %v8331_v50 = vunpack.i.h.bf16 %v12929_v51 }
 0x4ea   : > { %v8399_v6 = vpop.permute.xlu1 %8398  ;;  %7961 = vmatpush1.bf16.msra.mxu0 %v7960_v3  ;;  %v8414_v15 = vpop.permute.xlu0 %8413  ;;  %v7036_v10 = vsel %vm6897_vm5, %v7022_v58, %v8406_v46  ;;  %v7035_v19 = vsel %vm6897_vm5, %v7021_v41, %v8405_v54 }
 0x4eb   : > { %v8401_v25 = vunpack.i.h.bf16 %v8399_v6  ;;  %v8400_v26 = vunpack.i.l.bf16 %v8399_v6  ;;  %v8416_v7 = vunpack.i.h.bf16 %v8414_v15  ;;  %v8415_v49 = vunpack.i.l.bf16 %v8414_v15 }
 0x4ed   : > { %v7049_v59 = vsel %vm6912_vm6, %v7035_v19, %v8415_v49  ;;  %v7050_v53 = vsel %vm6912_vm6, %v7036_v10, %v8416_v7  ;;  %v6980_v33 = vsel %vm924_vm2, %v14562_v42, %v8401_v25  ;;  %v6979_v5 = vsel %vm924_vm2, %v14565_v14, %v8400_v26  ;;  %v1898_v19 = vld [vmem:[%s13073_s6] sm:$0xff] }
 0x4ee   : > { %v8409_v18 = vpop.permute.xlu1 %8408  ;;  %v8419_v30 = vpop.permute.xlu0 %8418  ;;  %v7962_v13 = vpack.c.bf16 %v7050_v53, %v7049_v59 }
 0x4ef   : > { %v8411_v62 = vunpack.i.h.bf16 %v8409_v18  ;;  %v8410_v34 = vunpack.i.l.bf16 %v8409_v18  ;;  %v8421_v44 = vunpack.i.h.bf16 %v8419_v30  ;;  %v8420_v12 = vunpack.i.l.bf16 %v8419_v30 }
 0x4f0   : > { %7963 = vmatprep.subr.bf16.mxu0 %v7962_v13 }
 0x4f1   : > { %v6993_v38 = vsel %vm6897_vm5, %v6979_v5, %v8410_v34  ;;  %v6994_v57 = vsel %vm6897_vm5, %v6980_v33, %v8411_v62 }
 0x4f2   : > { %v8439_v23 = vpop.permute.xlu1 %8438  ;;  %v7008_v21 = vsel %vm6912_vm6, %v6994_v57, %v8421_v44  ;;  %v7007_v63 = vsel %vm6912_vm6, %v6993_v38, %v8420_v12  ;;  %v8424_v11 = vpop.permute.xlu0 %8423 }
 0x4f3   : > { %v7964_v28 = vpack.c.bf16 %v7008_v21, %v7007_v63  ;;  %v8426_v9 = vunpack.i.h.bf16 %v8424_v11  ;;  %v8425_v4 = vunpack.i.l.bf16 %v8424_v11  ;;  %v8441_v27 = vunpack.i.h.bf16 %v8439_v23 }
 0x4f4   : > { %v8440_v40 = vunpack.i.l.bf16 %v8439_v23 }
 0x4f5   : > { %7965 = vmatpush1.bf16.msra.mxu0 %v7964_v28  ;;  %v7024_v43 = vsel %vm924_vm2, %v12655_v29, %v8426_v9  ;;  %v7023_v61 = vsel %vm924_vm2, %v14566_v2, %v8425_v4  ;;  %v8330_v29 = vunpack.i.l.bf16 %v12929_v51 }
 0x4f6   : > { %v7038_v36 = vsel %vm6897_vm5, %v7024_v43, %v8326_v39  ;;  %v7037_v46 = vsel %vm6897_vm5, %v7023_v61, %v8325_v32  ;;  %v8444_v54 = vpop.permute.xlu1 %8443  ;;  %v8429_v3 = vpop.permute.xlu0 %8428 }
 0x4f7   : > { %v8431_v6 = vunpack.i.h.bf16 %v8429_v3  ;;  %v8430_v56 = vunpack.i.l.bf16 %v8429_v3  ;;  %v7051_v17 = vsel %vm6912_vm6, %v7037_v46, %v8440_v40  ;;  %v7052_v52 = vsel %vm6912_vm6, %v7038_v36, %v8441_v27 }
 0x4f8   : > { %v7966_v58 = vpack.c.bf16 %v7052_v52, %v7051_v17  ;;  %v8446_v45 = vunpack.i.h.bf16 %v8444_v54  ;;  %v8445_v8 = vunpack.i.l.bf16 %v8444_v54 }
 0x4f9   : > { %v6982_v20 = vsel %vm924_vm2, %v12662_v0, %v8431_v6  ;;  %v6981_v22 = vsel %vm924_vm2, %v14567_v1, %v8430_v56 }
 0x4fa   : > { %v6995_v41 = vsel %vm6897_vm5, %v6981_v22, %v8330_v29  ;;  %v6996_v25 = vsel %vm6897_vm5, %v6982_v20, %v8331_v50  ;;  %v8434_v26 = vpop.permute.xlu0 %8433  ;;  %7968 = vmatprep.subr.msk.bf16.mxu0 %vm12932_vm9, %v7966_v58 }
 0x4fb   : > { %v7009_v51 = vsel %vm6912_vm6, %v6995_v41, %v8445_v8  ;;  %v7010_v15 = vsel %vm6912_vm6, %v6996_v25, %v8446_v45  ;;  %v8436_v0 = vunpack.i.h.bf16 %v8434_v26  ;;  %v8435_v7 = vunpack.i.l.bf16 %v8434_v26 }
 0x4fc   : > { %v7969_v49 = vpack.c.bf16 %v7010_v15, %v7009_v51 }
 0x4fd   : > { %v6925_v16 = vsel %vm6912_vm6, %v12844_v60, %v8435_v7  ;;  %v6926_v35 = vsel %vm6912_vm6, %v12847_v55, %v8436_v0 }
 0x4fe   : > { %v7939_v10 = vpack.c.bf16 %v6926_v35, %v6925_v16  ;;  %7971 = vmatpush1.bf16.msk.msra.mxu0 %vm12932_vm9, %v7969_v49 }
 0x500   : > { %7941 = vmatpush1.bf16.msk.msra.mxu1 %vm12932_vm9, %v7939_v10 }
 0x501   : > { %7453 = vmatmul.mubr.msk.f32.vlgmr.msra.gmra.mrb[56].mxu0 %vm7053_vm10, %v1898_v19 }
 0x503   : > { %7450 = vmatmul.mubr.msk.f32.vlgmr.msra.gmra.mrb[56].mxu1 %vm7053_vm10, %v1898_v19 }
 0x507   : > { %v7224_v18 = vpop.permute.xlu1 %7223 }
 0x50b   : > { %v7215_v60 = vpop.permute.xlu0 %7214 }
 0x5d4   : > { %v7207_v55 = vpop.f32.mrb[56].mxu0 }
 0x5d5   : > { %v7219_v62 = vmul.f32 %v7215_v60, %v7207_v55  ;;  %v7209_v34 = vpop.f32.mrb[57].mxu0 }
 0x5d6   : > { %v7136_v59 = vpop.f32.mrb[56].mxu1  ;;  %v7220_v53 = vmul.f32 %v7215_v60, %v7209_v34 }
 0x5d7   : > { %v7217_v47 = vmul.f32 %v7215_v60, %v7136_v59  ;;  %v7138_v24 = vpop.f32.mrb[57].mxu1  ;;  %v7228_v42 = vadd.f32 %v7224_v18, %v7219_v62 }
 0x5d8   : > { %v7218_v31 = vmul.f32 %v7215_v60, %v7138_v24  ;;  %v7229_v33 = vadd.f32 %v7224_v18, %v7220_v53 }
 0x5d9   : > { %v7226_v48 = vadd.f32 %v7224_v18, %v7217_v47  ;;  %v7232_v37 = vmax.f32 %v7228_v42, 0.0 }
 0x5da   : > { %v7227_v14 = vadd.f32 %v7224_v18, %v7218_v31  ;;  %v7233_v5 = vmax.f32 %v7229_v33, 0.0 }
 0x5db   : > { %v7230_v30 = vmax.f32 %v7226_v48, 0.0  ;;  %7236 = vst [vmem:[%s414_s30 + $0x10] sm:$0xff] %v7232_v37 }
 0x5dc   : > { %v7231_v13 = vmax.f32 %v7227_v14, 0.0  ;;  %7237 = vst [vmem:[%s414_s30 + $0x18] sm:$0xff] %v7233_v5 }
 0x5dd   : > { %7234 = vst [vmem:[%s414_s30] sm:$0xff] %v7230_v30 }
 0x5de   : > { %7235 = vst [vmem:[%s414_s30 + $0x8] sm:$0xff] %v7231_v13 }
 0x5df PF: > { %s19_s13 = sadd.s32 1, %s8487_s13   ;;  %s14568_s30 = smov %s8479_s11 }
 0x5e0   : > { %p16_p8 = scmp.ge.s32.totalorder %s19_s13, 6   ;;  %s14569_s10 = smov %s8483_s12 }
 0x5e1   : > { %s14570_s11 = smov %s14573_s14  ;;  %s14571_s12 = smov %s14577_s15 }
 0x5e2   :  { %18 = sbr.rel (!%p16_p8) target bundleno = 3 (0x3), region = 95 }

</bundles_post_ra>
